<compile_context>
chip_gen: v5e
topology: v5e:2x2
jax: 0.10.0
libtpu: 0.0.40
codegen_flags: <defaults>
</compile_context>

<pallas_src>
import functools

import jax
import jax.numpy as jnp
import numpy as np
from jax.experimental import pallas as pl
from jax.experimental.pallas import tpu as pltpu


def _vmem():
    return pl.BlockSpec(memory_space=pltpu.MemorySpace.VMEM)


def _smem():
    return pl.BlockSpec(memory_space=pltpu.MemorySpace.SMEM)


def fused_cnn_kernel(x_ref, wk_ref, bk_ref, row_ref, rob_ref, out_ref, *, k):
    """Fused conv -> relu -> maxpool -> flatten -> linear.

    x_ref   : (N, Cin, H, W)         VMEM  input image (NCHW)
    wk_ref  : (Cout*Cin*K*K,)        SMEM  conv weights, (co, ci, kh, kw) row-major
    bk_ref  : (Cout,)                SMEM  conv bias
    row_ref : (O, N, Cout, Hp, Wp)   VMEM  readout weights in NCHW-flatten order
    rob_ref : (1, O)                 VMEM  readout bias
    out_ref : (1, O)                 VMEM  result
    """
    n, cin, h, w = x_ref.shape
    o_dim, _, cout, hp, wp = row_ref.shape
    ho, wo = h - k + 1, w - k + 1            # conv output (stride=1, pad=0)

    # Load each input channel once; everything stays on-chip from here on.
    xs = [x_ref[:, ci, :, :] for ci in range(cin)]          # each (N, H, W)
    rw = row_ref[...]                                        # (O, N, Cout, Hp, Wp)

    acc = [None] * o_dim                                     # per-output rank-0 sums
    for co in range(cout):
        # ---- conv channel co: shifted-FMA accumulation on the VPU ----
        a = jnp.zeros((n, ho, wo), jnp.float32)
        for ci in range(cin):
            xc = xs[ci]
            for kh in range(k):
                for kw in range(k):
                    wv = wk_ref[((co * cin + ci) * k + kh) * k + kw]   # SMEM scalar
                    a = a + wv * xc[:, kh:kh + ho, kw:kw + wo]
        a = jnp.maximum(a + bk_ref[co], 0.0)                 # bias + ReLU

        # ---- KxK / stride-1 maxpool (post-pool ReLU dropped: inputs >= 0) ----
        p = a[:, 0:hp, 0:wp]
        for kh in range(k):
            for kw in range(k):
                if kh == 0 and kw == 0:
                    continue
                p = jnp.maximum(p, a[:, kh:kh + hp, kw:kw + wp])

        # ---- readout contribution of this channel (VPU mult + XLU reduce) ----
        for o in range(o_dim):
            contrib = jnp.sum(rw[o, :, co, :, :] * p)        # rank-0
            acc[o] = contrib if acc[o] is None else acc[o] + contrib

    # Assemble the (1, O) output without scalar stores: select into lanes.
    col = jax.lax.broadcasted_iota(jnp.int32, (1, o_dim), 1)
    out = rob_ref[...]
    for o in range(o_dim):
        out = out + jnp.where(col == o, acc[o], 0.0)
    out_ref[...] = out


def cnn_oldstyle_forward(x, conv_w, conv_b, ro_w, ro_b, *, kernel_size):
    n, cin, h, w = x.shape
    cout = conv_w.shape[0]
    k = kernel_size
    ho, wo = h - k + 1, w - k + 1
    hp, wp = ho - k + 1, wo - k + 1
    o_dim = ro_w.shape[0]

    # Trace-time metadata reshapes only (no transposes, no im2col glue).
    wk = conv_w.reshape(cout * cin * k * k)                  # SMEM scalars
    bk = conv_b.reshape(cout)
    row = ro_w.reshape(o_dim, n, cout, hp, wp)               # NCHW flatten order
    rob = ro_b.reshape(1, o_dim)

    flops = (2 * n * cout * ho * wo * cin * k * k            # conv FMAs
             + 2 * o_dim * n * cout * hp * wp)               # readout
    bytes_accessed = 4 * (x.size + wk.size + bk.size + row.size + rob.size + o_dim)

    out = pl.pallas_call(
        functools.partial(fused_cnn_kernel, k=k),
        out_shape=jax.ShapeDtypeStruct((1, o_dim), jnp.float32),
        in_specs=[_vmem(), _smem(), _smem(), _vmem(), _vmem()],
        out_specs=_vmem(),
        cost_estimate=pl.CostEstimate(
            flops=flops, transcendentals=0, bytes_accessed=bytes_accessed),
    )(x, wk, bk, row, rob)
    return out[0]


# ---------------- pure-JAX reference ----------------

def reference_forward(x, conv_w, conv_b, ro_w, ro_b, *, kernel_size):
    k = kernel_size
    y = jax.lax.conv_general_dilated(
        x, conv_w, window_strides=(1, 1), padding="VALID",
        dimension_numbers=("NCHW", "OIHW", "NCHW"),
        precision=jax.lax.Precision.HIGHEST)
    y = y + conv_b[None, :, None, None]
    y = jnp.maximum(y, 0.0)
    y = jax.lax.reduce_window(y, -jnp.inf, jax.lax.max,
                              (1, 1, k, k), (1, 1, 1, 1), "VALID")
    y = jnp.maximum(y, 0.0)
    flat = y.reshape(-1)
    return jnp.dot(ro_w, flat, precision=jax.lax.Precision.HIGHEST) + ro_b


if __name__ == "__main__":
    # CNN_oldstyle(input_channels=4, output_channels=4, kernel_size=3,
    #              stride=1, padding=0, batch_size=2)
    # readout expects batch*Cout*121 features -> 11x11 pooled -> 15x15 input.
    batch, cin, cout, k, hw = 2, 4, 4, 3, 15   # 15 -> conv 13 -> pool 11

    key = jax.random.PRNGKey(0)
    kx, kw1, kb1, kw2, kb2 = jax.random.split(key, 5)

    x = jax.random.normal(kx, (batch, cin, hw, hw), jnp.float32)
    conv_w = 0.1 * jax.random.normal(kw1, (cout, cin, k, k), jnp.float32)
    conv_b = 0.1 * jax.random.normal(kb1, (cout,), jnp.float32)
    n_feat = batch * cout * 11 * 11
    ro_w = 0.05 * jax.random.normal(kw2, (batch, n_feat), jnp.float32)
    ro_b = 0.05 * jax.random.normal(kb2, (batch,), jnp.float32)

    out = cnn_oldstyle_forward(x, conv_w, conv_b, ro_w, ro_b, kernel_size=k)
    out = jax.block_until_ready(out)

    ref = reference_forward(x, conv_w, conv_b, ro_w, ro_b, kernel_size=k)
    np.testing.assert_allclose(np.asarray(out), np.asarray(ref), rtol=2e-3, atol=2e-3)

    print("KERNEL_OK")
</pallas_src>

<mosaic_0001>
module attributes {stable_mosaic.version = 11 : i64} {
  func.func @fused_cnn_kernel(%arg0: memref<2x4x15x15xf32, #tpu.memory_space<vmem>>, %arg1: memref<144xf32, #tpu.memory_space<smem>>, %arg2: memref<4xf32, #tpu.memory_space<smem>>, %arg3: memref<2x2x4x11x11xf32, #tpu.memory_space<vmem>>, %arg4: memref<1x2xf32, #tpu.memory_space<vmem>>, %arg5: memref<1x2xf32, #tpu.memory_space<vmem>>) attributes {dimension_semantics = [], scalar_prefetch = 0 : i64, scratch_operands = 0 : i64, tpu.core_type = #tpu.core_type<tc>} {
    %c0 = arith.constant 0 : index
    %c0_0 = arith.constant 0 : index
    %c0_1 = arith.constant 0 : index
    %c0_2 = arith.constant 0 : index
    %0 = vector.load %arg0[%c0, %c0_0, %c0_1, %c0_2] : memref<2x4x15x15xf32, #tpu.memory_space<vmem>>, vector<2x1x15x15xf32>
    %1 = vector.shape_cast %0 : vector<2x1x15x15xf32> to vector<2x15x15xf32>
    %c0_3 = arith.constant 0 : index
    %c1 = arith.constant 1 : index
    %c0_4 = arith.constant 0 : index
    %c0_5 = arith.constant 0 : index
    %2 = vector.load %arg0[%c0_3, %c1, %c0_4, %c0_5] : memref<2x4x15x15xf32, #tpu.memory_space<vmem>>, vector<2x1x15x15xf32>
    %3 = vector.shape_cast %2 : vector<2x1x15x15xf32> to vector<2x15x15xf32>
    %c0_6 = arith.constant 0 : index
    %c2 = arith.constant 2 : index
    %c0_7 = arith.constant 0 : index
    %c0_8 = arith.constant 0 : index
    %4 = vector.load %arg0[%c0_6, %c2, %c0_7, %c0_8] : memref<2x4x15x15xf32, #tpu.memory_space<vmem>>, vector<2x1x15x15xf32>
    %5 = vector.shape_cast %4 : vector<2x1x15x15xf32> to vector<2x15x15xf32>
    %c0_9 = arith.constant 0 : index
    %c3 = arith.constant 3 : index
    %c0_10 = arith.constant 0 : index
    %c0_11 = arith.constant 0 : index
    %6 = vector.load %arg0[%c0_9, %c3, %c0_10, %c0_11] : memref<2x4x15x15xf32, #tpu.memory_space<vmem>>, vector<2x1x15x15xf32>
    %7 = vector.shape_cast %6 : vector<2x1x15x15xf32> to vector<2x15x15xf32>
    %c0_12 = arith.constant 0 : index
    %c0_13 = arith.constant 0 : index
    %c0_14 = arith.constant 0 : index
    %c0_15 = arith.constant 0 : index
    %c0_16 = arith.constant 0 : index
    %8 = vector.load %arg3[%c0_12, %c0_13, %c0_14, %c0_15, %c0_16] : memref<2x2x4x11x11xf32, #tpu.memory_space<vmem>>, vector<2x2x4x11x11xf32>
    %cst = arith.constant 0.000000e+00 : f32
    %9 = vector.broadcast %cst : f32 to vector<2x13x13xf32>
    %c0_17 = arith.constant 0 : index
    %10 = memref.load %arg1[%c0_17] : memref<144xf32, #tpu.memory_space<smem>>
    %11 = vector.extract_strided_slice %1 {offsets = [0, 0, 0], sizes = [2, 13, 13], strides = [1, 1, 1]} : vector<2x15x15xf32> to vector<2x13x13xf32>
    %12 = vector.broadcast %10 : f32 to vector<2x13x13xf32>
    %13 = arith.mulf %12, %11 : vector<2x13x13xf32>
    %14 = arith.addf %9, %13 : vector<2x13x13xf32>
    %c1_18 = arith.constant 1 : index
    %15 = memref.load %arg1[%c1_18] : memref<144xf32, #tpu.memory_space<smem>>
    %16 = vector.extract_strided_slice %1 {offsets = [0, 0, 1], sizes = [2, 13, 13], strides = [1, 1, 1]} : vector<2x15x15xf32> to vector<2x13x13xf32>
    %17 = vector.broadcast %15 : f32 to vector<2x13x13xf32>
    %18 = arith.mulf %17, %16 : vector<2x13x13xf32>
    %19 = arith.addf %14, %18 : vector<2x13x13xf32>
    %c2_19 = arith.constant 2 : index
    %20 = memref.load %arg1[%c2_19] : memref<144xf32, #tpu.memory_space<smem>>
    %21 = vector.extract_strided_slice %1 {offsets = [0, 0, 2], sizes = [2, 13, 13], strides = [1, 1, 1]} : vector<2x15x15xf32> to vector<2x13x13xf32>
    %22 = vector.broadcast %20 : f32 to vector<2x13x13xf32>
    %23 = arith.mulf %22, %21 : vector<2x13x13xf32>
    %24 = arith.addf %19, %23 : vector<2x13x13xf32>
    %c3_20 = arith.constant 3 : index
    %25 = memref.load %arg1[%c3_20] : memref<144xf32, #tpu.memory_space<smem>>
    %26 = vector.extract_strided_slice %1 {offsets = [0, 1, 0], sizes = [2, 13, 13], strides = [1, 1, 1]} : vector<2x15x15xf32> to vector<2x13x13xf32>
    %27 = vector.broadcast %25 : f32 to vector<2x13x13xf32>
    %28 = arith.mulf %27, %26 : vector<2x13x13xf32>
    %29 = arith.addf %24, %28 : vector<2x13x13xf32>
    %c4 = arith.constant 4 : index
    %30 = memref.load %arg1[%c4] : memref<144xf32, #tpu.memory_space<smem>>
    %31 = vector.extract_strided_slice %1 {offsets = [0, 1, 1], sizes = [2, 13, 13], strides = [1, 1, 1]} : vector<2x15x15xf32> to vector<2x13x13xf32>
    %32 = vector.broadcast %30 : f32 to vector<2x13x13xf32>
    %33 = arith.mulf %32, %31 : vector<2x13x13xf32>
    %34 = arith.addf %29, %33 : vector<2x13x13xf32>
    %c5 = arith.constant 5 : index
    %35 = memref.load %arg1[%c5] : memref<144xf32, #tpu.memory_space<smem>>
    %36 = vector.extract_strided_slice %1 {offsets = [0, 1, 2], sizes = [2, 13, 13], strides = [1, 1, 1]} : vector<2x15x15xf32> to vector<2x13x13xf32>
    %37 = vector.broadcast %35 : f32 to vector<2x13x13xf32>
    %38 = arith.mulf %37, %36 : vector<2x13x13xf32>
    %39 = arith.addf %34, %38 : vector<2x13x13xf32>
    %c6 = arith.constant 6 : index
    %40 = memref.load %arg1[%c6] : memref<144xf32, #tpu.memory_space<smem>>
    %41 = vector.extract_strided_slice %1 {offsets = [0, 2, 0], sizes = [2, 13, 13], strides = [1, 1, 1]} : vector<2x15x15xf32> to vector<2x13x13xf32>
    %42 = vector.broadcast %40 : f32 to vector<2x13x13xf32>
    %43 = arith.mulf %42, %41 : vector<2x13x13xf32>
    %44 = arith.addf %39, %43 : vector<2x13x13xf32>
    %c7 = arith.constant 7 : index
    %45 = memref.load %arg1[%c7] : memref<144xf32, #tpu.memory_space<smem>>
    %46 = vector.extract_strided_slice %1 {offsets = [0, 2, 1], sizes = [2, 13, 13], strides = [1, 1, 1]} : vector<2x15x15xf32> to vector<2x13x13xf32>
    %47 = vector.broadcast %45 : f32 to vector<2x13x13xf32>
    %48 = arith.mulf %47, %46 : vector<2x13x13xf32>
    %49 = arith.addf %44, %48 : vector<2x13x13xf32>
    %c8 = arith.constant 8 : index
    %50 = memref.load %arg1[%c8] : memref<144xf32, #tpu.memory_space<smem>>
    %51 = vector.extract_strided_slice %1 {offsets = [0, 2, 2], sizes = [2, 13, 13], strides = [1, 1, 1]} : vector<2x15x15xf32> to vector<2x13x13xf32>
    %52 = vector.broadcast %50 : f32 to vector<2x13x13xf32>
    %53 = arith.mulf %52, %51 : vector<2x13x13xf32>
    %54 = arith.addf %49, %53 : vector<2x13x13xf32>
    %c9 = arith.constant 9 : index
    %55 = memref.load %arg1[%c9] : memref<144xf32, #tpu.memory_space<smem>>
    %56 = vector.extract_strided_slice %3 {offsets = [0, 0, 0], sizes = [2, 13, 13], strides = [1, 1, 1]} : vector<2x15x15xf32> to vector<2x13x13xf32>
    %57 = vector.broadcast %55 : f32 to vector<2x13x13xf32>
    %58 = arith.mulf %57, %56 : vector<2x13x13xf32>
    %59 = arith.addf %54, %58 : vector<2x13x13xf32>
    %c10 = arith.constant 10 : index
    %60 = memref.load %arg1[%c10] : memref<144xf32, #tpu.memory_space<smem>>
    %61 = vector.extract_strided_slice %3 {offsets = [0, 0, 1], sizes = [2, 13, 13], strides = [1, 1, 1]} : vector<2x15x15xf32> to vector<2x13x13xf32>
    %62 = vector.broadcast %60 : f32 to vector<2x13x13xf32>
    %63 = arith.mulf %62, %61 : vector<2x13x13xf32>
    %64 = arith.addf %59, %63 : vector<2x13x13xf32>
    %c11 = arith.constant 11 : index
    %65 = memref.load %arg1[%c11] : memref<144xf32, #tpu.memory_space<smem>>
    %66 = vector.extract_strided_slice %3 {offsets = [0, 0, 2], sizes = [2, 13, 13], strides = [1, 1, 1]} : vector<2x15x15xf32> to vector<2x13x13xf32>
    %67 = vector.broadcast %65 : f32 to vector<2x13x13xf32>
    %68 = arith.mulf %67, %66 : vector<2x13x13xf32>
    %69 = arith.addf %64, %68 : vector<2x13x13xf32>
    %c12 = arith.constant 12 : index
    %70 = memref.load %arg1[%c12] : memref<144xf32, #tpu.memory_space<smem>>
    %71 = vector.extract_strided_slice %3 {offsets = [0, 1, 0], sizes = [2, 13, 13], strides = [1, 1, 1]} : vector<2x15x15xf32> to vector<2x13x13xf32>
    %72 = vector.broadcast %70 : f32 to vector<2x13x13xf32>
    %73 = arith.mulf %72, %71 : vector<2x13x13xf32>
    %74 = arith.addf %69, %73 : vector<2x13x13xf32>
    %c13 = arith.constant 13 : index
    %75 = memref.load %arg1[%c13] : memref<144xf32, #tpu.memory_space<smem>>
    %76 = vector.extract_strided_slice %3 {offsets = [0, 1, 1], sizes = [2, 13, 13], strides = [1, 1, 1]} : vector<2x15x15xf32> to vector<2x13x13xf32>
    %77 = vector.broadcast %75 : f32 to vector<2x13x13xf32>
    %78 = arith.mulf %77, %76 : vector<2x13x13xf32>
    %79 = arith.addf %74, %78 : vector<2x13x13xf32>
    %c14 = arith.constant 14 : index
    %80 = memref.load %arg1[%c14] : memref<144xf32, #tpu.memory_space<smem>>
    %81 = vector.extract_strided_slice %3 {offsets = [0, 1, 2], sizes = [2, 13, 13], strides = [1, 1, 1]} : vector<2x15x15xf32> to vector<2x13x13xf32>
    %82 = vector.broadcast %80 : f32 to vector<2x13x13xf32>
    %83 = arith.mulf %82, %81 : vector<2x13x13xf32>
    %84 = arith.addf %79, %83 : vector<2x13x13xf32>
    %c15 = arith.constant 15 : index
    %85 = memref.load %arg1[%c15] : memref<144xf32, #tpu.memory_space<smem>>
    %86 = vector.extract_strided_slice %3 {offsets = [0, 2, 0], sizes = [2, 13, 13], strides = [1, 1, 1]} : vector<2x15x15xf32> to vector<2x13x13xf32>
    %87 = vector.broadcast %85 : f32 to vector<2x13x13xf32>
    %88 = arith.mulf %87, %86 : vector<2x13x13xf32>
    %89 = arith.addf %84, %88 : vector<2x13x13xf32>
    %c16 = arith.constant 16 : index
    %90 = memref.load %arg1[%c16] : memref<144xf32, #tpu.memory_space<smem>>
    %91 = vector.extract_strided_slice %3 {offsets = [0, 2, 1], sizes = [2, 13, 13], strides = [1, 1, 1]} : vector<2x15x15xf32> to vector<2x13x13xf32>
    %92 = vector.broadcast %90 : f32 to vector<2x13x13xf32>
    %93 = arith.mulf %92, %91 : vector<2x13x13xf32>
    %94 = arith.addf %89, %93 : vector<2x13x13xf32>
    %c17 = arith.constant 17 : index
    %95 = memref.load %arg1[%c17] : memref<144xf32, #tpu.memory_space<smem>>
    %96 = vector.extract_strided_slice %3 {offsets = [0, 2, 2], sizes = [2, 13, 13], strides = [1, 1, 1]} : vector<2x15x15xf32> to vector<2x13x13xf32>
    %97 = vector.broadcast %95 : f32 to vector<2x13x13xf32>
    %98 = arith.mulf %97, %96 : vector<2x13x13xf32>
    %99 = arith.addf %94, %98 : vector<2x13x13xf32>
    %c18 = arith.constant 18 : index
    %100 = memref.load %arg1[%c18] : memref<144xf32, #tpu.memory_space<smem>>
    %101 = vector.extract_strided_slice %5 {offsets = [0, 0, 0], sizes = [2, 13, 13], strides = [1, 1, 1]} : vector<2x15x15xf32> to vector<2x13x13xf32>
    %102 = vector.broadcast %100 : f32 to vector<2x13x13xf32>
    %103 = arith.mulf %102, %101 : vector<2x13x13xf32>
    %104 = arith.addf %99, %103 : vector<2x13x13xf32>
    %c19 = arith.constant 19 : index
    %105 = memref.load %arg1[%c19] : memref<144xf32, #tpu.memory_space<smem>>
    %106 = vector.extract_strided_slice %5 {offsets = [0, 0, 1], sizes = [2, 13, 13], strides = [1, 1, 1]} : vector<2x15x15xf32> to vector<2x13x13xf32>
    %107 = vector.broadcast %105 : f32 to vector<2x13x13xf32>
    %108 = arith.mulf %107, %106 : vector<2x13x13xf32>
    %109 = arith.addf %104, %108 : vector<2x13x13xf32>
    %c20 = arith.constant 20 : index
    %110 = memref.load %arg1[%c20] : memref<144xf32, #tpu.memory_space<smem>>
    %111 = vector.extract_strided_slice %5 {offsets = [0, 0, 2], sizes = [2, 13, 13], strides = [1, 1, 1]} : vector<2x15x15xf32> to vector<2x13x13xf32>
    %112 = vector.broadcast %110 : f32 to vector<2x13x13xf32>
    %113 = arith.mulf %112, %111 : vector<2x13x13xf32>
    %114 = arith.addf %109, %113 : vector<2x13x13xf32>
    %c21 = arith.constant 21 : index
    %115 = memref.load %arg1[%c21] : memref<144xf32, #tpu.memory_space<smem>>
    %116 = vector.extract_strided_slice %5 {offsets = [0, 1, 0], sizes = [2, 13, 13], strides = [1, 1, 1]} : vector<2x15x15xf32> to vector<2x13x13xf32>
    %117 = vector.broadcast %115 : f32 to vector<2x13x13xf32>
    %118 = arith.mulf %117, %116 : vector<2x13x13xf32>
    %119 = arith.addf %114, %118 : vector<2x13x13xf32>
    %c22 = arith.constant 22 : index
    %120 = memref.load %arg1[%c22] : memref<144xf32, #tpu.memory_space<smem>>
    %121 = vector.extract_strided_slice %5 {offsets = [0, 1, 1], sizes = [2, 13, 13], strides = [1, 1, 1]} : vector<2x15x15xf32> to vector<2x13x13xf32>
    %122 = vector.broadcast %120 : f32 to vector<2x13x13xf32>
    %123 = arith.mulf %122, %121 : vector<2x13x13xf32>
    %124 = arith.addf %119, %123 : vector<2x13x13xf32>
    %c23 = arith.constant 23 : index
    %125 = memref.load %arg1[%c23] : memref<144xf32, #tpu.memory_space<smem>>
    %126 = vector.extract_strided_slice %5 {offsets = [0, 1, 2], sizes = [2, 13, 13], strides = [1, 1, 1]} : vector<2x15x15xf32> to vector<2x13x13xf32>
    %127 = vector.broadcast %125 : f32 to vector<2x13x13xf32>
    %128 = arith.mulf %127, %126 : vector<2x13x13xf32>
    %129 = arith.addf %124, %128 : vector<2x13x13xf32>
    %c24 = arith.constant 24 : index
    %130 = memref.load %arg1[%c24] : memref<144xf32, #tpu.memory_space<smem>>
    %131 = vector.extract_strided_slice %5 {offsets = [0, 2, 0], sizes = [2, 13, 13], strides = [1, 1, 1]} : vector<2x15x15xf32> to vector<2x13x13xf32>
    %132 = vector.broadcast %130 : f32 to vector<2x13x13xf32>
    %133 = arith.mulf %132, %131 : vector<2x13x13xf32>
    %134 = arith.addf %129, %133 : vector<2x13x13xf32>
    %c25 = arith.constant 25 : index
    %135 = memref.load %arg1[%c25] : memref<144xf32, #tpu.memory_space<smem>>
    %136 = vector.extract_strided_slice %5 {offsets = [0, 2, 1], sizes = [2, 13, 13], strides = [1, 1, 1]} : vector<2x15x15xf32> to vector<2x13x13xf32>
    %137 = vector.broadcast %135 : f32 to vector<2x13x13xf32>
    %138 = arith.mulf %137, %136 : vector<2x13x13xf32>
    %139 = arith.addf %134, %138 : vector<2x13x13xf32>
    %c26 = arith.constant 26 : index
    %140 = memref.load %arg1[%c26] : memref<144xf32, #tpu.memory_space<smem>>
    %141 = vector.extract_strided_slice %5 {offsets = [0, 2, 2], sizes = [2, 13, 13], strides = [1, 1, 1]} : vector<2x15x15xf32> to vector<2x13x13xf32>
    %142 = vector.broadcast %140 : f32 to vector<2x13x13xf32>
    %143 = arith.mulf %142, %141 : vector<2x13x13xf32>
    %144 = arith.addf %139, %143 : vector<2x13x13xf32>
    %c27 = arith.constant 27 : index
    %145 = memref.load %arg1[%c27] : memref<144xf32, #tpu.memory_space<smem>>
    %146 = vector.extract_strided_slice %7 {offsets = [0, 0, 0], sizes = [2, 13, 13], strides = [1, 1, 1]} : vector<2x15x15xf32> to vector<2x13x13xf32>
    %147 = vector.broadcast %145 : f32 to vector<2x13x13xf32>
    %148 = arith.mulf %147, %146 : vector<2x13x13xf32>
    %149 = arith.addf %144, %148 : vector<2x13x13xf32>
    %c28 = arith.constant 28 : index
    %150 = memref.load %arg1[%c28] : memref<144xf32, #tpu.memory_space<smem>>
    %151 = vector.extract_strided_slice %7 {offsets = [0, 0, 1], sizes = [2, 13, 13], strides = [1, 1, 1]} : vector<2x15x15xf32> to vector<2x13x13xf32>
    %152 = vector.broadcast %150 : f32 to vector<2x13x13xf32>
    %153 = arith.mulf %152, %151 : vector<2x13x13xf32>
    %154 = arith.addf %149, %153 : vector<2x13x13xf32>
    %c29 = arith.constant 29 : index
    %155 = memref.load %arg1[%c29] : memref<144xf32, #tpu.memory_space<smem>>
    %156 = vector.extract_strided_slice %7 {offsets = [0, 0, 2], sizes = [2, 13, 13], strides = [1, 1, 1]} : vector<2x15x15xf32> to vector<2x13x13xf32>
    %157 = vector.broadcast %155 : f32 to vector<2x13x13xf32>
    %158 = arith.mulf %157, %156 : vector<2x13x13xf32>
    %159 = arith.addf %154, %158 : vector<2x13x13xf32>
    %c30 = arith.constant 30 : index
    %160 = memref.load %arg1[%c30] : memref<144xf32, #tpu.memory_space<smem>>
    %161 = vector.extract_strided_slice %7 {offsets = [0, 1, 0], sizes = [2, 13, 13], strides = [1, 1, 1]} : vector<2x15x15xf32> to vector<2x13x13xf32>
    %162 = vector.broadcast %160 : f32 to vector<2x13x13xf32>
    %163 = arith.mulf %162, %161 : vector<2x13x13xf32>
    %164 = arith.addf %159, %163 : vector<2x13x13xf32>
    %c31 = arith.constant 31 : index
    %165 = memref.load %arg1[%c31] : memref<144xf32, #tpu.memory_space<smem>>
    %166 = vector.extract_strided_slice %7 {offsets = [0, 1, 1], sizes = [2, 13, 13], strides = [1, 1, 1]} : vector<2x15x15xf32> to vector<2x13x13xf32>
    %167 = vector.broadcast %165 : f32 to vector<2x13x13xf32>
    %168 = arith.mulf %167, %166 : vector<2x13x13xf32>
    %169 = arith.addf %164, %168 : vector<2x13x13xf32>
    %c32 = arith.constant 32 : index
    %170 = memref.load %arg1[%c32] : memref<144xf32, #tpu.memory_space<smem>>
    %171 = vector.extract_strided_slice %7 {offsets = [0, 1, 2], sizes = [2, 13, 13], strides = [1, 1, 1]} : vector<2x15x15xf32> to vector<2x13x13xf32>
    %172 = vector.broadcast %170 : f32 to vector<2x13x13xf32>
    %173 = arith.mulf %172, %171 : vector<2x13x13xf32>
    %174 = arith.addf %169, %173 : vector<2x13x13xf32>
    %c33 = arith.constant 33 : index
    %175 = memref.load %arg1[%c33] : memref<144xf32, #tpu.memory_space<smem>>
    %176 = vector.extract_strided_slice %7 {offsets = [0, 2, 0], sizes = [2, 13, 13], strides = [1, 1, 1]} : vector<2x15x15xf32> to vector<2x13x13xf32>
    %177 = vector.broadcast %175 : f32 to vector<2x13x13xf32>
    %178 = arith.mulf %177, %176 : vector<2x13x13xf32>
    %179 = arith.addf %174, %178 : vector<2x13x13xf32>
    %c34 = arith.constant 34 : index
    %180 = memref.load %arg1[%c34] : memref<144xf32, #tpu.memory_space<smem>>
    %181 = vector.extract_strided_slice %7 {offsets = [0, 2, 1], sizes = [2, 13, 13], strides = [1, 1, 1]} : vector<2x15x15xf32> to vector<2x13x13xf32>
    %182 = vector.broadcast %180 : f32 to vector<2x13x13xf32>
    %183 = arith.mulf %182, %181 : vector<2x13x13xf32>
    %184 = arith.addf %179, %183 : vector<2x13x13xf32>
    %c35 = arith.constant 35 : index
    %185 = memref.load %arg1[%c35] : memref<144xf32, #tpu.memory_space<smem>>
    %186 = vector.extract_strided_slice %7 {offsets = [0, 2, 2], sizes = [2, 13, 13], strides = [1, 1, 1]} : vector<2x15x15xf32> to vector<2x13x13xf32>
    %187 = vector.broadcast %185 : f32 to vector<2x13x13xf32>
    %188 = arith.mulf %187, %186 : vector<2x13x13xf32>
    %189 = arith.addf %184, %188 : vector<2x13x13xf32>
    %c0_21 = arith.constant 0 : index
    %190 = memref.load %arg2[%c0_21] : memref<4xf32, #tpu.memory_space<smem>>
    %191 = vector.broadcast %190 : f32 to vector<2x13x13xf32>
    %192 = arith.addf %189, %191 : vector<2x13x13xf32>
    %cst_22 = arith.constant 0.000000e+00 : f32
    %193 = vector.broadcast %cst_22 : f32 to vector<2x13x13xf32>
    %194 = arith.maximumf %192, %193 : vector<2x13x13xf32>
    %195 = vector.extract_strided_slice %194 {offsets = [0, 0, 0], sizes = [2, 11, 11], strides = [1, 1, 1]} : vector<2x13x13xf32> to vector<2x11x11xf32>
    %196 = vector.extract_strided_slice %194 {offsets = [0, 0, 1], sizes = [2, 11, 11], strides = [1, 1, 1]} : vector<2x13x13xf32> to vector<2x11x11xf32>
    %197 = arith.maximumf %195, %196 : vector<2x11x11xf32>
    %198 = vector.extract_strided_slice %194 {offsets = [0, 0, 2], sizes = [2, 11, 11], strides = [1, 1, 1]} : vector<2x13x13xf32> to vector<2x11x11xf32>
    %199 = arith.maximumf %197, %198 : vector<2x11x11xf32>
    %200 = vector.extract_strided_slice %194 {offsets = [0, 1, 0], sizes = [2, 11, 11], strides = [1, 1, 1]} : vector<2x13x13xf32> to vector<2x11x11xf32>
    %201 = arith.maximumf %199, %200 : vector<2x11x11xf32>
    %202 = vector.extract_strided_slice %194 {offsets = [0, 1, 1], sizes = [2, 11, 11], strides = [1, 1, 1]} : vector<2x13x13xf32> to vector<2x11x11xf32>
    %203 = arith.maximumf %201, %202 : vector<2x11x11xf32>
    %204 = vector.extract_strided_slice %194 {offsets = [0, 1, 2], sizes = [2, 11, 11], strides = [1, 1, 1]} : vector<2x13x13xf32> to vector<2x11x11xf32>
    %205 = arith.maximumf %203, %204 : vector<2x11x11xf32>
    %206 = vector.extract_strided_slice %194 {offsets = [0, 2, 0], sizes = [2, 11, 11], strides = [1, 1, 1]} : vector<2x13x13xf32> to vector<2x11x11xf32>
    %207 = arith.maximumf %205, %206 : vector<2x11x11xf32>
    %208 = vector.extract_strided_slice %194 {offsets = [0, 2, 1], sizes = [2, 11, 11], strides = [1, 1, 1]} : vector<2x13x13xf32> to vector<2x11x11xf32>
    %209 = arith.maximumf %207, %208 : vector<2x11x11xf32>
    %210 = vector.extract_strided_slice %194 {offsets = [0, 2, 2], sizes = [2, 11, 11], strides = [1, 1, 1]} : vector<2x13x13xf32> to vector<2x11x11xf32>
    %211 = arith.maximumf %209, %210 : vector<2x11x11xf32>
    %212 = vector.extract_strided_slice %8 {offsets = [0, 0, 0, 0, 0], sizes = [1, 2, 1, 11, 11], strides = [1, 1, 1, 1, 1]} : vector<2x2x4x11x11xf32> to vector<1x2x1x11x11xf32>
    %213 = vector.shape_cast %212 : vector<1x2x1x11x11xf32> to vector<2x11x11xf32>
    %214 = arith.mulf %213, %211 : vector<2x11x11xf32>
    %215 = vector.shape_cast %214 : vector<2x11x11xf32> to vector<1x2x11x11xf32>
    %cst_23 = arith.constant dense<0.000000e+00> : vector<1xf32>
    %216 = vector.multi_reduction <add>, %215, %cst_23 [1, 2, 3] : vector<1x2x11x11xf32> to vector<1xf32>
    %217 = vector.shape_cast %216 : vector<1xf32> to vector<1x1x1x1xf32>
    %218 = vector.extract %217[0, 0, 0, 0] : f32 from vector<1x1x1x1xf32>
    %219 = vector.extract_strided_slice %8 {offsets = [1, 0, 0, 0, 0], sizes = [1, 2, 1, 11, 11], strides = [1, 1, 1, 1, 1]} : vector<2x2x4x11x11xf32> to vector<1x2x1x11x11xf32>
    %220 = vector.shape_cast %219 : vector<1x2x1x11x11xf32> to vector<2x11x11xf32>
    %221 = arith.mulf %220, %211 : vector<2x11x11xf32>
    %222 = vector.shape_cast %221 : vector<2x11x11xf32> to vector<1x2x11x11xf32>
    %cst_24 = arith.constant dense<0.000000e+00> : vector<1xf32>
    %223 = vector.multi_reduction <add>, %222, %cst_24 [1, 2, 3] : vector<1x2x11x11xf32> to vector<1xf32>
    %224 = vector.shape_cast %223 : vector<1xf32> to vector<1x1x1x1xf32>
    %225 = vector.extract %224[0, 0, 0, 0] : f32 from vector<1x1x1x1xf32>
    %cst_25 = arith.constant 0.000000e+00 : f32
    %226 = vector.broadcast %cst_25 : f32 to vector<2x13x13xf32>
    %c36 = arith.constant 36 : index
    %227 = memref.load %arg1[%c36] : memref<144xf32, #tpu.memory_space<smem>>
    %228 = vector.extract_strided_slice %1 {offsets = [0, 0, 0], sizes = [2, 13, 13], strides = [1, 1, 1]} : vector<2x15x15xf32> to vector<2x13x13xf32>
    %229 = vector.broadcast %227 : f32 to vector<2x13x13xf32>
    %230 = arith.mulf %229, %228 : vector<2x13x13xf32>
    %231 = arith.addf %226, %230 : vector<2x13x13xf32>
    %c37 = arith.constant 37 : index
    %232 = memref.load %arg1[%c37] : memref<144xf32, #tpu.memory_space<smem>>
    %233 = vector.extract_strided_slice %1 {offsets = [0, 0, 1], sizes = [2, 13, 13], strides = [1, 1, 1]} : vector<2x15x15xf32> to vector<2x13x13xf32>
    %234 = vector.broadcast %232 : f32 to vector<2x13x13xf32>
    %235 = arith.mulf %234, %233 : vector<2x13x13xf32>
    %236 = arith.addf %231, %235 : vector<2x13x13xf32>
    %c38 = arith.constant 38 : index
    %237 = memref.load %arg1[%c38] : memref<144xf32, #tpu.memory_space<smem>>
    %238 = vector.extract_strided_slice %1 {offsets = [0, 0, 2], sizes = [2, 13, 13], strides = [1, 1, 1]} : vector<2x15x15xf32> to vector<2x13x13xf32>
    %239 = vector.broadcast %237 : f32 to vector<2x13x13xf32>
    %240 = arith.mulf %239, %238 : vector<2x13x13xf32>
    %241 = arith.addf %236, %240 : vector<2x13x13xf32>
    %c39 = arith.constant 39 : index
    %242 = memref.load %arg1[%c39] : memref<144xf32, #tpu.memory_space<smem>>
    %243 = vector.extract_strided_slice %1 {offsets = [0, 1, 0], sizes = [2, 13, 13], strides = [1, 1, 1]} : vector<2x15x15xf32> to vector<2x13x13xf32>
    %244 = vector.broadcast %242 : f32 to vector<2x13x13xf32>
    %245 = arith.mulf %244, %243 : vector<2x13x13xf32>
    %246 = arith.addf %241, %245 : vector<2x13x13xf32>
    %c40 = arith.constant 40 : index
    %247 = memref.load %arg1[%c40] : memref<144xf32, #tpu.memory_space<smem>>
    %248 = vector.extract_strided_slice %1 {offsets = [0, 1, 1], sizes = [2, 13, 13], strides = [1, 1, 1]} : vector<2x15x15xf32> to vector<2x13x13xf32>
    %249 = vector.broadcast %247 : f32 to vector<2x13x13xf32>
    %250 = arith.mulf %249, %248 : vector<2x13x13xf32>
    %251 = arith.addf %246, %250 : vector<2x13x13xf32>
    %c41 = arith.constant 41 : index
    %252 = memref.load %arg1[%c41] : memref<144xf32, #tpu.memory_space<smem>>
    %253 = vector.extract_strided_slice %1 {offsets = [0, 1, 2], sizes = [2, 13, 13], strides = [1, 1, 1]} : vector<2x15x15xf32> to vector<2x13x13xf32>
    %254 = vector.broadcast %252 : f32 to vector<2x13x13xf32>
    %255 = arith.mulf %254, %253 : vector<2x13x13xf32>
    %256 = arith.addf %251, %255 : vector<2x13x13xf32>
    %c42 = arith.constant 42 : index
    %257 = memref.load %arg1[%c42] : memref<144xf32, #tpu.memory_space<smem>>
    %258 = vector.extract_strided_slice %1 {offsets = [0, 2, 0], sizes = [2, 13, 13], strides = [1, 1, 1]} : vector<2x15x15xf32> to vector<2x13x13xf32>
    %259 = vector.broadcast %257 : f32 to vector<2x13x13xf32>
    %260 = arith.mulf %259, %258 : vector<2x13x13xf32>
    %261 = arith.addf %256, %260 : vector<2x13x13xf32>
    %c43 = arith.constant 43 : index
    %262 = memref.load %arg1[%c43] : memref<144xf32, #tpu.memory_space<smem>>
    %263 = vector.extract_strided_slice %1 {offsets = [0, 2, 1], sizes = [2, 13, 13], strides = [1, 1, 1]} : vector<2x15x15xf32> to vector<2x13x13xf32>
    %264 = vector.broadcast %262 : f32 to vector<2x13x13xf32>
    %265 = arith.mulf %264, %263 : vector<2x13x13xf32>
    %266 = arith.addf %261, %265 : vector<2x13x13xf32>
    %c44 = arith.constant 44 : index
    %267 = memref.load %arg1[%c44] : memref<144xf32, #tpu.memory_space<smem>>
    %268 = vector.extract_strided_slice %1 {offsets = [0, 2, 2], sizes = [2, 13, 13], strides = [1, 1, 1]} : vector<2x15x15xf32> to vector<2x13x13xf32>
    %269 = vector.broadcast %267 : f32 to vector<2x13x13xf32>
    %270 = arith.mulf %269, %268 : vector<2x13x13xf32>
    %271 = arith.addf %266, %270 : vector<2x13x13xf32>
    %c45 = arith.constant 45 : index
    %272 = memref.load %arg1[%c45] : memref<144xf32, #tpu.memory_space<smem>>
    %273 = vector.extract_strided_slice %3 {offsets = [0, 0, 0], sizes = [2, 13, 13], strides = [1, 1, 1]} : vector<2x15x15xf32> to vector<2x13x13xf32>
    %274 = vector.broadcast %272 : f32 to vector<2x13x13xf32>
    %275 = arith.mulf %274, %273 : vector<2x13x13xf32>
    %276 = arith.addf %271, %275 : vector<2x13x13xf32>
    %c46 = arith.constant 46 : index
    %277 = memref.load %arg1[%c46] : memref<144xf32, #tpu.memory_space<smem>>
    %278 = vector.extract_strided_slice %3 {offsets = [0, 0, 1], sizes = [2, 13, 13], strides = [1, 1, 1]} : vector<2x15x15xf32> to vector<2x13x13xf32>
    %279 = vector.broadcast %277 : f32 to vector<2x13x13xf32>
    %280 = arith.mulf %279, %278 : vector<2x13x13xf32>
    %281 = arith.addf %276, %280 : vector<2x13x13xf32>
    %c47 = arith.constant 47 : index
    %282 = memref.load %arg1[%c47] : memref<144xf32, #tpu.memory_space<smem>>
    %283 = vector.extract_strided_slice %3 {offsets = [0, 0, 2], sizes = [2, 13, 13], strides = [1, 1, 1]} : vector<2x15x15xf32> to vector<2x13x13xf32>
    %284 = vector.broadcast %282 : f32 to vector<2x13x13xf32>
    %285 = arith.mulf %284, %283 : vector<2x13x13xf32>
    %286 = arith.addf %281, %285 : vector<2x13x13xf32>
    %c48 = arith.constant 48 : index
    %287 = memref.load %arg1[%c48] : memref<144xf32, #tpu.memory_space<smem>>
    %288 = vector.extract_strided_slice %3 {offsets = [0, 1, 0], sizes = [2, 13, 13], strides = [1, 1, 1]} : vector<2x15x15xf32> to vector<2x13x13xf32>
    %289 = vector.broadcast %287 : f32 to vector<2x13x13xf32>
    %290 = arith.mulf %289, %288 : vector<2x13x13xf32>
    %291 = arith.addf %286, %290 : vector<2x13x13xf32>
    %c49 = arith.constant 49 : index
    %292 = memref.load %arg1[%c49] : memref<144xf32, #tpu.memory_space<smem>>
    %293 = vector.extract_strided_slice %3 {offsets = [0, 1, 1], sizes = [2, 13, 13], strides = [1, 1, 1]} : vector<2x15x15xf32> to vector<2x13x13xf32>
    %294 = vector.broadcast %292 : f32 to vector<2x13x13xf32>
    %295 = arith.mulf %294, %293 : vector<2x13x13xf32>
    %296 = arith.addf %291, %295 : vector<2x13x13xf32>
    %c50 = arith.constant 50 : index
    %297 = memref.load %arg1[%c50] : memref<144xf32, #tpu.memory_space<smem>>
    %298 = vector.extract_strided_slice %3 {offsets = [0, 1, 2], sizes = [2, 13, 13], strides = [1, 1, 1]} : vector<2x15x15xf32> to vector<2x13x13xf32>
    %299 = vector.broadcast %297 : f32 to vector<2x13x13xf32>
    %300 = arith.mulf %299, %298 : vector<2x13x13xf32>
    %301 = arith.addf %296, %300 : vector<2x13x13xf32>
    %c51 = arith.constant 51 : index
    %302 = memref.load %arg1[%c51] : memref<144xf32, #tpu.memory_space<smem>>
    %303 = vector.extract_strided_slice %3 {offsets = [0, 2, 0], sizes = [2, 13, 13], strides = [1, 1, 1]} : vector<2x15x15xf32> to vector<2x13x13xf32>
    %304 = vector.broadcast %302 : f32 to vector<2x13x13xf32>
    %305 = arith.mulf %304, %303 : vector<2x13x13xf32>
    %306 = arith.addf %301, %305 : vector<2x13x13xf32>
    %c52 = arith.constant 52 : index
    %307 = memref.load %arg1[%c52] : memref<144xf32, #tpu.memory_space<smem>>
    %308 = vector.extract_strided_slice %3 {offsets = [0, 2, 1], sizes = [2, 13, 13], strides = [1, 1, 1]} : vector<2x15x15xf32> to vector<2x13x13xf32>
    %309 = vector.broadcast %307 : f32 to vector<2x13x13xf32>
    %310 = arith.mulf %309, %308 : vector<2x13x13xf32>
    %311 = arith.addf %306, %310 : vector<2x13x13xf32>
    %c53 = arith.constant 53 : index
    %312 = memref.load %arg1[%c53] : memref<144xf32, #tpu.memory_space<smem>>
    %313 = vector.extract_strided_slice %3 {offsets = [0, 2, 2], sizes = [2, 13, 13], strides = [1, 1, 1]} : vector<2x15x15xf32> to vector<2x13x13xf32>
    %314 = vector.broadcast %312 : f32 to vector<2x13x13xf32>
    %315 = arith.mulf %314, %313 : vector<2x13x13xf32>
    %316 = arith.addf %311, %315 : vector<2x13x13xf32>
    %c54 = arith.constant 54 : index
    %317 = memref.load %arg1[%c54] : memref<144xf32, #tpu.memory_space<smem>>
    %318 = vector.extract_strided_slice %5 {offsets = [0, 0, 0], sizes = [2, 13, 13], strides = [1, 1, 1]} : vector<2x15x15xf32> to vector<2x13x13xf32>
    %319 = vector.broadcast %317 : f32 to vector<2x13x13xf32>
    %320 = arith.mulf %319, %318 : vector<2x13x13xf32>
    %321 = arith.addf %316, %320 : vector<2x13x13xf32>
    %c55 = arith.constant 55 : index
    %322 = memref.load %arg1[%c55] : memref<144xf32, #tpu.memory_space<smem>>
    %323 = vector.extract_strided_slice %5 {offsets = [0, 0, 1], sizes = [2, 13, 13], strides = [1, 1, 1]} : vector<2x15x15xf32> to vector<2x13x13xf32>
    %324 = vector.broadcast %322 : f32 to vector<2x13x13xf32>
    %325 = arith.mulf %324, %323 : vector<2x13x13xf32>
    %326 = arith.addf %321, %325 : vector<2x13x13xf32>
    %c56 = arith.constant 56 : index
    %327 = memref.load %arg1[%c56] : memref<144xf32, #tpu.memory_space<smem>>
    %328 = vector.extract_strided_slice %5 {offsets = [0, 0, 2], sizes = [2, 13, 13], strides = [1, 1, 1]} : vector<2x15x15xf32> to vector<2x13x13xf32>
    %329 = vector.broadcast %327 : f32 to vector<2x13x13xf32>
    %330 = arith.mulf %329, %328 : vector<2x13x13xf32>
    %331 = arith.addf %326, %330 : vector<2x13x13xf32>
    %c57 = arith.constant 57 : index
    %332 = memref.load %arg1[%c57] : memref<144xf32, #tpu.memory_space<smem>>
    %333 = vector.extract_strided_slice %5 {offsets = [0, 1, 0], sizes = [2, 13, 13], strides = [1, 1, 1]} : vector<2x15x15xf32> to vector<2x13x13xf32>
    %334 = vector.broadcast %332 : f32 to vector<2x13x13xf32>
    %335 = arith.mulf %334, %333 : vector<2x13x13xf32>
    %336 = arith.addf %331, %335 : vector<2x13x13xf32>
    %c58 = arith.constant 58 : index
    %337 = memref.load %arg1[%c58] : memref<144xf32, #tpu.memory_space<smem>>
    %338 = vector.extract_strided_slice %5 {offsets = [0, 1, 1], sizes = [2, 13, 13], strides = [1, 1, 1]} : vector<2x15x15xf32> to vector<2x13x13xf32>
    %339 = vector.broadcast %337 : f32 to vector<2x13x13xf32>
    %340 = arith.mulf %339, %338 : vector<2x13x13xf32>
    %341 = arith.addf %336, %340 : vector<2x13x13xf32>
    %c59 = arith.constant 59 : index
    %342 = memref.load %arg1[%c59] : memref<144xf32, #tpu.memory_space<smem>>
    %343 = vector.extract_strided_slice %5 {offsets = [0, 1, 2], sizes = [2, 13, 13], strides = [1, 1, 1]} : vector<2x15x15xf32> to vector<2x13x13xf32>
    %344 = vector.broadcast %342 : f32 to vector<2x13x13xf32>
    %345 = arith.mulf %344, %343 : vector<2x13x13xf32>
    %346 = arith.addf %341, %345 : vector<2x13x13xf32>
    %c60 = arith.constant 60 : index
    %347 = memref.load %arg1[%c60] : memref<144xf32, #tpu.memory_space<smem>>
    %348 = vector.extract_strided_slice %5 {offsets = [0, 2, 0], sizes = [2, 13, 13], strides = [1, 1, 1]} : vector<2x15x15xf32> to vector<2x13x13xf32>
    %349 = vector.broadcast %347 : f32 to vector<2x13x13xf32>
    %350 = arith.mulf %349, %348 : vector<2x13x13xf32>
    %351 = arith.addf %346, %350 : vector<2x13x13xf32>
    %c61 = arith.constant 61 : index
    %352 = memref.load %arg1[%c61] : memref<144xf32, #tpu.memory_space<smem>>
    %353 = vector.extract_strided_slice %5 {offsets = [0, 2, 1], sizes = [2, 13, 13], strides = [1, 1, 1]} : vector<2x15x15xf32> to vector<2x13x13xf32>
    %354 = vector.broadcast %352 : f32 to vector<2x13x13xf32>
    %355 = arith.mulf %354, %353 : vector<2x13x13xf32>
    %356 = arith.addf %351, %355 : vector<2x13x13xf32>
    %c62 = arith.constant 62 : index
    %357 = memref.load %arg1[%c62] : memref<144xf32, #tpu.memory_space<smem>>
    %358 = vector.extract_strided_slice %5 {offsets = [0, 2, 2], sizes = [2, 13, 13], strides = [1, 1, 1]} : vector<2x15x15xf32> to vector<2x13x13xf32>
    %359 = vector.broadcast %357 : f32 to vector<2x13x13xf32>
    %360 = arith.mulf %359, %358 : vector<2x13x13xf32>
    %361 = arith.addf %356, %360 : vector<2x13x13xf32>
    %c63 = arith.constant 63 : index
    %362 = memref.load %arg1[%c63] : memref<144xf32, #tpu.memory_space<smem>>
    %363 = vector.extract_strided_slice %7 {offsets = [0, 0, 0], sizes = [2, 13, 13], strides = [1, 1, 1]} : vector<2x15x15xf32> to vector<2x13x13xf32>
    %364 = vector.broadcast %362 : f32 to vector<2x13x13xf32>
    %365 = arith.mulf %364, %363 : vector<2x13x13xf32>
    %366 = arith.addf %361, %365 : vector<2x13x13xf32>
    %c64 = arith.constant 64 : index
    %367 = memref.load %arg1[%c64] : memref<144xf32, #tpu.memory_space<smem>>
    %368 = vector.extract_strided_slice %7 {offsets = [0, 0, 1], sizes = [2, 13, 13], strides = [1, 1, 1]} : vector<2x15x15xf32> to vector<2x13x13xf32>
    %369 = vector.broadcast %367 : f32 to vector<2x13x13xf32>
    %370 = arith.mulf %369, %368 : vector<2x13x13xf32>
    %371 = arith.addf %366, %370 : vector<2x13x13xf32>
    %c65 = arith.constant 65 : index
    %372 = memref.load %arg1[%c65] : memref<144xf32, #tpu.memory_space<smem>>
    %373 = vector.extract_strided_slice %7 {offsets = [0, 0, 2], sizes = [2, 13, 13], strides = [1, 1, 1]} : vector<2x15x15xf32> to vector<2x13x13xf32>
    %374 = vector.broadcast %372 : f32 to vector<2x13x13xf32>
    %375 = arith.mulf %374, %373 : vector<2x13x13xf32>
    %376 = arith.addf %371, %375 : vector<2x13x13xf32>
    %c66 = arith.constant 66 : index
    %377 = memref.load %arg1[%c66] : memref<144xf32, #tpu.memory_space<smem>>
    %378 = vector.extract_strided_slice %7 {offsets = [0, 1, 0], sizes = [2, 13, 13], strides = [1, 1, 1]} : vector<2x15x15xf32> to vector<2x13x13xf32>
    %379 = vector.broadcast %377 : f32 to vector<2x13x13xf32>
    %380 = arith.mulf %379, %378 : vector<2x13x13xf32>
    %381 = arith.addf %376, %380 : vector<2x13x13xf32>
    %c67 = arith.constant 67 : index
    %382 = memref.load %arg1[%c67] : memref<144xf32, #tpu.memory_space<smem>>
    %383 = vector.extract_strided_slice %7 {offsets = [0, 1, 1], sizes = [2, 13, 13], strides = [1, 1, 1]} : vector<2x15x15xf32> to vector<2x13x13xf32>
    %384 = vector.broadcast %382 : f32 to vector<2x13x13xf32>
    %385 = arith.mulf %384, %383 : vector<2x13x13xf32>
    %386 = arith.addf %381, %385 : vector<2x13x13xf32>
    %c68 = arith.constant 68 : index
    %387 = memref.load %arg1[%c68] : memref<144xf32, #tpu.memory_space<smem>>
    %388 = vector.extract_strided_slice %7 {offsets = [0, 1, 2], sizes = [2, 13, 13], strides = [1, 1, 1]} : vector<2x15x15xf32> to vector<2x13x13xf32>
    %389 = vector.broadcast %387 : f32 to vector<2x13x13xf32>
    %390 = arith.mulf %389, %388 : vector<2x13x13xf32>
    %391 = arith.addf %386, %390 : vector<2x13x13xf32>
    %c69 = arith.constant 69 : index
    %392 = memref.load %arg1[%c69] : memref<144xf32, #tpu.memory_space<smem>>
    %393 = vector.extract_strided_slice %7 {offsets = [0, 2, 0], sizes = [2, 13, 13], strides = [1, 1, 1]} : vector<2x15x15xf32> to vector<2x13x13xf32>
    %394 = vector.broadcast %392 : f32 to vector<2x13x13xf32>
    %395 = arith.mulf %394, %393 : vector<2x13x13xf32>
    %396 = arith.addf %391, %395 : vector<2x13x13xf32>
    %c70 = arith.constant 70 : index
    %397 = memref.load %arg1[%c70] : memref<144xf32, #tpu.memory_space<smem>>
    %398 = vector.extract_strided_slice %7 {offsets = [0, 2, 1], sizes = [2, 13, 13], strides = [1, 1, 1]} : vector<2x15x15xf32> to vector<2x13x13xf32>
    %399 = vector.broadcast %397 : f32 to vector<2x13x13xf32>
    %400 = arith.mulf %399, %398 : vector<2x13x13xf32>
    %401 = arith.addf %396, %400 : vector<2x13x13xf32>
    %c71 = arith.constant 71 : index
    %402 = memref.load %arg1[%c71] : memref<144xf32, #tpu.memory_space<smem>>
    %403 = vector.extract_strided_slice %7 {offsets = [0, 2, 2], sizes = [2, 13, 13], strides = [1, 1, 1]} : vector<2x15x15xf32> to vector<2x13x13xf32>
    %404 = vector.broadcast %402 : f32 to vector<2x13x13xf32>
    %405 = arith.mulf %404, %403 : vector<2x13x13xf32>
    %406 = arith.addf %401, %405 : vector<2x13x13xf32>
    %c1_26 = arith.constant 1 : index
    %407 = memref.load %arg2[%c1_26] : memref<4xf32, #tpu.memory_space<smem>>
    %408 = vector.broadcast %407 : f32 to vector<2x13x13xf32>
    %409 = arith.addf %406, %408 : vector<2x13x13xf32>
    %cst_27 = arith.constant 0.000000e+00 : f32
    %410 = vector.broadcast %cst_27 : f32 to vector<2x13x13xf32>
    %411 = arith.maximumf %409, %410 : vector<2x13x13xf32>
    %412 = vector.extract_strided_slice %411 {offsets = [0, 0, 0], sizes = [2, 11, 11], strides = [1, 1, 1]} : vector<2x13x13xf32> to vector<2x11x11xf32>
    %413 = vector.extract_strided_slice %411 {offsets = [0, 0, 1], sizes = [2, 11, 11], strides = [1, 1, 1]} : vector<2x13x13xf32> to vector<2x11x11xf32>
    %414 = arith.maximumf %412, %413 : vector<2x11x11xf32>
    %415 = vector.extract_strided_slice %411 {offsets = [0, 0, 2], sizes = [2, 11, 11], strides = [1, 1, 1]} : vector<2x13x13xf32> to vector<2x11x11xf32>
    %416 = arith.maximumf %414, %415 : vector<2x11x11xf32>
    %417 = vector.extract_strided_slice %411 {offsets = [0, 1, 0], sizes = [2, 11, 11], strides = [1, 1, 1]} : vector<2x13x13xf32> to vector<2x11x11xf32>
    %418 = arith.maximumf %416, %417 : vector<2x11x11xf32>
    %419 = vector.extract_strided_slice %411 {offsets = [0, 1, 1], sizes = [2, 11, 11], strides = [1, 1, 1]} : vector<2x13x13xf32> to vector<2x11x11xf32>
    %420 = arith.maximumf %418, %419 : vector<2x11x11xf32>
    %421 = vector.extract_strided_slice %411 {offsets = [0, 1, 2], sizes = [2, 11, 11], strides = [1, 1, 1]} : vector<2x13x13xf32> to vector<2x11x11xf32>
    %422 = arith.maximumf %420, %421 : vector<2x11x11xf32>
    %423 = vector.extract_strided_slice %411 {offsets = [0, 2, 0], sizes = [2, 11, 11], strides = [1, 1, 1]} : vector<2x13x13xf32> to vector<2x11x11xf32>
    %424 = arith.maximumf %422, %423 : vector<2x11x11xf32>
    %425 = vector.extract_strided_slice %411 {offsets = [0, 2, 1], sizes = [2, 11, 11], strides = [1, 1, 1]} : vector<2x13x13xf32> to vector<2x11x11xf32>
    %426 = arith.maximumf %424, %425 : vector<2x11x11xf32>
    %427 = vector.extract_strided_slice %411 {offsets = [0, 2, 2], sizes = [2, 11, 11], strides = [1, 1, 1]} : vector<2x13x13xf32> to vector<2x11x11xf32>
    %428 = arith.maximumf %426, %427 : vector<2x11x11xf32>
    %429 = vector.extract_strided_slice %8 {offsets = [0, 0, 1, 0, 0], sizes = [1, 2, 1, 11, 11], strides = [1, 1, 1, 1, 1]} : vector<2x2x4x11x11xf32> to vector<1x2x1x11x11xf32>
    %430 = vector.shape_cast %429 : vector<1x2x1x11x11xf32> to vector<2x11x11xf32>
    %431 = arith.mulf %430, %428 : vector<2x11x11xf32>
    %432 = vector.shape_cast %431 : vector<2x11x11xf32> to vector<1x2x11x11xf32>
    %cst_28 = arith.constant dense<0.000000e+00> : vector<1xf32>
    %433 = vector.multi_reduction <add>, %432, %cst_28 [1, 2, 3] : vector<1x2x11x11xf32> to vector<1xf32>
    %434 = vector.shape_cast %433 : vector<1xf32> to vector<1x1x1x1xf32>
    %435 = vector.extract %434[0, 0, 0, 0] : f32 from vector<1x1x1x1xf32>
    %436 = arith.addf %218, %435 : f32
    %437 = vector.extract_strided_slice %8 {offsets = [1, 0, 1, 0, 0], sizes = [1, 2, 1, 11, 11], strides = [1, 1, 1, 1, 1]} : vector<2x2x4x11x11xf32> to vector<1x2x1x11x11xf32>
    %438 = vector.shape_cast %437 : vector<1x2x1x11x11xf32> to vector<2x11x11xf32>
    %439 = arith.mulf %438, %428 : vector<2x11x11xf32>
    %440 = vector.shape_cast %439 : vector<2x11x11xf32> to vector<1x2x11x11xf32>
    %cst_29 = arith.constant dense<0.000000e+00> : vector<1xf32>
    %441 = vector.multi_reduction <add>, %440, %cst_29 [1, 2, 3] : vector<1x2x11x11xf32> to vector<1xf32>
    %442 = vector.shape_cast %441 : vector<1xf32> to vector<1x1x1x1xf32>
    %443 = vector.extract %442[0, 0, 0, 0] : f32 from vector<1x1x1x1xf32>
    %444 = arith.addf %225, %443 : f32
    %cst_30 = arith.constant 0.000000e+00 : f32
    %445 = vector.broadcast %cst_30 : f32 to vector<2x13x13xf32>
    %c72 = arith.constant 72 : index
    %446 = memref.load %arg1[%c72] : memref<144xf32, #tpu.memory_space<smem>>
    %447 = vector.extract_strided_slice %1 {offsets = [0, 0, 0], sizes = [2, 13, 13], strides = [1, 1, 1]} : vector<2x15x15xf32> to vector<2x13x13xf32>
    %448 = vector.broadcast %446 : f32 to vector<2x13x13xf32>
    %449 = arith.mulf %448, %447 : vector<2x13x13xf32>
    %450 = arith.addf %445, %449 : vector<2x13x13xf32>
    %c73 = arith.constant 73 : index
    %451 = memref.load %arg1[%c73] : memref<144xf32, #tpu.memory_space<smem>>
    %452 = vector.extract_strided_slice %1 {offsets = [0, 0, 1], sizes = [2, 13, 13], strides = [1, 1, 1]} : vector<2x15x15xf32> to vector<2x13x13xf32>
    %453 = vector.broadcast %451 : f32 to vector<2x13x13xf32>
    %454 = arith.mulf %453, %452 : vector<2x13x13xf32>
    %455 = arith.addf %450, %454 : vector<2x13x13xf32>
    %c74 = arith.constant 74 : index
    %456 = memref.load %arg1[%c74] : memref<144xf32, #tpu.memory_space<smem>>
    %457 = vector.extract_strided_slice %1 {offsets = [0, 0, 2], sizes = [2, 13, 13], strides = [1, 1, 1]} : vector<2x15x15xf32> to vector<2x13x13xf32>
    %458 = vector.broadcast %456 : f32 to vector<2x13x13xf32>
    %459 = arith.mulf %458, %457 : vector<2x13x13xf32>
    %460 = arith.addf %455, %459 : vector<2x13x13xf32>
    %c75 = arith.constant 75 : index
    %461 = memref.load %arg1[%c75] : memref<144xf32, #tpu.memory_space<smem>>
    %462 = vector.extract_strided_slice %1 {offsets = [0, 1, 0], sizes = [2, 13, 13], strides = [1, 1, 1]} : vector<2x15x15xf32> to vector<2x13x13xf32>
    %463 = vector.broadcast %461 : f32 to vector<2x13x13xf32>
    %464 = arith.mulf %463, %462 : vector<2x13x13xf32>
    %465 = arith.addf %460, %464 : vector<2x13x13xf32>
    %c76 = arith.constant 76 : index
    %466 = memref.load %arg1[%c76] : memref<144xf32, #tpu.memory_space<smem>>
    %467 = vector.extract_strided_slice %1 {offsets = [0, 1, 1], sizes = [2, 13, 13], strides = [1, 1, 1]} : vector<2x15x15xf32> to vector<2x13x13xf32>
    %468 = vector.broadcast %466 : f32 to vector<2x13x13xf32>
    %469 = arith.mulf %468, %467 : vector<2x13x13xf32>
    %470 = arith.addf %465, %469 : vector<2x13x13xf32>
    %c77 = arith.constant 77 : index
    %471 = memref.load %arg1[%c77] : memref<144xf32, #tpu.memory_space<smem>>
    %472 = vector.extract_strided_slice %1 {offsets = [0, 1, 2], sizes = [2, 13, 13], strides = [1, 1, 1]} : vector<2x15x15xf32> to vector<2x13x13xf32>
    %473 = vector.broadcast %471 : f32 to vector<2x13x13xf32>
    %474 = arith.mulf %473, %472 : vector<2x13x13xf32>
    %475 = arith.addf %470, %474 : vector<2x13x13xf32>
    %c78 = arith.constant 78 : index
    %476 = memref.load %arg1[%c78] : memref<144xf32, #tpu.memory_space<smem>>
    %477 = vector.extract_strided_slice %1 {offsets = [0, 2, 0], sizes = [2, 13, 13], strides = [1, 1, 1]} : vector<2x15x15xf32> to vector<2x13x13xf32>
    %478 = vector.broadcast %476 : f32 to vector<2x13x13xf32>
    %479 = arith.mulf %478, %477 : vector<2x13x13xf32>
    %480 = arith.addf %475, %479 : vector<2x13x13xf32>
    %c79 = arith.constant 79 : index
    %481 = memref.load %arg1[%c79] : memref<144xf32, #tpu.memory_space<smem>>
    %482 = vector.extract_strided_slice %1 {offsets = [0, 2, 1], sizes = [2, 13, 13], strides = [1, 1, 1]} : vector<2x15x15xf32> to vector<2x13x13xf32>
    %483 = vector.broadcast %481 : f32 to vector<2x13x13xf32>
    %484 = arith.mulf %483, %482 : vector<2x13x13xf32>
    %485 = arith.addf %480, %484 : vector<2x13x13xf32>
    %c80 = arith.constant 80 : index
    %486 = memref.load %arg1[%c80] : memref<144xf32, #tpu.memory_space<smem>>
    %487 = vector.extract_strided_slice %1 {offsets = [0, 2, 2], sizes = [2, 13, 13], strides = [1, 1, 1]} : vector<2x15x15xf32> to vector<2x13x13xf32>
    %488 = vector.broadcast %486 : f32 to vector<2x13x13xf32>
    %489 = arith.mulf %488, %487 : vector<2x13x13xf32>
    %490 = arith.addf %485, %489 : vector<2x13x13xf32>
    %c81 = arith.constant 81 : index
    %491 = memref.load %arg1[%c81] : memref<144xf32, #tpu.memory_space<smem>>
    %492 = vector.extract_strided_slice %3 {offsets = [0, 0, 0], sizes = [2, 13, 13], strides = [1, 1, 1]} : vector<2x15x15xf32> to vector<2x13x13xf32>
    %493 = vector.broadcast %491 : f32 to vector<2x13x13xf32>
    %494 = arith.mulf %493, %492 : vector<2x13x13xf32>
    %495 = arith.addf %490, %494 : vector<2x13x13xf32>
    %c82 = arith.constant 82 : index
    %496 = memref.load %arg1[%c82] : memref<144xf32, #tpu.memory_space<smem>>
    %497 = vector.extract_strided_slice %3 {offsets = [0, 0, 1], sizes = [2, 13, 13], strides = [1, 1, 1]} : vector<2x15x15xf32> to vector<2x13x13xf32>
    %498 = vector.broadcast %496 : f32 to vector<2x13x13xf32>
    %499 = arith.mulf %498, %497 : vector<2x13x13xf32>
    %500 = arith.addf %495, %499 : vector<2x13x13xf32>
    %c83 = arith.constant 83 : index
    %501 = memref.load %arg1[%c83] : memref<144xf32, #tpu.memory_space<smem>>
    %502 = vector.extract_strided_slice %3 {offsets = [0, 0, 2], sizes = [2, 13, 13], strides = [1, 1, 1]} : vector<2x15x15xf32> to vector<2x13x13xf32>
    %503 = vector.broadcast %501 : f32 to vector<2x13x13xf32>
    %504 = arith.mulf %503, %502 : vector<2x13x13xf32>
    %505 = arith.addf %500, %504 : vector<2x13x13xf32>
    %c84 = arith.constant 84 : index
    %506 = memref.load %arg1[%c84] : memref<144xf32, #tpu.memory_space<smem>>
    %507 = vector.extract_strided_slice %3 {offsets = [0, 1, 0], sizes = [2, 13, 13], strides = [1, 1, 1]} : vector<2x15x15xf32> to vector<2x13x13xf32>
    %508 = vector.broadcast %506 : f32 to vector<2x13x13xf32>
    %509 = arith.mulf %508, %507 : vector<2x13x13xf32>
    %510 = arith.addf %505, %509 : vector<2x13x13xf32>
    %c85 = arith.constant 85 : index
    %511 = memref.load %arg1[%c85] : memref<144xf32, #tpu.memory_space<smem>>
    %512 = vector.extract_strided_slice %3 {offsets = [0, 1, 1], sizes = [2, 13, 13], strides = [1, 1, 1]} : vector<2x15x15xf32> to vector<2x13x13xf32>
    %513 = vector.broadcast %511 : f32 to vector<2x13x13xf32>
    %514 = arith.mulf %513, %512 : vector<2x13x13xf32>
    %515 = arith.addf %510, %514 : vector<2x13x13xf32>
    %c86 = arith.constant 86 : index
    %516 = memref.load %arg1[%c86] : memref<144xf32, #tpu.memory_space<smem>>
    %517 = vector.extract_strided_slice %3 {offsets = [0, 1, 2], sizes = [2, 13, 13], strides = [1, 1, 1]} : vector<2x15x15xf32> to vector<2x13x13xf32>
    %518 = vector.broadcast %516 : f32 to vector<2x13x13xf32>
    %519 = arith.mulf %518, %517 : vector<2x13x13xf32>
    %520 = arith.addf %515, %519 : vector<2x13x13xf32>
    %c87 = arith.constant 87 : index
    %521 = memref.load %arg1[%c87] : memref<144xf32, #tpu.memory_space<smem>>
    %522 = vector.extract_strided_slice %3 {offsets = [0, 2, 0], sizes = [2, 13, 13], strides = [1, 1, 1]} : vector<2x15x15xf32> to vector<2x13x13xf32>
    %523 = vector.broadcast %521 : f32 to vector<2x13x13xf32>
    %524 = arith.mulf %523, %522 : vector<2x13x13xf32>
    %525 = arith.addf %520, %524 : vector<2x13x13xf32>
    %c88 = arith.constant 88 : index
    %526 = memref.load %arg1[%c88] : memref<144xf32, #tpu.memory_space<smem>>
    %527 = vector.extract_strided_slice %3 {offsets = [0, 2, 1], sizes = [2, 13, 13], strides = [1, 1, 1]} : vector<2x15x15xf32> to vector<2x13x13xf32>
    %528 = vector.broadcast %526 : f32 to vector<2x13x13xf32>
    %529 = arith.mulf %528, %527 : vector<2x13x13xf32>
    %530 = arith.addf %525, %529 : vector<2x13x13xf32>
    %c89 = arith.constant 89 : index
    %531 = memref.load %arg1[%c89] : memref<144xf32, #tpu.memory_space<smem>>
    %532 = vector.extract_strided_slice %3 {offsets = [0, 2, 2], sizes = [2, 13, 13], strides = [1, 1, 1]} : vector<2x15x15xf32> to vector<2x13x13xf32>
    %533 = vector.broadcast %531 : f32 to vector<2x13x13xf32>
    %534 = arith.mulf %533, %532 : vector<2x13x13xf32>
    %535 = arith.addf %530, %534 : vector<2x13x13xf32>
    %c90 = arith.constant 90 : index
    %536 = memref.load %arg1[%c90] : memref<144xf32, #tpu.memory_space<smem>>
    %537 = vector.extract_strided_slice %5 {offsets = [0, 0, 0], sizes = [2, 13, 13], strides = [1, 1, 1]} : vector<2x15x15xf32> to vector<2x13x13xf32>
    %538 = vector.broadcast %536 : f32 to vector<2x13x13xf32>
    %539 = arith.mulf %538, %537 : vector<2x13x13xf32>
    %540 = arith.addf %535, %539 : vector<2x13x13xf32>
    %c91 = arith.constant 91 : index
    %541 = memref.load %arg1[%c91] : memref<144xf32, #tpu.memory_space<smem>>
    %542 = vector.extract_strided_slice %5 {offsets = [0, 0, 1], sizes = [2, 13, 13], strides = [1, 1, 1]} : vector<2x15x15xf32> to vector<2x13x13xf32>
    %543 = vector.broadcast %541 : f32 to vector<2x13x13xf32>
    %544 = arith.mulf %543, %542 : vector<2x13x13xf32>
    %545 = arith.addf %540, %544 : vector<2x13x13xf32>
    %c92 = arith.constant 92 : index
    %546 = memref.load %arg1[%c92] : memref<144xf32, #tpu.memory_space<smem>>
    %547 = vector.extract_strided_slice %5 {offsets = [0, 0, 2], sizes = [2, 13, 13], strides = [1, 1, 1]} : vector<2x15x15xf32> to vector<2x13x13xf32>
    %548 = vector.broadcast %546 : f32 to vector<2x13x13xf32>
    %549 = arith.mulf %548, %547 : vector<2x13x13xf32>
    %550 = arith.addf %545, %549 : vector<2x13x13xf32>
    %c93 = arith.constant 93 : index
    %551 = memref.load %arg1[%c93] : memref<144xf32, #tpu.memory_space<smem>>
    %552 = vector.extract_strided_slice %5 {offsets = [0, 1, 0], sizes = [2, 13, 13], strides = [1, 1, 1]} : vector<2x15x15xf32> to vector<2x13x13xf32>
    %553 = vector.broadcast %551 : f32 to vector<2x13x13xf32>
    %554 = arith.mulf %553, %552 : vector<2x13x13xf32>
    %555 = arith.addf %550, %554 : vector<2x13x13xf32>
    %c94 = arith.constant 94 : index
    %556 = memref.load %arg1[%c94] : memref<144xf32, #tpu.memory_space<smem>>
    %557 = vector.extract_strided_slice %5 {offsets = [0, 1, 1], sizes = [2, 13, 13], strides = [1, 1, 1]} : vector<2x15x15xf32> to vector<2x13x13xf32>
    %558 = vector.broadcast %556 : f32 to vector<2x13x13xf32>
    %559 = arith.mulf %558, %557 : vector<2x13x13xf32>
    %560 = arith.addf %555, %559 : vector<2x13x13xf32>
    %c95 = arith.constant 95 : index
    %561 = memref.load %arg1[%c95] : memref<144xf32, #tpu.memory_space<smem>>
    %562 = vector.extract_strided_slice %5 {offsets = [0, 1, 2], sizes = [2, 13, 13], strides = [1, 1, 1]} : vector<2x15x15xf32> to vector<2x13x13xf32>
    %563 = vector.broadcast %561 : f32 to vector<2x13x13xf32>
    %564 = arith.mulf %563, %562 : vector<2x13x13xf32>
    %565 = arith.addf %560, %564 : vector<2x13x13xf32>
    %c96 = arith.constant 96 : index
    %566 = memref.load %arg1[%c96] : memref<144xf32, #tpu.memory_space<smem>>
    %567 = vector.extract_strided_slice %5 {offsets = [0, 2, 0], sizes = [2, 13, 13], strides = [1, 1, 1]} : vector<2x15x15xf32> to vector<2x13x13xf32>
    %568 = vector.broadcast %566 : f32 to vector<2x13x13xf32>
    %569 = arith.mulf %568, %567 : vector<2x13x13xf32>
    %570 = arith.addf %565, %569 : vector<2x13x13xf32>
    %c97 = arith.constant 97 : index
    %571 = memref.load %arg1[%c97] : memref<144xf32, #tpu.memory_space<smem>>
    %572 = vector.extract_strided_slice %5 {offsets = [0, 2, 1], sizes = [2, 13, 13], strides = [1, 1, 1]} : vector<2x15x15xf32> to vector<2x13x13xf32>
    %573 = vector.broadcast %571 : f32 to vector<2x13x13xf32>
    %574 = arith.mulf %573, %572 : vector<2x13x13xf32>
    %575 = arith.addf %570, %574 : vector<2x13x13xf32>
    %c98 = arith.constant 98 : index
    %576 = memref.load %arg1[%c98] : memref<144xf32, #tpu.memory_space<smem>>
    %577 = vector.extract_strided_slice %5 {offsets = [0, 2, 2], sizes = [2, 13, 13], strides = [1, 1, 1]} : vector<2x15x15xf32> to vector<2x13x13xf32>
    %578 = vector.broadcast %576 : f32 to vector<2x13x13xf32>
    %579 = arith.mulf %578, %577 : vector<2x13x13xf32>
    %580 = arith.addf %575, %579 : vector<2x13x13xf32>
    %c99 = arith.constant 99 : index
    %581 = memref.load %arg1[%c99] : memref<144xf32, #tpu.memory_space<smem>>
    %582 = vector.extract_strided_slice %7 {offsets = [0, 0, 0], sizes = [2, 13, 13], strides = [1, 1, 1]} : vector<2x15x15xf32> to vector<2x13x13xf32>
    %583 = vector.broadcast %581 : f32 to vector<2x13x13xf32>
    %584 = arith.mulf %583, %582 : vector<2x13x13xf32>
    %585 = arith.addf %580, %584 : vector<2x13x13xf32>
    %c100 = arith.constant 100 : index
    %586 = memref.load %arg1[%c100] : memref<144xf32, #tpu.memory_space<smem>>
    %587 = vector.extract_strided_slice %7 {offsets = [0, 0, 1], sizes = [2, 13, 13], strides = [1, 1, 1]} : vector<2x15x15xf32> to vector<2x13x13xf32>
    %588 = vector.broadcast %586 : f32 to vector<2x13x13xf32>
    %589 = arith.mulf %588, %587 : vector<2x13x13xf32>
    %590 = arith.addf %585, %589 : vector<2x13x13xf32>
    %c101 = arith.constant 101 : index
    %591 = memref.load %arg1[%c101] : memref<144xf32, #tpu.memory_space<smem>>
    %592 = vector.extract_strided_slice %7 {offsets = [0, 0, 2], sizes = [2, 13, 13], strides = [1, 1, 1]} : vector<2x15x15xf32> to vector<2x13x13xf32>
    %593 = vector.broadcast %591 : f32 to vector<2x13x13xf32>
    %594 = arith.mulf %593, %592 : vector<2x13x13xf32>
    %595 = arith.addf %590, %594 : vector<2x13x13xf32>
    %c102 = arith.constant 102 : index
    %596 = memref.load %arg1[%c102] : memref<144xf32, #tpu.memory_space<smem>>
    %597 = vector.extract_strided_slice %7 {offsets = [0, 1, 0], sizes = [2, 13, 13], strides = [1, 1, 1]} : vector<2x15x15xf32> to vector<2x13x13xf32>
    %598 = vector.broadcast %596 : f32 to vector<2x13x13xf32>
    %599 = arith.mulf %598, %597 : vector<2x13x13xf32>
    %600 = arith.addf %595, %599 : vector<2x13x13xf32>
    %c103 = arith.constant 103 : index
    %601 = memref.load %arg1[%c103] : memref<144xf32, #tpu.memory_space<smem>>
    %602 = vector.extract_strided_slice %7 {offsets = [0, 1, 1], sizes = [2, 13, 13], strides = [1, 1, 1]} : vector<2x15x15xf32> to vector<2x13x13xf32>
    %603 = vector.broadcast %601 : f32 to vector<2x13x13xf32>
    %604 = arith.mulf %603, %602 : vector<2x13x13xf32>
    %605 = arith.addf %600, %604 : vector<2x13x13xf32>
    %c104 = arith.constant 104 : index
    %606 = memref.load %arg1[%c104] : memref<144xf32, #tpu.memory_space<smem>>
    %607 = vector.extract_strided_slice %7 {offsets = [0, 1, 2], sizes = [2, 13, 13], strides = [1, 1, 1]} : vector<2x15x15xf32> to vector<2x13x13xf32>
    %608 = vector.broadcast %606 : f32 to vector<2x13x13xf32>
    %609 = arith.mulf %608, %607 : vector<2x13x13xf32>
    %610 = arith.addf %605, %609 : vector<2x13x13xf32>
    %c105 = arith.constant 105 : index
    %611 = memref.load %arg1[%c105] : memref<144xf32, #tpu.memory_space<smem>>
    %612 = vector.extract_strided_slice %7 {offsets = [0, 2, 0], sizes = [2, 13, 13], strides = [1, 1, 1]} : vector<2x15x15xf32> to vector<2x13x13xf32>
    %613 = vector.broadcast %611 : f32 to vector<2x13x13xf32>
    %614 = arith.mulf %613, %612 : vector<2x13x13xf32>
    %615 = arith.addf %610, %614 : vector<2x13x13xf32>
    %c106 = arith.constant 106 : index
    %616 = memref.load %arg1[%c106] : memref<144xf32, #tpu.memory_space<smem>>
    %617 = vector.extract_strided_slice %7 {offsets = [0, 2, 1], sizes = [2, 13, 13], strides = [1, 1, 1]} : vector<2x15x15xf32> to vector<2x13x13xf32>
    %618 = vector.broadcast %616 : f32 to vector<2x13x13xf32>
    %619 = arith.mulf %618, %617 : vector<2x13x13xf32>
    %620 = arith.addf %615, %619 : vector<2x13x13xf32>
    %c107 = arith.constant 107 : index
    %621 = memref.load %arg1[%c107] : memref<144xf32, #tpu.memory_space<smem>>
    %622 = vector.extract_strided_slice %7 {offsets = [0, 2, 2], sizes = [2, 13, 13], strides = [1, 1, 1]} : vector<2x15x15xf32> to vector<2x13x13xf32>
    %623 = vector.broadcast %621 : f32 to vector<2x13x13xf32>
    %624 = arith.mulf %623, %622 : vector<2x13x13xf32>
    %625 = arith.addf %620, %624 : vector<2x13x13xf32>
    %c2_31 = arith.constant 2 : index
    %626 = memref.load %arg2[%c2_31] : memref<4xf32, #tpu.memory_space<smem>>
    %627 = vector.broadcast %626 : f32 to vector<2x13x13xf32>
    %628 = arith.addf %625, %627 : vector<2x13x13xf32>
    %cst_32 = arith.constant 0.000000e+00 : f32
    %629 = vector.broadcast %cst_32 : f32 to vector<2x13x13xf32>
    %630 = arith.maximumf %628, %629 : vector<2x13x13xf32>
    %631 = vector.extract_strided_slice %630 {offsets = [0, 0, 0], sizes = [2, 11, 11], strides = [1, 1, 1]} : vector<2x13x13xf32> to vector<2x11x11xf32>
    %632 = vector.extract_strided_slice %630 {offsets = [0, 0, 1], sizes = [2, 11, 11], strides = [1, 1, 1]} : vector<2x13x13xf32> to vector<2x11x11xf32>
    %633 = arith.maximumf %631, %632 : vector<2x11x11xf32>
    %634 = vector.extract_strided_slice %630 {offsets = [0, 0, 2], sizes = [2, 11, 11], strides = [1, 1, 1]} : vector<2x13x13xf32> to vector<2x11x11xf32>
    %635 = arith.maximumf %633, %634 : vector<2x11x11xf32>
    %636 = vector.extract_strided_slice %630 {offsets = [0, 1, 0], sizes = [2, 11, 11], strides = [1, 1, 1]} : vector<2x13x13xf32> to vector<2x11x11xf32>
    %637 = arith.maximumf %635, %636 : vector<2x11x11xf32>
    %638 = vector.extract_strided_slice %630 {offsets = [0, 1, 1], sizes = [2, 11, 11], strides = [1, 1, 1]} : vector<2x13x13xf32> to vector<2x11x11xf32>
    %639 = arith.maximumf %637, %638 : vector<2x11x11xf32>
    %640 = vector.extract_strided_slice %630 {offsets = [0, 1, 2], sizes = [2, 11, 11], strides = [1, 1, 1]} : vector<2x13x13xf32> to vector<2x11x11xf32>
    %641 = arith.maximumf %639, %640 : vector<2x11x11xf32>
    %642 = vector.extract_strided_slice %630 {offsets = [0, 2, 0], sizes = [2, 11, 11], strides = [1, 1, 1]} : vector<2x13x13xf32> to vector<2x11x11xf32>
    %643 = arith.maximumf %641, %642 : vector<2x11x11xf32>
    %644 = vector.extract_strided_slice %630 {offsets = [0, 2, 1], sizes = [2, 11, 11], strides = [1, 1, 1]} : vector<2x13x13xf32> to vector<2x11x11xf32>
    %645 = arith.maximumf %643, %644 : vector<2x11x11xf32>
    %646 = vector.extract_strided_slice %630 {offsets = [0, 2, 2], sizes = [2, 11, 11], strides = [1, 1, 1]} : vector<2x13x13xf32> to vector<2x11x11xf32>
    %647 = arith.maximumf %645, %646 : vector<2x11x11xf32>
    %648 = vector.extract_strided_slice %8 {offsets = [0, 0, 2, 0, 0], sizes = [1, 2, 1, 11, 11], strides = [1, 1, 1, 1, 1]} : vector<2x2x4x11x11xf32> to vector<1x2x1x11x11xf32>
    %649 = vector.shape_cast %648 : vector<1x2x1x11x11xf32> to vector<2x11x11xf32>
    %650 = arith.mulf %649, %647 : vector<2x11x11xf32>
    %651 = vector.shape_cast %650 : vector<2x11x11xf32> to vector<1x2x11x11xf32>
    %cst_33 = arith.constant dense<0.000000e+00> : vector<1xf32>
    %652 = vector.multi_reduction <add>, %651, %cst_33 [1, 2, 3] : vector<1x2x11x11xf32> to vector<1xf32>
    %653 = vector.shape_cast %652 : vector<1xf32> to vector<1x1x1x1xf32>
    %654 = vector.extract %653[0, 0, 0, 0] : f32 from vector<1x1x1x1xf32>
    %655 = arith.addf %436, %654 : f32
    %656 = vector.extract_strided_slice %8 {offsets = [1, 0, 2, 0, 0], sizes = [1, 2, 1, 11, 11], strides = [1, 1, 1, 1, 1]} : vector<2x2x4x11x11xf32> to vector<1x2x1x11x11xf32>
    %657 = vector.shape_cast %656 : vector<1x2x1x11x11xf32> to vector<2x11x11xf32>
    %658 = arith.mulf %657, %647 : vector<2x11x11xf32>
    %659 = vector.shape_cast %658 : vector<2x11x11xf32> to vector<1x2x11x11xf32>
    %cst_34 = arith.constant dense<0.000000e+00> : vector<1xf32>
    %660 = vector.multi_reduction <add>, %659, %cst_34 [1, 2, 3] : vector<1x2x11x11xf32> to vector<1xf32>
    %661 = vector.shape_cast %660 : vector<1xf32> to vector<1x1x1x1xf32>
    %662 = vector.extract %661[0, 0, 0, 0] : f32 from vector<1x1x1x1xf32>
    %663 = arith.addf %444, %662 : f32
    %cst_35 = arith.constant 0.000000e+00 : f32
    %664 = vector.broadcast %cst_35 : f32 to vector<2x13x13xf32>
    %c108 = arith.constant 108 : index
    %665 = memref.load %arg1[%c108] : memref<144xf32, #tpu.memory_space<smem>>
    %666 = vector.extract_strided_slice %1 {offsets = [0, 0, 0], sizes = [2, 13, 13], strides = [1, 1, 1]} : vector<2x15x15xf32> to vector<2x13x13xf32>
    %667 = vector.broadcast %665 : f32 to vector<2x13x13xf32>
    %668 = arith.mulf %667, %666 : vector<2x13x13xf32>
    %669 = arith.addf %664, %668 : vector<2x13x13xf32>
    %c109 = arith.constant 109 : index
    %670 = memref.load %arg1[%c109] : memref<144xf32, #tpu.memory_space<smem>>
    %671 = vector.extract_strided_slice %1 {offsets = [0, 0, 1], sizes = [2, 13, 13], strides = [1, 1, 1]} : vector<2x15x15xf32> to vector<2x13x13xf32>
    %672 = vector.broadcast %670 : f32 to vector<2x13x13xf32>
    %673 = arith.mulf %672, %671 : vector<2x13x13xf32>
    %674 = arith.addf %669, %673 : vector<2x13x13xf32>
    %c110 = arith.constant 110 : index
    %675 = memref.load %arg1[%c110] : memref<144xf32, #tpu.memory_space<smem>>
    %676 = vector.extract_strided_slice %1 {offsets = [0, 0, 2], sizes = [2, 13, 13], strides = [1, 1, 1]} : vector<2x15x15xf32> to vector<2x13x13xf32>
    %677 = vector.broadcast %675 : f32 to vector<2x13x13xf32>
    %678 = arith.mulf %677, %676 : vector<2x13x13xf32>
    %679 = arith.addf %674, %678 : vector<2x13x13xf32>
    %c111 = arith.constant 111 : index
    %680 = memref.load %arg1[%c111] : memref<144xf32, #tpu.memory_space<smem>>
    %681 = vector.extract_strided_slice %1 {offsets = [0, 1, 0], sizes = [2, 13, 13], strides = [1, 1, 1]} : vector<2x15x15xf32> to vector<2x13x13xf32>
    %682 = vector.broadcast %680 : f32 to vector<2x13x13xf32>
    %683 = arith.mulf %682, %681 : vector<2x13x13xf32>
    %684 = arith.addf %679, %683 : vector<2x13x13xf32>
    %c112 = arith.constant 112 : index
    %685 = memref.load %arg1[%c112] : memref<144xf32, #tpu.memory_space<smem>>
    %686 = vector.extract_strided_slice %1 {offsets = [0, 1, 1], sizes = [2, 13, 13], strides = [1, 1, 1]} : vector<2x15x15xf32> to vector<2x13x13xf32>
    %687 = vector.broadcast %685 : f32 to vector<2x13x13xf32>
    %688 = arith.mulf %687, %686 : vector<2x13x13xf32>
    %689 = arith.addf %684, %688 : vector<2x13x13xf32>
    %c113 = arith.constant 113 : index
    %690 = memref.load %arg1[%c113] : memref<144xf32, #tpu.memory_space<smem>>
    %691 = vector.extract_strided_slice %1 {offsets = [0, 1, 2], sizes = [2, 13, 13], strides = [1, 1, 1]} : vector<2x15x15xf32> to vector<2x13x13xf32>
    %692 = vector.broadcast %690 : f32 to vector<2x13x13xf32>
    %693 = arith.mulf %692, %691 : vector<2x13x13xf32>
    %694 = arith.addf %689, %693 : vector<2x13x13xf32>
    %c114 = arith.constant 114 : index
    %695 = memref.load %arg1[%c114] : memref<144xf32, #tpu.memory_space<smem>>
    %696 = vector.extract_strided_slice %1 {offsets = [0, 2, 0], sizes = [2, 13, 13], strides = [1, 1, 1]} : vector<2x15x15xf32> to vector<2x13x13xf32>
    %697 = vector.broadcast %695 : f32 to vector<2x13x13xf32>
    %698 = arith.mulf %697, %696 : vector<2x13x13xf32>
    %699 = arith.addf %694, %698 : vector<2x13x13xf32>
    %c115 = arith.constant 115 : index
    %700 = memref.load %arg1[%c115] : memref<144xf32, #tpu.memory_space<smem>>
    %701 = vector.extract_strided_slice %1 {offsets = [0, 2, 1], sizes = [2, 13, 13], strides = [1, 1, 1]} : vector<2x15x15xf32> to vector<2x13x13xf32>
    %702 = vector.broadcast %700 : f32 to vector<2x13x13xf32>
    %703 = arith.mulf %702, %701 : vector<2x13x13xf32>
    %704 = arith.addf %699, %703 : vector<2x13x13xf32>
    %c116 = arith.constant 116 : index
    %705 = memref.load %arg1[%c116] : memref<144xf32, #tpu.memory_space<smem>>
    %706 = vector.extract_strided_slice %1 {offsets = [0, 2, 2], sizes = [2, 13, 13], strides = [1, 1, 1]} : vector<2x15x15xf32> to vector<2x13x13xf32>
    %707 = vector.broadcast %705 : f32 to vector<2x13x13xf32>
    %708 = arith.mulf %707, %706 : vector<2x13x13xf32>
    %709 = arith.addf %704, %708 : vector<2x13x13xf32>
    %c117 = arith.constant 117 : index
    %710 = memref.load %arg1[%c117] : memref<144xf32, #tpu.memory_space<smem>>
    %711 = vector.extract_strided_slice %3 {offsets = [0, 0, 0], sizes = [2, 13, 13], strides = [1, 1, 1]} : vector<2x15x15xf32> to vector<2x13x13xf32>
    %712 = vector.broadcast %710 : f32 to vector<2x13x13xf32>
    %713 = arith.mulf %712, %711 : vector<2x13x13xf32>
    %714 = arith.addf %709, %713 : vector<2x13x13xf32>
    %c118 = arith.constant 118 : index
    %715 = memref.load %arg1[%c118] : memref<144xf32, #tpu.memory_space<smem>>
    %716 = vector.extract_strided_slice %3 {offsets = [0, 0, 1], sizes = [2, 13, 13], strides = [1, 1, 1]} : vector<2x15x15xf32> to vector<2x13x13xf32>
    %717 = vector.broadcast %715 : f32 to vector<2x13x13xf32>
    %718 = arith.mulf %717, %716 : vector<2x13x13xf32>
    %719 = arith.addf %714, %718 : vector<2x13x13xf32>
    %c119 = arith.constant 119 : index
    %720 = memref.load %arg1[%c119] : memref<144xf32, #tpu.memory_space<smem>>
    %721 = vector.extract_strided_slice %3 {offsets = [0, 0, 2], sizes = [2, 13, 13], strides = [1, 1, 1]} : vector<2x15x15xf32> to vector<2x13x13xf32>
    %722 = vector.broadcast %720 : f32 to vector<2x13x13xf32>
    %723 = arith.mulf %722, %721 : vector<2x13x13xf32>
    %724 = arith.addf %719, %723 : vector<2x13x13xf32>
    %c120 = arith.constant 120 : index
    %725 = memref.load %arg1[%c120] : memref<144xf32, #tpu.memory_space<smem>>
    %726 = vector.extract_strided_slice %3 {offsets = [0, 1, 0], sizes = [2, 13, 13], strides = [1, 1, 1]} : vector<2x15x15xf32> to vector<2x13x13xf32>
    %727 = vector.broadcast %725 : f32 to vector<2x13x13xf32>
    %728 = arith.mulf %727, %726 : vector<2x13x13xf32>
    %729 = arith.addf %724, %728 : vector<2x13x13xf32>
    %c121 = arith.constant 121 : index
    %730 = memref.load %arg1[%c121] : memref<144xf32, #tpu.memory_space<smem>>
    %731 = vector.extract_strided_slice %3 {offsets = [0, 1, 1], sizes = [2, 13, 13], strides = [1, 1, 1]} : vector<2x15x15xf32> to vector<2x13x13xf32>
    %732 = vector.broadcast %730 : f32 to vector<2x13x13xf32>
    %733 = arith.mulf %732, %731 : vector<2x13x13xf32>
    %734 = arith.addf %729, %733 : vector<2x13x13xf32>
    %c122 = arith.constant 122 : index
    %735 = memref.load %arg1[%c122] : memref<144xf32, #tpu.memory_space<smem>>
    %736 = vector.extract_strided_slice %3 {offsets = [0, 1, 2], sizes = [2, 13, 13], strides = [1, 1, 1]} : vector<2x15x15xf32> to vector<2x13x13xf32>
    %737 = vector.broadcast %735 : f32 to vector<2x13x13xf32>
    %738 = arith.mulf %737, %736 : vector<2x13x13xf32>
    %739 = arith.addf %734, %738 : vector<2x13x13xf32>
    %c123 = arith.constant 123 : index
    %740 = memref.load %arg1[%c123] : memref<144xf32, #tpu.memory_space<smem>>
    %741 = vector.extract_strided_slice %3 {offsets = [0, 2, 0], sizes = [2, 13, 13], strides = [1, 1, 1]} : vector<2x15x15xf32> to vector<2x13x13xf32>
    %742 = vector.broadcast %740 : f32 to vector<2x13x13xf32>
    %743 = arith.mulf %742, %741 : vector<2x13x13xf32>
    %744 = arith.addf %739, %743 : vector<2x13x13xf32>
    %c124 = arith.constant 124 : index
    %745 = memref.load %arg1[%c124] : memref<144xf32, #tpu.memory_space<smem>>
    %746 = vector.extract_strided_slice %3 {offsets = [0, 2, 1], sizes = [2, 13, 13], strides = [1, 1, 1]} : vector<2x15x15xf32> to vector<2x13x13xf32>
    %747 = vector.broadcast %745 : f32 to vector<2x13x13xf32>
    %748 = arith.mulf %747, %746 : vector<2x13x13xf32>
    %749 = arith.addf %744, %748 : vector<2x13x13xf32>
    %c125 = arith.constant 125 : index
    %750 = memref.load %arg1[%c125] : memref<144xf32, #tpu.memory_space<smem>>
    %751 = vector.extract_strided_slice %3 {offsets = [0, 2, 2], sizes = [2, 13, 13], strides = [1, 1, 1]} : vector<2x15x15xf32> to vector<2x13x13xf32>
    %752 = vector.broadcast %750 : f32 to vector<2x13x13xf32>
    %753 = arith.mulf %752, %751 : vector<2x13x13xf32>
    %754 = arith.addf %749, %753 : vector<2x13x13xf32>
    %c126 = arith.constant 126 : index
    %755 = memref.load %arg1[%c126] : memref<144xf32, #tpu.memory_space<smem>>
    %756 = vector.extract_strided_slice %5 {offsets = [0, 0, 0], sizes = [2, 13, 13], strides = [1, 1, 1]} : vector<2x15x15xf32> to vector<2x13x13xf32>
    %757 = vector.broadcast %755 : f32 to vector<2x13x13xf32>
    %758 = arith.mulf %757, %756 : vector<2x13x13xf32>
    %759 = arith.addf %754, %758 : vector<2x13x13xf32>
    %c127 = arith.constant 127 : index
    %760 = memref.load %arg1[%c127] : memref<144xf32, #tpu.memory_space<smem>>
    %761 = vector.extract_strided_slice %5 {offsets = [0, 0, 1], sizes = [2, 13, 13], strides = [1, 1, 1]} : vector<2x15x15xf32> to vector<2x13x13xf32>
    %762 = vector.broadcast %760 : f32 to vector<2x13x13xf32>
    %763 = arith.mulf %762, %761 : vector<2x13x13xf32>
    %764 = arith.addf %759, %763 : vector<2x13x13xf32>
    %c128 = arith.constant 128 : index
    %765 = memref.load %arg1[%c128] : memref<144xf32, #tpu.memory_space<smem>>
    %766 = vector.extract_strided_slice %5 {offsets = [0, 0, 2], sizes = [2, 13, 13], strides = [1, 1, 1]} : vector<2x15x15xf32> to vector<2x13x13xf32>
    %767 = vector.broadcast %765 : f32 to vector<2x13x13xf32>
    %768 = arith.mulf %767, %766 : vector<2x13x13xf32>
    %769 = arith.addf %764, %768 : vector<2x13x13xf32>
    %c129 = arith.constant 129 : index
    %770 = memref.load %arg1[%c129] : memref<144xf32, #tpu.memory_space<smem>>
    %771 = vector.extract_strided_slice %5 {offsets = [0, 1, 0], sizes = [2, 13, 13], strides = [1, 1, 1]} : vector<2x15x15xf32> to vector<2x13x13xf32>
    %772 = vector.broadcast %770 : f32 to vector<2x13x13xf32>
    %773 = arith.mulf %772, %771 : vector<2x13x13xf32>
    %774 = arith.addf %769, %773 : vector<2x13x13xf32>
    %c130 = arith.constant 130 : index
    %775 = memref.load %arg1[%c130] : memref<144xf32, #tpu.memory_space<smem>>
    %776 = vector.extract_strided_slice %5 {offsets = [0, 1, 1], sizes = [2, 13, 13], strides = [1, 1, 1]} : vector<2x15x15xf32> to vector<2x13x13xf32>
    %777 = vector.broadcast %775 : f32 to vector<2x13x13xf32>
    %778 = arith.mulf %777, %776 : vector<2x13x13xf32>
    %779 = arith.addf %774, %778 : vector<2x13x13xf32>
    %c131 = arith.constant 131 : index
    %780 = memref.load %arg1[%c131] : memref<144xf32, #tpu.memory_space<smem>>
    %781 = vector.extract_strided_slice %5 {offsets = [0, 1, 2], sizes = [2, 13, 13], strides = [1, 1, 1]} : vector<2x15x15xf32> to vector<2x13x13xf32>
    %782 = vector.broadcast %780 : f32 to vector<2x13x13xf32>
    %783 = arith.mulf %782, %781 : vector<2x13x13xf32>
    %784 = arith.addf %779, %783 : vector<2x13x13xf32>
    %c132 = arith.constant 132 : index
    %785 = memref.load %arg1[%c132] : memref<144xf32, #tpu.memory_space<smem>>
    %786 = vector.extract_strided_slice %5 {offsets = [0, 2, 0], sizes = [2, 13, 13], strides = [1, 1, 1]} : vector<2x15x15xf32> to vector<2x13x13xf32>
    %787 = vector.broadcast %785 : f32 to vector<2x13x13xf32>
    %788 = arith.mulf %787, %786 : vector<2x13x13xf32>
    %789 = arith.addf %784, %788 : vector<2x13x13xf32>
    %c133 = arith.constant 133 : index
    %790 = memref.load %arg1[%c133] : memref<144xf32, #tpu.memory_space<smem>>
    %791 = vector.extract_strided_slice %5 {offsets = [0, 2, 1], sizes = [2, 13, 13], strides = [1, 1, 1]} : vector<2x15x15xf32> to vector<2x13x13xf32>
    %792 = vector.broadcast %790 : f32 to vector<2x13x13xf32>
    %793 = arith.mulf %792, %791 : vector<2x13x13xf32>
    %794 = arith.addf %789, %793 : vector<2x13x13xf32>
    %c134 = arith.constant 134 : index
    %795 = memref.load %arg1[%c134] : memref<144xf32, #tpu.memory_space<smem>>
    %796 = vector.extract_strided_slice %5 {offsets = [0, 2, 2], sizes = [2, 13, 13], strides = [1, 1, 1]} : vector<2x15x15xf32> to vector<2x13x13xf32>
    %797 = vector.broadcast %795 : f32 to vector<2x13x13xf32>
    %798 = arith.mulf %797, %796 : vector<2x13x13xf32>
    %799 = arith.addf %794, %798 : vector<2x13x13xf32>
    %c135 = arith.constant 135 : index
    %800 = memref.load %arg1[%c135] : memref<144xf32, #tpu.memory_space<smem>>
    %801 = vector.extract_strided_slice %7 {offsets = [0, 0, 0], sizes = [2, 13, 13], strides = [1, 1, 1]} : vector<2x15x15xf32> to vector<2x13x13xf32>
    %802 = vector.broadcast %800 : f32 to vector<2x13x13xf32>
    %803 = arith.mulf %802, %801 : vector<2x13x13xf32>
    %804 = arith.addf %799, %803 : vector<2x13x13xf32>
    %c136 = arith.constant 136 : index
    %805 = memref.load %arg1[%c136] : memref<144xf32, #tpu.memory_space<smem>>
    %806 = vector.extract_strided_slice %7 {offsets = [0, 0, 1], sizes = [2, 13, 13], strides = [1, 1, 1]} : vector<2x15x15xf32> to vector<2x13x13xf32>
    %807 = vector.broadcast %805 : f32 to vector<2x13x13xf32>
    %808 = arith.mulf %807, %806 : vector<2x13x13xf32>
    %809 = arith.addf %804, %808 : vector<2x13x13xf32>
    %c137 = arith.constant 137 : index
    %810 = memref.load %arg1[%c137] : memref<144xf32, #tpu.memory_space<smem>>
    %811 = vector.extract_strided_slice %7 {offsets = [0, 0, 2], sizes = [2, 13, 13], strides = [1, 1, 1]} : vector<2x15x15xf32> to vector<2x13x13xf32>
    %812 = vector.broadcast %810 : f32 to vector<2x13x13xf32>
    %813 = arith.mulf %812, %811 : vector<2x13x13xf32>
    %814 = arith.addf %809, %813 : vector<2x13x13xf32>
    %c138 = arith.constant 138 : index
    %815 = memref.load %arg1[%c138] : memref<144xf32, #tpu.memory_space<smem>>
    %816 = vector.extract_strided_slice %7 {offsets = [0, 1, 0], sizes = [2, 13, 13], strides = [1, 1, 1]} : vector<2x15x15xf32> to vector<2x13x13xf32>
    %817 = vector.broadcast %815 : f32 to vector<2x13x13xf32>
    %818 = arith.mulf %817, %816 : vector<2x13x13xf32>
    %819 = arith.addf %814, %818 : vector<2x13x13xf32>
    %c139 = arith.constant 139 : index
    %820 = memref.load %arg1[%c139] : memref<144xf32, #tpu.memory_space<smem>>
    %821 = vector.extract_strided_slice %7 {offsets = [0, 1, 1], sizes = [2, 13, 13], strides = [1, 1, 1]} : vector<2x15x15xf32> to vector<2x13x13xf32>
    %822 = vector.broadcast %820 : f32 to vector<2x13x13xf32>
    %823 = arith.mulf %822, %821 : vector<2x13x13xf32>
    %824 = arith.addf %819, %823 : vector<2x13x13xf32>
    %c140 = arith.constant 140 : index
    %825 = memref.load %arg1[%c140] : memref<144xf32, #tpu.memory_space<smem>>
    %826 = vector.extract_strided_slice %7 {offsets = [0, 1, 2], sizes = [2, 13, 13], strides = [1, 1, 1]} : vector<2x15x15xf32> to vector<2x13x13xf32>
    %827 = vector.broadcast %825 : f32 to vector<2x13x13xf32>
    %828 = arith.mulf %827, %826 : vector<2x13x13xf32>
    %829 = arith.addf %824, %828 : vector<2x13x13xf32>
    %c141 = arith.constant 141 : index
    %830 = memref.load %arg1[%c141] : memref<144xf32, #tpu.memory_space<smem>>
    %831 = vector.extract_strided_slice %7 {offsets = [0, 2, 0], sizes = [2, 13, 13], strides = [1, 1, 1]} : vector<2x15x15xf32> to vector<2x13x13xf32>
    %832 = vector.broadcast %830 : f32 to vector<2x13x13xf32>
    %833 = arith.mulf %832, %831 : vector<2x13x13xf32>
    %834 = arith.addf %829, %833 : vector<2x13x13xf32>
    %c142 = arith.constant 142 : index
    %835 = memref.load %arg1[%c142] : memref<144xf32, #tpu.memory_space<smem>>
    %836 = vector.extract_strided_slice %7 {offsets = [0, 2, 1], sizes = [2, 13, 13], strides = [1, 1, 1]} : vector<2x15x15xf32> to vector<2x13x13xf32>
    %837 = vector.broadcast %835 : f32 to vector<2x13x13xf32>
    %838 = arith.mulf %837, %836 : vector<2x13x13xf32>
    %839 = arith.addf %834, %838 : vector<2x13x13xf32>
    %c143 = arith.constant 143 : index
    %840 = memref.load %arg1[%c143] : memref<144xf32, #tpu.memory_space<smem>>
    %841 = vector.extract_strided_slice %7 {offsets = [0, 2, 2], sizes = [2, 13, 13], strides = [1, 1, 1]} : vector<2x15x15xf32> to vector<2x13x13xf32>
    %842 = vector.broadcast %840 : f32 to vector<2x13x13xf32>
    %843 = arith.mulf %842, %841 : vector<2x13x13xf32>
    %844 = arith.addf %839, %843 : vector<2x13x13xf32>
    %c3_36 = arith.constant 3 : index
    %845 = memref.load %arg2[%c3_36] : memref<4xf32, #tpu.memory_space<smem>>
    %846 = vector.broadcast %845 : f32 to vector<2x13x13xf32>
    %847 = arith.addf %844, %846 : vector<2x13x13xf32>
    %cst_37 = arith.constant 0.000000e+00 : f32
    %848 = vector.broadcast %cst_37 : f32 to vector<2x13x13xf32>
    %849 = arith.maximumf %847, %848 : vector<2x13x13xf32>
    %850 = vector.extract_strided_slice %849 {offsets = [0, 0, 0], sizes = [2, 11, 11], strides = [1, 1, 1]} : vector<2x13x13xf32> to vector<2x11x11xf32>
    %851 = vector.extract_strided_slice %849 {offsets = [0, 0, 1], sizes = [2, 11, 11], strides = [1, 1, 1]} : vector<2x13x13xf32> to vector<2x11x11xf32>
    %852 = arith.maximumf %850, %851 : vector<2x11x11xf32>
    %853 = vector.extract_strided_slice %849 {offsets = [0, 0, 2], sizes = [2, 11, 11], strides = [1, 1, 1]} : vector<2x13x13xf32> to vector<2x11x11xf32>
    %854 = arith.maximumf %852, %853 : vector<2x11x11xf32>
    %855 = vector.extract_strided_slice %849 {offsets = [0, 1, 0], sizes = [2, 11, 11], strides = [1, 1, 1]} : vector<2x13x13xf32> to vector<2x11x11xf32>
    %856 = arith.maximumf %854, %855 : vector<2x11x11xf32>
    %857 = vector.extract_strided_slice %849 {offsets = [0, 1, 1], sizes = [2, 11, 11], strides = [1, 1, 1]} : vector<2x13x13xf32> to vector<2x11x11xf32>
    %858 = arith.maximumf %856, %857 : vector<2x11x11xf32>
    %859 = vector.extract_strided_slice %849 {offsets = [0, 1, 2], sizes = [2, 11, 11], strides = [1, 1, 1]} : vector<2x13x13xf32> to vector<2x11x11xf32>
    %860 = arith.maximumf %858, %859 : vector<2x11x11xf32>
    %861 = vector.extract_strided_slice %849 {offsets = [0, 2, 0], sizes = [2, 11, 11], strides = [1, 1, 1]} : vector<2x13x13xf32> to vector<2x11x11xf32>
    %862 = arith.maximumf %860, %861 : vector<2x11x11xf32>
    %863 = vector.extract_strided_slice %849 {offsets = [0, 2, 1], sizes = [2, 11, 11], strides = [1, 1, 1]} : vector<2x13x13xf32> to vector<2x11x11xf32>
    %864 = arith.maximumf %862, %863 : vector<2x11x11xf32>
    %865 = vector.extract_strided_slice %849 {offsets = [0, 2, 2], sizes = [2, 11, 11], strides = [1, 1, 1]} : vector<2x13x13xf32> to vector<2x11x11xf32>
    %866 = arith.maximumf %864, %865 : vector<2x11x11xf32>
    %867 = vector.extract_strided_slice %8 {offsets = [0, 0, 3, 0, 0], sizes = [1, 2, 1, 11, 11], strides = [1, 1, 1, 1, 1]} : vector<2x2x4x11x11xf32> to vector<1x2x1x11x11xf32>
    %868 = vector.shape_cast %867 : vector<1x2x1x11x11xf32> to vector<2x11x11xf32>
    %869 = arith.mulf %868, %866 : vector<2x11x11xf32>
    %870 = vector.shape_cast %869 : vector<2x11x11xf32> to vector<1x2x11x11xf32>
    %cst_38 = arith.constant dense<0.000000e+00> : vector<1xf32>
    %871 = vector.multi_reduction <add>, %870, %cst_38 [1, 2, 3] : vector<1x2x11x11xf32> to vector<1xf32>
    %872 = vector.shape_cast %871 : vector<1xf32> to vector<1x1x1x1xf32>
    %873 = vector.extract %872[0, 0, 0, 0] : f32 from vector<1x1x1x1xf32>
    %874 = arith.addf %655, %873 : f32
    %875 = vector.extract_strided_slice %8 {offsets = [1, 0, 3, 0, 0], sizes = [1, 2, 1, 11, 11], strides = [1, 1, 1, 1, 1]} : vector<2x2x4x11x11xf32> to vector<1x2x1x11x11xf32>
    %876 = vector.shape_cast %875 : vector<1x2x1x11x11xf32> to vector<2x11x11xf32>
    %877 = arith.mulf %876, %866 : vector<2x11x11xf32>
    %878 = vector.shape_cast %877 : vector<2x11x11xf32> to vector<1x2x11x11xf32>
    %cst_39 = arith.constant dense<0.000000e+00> : vector<1xf32>
    %879 = vector.multi_reduction <add>, %878, %cst_39 [1, 2, 3] : vector<1x2x11x11xf32> to vector<1xf32>
    %880 = vector.shape_cast %879 : vector<1xf32> to vector<1x1x1x1xf32>
    %881 = vector.extract %880[0, 0, 0, 0] : f32 from vector<1x1x1x1xf32>
    %882 = arith.addf %663, %881 : f32
    %883 = tpu.iota {dimensions = array<i32: 1>} : vector<1x2xi32>
    %c0_40 = arith.constant 0 : index
    %c0_41 = arith.constant 0 : index
    %884 = vector.load %arg4[%c0_40, %c0_41] : memref<1x2xf32, #tpu.memory_space<vmem>>, vector<1x2xf32>
    %c0_i32 = arith.constant 0 : i32
    %885 = vector.broadcast %c0_i32 : i32 to vector<1x2xi32>
    %886 = arith.cmpi eq, %883, %885 : vector<1x2xi32>
    %cst_42 = arith.constant 0.000000e+00 : f32
    %887 = vector.broadcast %874 : f32 to vector<1x2xf32>
    %888 = vector.broadcast %cst_42 : f32 to vector<1x2xf32>
    %889 = arith.select %886, %887, %888 : vector<1x2xi1>, vector<1x2xf32>
    %890 = arith.addf %884, %889 : vector<1x2xf32>
    %c1_i32 = arith.constant 1 : i32
    %891 = vector.broadcast %c1_i32 : i32 to vector<1x2xi32>
    %892 = arith.cmpi eq, %883, %891 : vector<1x2xi32>
    %cst_43 = arith.constant 0.000000e+00 : f32
    %893 = vector.broadcast %882 : f32 to vector<1x2xf32>
    %894 = vector.broadcast %cst_43 : f32 to vector<1x2xf32>
    %895 = arith.select %892, %893, %894 : vector<1x2xi1>, vector<1x2xf32>
    %896 = arith.addf %890, %895 : vector<1x2xf32>
    %c0_44 = arith.constant 0 : index
    %c0_45 = arith.constant 0 : index
    %897 = vector.load %arg5[%c0_44, %c0_45] : memref<1x2xf32, #tpu.memory_space<vmem>>, vector<1x2xf32>
    tpu.vector_store %arg5[%c0_44, %c0_45], %896 {strides = array<i32>} : memref<1x2xf32, #tpu.memory_space<vmem>>, vector<1x2xf32>,
    return
  }
}

</mosaic_0001>

<bundles_post_ra>
// kernel: tpu_custom_call.1
= control target key start
LH: loop header
LB: loop body
LE: loop exit
PB: predicated region body
PF: predicated region fallthrough
CT: control target
= control target key end

     0   :  { %10 = vsyncpa [#allocation4], 0  ;;  %s8046_s0 = inlined_call_operand.vmem [shape: f32[2,4,15,15], index: 0, kind: input, shape index: {}]   ;;  %s8047_s1 = inlined_call_operand.vmem [shape: f32[144], index: 1, kind: input, shape index: {}]   ;;  %s8048_s2 = inlined_call_operand.vmem [shape: f32[4], index: 2, kind: input, shape index: {}]   ;;  %s8049_s3 = inlined_call_operand.vmem [shape: f32[2,2,4,11,11], index: 3, kind: input, shape index: {}]   ;;  %s8050_s4 = inlined_call_operand.vmem [shape: f32[1,2], index: 4, kind: input, shape index: {}]   ;;  %s8051_s5 = inlined_call_operand.hbm [shape: f32[1,2], index: 5, kind: output, shape index: {}]  }
   0x1   :  { %11 = vsyncpa [#allocation6], 0 }
   0x2   :  { %12 = vsyncpa [#allocation3], 0  ;;  %s20_s20 = sshll.u32 %s8047_s1, 4  ;;  %s29_s23 = sshll.u32 %s8048_s2, 4  ;;  %s21_s20 = int_to_ptr.vmem [resolvable:$true] %s20_s20  ;;  %s30_s23 = int_to_ptr.vmem [resolvable:$true] %s29_s23 }
   0x3   :  { %s4943_s24 = smov [#allocation2]   ;;  %s4944_s25 = smov [#allocation5]  }
   0x4   :  { %23 = dma.vmem_to_smem %s21_s20, 32, %s4943_s24, [#allocation4]  }
   0x5   :  { %32 = dma.vmem_to_smem %s30_s23, 16, %s4944_s25, [#allocation6]  }
   0x6   :  { %4937 = dma.done.wait [#allocation4], 32  }
   0x7   :  { %4938 = vsyncadd [#allocation4], 4294967264 }
   0x8   :  { %4939 = dma.done.wait [#allocation6], 16  }
   0x9   :  { %4940 = vsyncadd [#allocation6], 4294967280 }
   0xa   :  { %45 = sfence }
   0xb   :  { %s4670_s26 = sld [smem:[#allocation2 + $0x1]]  ;;  %v4987_v0 = vld [vmem:[%s8046_s0 + $0x40] sm:$0xff]  ;;  %s4945_s6 = smov 127   ;;  %v5002_v7 = vld [vmem:[%s8046_s0 + $0x48] sm:$0x7f]  ;;  %vm169_vm0 = vcmask 1046528  }
   0xc   :  { %s4671_s27 = sld [smem:[#allocation2 + $0x2]]  ;;  %v4992_v1 = vld [vmem:[%s8046_s0] sm:$0xff]  ;;  %v5007_v8 = vld [vmem:[%s8046_s0 + $0x8] sm:$0x7f]  ;;  %s4946_s11 = smov 126   ;;  %vm258_vm1 = vcmask 1045504  }
   0xd   :  { %s4673_s2 = sld [smem:[#allocation2 + $0x4]]  ;;  %v5062_v58 = vld [vmem:[%s8046_s0 + $0x18] sm:$0x7f]  ;;  %v5067_v60 = vld [vmem:[%s8046_s0 + $0x10] sm:$0xff]  ;;  %vm1195_vm2 = vcmask 83968   ;;  %vm1193_vm3 = vcmask 89088  }
   0xe   :  { %s4674_s12 = sld [smem:[#allocation2 + $0x5]]  ;;  %v5075_v63 = vld [vmem:[%s8046_s0 + $0x50] sm:$0xff]  ;;  %vm4638_vm6 = vcmask 8192  }
   0xf   :  { %s4676_s13 = sld [smem:[#allocation2 + $0x7]] }
  0x10   :  { %s4677_s14 = sld [smem:[#allocation2 + $0x8]] }
  0x11   :  { %v108_v2 = vstv %s4670_s26  ;;  %s4679_s15 = sld [smem:[#allocation2 + $0xa]] }
  0x12   :  { %v111_v3 = vmul.f32 %v108_v2, %v4987_v0  ;;  %v109_v4 = vmul.f32 %v108_v2, %v4992_v1  ;;  %v134_v5 = vstv %s4671_s27  ;;  %v112_v9 = vmul.f32 %v108_v2, %v5002_v7  ;;  %s4680_s20 = sld [smem:[#allocation2 + $0xb]] }
  0x13   :  { %v135_v6 = vmul.f32 %v134_v5, %v4992_v1  ;;  %v110_v10 = vmul.f32 %v108_v2, %v5007_v8  ;;  %v136_v11 = vmul.f32 %v134_v5, %v5007_v8  ;;  %v185_v12 = vstv %s4673_s2  ;;  %s4682_s23 = sld [smem:[#allocation2 + $0xd]] }
  0x14   :  { %121 = vrot.lane.b32.xlu1 %v111_v3, %s4945_s6  ;;  %117 = vrot.lane.b32.xlu0 %v109_v4, %s4945_s6  ;;  %v186_v13 = vmul.f32 %v185_v12, %v4992_v1  ;;  %v187_v14 = vmul.f32 %v185_v12, %v5007_v8  ;;  %v138_v16 = vmul.f32 %v134_v5, %v5002_v7  ;;  %v217_v24 = vstv %s4674_s12  ;;  %v5083_v4 = vld [vmem:[%s8046_s0 + $0x58] sm:$0x7f]  ;;  %s4683_s26 = sld [smem:[#allocation2 + $0xe]] }
  0x15   :  { %143 = vrot.lane.b32.xlu2 %v135_v6, %s4946_s11  ;;  %v137_v17 = vmul.f32 %v134_v5, %v4987_v0  ;;  %v188_v18 = vmul.f32 %v185_v12, %v4987_v0  ;;  %v189_v19 = vmul.f32 %v185_v12, %v5002_v7  ;;  %v219_v26 = vmul.f32 %v217_v24, %v5007_v8  ;;  %s4685_s27 = sld [smem:[#allocation2 + $0x10]] }
  0x16   :  { %v194_v15 = vrot.slane %v186_v13, 1  ;;  %v195_v20 = vrot.slane %v187_v14, 1  ;;  %v218_v27 = vmul.f32 %v217_v24, %v4992_v1  ;;  %v220_v28 = vmul.f32 %v217_v24, %v4987_v0  ;;  %s4686_s28 = sld [smem:[#allocation2 + $0x11]] }
  0x17   :  { %v197_v22 = vrot.slane %v188_v18, 1  ;;  %v198_v23 = vrot.slane %v189_v19, 1  ;;  %v227_v29 = vrot.slane %v219_v26, 1  ;;  %v221_v31 = vmul.f32 %v217_v24, %v5002_v7  ;;  %s4688_s29 = sld [smem:[#allocation2 + $0x13]] }
  0x18   :  { %v196_v21 = vsel %vm169_vm0, %v194_v15, %v195_v20  ;;  %v226_v30 = vrot.slane %v218_v27, 1  ;;  %v274_v32 = vstv %s4676_s13  ;;  %v229_v33 = vrot.slane %v220_v28, 1  ;;  %s4689_s8 = sld [smem:[#allocation2 + $0x14]] }
  0x19   :  { %v199_v25 = vsel %vm169_vm0, %v197_v22, %v198_v23  ;;  %v275_v35 = vmul.f32 %v274_v32, %v4992_v1  ;;  %v276_v36 = vmul.f32 %v274_v32, %v5007_v8  ;;  %v230_v37 = vrot.slane %v221_v31, 1  ;;  %s4691_s12 = sld [smem:[#allocation2 + $0x16]] }
  0x1a   :  { %v228_v34 = vsel %vm169_vm0, %v226_v30, %v227_v29  ;;  %v278_v42 = vmul.f32 %v274_v32, %v5002_v7  ;;  %v277_v43 = vmul.f32 %v274_v32, %v4987_v0  ;;  %v306_v44 = vstv %s4677_s14  ;;  %s4694_s16 = sld [smem:[#allocation2 + $0x19]] }
  0x1b   :  { %v231_v38 = vsel %vm169_vm0, %v229_v33, %v230_v37  ;;  %v283_v39 = vrot.slane %v275_v35, 2  ;;  %v284_v40 = vrot.slane %v276_v36, 2  ;;  %v307_v45 = vmul.f32 %v306_v44, %v4992_v1  ;;  %s4695_s17 = sld [smem:[#allocation2 + $0x1a]] }
  0x1c   :  { %123 = vrot.lane.b32.xlu1 %v112_v9, %s4945_s6  ;;  %119 = vrot.lane.b32.xlu0 %v110_v10, %s4945_s6  ;;  %v287_v46 = vrot.slane %v278_v42, 2  ;;  %v286_v47 = vrot.slane %v277_v43, 2  ;;  %v308_v48 = vmul.f32 %v306_v44, %v5007_v8  ;;  %v309_v51 = vmul.f32 %v306_v44, %v4987_v0  ;;  %s4697_s18 = sld [smem:[#allocation2 + $0x1c]] }
  0x1d   :  { %145 = vrot.lane.b32.xlu2 %v136_v11, %s4946_s11  ;;  %v285_v41 = vsel %vm258_vm1, %v283_v39, %v284_v40  ;;  %v315_v49 = vrot.slane %v307_v45, 2  ;;  %v310_v52 = vmul.f32 %v306_v44, %v5002_v7  ;;  %v348_v59 = vstv %s4679_s15  ;;  %s4692_s15 = sld [smem:[#allocation2 + $0x17]] }
  0x1e   :  { %v288_v50 = vsel %vm258_vm1, %v286_v47, %v287_v46  ;;  %v316_v53 = vrot.slane %v308_v48, 2  ;;  %v318_v55 = vrot.slane %v309_v51, 2  ;;  %v350_v61 = vmul.f32 %v5062_v58, %v348_v59  ;;  %s4703_s1 = sld [smem:[#allocation2 + $0x22]] }
  0x1f   :  { %v319_v56 = vrot.slane %v310_v52, 2  ;;  %v349_v62 = vmul.f32 %v5067_v60, %v348_v59  ;;  %v351_v2 = vmul.f32 %v5075_v63, %v348_v59  ;;  %v374_v3 = vstv %s4680_s20  ;;  %s4704_s30 = sld [smem:[#allocation2 + $0x23]] }
  0x20   :  { %v317_v54 = vsel %vm258_vm1, %v315_v49, %v316_v53  ;;  %v375_v5 = vmul.f32 %v5067_v60, %v374_v3  ;;  %v352_v6 = vmul.f32 %v5083_v4, %v348_v59  ;;  %v424_v9 = vstv %s4682_s23  ;;  %s4698_s23 = sld [smem:[#allocation2 + $0x1d]] }
  0x21   :  { %v320_v57 = vsel %vm258_vm1, %v318_v55, %v319_v56  ;;  %v376_v10 = vmul.f32 %v5062_v58, %v374_v3  ;;  %v425_v11 = vmul.f32 %v5067_v60, %v424_v9  ;;  %v426_v12 = vmul.f32 %v5062_v58, %v424_v9  ;;  %s97_s2 = sld [smem:[#allocation2]] }
  0x22   :  { %v378_v14 = vmul.f32 %v5083_v4, %v374_v3  ;;  %v377_v15 = vmul.f32 %v5075_v63, %v374_v3  ;;  %v456_v22 = vstv %s4683_s26  ;;  %v512_v30 = vstv %s4685_s27  ;;  %v5150_v3 = vld [vmem:[%s8046_s0 + $0x28] sm:$0x7f]  ;;  %s4700_s26 = sld [smem:[#allocation2 + $0x1f]] }
  0x23   :  { %v433_v13 = vrot.slane %v425_v11, 1  ;;  %v434_v18 = vrot.slane %v426_v12, 1  ;;  %v458_v24 = vmul.f32 %v5062_v58, %v456_v22  ;;  %v459_v26 = vmul.f32 %v5075_v63, %v456_v22  ;;  %8106 = vst [vmem:[#allocation11_spill] sm:$0xff] %v5150_v3  ;;  %s4672_s7 = sld [smem:[#allocation2 + $0x3]] }
  0x24   :  { %149 = vrot.lane.b32.xlu1 %v138_v16, %s4946_s11  ;;  %147 = vrot.lane.b32.xlu0 %v137_v17, %s4946_s11  ;;  %v427_v16 = vmul.f32 %v5075_v63, %v424_v9  ;;  %v428_v17 = vmul.f32 %v5083_v4, %v424_v9  ;;  %v514_v35 = vmul.f32 %v5062_v58, %v512_v30  ;;  %v544_v44 = vstv %s4686_s28  ;;  %s4678_s9 = sld [smem:[#allocation2 + $0x9]] }
  0x25   :  { %200 = vrot.lane.b32.xlu2 %v196_v21, %s4945_s6  ;;  %v435_v19 = vsel %vm169_vm0, %v433_v13, %v434_v18  ;;  %v466_v27 = vrot.slane %v458_v24, 1  ;;  %v468_v31 = vrot.slane %v459_v26, 1  ;;  %v516_v42 = vmul.f32 %v5083_v4, %v512_v30  ;;  %s4681_s10 = sld [smem:[#allocation2 + $0xc]] }
  0x26   :  { %v437_v21 = vrot.slane %v428_v17, 1  ;;  %v522_v39 = vrot.slane %v514_v35, 2  ;;  %v515_v43 = vmul.f32 %v5075_v63, %v512_v30  ;;  %v545_v45 = vmul.f32 %v5067_v60, %v544_v44  ;;  %v5177_v17 = vld [vmem:[%s8046_s0 + $0x68] sm:$0x7f]  ;;  %s4687_s13 = sld [smem:[#allocation2 + $0x12]] }
  0x27   :  { %v546_v48 = vmul.f32 %v5062_v58, %v544_v44  ;;  %v547_v52 = vmul.f32 %v5075_v63, %v544_v44  ;;  %8109 = vst [vmem:[#allocation14_spill] sm:$0xff] %v5177_v17  ;;  %s4690_s14 = sld [smem:[#allocation2 + $0x15]] }
  0x28   :  { %v524_v47 = vrot.slane %v515_v43, 2  ;;  %v553_v49 = vrot.slane %v545_v45, 2  ;;  %v694_v43 = vstv %s4692_s15  ;;  %s4693_s15 = sld [smem:[#allocation2 + $0x18]] }
  0x29   :  { %s1051_s19 = sld [smem:[#allocation5]] }
  0x2a   :  { %s4706_s20 = sld [smem:[#allocation2 + $0x25]] }
  0x2b   :  { %s4710_s22 = sld [smem:[#allocation2 + $0x29]] }
  0x2c   :  { %204 = vrot.lane.b32.xlu1 %v199_v25, %s4945_s6  ;;  %202 = vrot.lane.b32.xlu0 %v195_v20, %s4945_s6  ;;  %v436_v20 = vrot.slane %v427_v16, 1  ;;  %v457_v25 = vmul.f32 %v5067_v60, %v456_v22  ;;  %v612_v16 = vstv %s4689_s8  ;;  %s4675_s8 = sld [smem:[#allocation2 + $0x6]] }
  0x2d   :  { %206 = vrot.lane.b32.xlu2 %v198_v23, %s4945_s6  ;;  %v614_v24 = vmul.f32 %v5150_v3, %v612_v16  ;;  %s4713_s24 = sld [smem:[#allocation2 + $0x2c]] }
  0x2e   :  { %v438_v23 = vsel %vm169_vm0, %v436_v20, %v437_v21  ;;  %v465_v28 = vrot.slane %v457_v25, 1  ;;  %s4715_s25 = sld [smem:[#allocation2 + $0x2e]] }
  0x2f   :  { %s4731_s27 = sld [smem:[#allocation2 + $0x3e]] }
  0x30   :  { %v467_v33 = vsel %vm169_vm0, %v465_v28, %v466_v27  ;;  %s4733_s28 = sld [smem:[#allocation2 + $0x40]] }
  0x31   :  { %s4756_s21 = sld [smem:[#allocation2 + $0x56]] }
  0x34   :  { %234 = vrot.lane.b32.xlu1 %v227_v29, %s4946_s11  ;;  %232 = vrot.lane.b32.xlu0 %v228_v34, %s4946_s11  ;;  %v460_v29 = vmul.f32 %v5083_v4, %v456_v22  ;;  %v513_v34 = vmul.f32 %v5067_v60, %v512_v30  ;;  %v616_v30 = vmul.f32 %v5177_v17, %v612_v16 }
  0x35   :  { %236 = vrot.lane.b32.xlu2 %v231_v38, %s4946_s11 }
  0x36   :  { %v469_v36 = vrot.slane %v460_v29, 1  ;;  %v521_v38 = vrot.slane %v513_v34, 2 }
  0x3c   :  { %289 = vrot.lane.b32.xlu1 %v285_v41, %s4945_s6  ;;  %238 = vrot.lane.b32.xlu0 %v230_v37, %s4946_s11  ;;  %v470_v37 = vsel %vm169_vm0, %v468_v31, %v469_v36  ;;  %v523_v41 = vsel %vm258_vm1, %v521_v38, %v522_v39 }
  0x3d   :  { %291 = vrot.lane.b32.xlu2 %v284_v40, %s4945_s6 }
  0x44   :  { %295 = vrot.lane.b32.xlu1 %v287_v46, %s4945_s6  ;;  %293 = vrot.lane.b32.xlu0 %v288_v50, %s4945_s6  ;;  %v525_v46 = vrot.slane %v516_v42, 2 }
  0x45   :  { %321 = vrot.lane.b32.xlu2 %v317_v54, %s4946_s11  ;;  %v554_v54 = vrot.slane %v546_v48, 2 }
  0x46   :  { %v526_v51 = vsel %vm258_vm1, %v524_v47, %v525_v46 }
  0x47   :  { %v555_v55 = vsel %vm258_vm1, %v553_v49, %v554_v54 }
  0x4c   :  { %325 = vrot.lane.b32.xlu1 %v320_v57, %s4946_s11  ;;  %323 = vrot.lane.b32.xlu0 %v316_v53, %s4946_s11  ;;  %v548_v53 = vmul.f32 %v5083_v4, %v544_v44 }
  0x4d   :  { %327 = vrot.lane.b32.xlu2 %v319_v56, %s4946_s11  ;;  %v556_v56 = vrot.slane %v547_v52, 2  ;;  %v698_v52 = vmul.f32 %v5177_v17, %v694_v43 }
  0x4e   :  { %v557_v57 = vrot.slane %v548_v53, 2 }
  0x54   :  { %359 = vrot.lane.b32.xlu1 %v350_v61, %s4945_s6  ;;  %357 = vrot.lane.b32.xlu0 %v349_v62, %s4945_s6 }
  0x55   :  { %361 = vrot.lane.b32.xlu2 %v351_v2, %s4945_s6  ;;  %v558_v2 = vsel %vm258_vm1, %v556_v56, %v557_v57 }
  0x5c   :  { %383 = vrot.lane.b32.xlu1 %v375_v5, %s4946_s11  ;;  %363 = vrot.lane.b32.xlu0 %v352_v6, %s4945_s6  ;;  %v586_v5 = vstv %s4688_s29  ;;  %v5155_v6 = vld [vmem:[%s8046_s0 + $0x20] sm:$0xff]  ;;  %s4701_s29 = sld [smem:[#allocation2 + $0x20]] }
  0x5d   :  { %385 = vrot.lane.b32.xlu2 %v376_v10, %s4946_s11  ;;  %8107 = vst [vmem:[#allocation12_spill] sm:$0xff] %v5155_v6  ;;  %v588_v11 = vmul.f32 %v5150_v3, %v586_v5  ;;  %v587_v12 = vmul.f32 %v5155_v6, %v586_v5  ;;  %v613_v20 = vmul.f32 %v5155_v6, %v612_v16 }
  0x5e   :  { %v695_v47 = vmul.f32 %v5155_v6, %v694_v43 }
  0x64   :  { %389 = vrot.lane.b32.xlu1 %v378_v14, %s4946_s11  ;;  %387 = vrot.lane.b32.xlu0 %v377_v15, %s4946_s11  ;;  %v5169_v14 = vld [vmem:[%s8046_s0 + $0x60] sm:$0xff] }
  0x65   :  { %439 = vrot.lane.b32.xlu2 %v435_v19, %s4945_s6  ;;  %8108 = vst [vmem:[#allocation13_spill] sm:$0xff] %v5169_v14  ;;  %v589_v15 = vmul.f32 %v5169_v14, %v586_v5  ;;  %v615_v31 = vmul.f32 %v5169_v14, %v612_v16  ;;  %v697_v48 = vmul.f32 %v5169_v14, %v694_v43 }
  0x67   :  { %v706_v56 = vrot.slane %v697_v48, 1 }
  0x6c   :  { %443 = vrot.lane.b32.xlu1 %v438_v23, %s4945_s6  ;;  %441 = vrot.lane.b32.xlu0 %v434_v18, %s4945_s6  ;;  %v662_v23 = vstv %s4691_s12  ;;  %s4684_s12 = sld [smem:[#allocation2 + $0xf]] }
  0x6d   :  { %445 = vrot.lane.b32.xlu2 %v437_v21, %s4945_s6  ;;  %v590_v21 = vmul.f32 %v5177_v17, %v586_v5  ;;  %v663_v25 = vmul.f32 %v5155_v6, %v662_v23  ;;  %v664_v26 = vmul.f32 %v5150_v3, %v662_v23  ;;  %v665_v34 = vmul.f32 %v5169_v14, %v662_v23 }
  0x6e   :  { %v666_v35 = vmul.f32 %v5177_v17, %v662_v23 }
  0x6f   :  { %v5110_v32 = vpop.permute.xlu2 %143  ;;  %v671_v29 = vrot.slane %v663_v25, 1  ;;  %v674_v38 = vrot.slane %v665_v34, 1 }
  0x74   :  { %473 = vrot.lane.b32.xlu1 %v466_v27, %s4946_s11  ;;  %471 = vrot.lane.b32.xlu0 %v467_v33, %s4946_s11 }
  0x75   :  { %475 = vrot.lane.b32.xlu2 %v470_v37, %s4946_s11 }
  0x77   :  { %v5119_v40 = vpop.permute.xlu2 %145 }
  0x7c   :  { %527 = vrot.lane.b32.xlu1 %v523_v41, %s4945_s6  ;;  %477 = vrot.lane.b32.xlu0 %v469_v36, %s4946_s11  ;;  %v672_v36 = vrot.slane %v664_v26, 1 }
  0x7d   :  { %529 = vrot.lane.b32.xlu2 %v522_v39, %s4945_s6  ;;  %v675_v39 = vrot.slane %v666_v35, 1 }
  0x7e   :  { %v673_v37 = vsel %vm169_vm0, %v671_v29, %v672_v36 }
  0x7f   :  { %v5129_v50 = vpop.permute.xlu2 %200  ;;  %v676_v45 = vsel %vm169_vm0, %v674_v38, %v675_v39 }
  0x84   :  { %533 = vrot.lane.b32.xlu1 %v525_v46, %s4945_s6  ;;  %531 = vrot.lane.b32.xlu0 %v526_v51, %s4945_s6  ;;  %v696_v46 = vmul.f32 %v5150_v3, %v694_v43  ;;  %v703_v51 = vrot.slane %v695_v47, 1 }
  0x85   :  { %559 = vrot.lane.b32.xlu2 %v555_v55, %s4946_s11  ;;  %v750_v55 = vstv %s4694_s16  ;;  %s4696_s16 = sld [smem:[#allocation2 + $0x1b]] }
  0x86   :  { %v5137_v59 = vpop.permute.xlu1 %121  ;;  %v5139_v61 = vpop.permute.xlu0 %117  ;;  %v704_v49 = vrot.slane %v696_v46, 1  ;;  %v751_v5 = vmul.f32 %v5155_v6, %v750_v55  ;;  %v754_v26 = vmul.f32 %v5177_v17, %v750_v55  ;;  %v753_v29 = vmul.f32 %v5169_v14, %v750_v55 }
  0x87   :  { %v5142_v62 = vpop.permute.xlu2 %206 }
  0x88   :  { %v759_v16 = vrot.slane %v751_v5, 2  ;;  %v763_v34 = vrot.slane %v754_v26, 2  ;;  %v762_v35 = vrot.slane %v753_v29, 2 }
  0x8c   :  { %563 = vrot.lane.b32.xlu1 %v558_v2, %s4946_s11  ;;  %561 = vrot.lane.b32.xlu0 %v554_v54, %s4946_s11  ;;  %v705_v2 = vsel %vm169_vm0, %v703_v51, %v704_v49 }
  0x8d   :  { %565 = vrot.lane.b32.xlu2 %v557_v57, %s4946_s11 }
  0x8e   :  { %v5157_v9 = vpop.permute.xlu1 %123  ;;  %v5159_v10 = vpop.permute.xlu0 %119 }
  0x8f   :  { %v5164_v13 = vpop.permute.xlu2 %236 }
  0x94   :  { %597 = vrot.lane.b32.xlu1 %v588_v11, %s4945_s6  ;;  %595 = vrot.lane.b32.xlu0 %v587_v12, %s4945_s6  ;;  %v752_v11 = vmul.f32 %v5150_v3, %v750_v55  ;;  %v707_v12 = vrot.slane %v698_v52, 1 }
  0x95   :  { %599 = vrot.lane.b32.xlu2 %v589_v15, %s4945_s6 }
  0x96   :  { %v5179_v18 = vpop.permute.xlu1 %149  ;;  %v5181_v19 = vpop.permute.xlu0 %147  ;;  %v708_v15 = vsel %vm169_vm0, %v706_v56, %v707_v12 }
  0x97   :  { %v5186_v22 = vpop.permute.xlu2 %291 }
  0x9c   :  { %621 = vrot.lane.b32.xlu1 %v613_v20, %s4946_s11  ;;  %601 = vrot.lane.b32.xlu0 %v590_v21, %s4945_s6  ;;  %v760_v20 = vrot.slane %v752_v11, 2  ;;  %v5274_v11 = vld [vmem:[%s8046_s0 + $0x38] sm:$0x7f] }
  0x9d   :  { %623 = vrot.lane.b32.xlu2 %v614_v24, %s4946_s11  ;;  %8110 = vst [vmem:[#allocation15_spill] sm:$0xff] %v5274_v11 }
  0x9e   :  { %v5193_v27 = vpop.permute.xlu1 %204  ;;  %v5195_v28 = vpop.permute.xlu0 %202  ;;  %v761_v25 = vsel %vm258_vm1, %v759_v16, %v760_v20 }
  0x9f   :  { %v5200_v33 = vpop.permute.xlu2 %321 }
  0xa4   :  { %627 = vrot.lane.b32.xlu1 %v616_v30, %s4946_s11  ;;  %625 = vrot.lane.b32.xlu0 %v615_v31, %s4946_s11  ;;  %v782_v30 = vstv %s4695_s17  ;;  %s4699_s17 = sld [smem:[#allocation2 + $0x1e]] }
  0xa5   :  { %677 = vrot.lane.b32.xlu2 %v673_v37, %s4945_s6  ;;  %v783_v31 = vmul.f32 %v5155_v6, %v782_v30  ;;  %v785_v46 = vmul.f32 %v5169_v14, %v782_v30  ;;  %v786_v47 = vmul.f32 %v5177_v17, %v782_v30 }
  0xa6   :  { %v5207_v41 = vpop.permute.xlu1 %234  ;;  %v5209_v42 = vpop.permute.xlu0 %232 }
  0xa7   :  { %v5212_v44 = vpop.permute.xlu2 %327  ;;  %v794_v51 = vrot.slane %v785_v46, 2  ;;  %v795_v52 = vrot.slane %v786_v47, 2 }
  0xa9   :  { %v796_v5 = vsel %vm258_vm1, %v794_v51, %v795_v52 }
  0xac   :  { %681 = vrot.lane.b32.xlu1 %v676_v45, %s4945_s6  ;;  %679 = vrot.lane.b32.xlu0 %v672_v36, %s4945_s6  ;;  %v784_v36 = vmul.f32 %v5150_v3, %v782_v30  ;;  %v764_v45 = vsel %vm258_vm1, %v762_v35, %v763_v34  ;;  %v5293_v30 = vld [vmem:[%s8046_s0 + $0x70] sm:$0xff]  ;;  %v5301_v35 = vld [vmem:[%s8046_s0 + $0x78] sm:$0x7f] }
  0xad   :  { %683 = vrot.lane.b32.xlu2 %v675_v39, %s4945_s6  ;;  %v791_v39 = vrot.slane %v783_v31, 2  ;;  %8113 = vst [vmem:[#allocation18_spill] sm:$0xff] %v5293_v30 }
  0xae   :  { %v5221_v53 = vpop.permute.xlu1 %289  ;;  %v5223_v54 = vpop.permute.xlu0 %238  ;;  %v792_v48 = vrot.slane %v784_v36, 2  ;;  %8114 = vst [vmem:[#allocation19_spill] sm:$0xff] %v5301_v35 }
  0xaf   :  { %v5226_v57 = vpop.permute.xlu2 %361 }
  0xb4   :  { %711 = vrot.lane.b32.xlu1 %v704_v49, %s4946_s11  ;;  %709 = vrot.lane.b32.xlu0 %v705_v2, %s4946_s11  ;;  %v793_v49 = vsel %vm258_vm1, %v791_v39, %v792_v48 }
  0xb5   :  { %713 = vrot.lane.b32.xlu2 %v708_v15, %s4946_s11  ;;  %v5279_v15 = vld [vmem:[%s8046_s0 + $0x30] sm:$0xff] }
  0xb6   :  { %v5234_v21 = vpop.permute.xlu1 %295  ;;  %v5236_v23 = vpop.permute.xlu0 %293  ;;  %8111 = vst [vmem:[#allocation16_spill] sm:$0xff] %v5279_v15 }
  0xb7   :  { %v5239_v24 = vpop.permute.xlu2 %385 }
  0xbc   :  { %765 = vrot.lane.b32.xlu1 %v761_v25, %s4945_s6  ;;  %715 = vrot.lane.b32.xlu0 %v707_v12, %s4946_s11  ;;  %v824_v12 = vstv %s4697_s18  ;;  %s4702_s18 = sld [smem:[#allocation2 + $0x21]] }
  0xbd   :  { %767 = vrot.lane.b32.xlu2 %v760_v20, %s4945_s6  ;;  %v826_v25 = vmul.f32 %v5274_v11, %v824_v12  ;;  %v825_v26 = vmul.f32 %v5279_v15, %v824_v12  ;;  %v827_v31 = vmul.f32 %v5293_v30, %v824_v12  ;;  %v828_v46 = vmul.f32 %v5301_v35, %v824_v12 }
  0xbe   :  { %v5248_v37 = vpop.permute.xlu1 %325  ;;  %v5250_v38 = vpop.permute.xlu0 %323 }
  0xbf   :  { %v5253_v43 = vpop.permute.xlu2 %439 }
  0xc4   :  { %771 = vrot.lane.b32.xlu1 %v763_v34, %s4945_s6  ;;  %769 = vrot.lane.b32.xlu0 %v764_v45, %s4945_s6  ;;  %v850_v34 = vstv %s4698_s23  ;;  %s4712_s23 = sld [smem:[#allocation2 + $0x2b]] }
  0xc5   :  { %797 = vrot.lane.b32.xlu2 %v793_v49, %s4946_s11  ;;  %v851_v45 = vmul.f32 %v5279_v15, %v850_v34  ;;  %v852_v49 = vmul.f32 %v5274_v11, %v850_v34 }
  0xc6   :  { %v5261_v55 = vpop.permute.xlu1 %359  ;;  %v5263_v56 = vpop.permute.xlu0 %357 }
  0xc7   :  { %v5266_v2 = vpop.permute.xlu2 %445 }
  0xcc   :  { %801 = vrot.lane.b32.xlu1 %v796_v5, %s4946_s11  ;;  %799 = vrot.lane.b32.xlu0 %v792_v48, %s4946_s11  ;;  %v900_v48 = vstv %s4700_s26  ;;  %s4716_s26 = sld [smem:[#allocation2 + $0x2f]] }
  0xcd   :  { %803 = vrot.lane.b32.xlu2 %v795_v52, %s4946_s11  ;;  %v901_v51 = vmul.f32 %v5279_v15, %v900_v48  ;;  %v902_v52 = vmul.f32 %v5274_v11, %v900_v48 }
  0xce   :  { %v5281_v16 = vpop.permute.xlu1 %383  ;;  %v5283_v20 = vpop.permute.xlu0 %363 }
  0xcf   :  { %v5288_v29 = vpop.permute.xlu2 %475  ;;  %v909_v12 = vrot.slane %v901_v51, 1 }
  0xd0   :  { %8112 = vst [vmem:[#allocation17_spill] sm:$0xff] %v5288_v29 }
  0xd4   :  { %835 = vrot.lane.b32.xlu1 %v826_v25, %s4945_s6  ;;  %833 = vrot.lane.b32.xlu0 %v825_v26, %s4945_s6  ;;  %v854_v26 = vmul.f32 %v5301_v35, %v850_v34 }
  0xd5   :  { %837 = vrot.lane.b32.xlu2 %v827_v31, %s4945_s6  ;;  %v853_v31 = vmul.f32 %v5293_v30, %v850_v34  ;;  %v932_v34 = vstv %s4701_s29  ;;  %s4707_s29 = sld [smem:[#allocation2 + $0x26]] }
  0xd6   :  { %v5303_v36 = vpop.permute.xlu1 %389  ;;  %v5305_v39 = vpop.permute.xlu0 %387 }
  0xd7   :  { %v5310_v47 = vpop.permute.xlu2 %529 }
  0xd8   :  { %8115 = vst [vmem:[#allocation20_spill] sm:$0xff] %v5310_v47  ;;  %v910_v47 = vrot.slane %v902_v52, 1  ;;  %v934_v52 = vmul.f32 %v5274_v11, %v932_v34 }
  0xda   :  { %v911_v17 = vsel %vm169_vm0, %v909_v12, %v910_v47  ;;  %v933_v12 = vmul.f32 %v5279_v15, %v932_v34 }
  0xdc   :  { %859 = vrot.lane.b32.xlu1 %v851_v45, %s4946_s11  ;;  %839 = vrot.lane.b32.xlu0 %v828_v46, %s4945_s6  ;;  %v903_v45 = vmul.f32 %v5293_v30, %v900_v48  ;;  %v904_v46 = vmul.f32 %v5301_v35, %v900_v48 }
  0xdd   :  { %861 = vrot.lane.b32.xlu2 %v852_v49, %s4946_s11 }
  0xde   :  { %v5317_v5 = vpop.permute.xlu1 %443  ;;  %v5319_v25 = vpop.permute.xlu0 %441  ;;  %v912_v49 = vrot.slane %v903_v45, 1  ;;  %v913_v29 = vrot.slane %v904_v46, 1  ;;  %v941_v45 = vrot.slane %v933_v12, 1  ;;  %v936_v46 = vmul.f32 %v5301_v35, %v932_v34 }
  0xdf   :  { %8116 = vst [vmem:[#allocation21_spill] sm:$0xff] %v5317_v5  ;;  %v5324_v14 = vpop.permute.xlu2 %559 }
  0xe0   :  { %8117 = vst [vmem:[#allocation22_spill] sm:$0xff] %v5319_v25  ;;  %v914_v48 = vsel %vm169_vm0, %v912_v49, %v913_v29 }
  0xe1   :  { %8118 = vst [vmem:[#allocation23_spill] sm:$0xff] %v5324_v14 }
  0xe4   :  { %865 = vrot.lane.b32.xlu1 %v854_v26, %s4946_s11  ;;  %863 = vrot.lane.b32.xlu0 %v853_v31, %s4946_s11  ;;  %v935_v26 = vmul.f32 %v5293_v30, %v932_v34  ;;  %v942_v31 = vrot.slane %v934_v52, 1  ;;  %v945_v52 = vrot.slane %v936_v46, 1 }
  0xe5   :  { %915 = vrot.lane.b32.xlu2 %v911_v17, %s4945_s6 }
  0xe6   :  { %v5331_v51 = vpop.permute.xlu1 %473  ;;  %v5333_v3 = vpop.permute.xlu0 %471  ;;  %v944_v49 = vrot.slane %v935_v26, 1  ;;  %v943_v5 = vsel %vm169_vm0, %v941_v45, %v942_v31 }
  0xe7   :  { %8119 = vst [vmem:[#allocation24_spill] sm:$0xff] %v5331_v51  ;;  %v5336_v14 = vpop.permute.xlu2 %565 }
  0xe8   :  { %8120 = vst [vmem:[#allocation25_spill] sm:$0xff] %v5336_v14  ;;  %v988_v14 = vstv %s4703_s1  ;;  %v946_v34 = vsel %vm169_vm0, %v944_v49, %v945_v52  ;;  %s4709_s1 = sld [smem:[#allocation2 + $0x28]] }
  0xe9   :  { %v992_v49 = vmul.f32 %v5301_v35, %v988_v14 }
  0xec   :  { %919 = vrot.lane.b32.xlu1 %v914_v48, %s4945_s6  ;;  %917 = vrot.lane.b32.xlu0 %v910_v47, %s4945_s6  ;;  %v989_v48 = vmul.f32 %v5279_v15, %v988_v14  ;;  %v990_v47 = vmul.f32 %v5274_v11, %v988_v14 }
  0xed   :  { %921 = vrot.lane.b32.xlu2 %v913_v29, %s4945_s6 }
  0xee   :  { %v5345_v17 = vpop.permute.xlu1 %527  ;;  %v5347_v51 = vpop.permute.xlu0 %477  ;;  %v997_v12 = vrot.slane %v989_v48, 2  ;;  %v998_v6 = vrot.slane %v990_v47, 2  ;;  %v1001_v48 = vrot.slane %v992_v49, 2 }
  0xef   :  { %8121 = vst [vmem:[#allocation26_spill] sm:$0xff] %v5347_v51  ;;  %v5350_v25 = vpop.permute.xlu2 %599 }
  0xf0   :  { %8122 = vst [vmem:[#allocation27_spill] sm:$0xff] %v5350_v25  ;;  %v999_v46 = vsel %vm258_vm1, %v997_v12, %v998_v6  ;;  %v1020_v25 = vstv %s4704_s30  ;;  %s4729_s30 = sld [smem:[#allocation2 + $0x3c]] }
  0xf4   :  { %949 = vrot.lane.b32.xlu1 %v942_v31, %s4946_s11  ;;  %947 = vrot.lane.b32.xlu0 %v943_v5, %s4946_s11  ;;  %v991_v31 = vmul.f32 %v5293_v30, %v988_v14  ;;  %v1021_v5 = vmul.f32 %v5279_v15, %v1020_v25  ;;  %v160_v14 = vstv %s4672_s7  ;;  %s4735_s7 = sld [smem:[#allocation2 + $0x42]] }
  0xf5   :  { %951 = vrot.lane.b32.xlu2 %v946_v34, %s4946_s11  ;;  %v1022_v34 = vmul.f32 %v5274_v11, %v1020_v25 }
  0xf6   :  { %v5358_v29 = vpop.permute.xlu1 %533  ;;  %v5360_v26 = vpop.permute.xlu0 %531  ;;  %v1000_v47 = vrot.slane %v991_v31, 2  ;;  %v1029_v12 = vrot.slane %v1021_v5, 2 }
  0xf7   :  { %8123 = vst [vmem:[#allocation28_spill] sm:$0xff] %v5358_v29  ;;  %v5363_v45 = vpop.permute.xlu2 %623  ;;  %v98_v29 = vstv %s97_s2  ;;  %v1030_v49 = vrot.slane %v1022_v34, 2  ;;  %s4736_s2 = sld [smem:[#allocation2 + $0x43]] }
  0xf8   :  { %8124 = vst [vmem:[#allocation29_spill] sm:$0xff] %v5360_v26  ;;  %v1002_v15 = vsel %vm258_vm1, %v1000_v47, %v1001_v48  ;;  %v99_v31 = vmul.f32 %v98_v29, %v4992_v1 }
  0xf9   :  { %8125 = vst [vmem:[#allocation30_spill] sm:$0xff] %v5363_v45  ;;  %v1031_v11 = vsel %vm258_vm1, %v1029_v12, %v1030_v49 }
  0xfc   :  { %1003 = vrot.lane.b32.xlu1 %v999_v46, %s4945_s6  ;;  %953 = vrot.lane.b32.xlu0 %v945_v52, %s4946_s11  ;;  %v1023_v46 = vmul.f32 %v5293_v30, %v1020_v25  ;;  %v1024_v52 = vmul.f32 %v5301_v35, %v1020_v25  ;;  %v129_v25 = vadd.f32 %v5139_v61, %v99_v31 }
  0xfd   :  { %1005 = vrot.lane.b32.xlu2 %v998_v6, %s4945_s6  ;;  %v162_v6 = vmul.f32 %v160_v14, %v5007_v8 }
  0xfe   :  { %v5372_v26 = vpop.permute.xlu1 %563  ;;  %v5374_v45 = vpop.permute.xlu0 %561  ;;  %v1032_v5 = vrot.slane %v1023_v46, 2  ;;  %v1033_v47 = vrot.slane %v1024_v52, 2  ;;  %v249_v52 = vstv %s4675_s8  ;;  %s4738_s8 = sld [smem:[#allocation2 + $0x45]] }
  0xff   :  { %8126 = vst [vmem:[#allocation31_spill] sm:$0xff] %v5372_v26  ;;  %v5377_v51 = vpop.permute.xlu2 %677  ;;  %v171_v12 = vrot.slane %v162_v6, 1  ;;  %v250_v61 = vmul.f32 %v249_v52, %v4992_v1 }
 0x100   :  { %8127 = vst [vmem:[#allocation32_spill] sm:$0xff] %v5374_v45  ;;  %v161_v45 = vmul.f32 %v160_v14, %v4992_v1  ;;  %v1034_v26 = vsel %vm258_vm1, %v1032_v5, %v1033_v47  ;;  %v101_v1 = vmul.f32 %v98_v29, %v4987_v0 }
 0x101   :  { %8128 = vst [vmem:[#allocation33_spill] sm:$0xff] %v5377_v51 }
 0x102   :  { %v170_v34 = vrot.slane %v161_v45, 1 }
 0x104   :  { %1009 = vrot.lane.b32.xlu1 %v1001_v48, %s4945_s6  ;;  %1007 = vrot.lane.b32.xlu0 %v1002_v15, %s4945_s6  ;;  %v155_v48 = vadd.f32 %v5110_v32, %v129_v25  ;;  %v102_v15 = vmul.f32 %v98_v29, %v5002_v7  ;;  %v172_v46 = vsel %vm169_vm0, %v170_v34, %v171_v12 }
 0x105   :  { %1035 = vrot.lane.b32.xlu2 %v1031_v11, %s4946_s11  ;;  %v251_v11 = vmul.f32 %v249_v52, %v5007_v8  ;;  %v163_v25 = vmul.f32 %v160_v14, %v4987_v0 }
 0x106   :  { %v5388_v51 = vpop.permute.xlu1 %597  ;;  %v5390_v30 = vpop.permute.xlu0 %595  ;;  %v180_v32 = vadd.f32 %v172_v46, %v155_v48  ;;  %v132_v6 = vadd.f32 %v5157_v9, %v102_v15 }
 0x107   :  { %8129 = vst [vmem:[#allocation34_spill] sm:$0xff] %v5388_v51  ;;  %v5394_v35 = vpop.permute.xlu2 %683  ;;  %v260_v34 = vrot.slane %v251_v11, 2  ;;  %v173_v15 = vrot.slane %v163_v25, 1  ;;  %v131_v11 = vadd.f32 %v5137_v59, %v101_v1  ;;  %v252_v59 = vmul.f32 %v249_v52, %v4987_v0 }
 0x108   :  { %8130 = vst [vmem:[#allocation35_spill] sm:$0xff] %v5394_v35  ;;  %v259_v35 = vrot.slane %v250_v61, 2  ;;  %v212_v51 = vadd.f32 %v5129_v50, %v180_v32 }
 0x10a   :  { %v244_v48 = vadd.f32 %v5209_v42, %v212_v51  ;;  %v253_v51 = vmul.f32 %v249_v52, %v5002_v7 }
 0x10c   :  { %1039 = vrot.lane.b32.xlu1 %v1034_v26, %s4946_s11  ;;  %1037 = vrot.lane.b32.xlu0 %v1030_v49, %s4946_s11  ;;  %v100_v26 = vmul.f32 %v98_v29, %v5007_v8  ;;  %v164_v49 = vmul.f32 %v160_v14, %v5002_v7  ;;  %v261_v8 = vsel %vm258_vm1, %v259_v35, %v260_v34  ;;  %v263_v25 = vrot.slane %v253_v51, 2 }
 0x10d   :  { %1041 = vrot.lane.b32.xlu2 %v1033_v47, %s4946_s11  ;;  %v269_v61 = vadd.f32 %v261_v8, %v244_v48 }
 0x10e   :  { %v5404_v45 = vpop.permute.xlu1 %621  ;;  %v5406_v31 = vpop.permute.xlu0 %601  ;;  %v130_v47 = vadd.f32 %v5159_v10, %v100_v26  ;;  %v174_v9 = vrot.slane %v164_v49, 1  ;;  %v157_v10 = vadd.f32 %v5181_v19, %v131_v11 }
 0x10f   :  { %8131 = vst [vmem:[#allocation36_spill] sm:$0xff] %v5406_v31  ;;  %v5410_v5 = vpop.permute.xlu2 %713  ;;  %v158_v31 = vadd.f32 %v5179_v18, %v132_v6  ;;  %v301_v32 = vadd.f32 %v5221_v53, %v269_v61  ;;  %v338_v6 = vstv %s4678_s9  ;;  %s4741_s9 = sld [smem:[#allocation5 + $0x1]] }
 0x110   :  { %v156_v18 = vadd.f32 %v5119_v40, %v130_v47  ;;  %v175_v42 = vsel %vm169_vm0, %v173_v15, %v174_v9  ;;  %v339_v40 = vmul.f32 %v5067_v60, %v338_v6  ;;  %v400_v47 = vstv %s4681_s10  ;;  %s4719_s10 = sld [smem:[#allocation2 + $0x32]] }
 0x111   :  { %v183_v29 = vadd.f32 %v174_v9, %v158_v31  ;;  %v182_v31 = vadd.f32 %v175_v42, %v157_v10  ;;  %v333_v53 = vadd.f32 %v5200_v33, %v301_v32  ;;  %v262_v9 = vrot.slane %v252_v59, 2 }
 0x112   :  { %v181_v26 = vadd.f32 %v171_v12, %v156_v18  ;;  %v401_v0 = vmul.f32 %v5067_v60, %v400_v47  ;;  %v402_v48 = vmul.f32 %v5062_v58, %v400_v47  ;;  %v341_v32 = vmul.f32 %v5075_v63, %v338_v6 }
 0x113   :  { %v215_v35 = vadd.f32 %v5142_v62, %v183_v29  ;;  %v214_v7 = vadd.f32 %v5193_v27, %v182_v31  ;;  %v343_v8 = vadd.f32 %v339_v40, %v333_v53  ;;  %v488_v59 = vstv %s4684_s12  ;;  %s4721_s12 = sld [smem:[#allocation2 + $0x34]] }
 0x114   :  { %v213_v62 = vadd.f32 %v5195_v28, %v181_v26  ;;  %v264_v28 = vsel %vm258_vm1, %v262_v9, %v263_v25  ;;  %v409_v33 = vrot.slane %v401_v0, 1  ;;  %v410_v18 = vrot.slane %v402_v48, 1 }
 0x115   :  { %v247_v49 = vadd.f32 %v5223_v54, %v215_v35  ;;  %v246_v15 = vadd.f32 %v5164_v13, %v214_v7  ;;  %v369_v29 = vadd.f32 %v5263_v56, %v343_v8  ;;  %v342_v13 = vmul.f32 %v5083_v4, %v338_v6 }
 0x116   :  { %v5421_v46 = vpop.permute.xlu1 %627  ;;  %v5423_v14 = vpop.permute.xlu0 %625  ;;  %v245_v54 = vadd.f32 %v5207_v41, %v213_v62  ;;  %v340_v31 = vmul.f32 %v5062_v58, %v338_v6  ;;  %v404_v26 = vmul.f32 %v5083_v4, %v400_v47  ;;  %v403_v62 = vmul.f32 %v5075_v63, %v400_v47 }
 0x117   :  { %v5426_v50 = vpop.permute.xlu2 %767  ;;  %v272_v52 = vadd.f32 %v263_v25, %v247_v49  ;;  %v271_v41 = vadd.f32 %v264_v28, %v246_v15  ;;  %v395_v51 = vadd.f32 %v5281_v16, %v369_v29  ;;  %v489_v16 = vmul.f32 %v5067_v60, %v488_v59 }
 0x118   :  { %v270_v11 = vadd.f32 %v260_v34, %v245_v54  ;;  %v412_v47 = vrot.slane %v403_v62, 1 }
 0x119   :  { %v304_v27 = vadd.f32 %v5234_v21, %v272_v52  ;;  %v411_v21 = vsel %vm169_vm0, %v409_v33, %v410_v18  ;;  %v303_v56 = vadd.f32 %v5236_v23, %v271_v41  ;;  %v413_v23 = vrot.slane %v404_v26, 1 }
 0x11a   :  { %v302_v34 = vadd.f32 %v5186_v22, %v270_v11  ;;  %v419_v7 = vadd.f32 %v411_v21, %v395_v51  ;;  %v497_v9 = vrot.slane %v489_v16, 2  ;;  %v492_v33 = vmul.f32 %v5083_v4, %v488_v59  ;;  %v8132_v51 = vld [vmem:[#allocation26_spill] sm:$0xff] }
 0x11b   :  { %v336_v42 = vadd.f32 %v5212_v44, %v304_v27  ;;  %v490_v44 = vmul.f32 %v5062_v58, %v488_v59  ;;  %v335_v49 = vadd.f32 %v5248_v37, %v303_v56  ;;  %v491_v41 = vmul.f32 %v5075_v63, %v488_v59  ;;  %v8134_v56 = vld [vmem:[#allocation21_spill] sm:$0xff]  ;;  %v8137_v63 = vld [vmem:[#allocation24_spill] sm:$0xff] }
 0x11c   :  { %v334_v25 = vadd.f32 %v5250_v38, %v302_v34  ;;  %v451_v60 = vadd.f32 %v5253_v43, %v419_v7  ;;  %v501_v21 = vrot.slane %v492_v33, 2  ;;  %v8133_v34 = vld [vmem:[#allocation12_spill] sm:$0xff]  ;;  %v638_v16 = vstv %s4690_s14  ;;  %s4724_s14 = sld [smem:[#allocation2 + $0x37]] }
 0x11d   :  { %v346_v40 = vadd.f32 %v342_v13, %v336_v42  ;;  %v498_v53 = vrot.slane %v490_v44, 2  ;;  %v345_v58 = vadd.f32 %v341_v32, %v335_v49  ;;  %v8136_v44 = vld [vmem:[#allocation23_spill] sm:$0xff]  ;;  %v639_v49 = vmul.f32 %v8133_v34, %v638_v16 }
 0x11e   :  { %v5437_v19 = vpop.permute.xlu1 %681  ;;  %v5439_v1 = vpop.permute.xlu0 %679  ;;  %v344_v54 = vadd.f32 %v340_v31, %v334_v25  ;;  %v483_v52 = vadd.f32 %v5333_v3, %v451_v60  ;;  %v8135_v31 = vld [vmem:[#allocation22_spill] sm:$0xff]  ;;  %v8138_v25 = vld [vmem:[#allocation11_spill] sm:$0xff] }
 0x11f   :  { %v5445_v12 = vpop.permute.xlu2 %797  ;;  %v372_v22 = vadd.f32 %v5283_v20, %v346_v40  ;;  %v499_v48 = vsel %vm258_vm1, %v497_v9, %v498_v53  ;;  %v371_v15 = vadd.f32 %v5226_v57, %v345_v58  ;;  %v576_v57 = vstv %s4687_s13  ;;  %v8140_v9 = vld [vmem:[#allocation28_spill] sm:$0xff]  ;;  %s4722_s13 = sld [smem:[#allocation2 + $0x35]] }
 0x120   :  { %v370_v20 = vadd.f32 %v5261_v55, %v344_v54  ;;  %v507_v28 = vadd.f32 %v499_v48, %v483_v52  ;;  %v577_v4 = vmul.f32 %v8133_v34, %v576_v57  ;;  %v640_v40 = vmul.f32 %v8138_v25, %v638_v16 }
 0x121   :  { %v398_v37 = vadd.f32 %v5303_v36, %v372_v22  ;;  %v397_v43 = vadd.f32 %v5305_v39, %v371_v15  ;;  %v414_v36 = vsel %vm169_vm0, %v412_v47, %v413_v23  ;;  %v8141_v15 = vld [vmem:[#allocation25_spill] sm:$0xff] }
 0x122   :  { %v396_v8 = vadd.f32 %v5239_v24, %v370_v20  ;;  %v539_v29 = vadd.f32 %v5345_v17, %v507_v28  ;;  %v500_v17 = vrot.slane %v491_v41, 2  ;;  %v648_v47 = vrot.slane %v640_v40, 1  ;;  %v8144_v41 = vld [vmem:[#allocation29_spill] sm:$0xff] }
 0x123   :  { %v422_v27 = vadd.f32 %v413_v23, %v398_v37  ;;  %v421_v42 = vadd.f32 %v414_v36, %v397_v43  ;;  %v8139_v23 = vld [vmem:[#allocation17_spill] sm:$0xff]  ;;  %v647_v37 = vrot.slane %v639_v49, 1  ;;  %v8142_v43 = vld [vmem:[#allocation14_spill] sm:$0xff]  ;;  %v8148_v49 = vld [vmem:[#allocation36_spill] sm:$0xff] }
 0x124   :  { %v420_v24 = vadd.f32 %v410_v18, %v396_v8  ;;  %v502_v60 = vsel %vm258_vm1, %v500_v17, %v501_v21  ;;  %v580_v28 = vmul.f32 %v8142_v43, %v576_v57 }
 0x125   :  { %v454_v3 = vadd.f32 %v5266_v2, %v422_v27  ;;  %v453_v32 = vadd.f32 %v8134_v56, %v421_v42  ;;  %v571_v2 = vadd.f32 %v8136_v44, %v539_v29  ;;  %v649_v33 = vsel %vm169_vm0, %v647_v37, %v648_v47 }
 0x126   :  { %v5453_v10 = vpop.permute.xlu1 %711  ;;  %v5455_v61 = vpop.permute.xlu0 %709  ;;  %v452_v26 = vadd.f32 %v8135_v31, %v420_v24  ;;  %v8145_v24 = vld [vmem:[#allocation13_spill] sm:$0xff] }
 0x127   :  { %v5461_v35 = vpop.permute.xlu2 %803  ;;  %v486_v39 = vadd.f32 %v8132_v51, %v454_v3  ;;  %v485_v62 = vadd.f32 %v8139_v23, %v453_v32  ;;  %v581_v54 = vadd.f32 %v577_v4, %v571_v2  ;;  %v8143_v3 = vld [vmem:[#allocation20_spill] sm:$0xff]  ;;  %v726_v51 = vstv %s4693_s15  ;;  %v8146_v32 = vld [vmem:[#allocation31_spill] sm:$0xff]  ;;  %s4725_s15 = sld [smem:[#allocation2 + $0x38]] }
 0x128   :  { %v484_v59 = vadd.f32 %v8137_v63, %v452_v26  ;;  %v8147_v26 = vld [vmem:[#allocation32_spill] sm:$0xff] }
 0x129   :  { %v510_v18 = vadd.f32 %v501_v21, %v486_v39  ;;  %v607_v52 = vadd.f32 %v5390_v30, %v581_v54  ;;  %v509_v48 = vadd.f32 %v502_v60, %v485_v62  ;;  %v578_v30 = vmul.f32 %v8138_v25, %v576_v57  ;;  %v8149_v62 = vld [vmem:[#allocation33_spill] sm:$0xff] }
 0x12a   :  { %v508_v20 = vadd.f32 %v498_v53, %v484_v59  ;;  %v579_v53 = vmul.f32 %v8145_v24, %v576_v57  ;;  %v642_v39 = vmul.f32 %v8142_v43, %v638_v16  ;;  %v728_v21 = vmul.f32 %v8138_v25, %v726_v51 }
 0x12b   :  { %v542_v58 = vadd.f32 %v8140_v9, %v510_v18  ;;  %v633_v8 = vadd.f32 %v5404_v45, %v607_v52  ;;  %v541_v42 = vadd.f32 %v8144_v41, %v509_v48  ;;  %v727_v45 = vmul.f32 %v8133_v34, %v726_v51  ;;  %v8153_v41 = vld [vmem:[#allocation35_spill] sm:$0xff] }
 0x12c   :  { %v540_v29 = vadd.f32 %v8143_v3, %v508_v20  ;;  %v651_v59 = vrot.slane %v642_v39, 1  ;;  %v641_v57 = vmul.f32 %v8145_v24, %v638_v16  ;;  %v736_v18 = vrot.slane %v728_v21, 2 }
 0x12d   :  { %v574_v27 = vadd.f32 %v8141_v15, %v542_v58  ;;  %v573_v31 = vadd.f32 %v8146_v32, %v541_v42  ;;  %v657_v17 = vadd.f32 %v649_v33, %v633_v8  ;;  %v735_v40 = vrot.slane %v727_v45, 2  ;;  %v8150_v58 = vld [vmem:[#allocation34_spill] sm:$0xff]  ;;  %v8151_v15 = vld [vmem:[#allocation27_spill] sm:$0xff] }
 0x12e   :  { %v5474_v6 = vpop.permute.xlu1 %765  ;;  %v5476_v0 = vpop.permute.xlu0 %715  ;;  %v572_v44 = vadd.f32 %v8147_v26, %v540_v29  ;;  %v650_v20 = vrot.slane %v641_v57, 1  ;;  %v729_v39 = vmul.f32 %v8145_v24, %v726_v51  ;;  %v8154_v26 = vld [vmem:[#allocation16_spill] sm:$0xff] }
 0x12f   :  { %v5480_v38 = vpop.permute.xlu2 %837  ;;  %v584_v2 = vadd.f32 %v580_v28, %v574_v27  ;;  %v583_v23 = vadd.f32 %v579_v53, %v573_v31  ;;  %v689_v34 = vadd.f32 %v8149_v62, %v657_v17  ;;  %v737_v52 = vsel %vm258_vm1, %v735_v40, %v736_v18  ;;  %v8152_v28 = vld [vmem:[#allocation30_spill] sm:$0xff] }
 0x130   :  { %v582_v25 = vadd.f32 %v578_v30, %v572_v44  ;;  %v652_v29 = vsel %vm169_vm0, %v650_v20, %v651_v59  ;;  %v814_v30 = vstv %s4696_s16  ;;  %v8156_v20 = vld [vmem:[#allocation19_spill] sm:$0xff]  ;;  %s4740_s16 = sld [smem:[#allocation2 + $0x47]] }
 0x131   :  { %v610_v63 = vadd.f32 %v8148_v49, %v584_v2  ;;  %v721_v60 = vadd.f32 %v5455_v61, %v689_v34  ;;  %v609_v27 = vadd.f32 %v8151_v15, %v583_v23  ;;  %v730_v61 = vmul.f32 %v8142_v43, %v726_v51  ;;  %v8155_v51 = vld [vmem:[#allocation15_spill] sm:$0xff] }
 0x132   :  { %v608_v54 = vadd.f32 %v8150_v58, %v582_v25  ;;  %v815_v44 = vmul.f32 %v8154_v26, %v814_v30 }
 0x133   :  { %v636_v9 = vadd.f32 %v5421_v46, %v610_v63  ;;  %v635_v46 = vadd.f32 %v5423_v14, %v609_v27  ;;  %v745_v3 = vadd.f32 %v737_v52, %v721_v60  ;;  %v739_v31 = vrot.slane %v730_v61, 2  ;;  %v8157_v27 = vld [vmem:[#allocation18_spill] sm:$0xff] }
 0x134   :  { %v634_v33 = vadd.f32 %v8152_v28, %v608_v54  ;;  %v876_v63 = vstv %s4699_s17  ;;  %v818_v52 = vmul.f32 %v8156_v20, %v814_v30  ;;  %v964_v28 = vstv %s4702_s18  ;;  %s4727_s18 = sld [smem:[#allocation2 + $0x3a]] }
 0x135   :  { %v660_v8 = vadd.f32 %v651_v59, %v636_v9  ;;  %v777_v53 = vadd.f32 %v5474_v6, %v745_v3  ;;  %v659_v21 = vadd.f32 %v652_v29, %v635_v46  ;;  %v738_v59 = vrot.slane %v729_v39, 2  ;;  %s4705_s17 = sld [smem:[#allocation2 + $0x24]] }
 0x136   :  { %v5490_v11 = vpop.permute.xlu1 %771  ;;  %v5492_v55 = vpop.permute.xlu0 %769  ;;  %v658_v45 = vadd.f32 %v648_v47, %v634_v33  ;;  %v877_v24 = vmul.f32 %v8154_v26, %v876_v63  ;;  %v878_v57 = vmul.f32 %v8155_v51, %v876_v63  ;;  %v880_v33 = vmul.f32 %v8156_v20, %v876_v63 }
 0x137   :  { %v5498_v13 = vpop.permute.xlu2 %861  ;;  %v692_v42 = vadd.f32 %v8153_v41, %v660_v8  ;;  %v691_v17 = vadd.f32 %v5437_v19, %v659_v21  ;;  %v809_v49 = vadd.f32 %v5445_v12, %v777_v53  ;;  %v817_v8 = vmul.f32 %v8157_v27, %v814_v30 }
 0x138   :  { %v690_v43 = vadd.f32 %v5439_v1, %v658_v45  ;;  %v740_v1 = vsel %vm258_vm1, %v738_v59, %v739_v31  ;;  %v885_v12 = vrot.slane %v877_v24, 1  ;;  %v886_v34 = vrot.slane %v878_v57, 1 }
 0x139   :  { %v724_v32 = vadd.f32 %v5476_v0, %v692_v42  ;;  %v723_v40 = vadd.f32 %v5410_v5, %v691_v17  ;;  %v819_v23 = vadd.f32 %v815_v44, %v809_v49  ;;  %v966_v46 = vmul.f32 %v8155_v51, %v964_v28 }
 0x13a   :  { %v722_v47 = vadd.f32 %v5453_v10, %v690_v43  ;;  %v887_v15 = vsel %vm169_vm0, %v885_v12, %v886_v34  ;;  %v879_v41 = vmul.f32 %v8157_v27, %v876_v63  ;;  %v967_v57 = vmul.f32 %v8157_v27, %v964_v28 }
 0x13b   :  { %v748_v0 = vadd.f32 %v739_v31, %v724_v32  ;;  %v747_v54 = vadd.f32 %v740_v1, %v723_v40  ;;  %v974_v39 = vrot.slane %v966_v46, 2 }
 0x13c   :  { %v746_v25 = vadd.f32 %v736_v18, %v722_v47 }
 0x13d   :  { %v780_v19 = vadd.f32 %v5490_v11, %v748_v0  ;;  %v779_v11 = vadd.f32 %v5492_v55, %v747_v54  ;;  %v889_v55 = vrot.slane %v880_v33, 1 }
 0x13e   :  { %v5507_v7 = vpop.permute.xlu1 %801  ;;  %v5509_v22 = vpop.permute.xlu0 %799  ;;  %v778_v5 = vadd.f32 %v5426_v50, %v746_v25  ;;  %v976_v25 = vrot.slane %v967_v57, 2  ;;  %v5702_v57 = vstv %s4707_s29  ;;  %s4718_s29 = sld [smem:[#allocation2 + $0x31]] }
 0x13f   :  { %v5518_v36 = vpop.permute.xlu2 %915  ;;  %v812_v10 = vadd.f32 %v5461_v35, %v780_v19  ;;  %v965_v35 = vmul.f32 %v8154_v26, %v964_v28 }
 0x140   :  { %v810_v3 = vadd.f32 %v5509_v22, %v778_v5  ;;  %v888_v22 = vrot.slane %v879_v41, 1 }
 0x141   :  { %v822_v29 = vadd.f32 %v818_v52, %v812_v10 }
 0x142   :  { %v890_v24 = vsel %vm169_vm0, %v888_v22, %v889_v55 }
 0x146   :  { %v5528_v4 = vpop.permute.xlu1 %835  ;;  %v834_v56 = vpop.permute.xlu0 %833 }
 0x147   :  { %v5538_v37 = vpop.permute.xlu2 %921  ;;  %v845_v62 = vadd.f32 %v834_v56, %v819_v23  ;;  %v816_v56 = vmul.f32 %v8155_v51, %v814_v30  ;;  %v973_v30 = vrot.slane %v965_v35, 2  ;;  %v1052_v51 = vstv %s1051_s19  ;;  %s4711_s19 = sld [smem:[#allocation2 + $0x2a]] }
 0x149   :  { %v820_v45 = vadd.f32 %v816_v56, %v810_v3  ;;  %v975_v44 = vsel %vm258_vm1, %v973_v30, %v974_v39 }
 0x14e   :  { %v860_v48 = vpop.permute.xlu1 %859  ;;  %v840_v16 = vpop.permute.xlu0 %839 }
 0x14f   :  { %v5554_v6 = vpop.permute.xlu2 %951  ;;  %v871_v60 = vadd.f32 %v860_v48, %v845_v62  ;;  %v811_v48 = vadd.f32 %v5507_v7, %v779_v11  ;;  %v848_v61 = vadd.f32 %v840_v16, %v822_v29  ;;  %v846_v7 = vadd.f32 %v5528_v4, %v820_v45 }
 0x150   :  { %v968_v4 = vmul.f32 %v8156_v20, %v964_v28 }
 0x151   :  { %v895_v50 = vadd.f32 %v887_v15, %v871_v60  ;;  %v821_v21 = vadd.f32 %v817_v8, %v811_v48  ;;  %v872_v49 = vadd.f32 %v5498_v13, %v846_v7  ;;  %v5677_v7 = vld [vmem:[%s8046_s0] sm:$0xff] }
 0x152   :  { %v977_v12 = vrot.slane %v968_v4, 2 }
 0x153   :  { %v927_v32 = vadd.f32 %v5518_v36, %v895_v50  ;;  %v847_v16 = vadd.f32 %v5480_v38, %v821_v21  ;;  %v896_v38 = vadd.f32 %v886_v34, %v872_v49 }
 0x154   :  { %v978_v34 = vsel %vm258_vm1, %v976_v25, %v977_v12 }
 0x156   :  { %v866_v14 = vpop.permute.xlu1 %865  ;;  %v864_v2 = vpop.permute.xlu0 %863 }
 0x157   :  { %v1006_v18 = vpop.permute.xlu2 %1005  ;;  %v874_v31 = vadd.f32 %v866_v14, %v848_v61  ;;  %v873_v63 = vadd.f32 %v864_v2, %v847_v16  ;;  %v5684_v16 = vld [vmem:[%s8046_s0 + $0x8] sm:$0x7f] }
 0x159   :  { %v898_v17 = vadd.f32 %v889_v55, %v874_v31  ;;  %v897_v40 = vadd.f32 %v890_v24, %v873_v63  ;;  %v1242_v31 = vstv %s4706_s20  ;;  %v5691_v63 = vld [vmem:[%s8046_s0 + $0x40] sm:$0xff]  ;;  %s4772_s20 = sld [smem:[#allocation2 + $0x66]] }
 0x15b   :  { %v930_v14 = vadd.f32 %v5538_v37, %v898_v17  ;;  %v1244_v17 = vmul.f32 %v5684_v16, %v1242_v31 }
 0x15e   :  { %v920_v9 = vpop.permute.xlu1 %919  ;;  %v918_v58 = vpop.permute.xlu0 %917 }
 0x15f   :  { %v1036_v43 = vpop.permute.xlu2 %1035  ;;  %v929_v1 = vadd.f32 %v920_v9, %v897_v40  ;;  %v928_v13 = vadd.f32 %v918_v58, %v896_v38  ;;  %v1269_v38 = vmul.f32 %v5677_v7, %v5702_v57 }
 0x161   :  { %v961_v20 = vadd.f32 %v5554_v6, %v929_v1  ;;  %v1270_v1 = vmul.f32 %v5684_v16, %v5702_v57 }
 0x163   :  { %v985_v5 = vadd.f32 %v978_v34, %v961_v20 }
 0x166   :  { %v950_v42 = vpop.permute.xlu1 %949  ;;  %v948_v53 = vpop.permute.xlu0 %947 }
 0x167   :  { %v959_v26 = vadd.f32 %v948_v53, %v927_v32  ;;  %v960_v62 = vadd.f32 %v950_v42, %v928_v13  ;;  %v1042_v37 = vpop.permute.xlu2 %1041 }
 0x169   :  { %v983_v59 = vadd.f32 %v975_v44, %v959_v26  ;;  %v984_v9 = vadd.f32 %v974_v39, %v960_v62  ;;  %v1243_v26 = vmul.f32 %v5677_v7, %v1242_v31 }
 0x16b   :  { %v1016_v27 = vadd.f32 %v1006_v18, %v984_v9 }
 0x16e   :  { %v1004_v47 = vpop.permute.xlu1 %1003  ;;  %v954_v36 = vpop.permute.xlu0 %953 }
 0x16f   :  { %v1015_v0 = vadd.f32 %v1004_v47, %v983_v59  ;;  %v962_v19 = vadd.f32 %v954_v36, %v930_v14  ;;  %v1245_v59 = vmul.f32 %v5691_v63, %v1242_v31  ;;  %v5698_v14 = vld [vmem:[%s8046_s0 + $0x48] sm:$0x7f] }
 0x171   :  { %v1047_v23 = vadd.f32 %v1036_v43, %v1015_v0  ;;  %v986_v10 = vadd.f32 %v977_v12, %v962_v19  ;;  %v1246_v0 = vmul.f32 %v5698_v14, %v1242_v31  ;;  %v5710_v12 = vstv %s4709_s1  ;;  %s4726_s1 = sld [smem:[#allocation2 + $0x39]] }
 0x173   :  { %v1053_v2 = vadd.f32 %v1052_v51, %v1047_v23 }
 0x175   :  { %v5584_v54 = vmax.f32 %v1053_v2, 0.0 }
 0x176   :  { %v1010_v60 = vpop.permute.xlu1 %1009  ;;  %v1008_v52 = vpop.permute.xlu0 %1007 }
 0x177   :  { %v1018_v15 = vadd.f32 %v1010_v60, %v986_v10  ;;  %1065 = vrot.lane.b32.xlu0 %v5584_v54, %s4945_s6  ;;  %v1017_v8 = vadd.f32 %v1008_v52, %v985_v5  ;;  %v1097_v50 = vrot.slane %v5584_v54, 1  ;;  %v1143_v45 = vrot.slane %v5584_v54, 2 }
 0x178   :  { %v1319_v10 = vmul.f32 %v5677_v7, %v5710_v12 }
 0x179   :  { %v1050_v58 = vadd.f32 %v1042_v37, %v1018_v15  ;;  %v1320_v37 = vmul.f32 %v5684_v16, %v5710_v12 }
 0x17a   :  { %v1327_v52 = vrot.slane %v1319_v10, 1 }
 0x17b   :  { %v1056_v11 = vadd.f32 %v1052_v51, %v1050_v58  ;;  %v1328_v20 = vrot.slane %v1320_v37, 1 }
 0x17d   :  { %v5590_v28 = vmax.f32 %v1056_v11, 0.0  ;;  %v1329_v9 = vsel %vm169_vm0, %v1327_v52, %v1328_v20  ;;  %v1322_v52 = vmul.f32 %v5698_v14, %v5710_v12 }
 0x17e   :  { %v1040_v56 = vpop.permute.xlu1 %1039  ;;  %v1038_v33 = vpop.permute.xlu0 %1037 }
 0x17f   :  { %v1049_v46 = vadd.f32 %v1040_v56, %v1017_v8  ;;  %v1048_v35 = vadd.f32 %v1038_v33, %v1016_v27  ;;  %1071 = vrot.lane.b32.xlu0 %v5590_v28, %s4945_s6  ;;  %v5626_v41 = vrot.slane %v5590_v28, 1  ;;  %v5640_v39 = vrot.slane %v5590_v28, 2 }
 0x181   :  { %v1055_v6 = vadd.f32 %v1052_v51, %v1049_v46  ;;  %v1054_v48 = vadd.f32 %v1052_v51, %v1048_v35 }
 0x183   :  { %v5594_v3 = vmax.f32 %v1055_v6, 0.0  ;;  %v5596_v29 = vmax.f32 %v1054_v48, 0.0 }
 0x185   :  { %1069 = vrot.lane.b32.xlu2 %v5594_v3, %s4945_s6  ;;  %1067 = vrot.lane.b32.xlu1 %v5596_v29, %s4945_s6  ;;  %v5609_v18 = vrot.slane %v5596_v29, 1  ;;  %v1100_v55 = vrot.slane %v5594_v3, 1  ;;  %v1146_v53 = vrot.slane %v5594_v3, 2  ;;  %v5653_v21 = vrot.slane %v5596_v29, 2 }
 0x187   :  { %1085 = vrot.lane.b32.xlu0 %v5594_v3, %s4946_s11  ;;  %v5616_v61 = vsel %vm169_vm0, %v1097_v50, %v5609_v18  ;;  %v5630_v42 = vsel %vm169_vm0, %v1100_v55, %v5626_v41  ;;  %v5648_v30 = vsel %vm258_vm1, %v1146_v53, %v5640_v39  ;;  %v5658_v32 = vsel %vm258_vm1, %v1143_v45, %v5653_v21 }
 0x18d   :  { %1083 = vrot.lane.b32.xlu2 %v5596_v29, %s4946_s11  ;;  %1081 = vrot.lane.b32.xlu1 %v5584_v54, %s4946_s11 }
 0x18f   :  { %1113 = vrot.lane.b32.xlu0 %v5609_v18, %s4945_s6 }
 0x195   :  { %1087 = vrot.lane.b32.xlu1 %v5590_v28, %s4946_s11  ;;  %1111 = vrot.lane.b32.xlu2 %v5616_v61, %s4945_s6 }
 0x197   :  { %1127 = vrot.lane.b32.xlu0 %v5616_v61, %s4946_s11 }
 0x19d   :  { %1115 = vrot.lane.b32.xlu1 %v5630_v42, %s4945_s6  ;;  %1117 = vrot.lane.b32.xlu2 %v5626_v41, %s4945_s6 }
 0x19f   :  { %1133 = vrot.lane.b32.xlu0 %v5626_v41, %s4946_s11 }
 0x1a5   :  { %1129 = vrot.lane.b32.xlu1 %v5609_v18, %s4946_s11  ;;  %1131 = vrot.lane.b32.xlu2 %v5630_v42, %s4946_s11 }
 0x1a7   :  { %1161 = vrot.lane.b32.xlu0 %v5648_v30, %s4945_s6 }
 0x1ad   :  { %1157 = vrot.lane.b32.xlu1 %v5658_v32, %s4945_s6  ;;  %1159 = vrot.lane.b32.xlu2 %v5653_v21, %s4945_s6 }
 0x1af   :  { %1175 = vrot.lane.b32.xlu0 %v5653_v21, %s4946_s11 }
 0x1b5   :  { %1163 = vrot.lane.b32.xlu1 %v5640_v39, %s4945_s6  ;;  %1173 = vrot.lane.b32.xlu2 %v5658_v32, %s4946_s11 }
 0x1bd   :  { %1177 = vrot.lane.b32.xlu1 %v5648_v30, %s4946_s11  ;;  %1179 = vrot.lane.b32.xlu2 %v5640_v39, %s4946_s11 }
 0x1c5   :  { %1251 = vrot.lane.b32.xlu2 %v1243_v26, %s4945_s6 }
 0x1cd   :  { %1253 = vrot.lane.b32.xlu2 %v1244_v17, %s4945_s6 }
 0x1d5   :  { %1255 = vrot.lane.b32.xlu2 %v1245_v59, %s4945_s6 }
 0x1dd   :  { %1257 = vrot.lane.b32.xlu2 %v1246_v0, %s4945_s6 }
 0x1df   :  { %v1070_v22 = vpop.permute.xlu2 %1069 }
 0x1e5   :  { %1277 = vrot.lane.b32.xlu2 %v1269_v38, %s4946_s11 }
 0x1e7   :  { %v1084_v43 = vpop.permute.xlu2 %1083 }
 0x1e9   :  { %v1066_v44 = vpop.permute.xlu0 %1065 }
 0x1ea   :  { %v1077_v60 = vmax.f32 %v5584_v54, %v1066_v44  ;;  %v1079_v54 = vmax.f32 %v5594_v3, %v1070_v22 }
 0x1ed   :  { %1279 = vrot.lane.b32.xlu2 %v1270_v1, %s4946_s11 }
 0x1ef   :  { %v1112_v36 = vpop.permute.xlu2 %1111 }
 0x1f1   :  { %v1072_v49 = vpop.permute.xlu0 %1071 }
 0x1f2   :  { %v1080_v58 = vmax.f32 %v5590_v28, %v1072_v49 }
 0x1f5   :  { %1333 = vrot.lane.b32.xlu2 %v1329_v9, %s4945_s6 }
 0x1f7   :  { %v1068_v24 = vpop.permute.xlu1 %1067  ;;  %v1118_v40 = vpop.permute.xlu2 %1117 }
 0x1f8   :  { %v1078_v25 = vmax.f32 %v5596_v29, %v1068_v24  ;;  %v81_v24 = vld [vmem:[%s8049_s3 + $0x80] sm:$0xff] }
 0x1f9   :  { %v1086_v47 = vpop.permute.xlu0 %1085 }
 0x1fa   :  { %v1094_v34 = vmax.f32 %v1078_v25, %v1084_v43  ;;  %v1095_v29 = vmax.f32 %v1079_v54, %v1086_v47 }
 0x1fc   :  { %v1108_v8 = vmax.f32 %v1094_v34, %v5609_v18  ;;  %v1109_v53 = vmax.f32 %v1095_v29, %v5630_v42  ;;  %v82_v42 = vld [vmem:[%s8049_s3 + $0x88] sm:$0x7] }
 0x1fd   :  { %1335 = vrot.lane.b32.xlu2 %v1328_v20, %s4945_s6 }
 0x1ff   :  { %v1082_v4 = vpop.permute.xlu1 %1081  ;;  %v1132_v13 = vpop.permute.xlu2 %1131 }
 0x200   :  { %v1093_v15 = vmax.f32 %v1077_v60, %v1082_v4 }
 0x201   :  { %v1114_v51 = vpop.permute.xlu0 %1113 }
 0x202   :  { %v1107_v11 = vmax.f32 %v1093_v15, %v5616_v61  ;;  %v1124_v46 = vmax.f32 %v1108_v8, %v1114_v51 }
 0x204   :  { %v1123_v35 = vmax.f32 %v1107_v11, %v1112_v36 }
 0x207   :  { %v1088_v19 = vpop.permute.xlu1 %1087  ;;  %v1160_v27 = vpop.permute.xlu2 %1159 }
 0x208   :  { %v1096_v56 = vmax.f32 %v1080_v58, %v1088_v19  ;;  %v1331_v58 = vrot.slane %v1322_v52, 1 }
 0x209   :  { %v1128_v23 = vpop.permute.xlu0 %1127 }
 0x20a   :  { %v1110_v6 = vmax.f32 %v1096_v56, %v5626_v41  ;;  %v1139_v50 = vmax.f32 %v1123_v35, %v1128_v23  ;;  %v90_v23 = vld [vmem:[%s8049_s3 + $0xc8] sm:$0x7]  ;;  %1339 = vrot.lane.b32.xlu2 %v1331_v58, %s4945_s6 }
 0x20c   :  { %v1126_v55 = vmax.f32 %v1110_v6, %v1118_v40  ;;  %v1153_v45 = vmax.f32 %v1139_v50, %v5658_v32  ;;  %v65_v32 = vld [vmem:[%s8049_s3] sm:$0xff]  ;;  %v1271_v50 = vmul.f32 %v5691_v63, %v5702_v57 }
 0x20f   :  { %v1116_v2 = vpop.permute.xlu1 %1115  ;;  %v1174_v18 = vpop.permute.xlu2 %1173 }
 0x210   :  { %v1125_v26 = vmax.f32 %v1109_v53, %v1116_v2  ;;  %v73_v2 = vld [vmem:[%s8049_s3 + $0x40] sm:$0xff] }
 0x211   :  { %v1134_v62 = vpop.permute.xlu0 %1133 }
 0x212   :  { %v1142_v31 = vmax.f32 %v1126_v55, %v1134_v62  ;;  %v1141_v49 = vmax.f32 %v1125_v26, %v1132_v13  ;;  %v74_v62 = vld [vmem:[%s8049_s3 + $0x48] sm:$0x7] }
 0x214   :  { %v1156_v43 = vmax.f32 %v1142_v31, %v5640_v39  ;;  %v1155_v4 = vmax.f32 %v1141_v49, %v5648_v30  ;;  %v89_v30 = vld [vmem:[%s8049_s3 + $0xc0] sm:$0xff]  ;;  %v1406_v31 = vstv %s4712_s23  ;;  %v1438_v49 = vstv %s4713_s24  ;;  %s4714_s24 = sld [smem:[#allocation2 + $0x2d]] }
 0x215   :  { %s4759_s23 = sld [smem:[#allocation2 + $0x59]] }
 0x217   :  { %v1130_v5 = vpop.permute.xlu1 %1129  ;;  %v1180_v0 = vpop.permute.xlu2 %1179 }
 0x218   :  { %v1140_v48 = vmax.f32 %v1124_v46, %v1130_v5 }
 0x219   :  { %v1162_v33 = vpop.permute.xlu0 %1161 }
 0x21a   :  { %v1154_v61 = vmax.f32 %v1140_v48, %v5653_v21  ;;  %v66_v21 = vld [vmem:[%s8049_s3 + $0x8] sm:$0x7]  ;;  %v1171_v19 = vmax.f32 %v1155_v4, %v1162_v33  ;;  %v1350_v48 = vstv %s4710_s22  ;;  %v1409_v4 = vmul.f32 %v5691_v63, %v1406_v31  ;;  %s4758_s22 = sld [smem:[#allocation2 + $0x58]] }
 0x21b   :  { %v1354_v29 = vmul.f32 %v5698_v14, %v1350_v48  ;;  %v1353_v55 = vmul.f32 %v5691_v63, %v1350_v48 }
 0x21c   :  { %v1170_v44 = vmax.f32 %v1154_v61, %v1160_v27 }
 0x21d   :  { %v1363_v61 = vrot.slane %v1354_v29, 1  ;;  %v1362_v53 = vrot.slane %v1353_v55, 1 }
 0x21f   :  { %v1158_v28 = vpop.permute.xlu1 %1157  ;;  %v1364_v26 = vsel %vm169_vm0, %v1362_v53, %v1363_v61 }
 0x220   :  { %v1169_v3 = vmax.f32 %v1153_v45, %v1158_v28  ;;  %v1321_v28 = vmul.f32 %v5691_v63, %v5710_v12  ;;  %1369 = vrot.lane.b32.xlu2 %v1364_v26, %s4946_s11  ;;  %v1408_v12 = vmul.f32 %v5684_v16, %v1406_v31 }
 0x221   :  { %v1176_v22 = vpop.permute.xlu0 %1175 }
 0x222   :  { %v1186_v41 = vmax.f32 %v1170_v44, %v1176_v22  ;;  %v1185_v59 = vmax.f32 %v1169_v3, %v1174_v18  ;;  %v1272_v18 = vmul.f32 %v5698_v14, %v5702_v57  ;;  %v1330_v45 = vrot.slane %v1321_v28, 1 }
 0x223   :  { %v1351_v3 = vmul.f32 %v5677_v7, %v1350_v48  ;;  %v1352_v22 = vmul.f32 %v5684_v16, %v1350_v48 }
 0x224   :  { %v1190_v39 = vmul.f32 %v1186_v41, %v66_v21  ;;  %v1212_v36 = vmul.f32 %v1186_v41, %v82_v42  ;;  %v1189_v51 = vmul.f32 %v1185_v59, %v65_v32  ;;  %v1211_v40 = vmul.f32 %v1185_v59, %v81_v24  ;;  %v5782_v41 = vpop.permute.xlu2 %1251 }
 0x225   :  { %v1332_v44 = vsel %vm169_vm0, %v1330_v45, %v1331_v58  ;;  %v1360_v57 = vrot.slane %v1352_v22, 1  ;;  %v1440_v21 = vmul.f32 %v5684_v16, %v1438_v49  ;;  %v1407_v42 = vmul.f32 %v5677_v7, %v1406_v31  ;;  %v5830_v58 = vld [vmem:[%s8046_s0 + $0x10] sm:$0xff] }
 0x226   :  { %v1196_v1 = vsel %vm1195_vm2, %v1190_v39, 0.0  ;;  %v1216_v13 = vsel %vm1195_vm2, %v1212_v36, 0.0  ;;  %v1215_v37 = vsel %vm1193_vm3, %v1211_v40, 0.0  ;;  %v1194_v60 = vsel %vm1193_vm3, %v1189_v51, 0.0 }
 0x227   :  { %v1164_v17 = vpop.permute.xlu1 %1163  ;;  %v1217_v5 = vadd.f32 %v1216_v13, %v1215_v37  ;;  %v1197_v11 = vadd.f32 %v1196_v1, %v1194_v60  ;;  %v1439_v32 = vmul.f32 %v5677_v7, %v1438_v49  ;;  %v1415_v36 = vrot.slane %v1407_v42, 2 }
 0x228   :  { %v1172_v47 = vmax.f32 %v1156_v43, %v1164_v17  ;;  %v1359_v17 = vrot.slane %v1351_v3, 1  ;;  %v1416_v43 = vrot.slane %v1408_v12, 2  ;;  %v1410_v51 = vmul.f32 %v5698_v14, %v1406_v31 }
 0x229   :  { %v1447_v39 = vrot.slane %v1439_v32, 2  ;;  %v1442_v40 = vmul.f32 %v5698_v14, %v1438_v49 }
 0x22a   :  { %v1188_v38 = vmax.f32 %v1172_v47, %v1180_v0  ;;  %v1361_v59 = vsel %vm169_vm0, %v1359_v17, %v1360_v57  ;;  %1423 = vrot.lane.b32.xlu2 %v1416_v43, %s4945_s6  ;;  %v1448_v47 = vrot.slane %v1440_v21, 2 }
 0x22b   :  { %v1451_v1 = vrot.slane %v1442_v40, 2 }
 0x22c   :  { %v1214_v20 = vmul.f32 %v1188_v38, %v90_v23  ;;  %v1192_v9 = vmul.f32 %v1188_v38, %v74_v62  ;;  %v5791_v24 = vpop.permute.xlu2 %1253  ;;  %v1449_v0 = vsel %vm258_vm1, %v1447_v39, %v1448_v47  ;;  %v1417_v38 = vsel %vm258_vm1, %v1415_v36, %v1416_v43  ;;  %v5812_v62 = vld [vmem:[%s8046_s0 + $0x50] sm:$0xff] }
 0x22d   :  { %v1419_v23 = vrot.slane %v1410_v51, 2 }
 0x22e   :  { %v1220_v46 = vsel %vm1195_vm2, %v1214_v20, 0.0  ;;  %v1200_v54 = vsel %vm1195_vm2, %v1192_v9, 0.0  ;;  %v1506_v20 = vstv %s4716_s26  ;;  %s4730_s26 = sld [smem:[#allocation2 + $0x3d]] }
 0x22f   :  { %v1178_v25 = vpop.permute.xlu1 %1177  ;;  %v1507_v48 = vmul.f32 %v5830_v58, %v1506_v20  ;;  %v1509_v55 = vmul.f32 %v5812_v62, %v1506_v20 }
 0x230   :  { %v1187_v10 = vmax.f32 %v1171_v19, %v1178_v25  ;;  %v1418_v19 = vrot.slane %v1409_v4, 2  ;;  %v1480_v25 = vstv %s4715_s25  ;;  %s4728_s25 = sld [smem:[#allocation2 + $0x3b]] }
 0x232   :  { %v1191_v15 = vmul.f32 %v1187_v10, %v73_v2  ;;  %v1213_v34 = vmul.f32 %v1187_v10, %v89_v30  ;;  %1453 = vrot.lane.b32.xlu2 %v1449_v0, %s4946_s11  ;;  %v1420_v2 = vsel %vm258_vm1, %v1418_v19, %v1419_v23  ;;  %v1441_v30 = vmul.f32 %v5691_v63, %v1438_v49 }
 0x233   :  { %v1483_v10 = vmul.f32 %v5812_v62, %v1480_v25 }
 0x234   :  { %v1218_v27 = vsel %vm1193_vm3, %v1213_v34, 0.0  ;;  %v1198_v8 = vsel %vm1193_vm3, %v1191_v15, 0.0  ;;  %v5802_v13 = vpop.permute.xlu2 %1255  ;;  %v1450_v37 = vrot.slane %v1441_v30, 2  ;;  %v1556_v15 = vstv %s4718_s29  ;;  %v5824_v34 = vld [vmem:[%s8046_s0 + $0x18] sm:$0x7f]  ;;  %s4734_s29 = sld [smem:[#allocation2 + $0x41]] }
 0x235   :  { %v1219_v56 = vadd.f32 %v1218_v27, %v1217_v5  ;;  %v1199_v33 = vadd.f32 %v1198_v8, %v1197_v11  ;;  %v1508_v9 = vmul.f32 %v5824_v34, %v1506_v20  ;;  %v1481_v5 = vmul.f32 %v5830_v58, %v1480_v25 }
 0x236   :  { %v1452_v52 = vsel %vm258_vm1, %v1450_v37, %v1451_v1  ;;  %v1558_v11 = vmul.f32 %v5824_v34, %v1556_v15  ;;  %v1482_v27 = vmul.f32 %v5824_v34, %v1480_v25  ;;  %v1559_v45 = vmul.f32 %v5812_v62, %v1556_v15 }
 0x237   :  { %v1221_v35 = vadd.f32 %v1220_v46, %v1219_v56  ;;  %v1201_v6 = vadd.f32 %v1200_v54, %v1199_v33  ;;  %v1557_v56 = vmul.f32 %v5830_v58, %v1556_v15  ;;  %v5844_v54 = vld [vmem:[%s8046_s0 + $0x58] sm:$0x7f] }
 0x238   :  { %v1566_v33 = vrot.slane %v1558_v11, 1  ;;  %v1560_v29 = vmul.f32 %v5844_v54, %v1556_v15  ;;  %v1568_v12 = vrot.slane %v1559_v45, 1 }
 0x239   :  { %1222 = vadd.xlane.f32.xlu1 %v1221_v35  ;;  %1202 = vadd.xlane.f32.xlu0 %v1201_v6  ;;  %v1565_v46 = vrot.slane %v1557_v56, 1  ;;  %v1484_v35 = vmul.f32 %v5844_v54, %v1480_v25  ;;  %v1718_v56 = vstv %s4724_s14  ;;  %s4737_s14 = sld [smem:[#allocation2 + $0x44]] }
 0x23a   :  { %1459 = vrot.lane.b32.xlu2 %v1451_v1, %s4946_s11  ;;  %v1569_v28 = vrot.slane %v1560_v29, 1 }
 0x23b   :  { %v1567_v6 = vsel %vm169_vm0, %v1565_v46, %v1566_v33 }
 0x23c   :  { %v5816_v60 = vpop.permute.xlu2 %1257 }
 0x242   :  { %1493 = vrot.lane.b32.xlu2 %v1483_v10, %s4945_s6 }
 0x244   :  { %v5837_v8 = vpop.permute.xlu2 %1277 }
 0x24a   :  { %1517 = vrot.lane.b32.xlu2 %v1508_v9, %s4946_s11 }
 0x24d   :  { %1281 = vrot.lane.b32.xlu0 %v1271_v50, %s4946_s11  ;;  %v5852_v50 = vpop.permute.xlu2 %1279 }
 0x252   :  { %1283 = vrot.lane.b32.xlu1 %v1272_v18, %s4946_s11  ;;  %1571 = vrot.lane.b32.xlu2 %v1567_v6, %s4945_s6  ;;  %v1510_v18 = vmul.f32 %v5844_v54, %v1506_v20 }
 0x255   :  { %1337 = vrot.lane.b32.xlu0 %v1332_v44, %s4945_s6  ;;  %v5863_v22 = vpop.permute.xlu2 %1333  ;;  %v1644_v44 = vstv %s4721_s12  ;;  %s4768_s12 = sld [smem:[#allocation2 + $0x62]] }
 0x256   :  { %v1646_v49 = vmul.f32 %v5824_v34, %v1644_v44  ;;  %v1645_v4 = vmul.f32 %v5830_v58, %v1644_v44  ;;  %v1648_v1 = vmul.f32 %v5844_v54, %v1644_v44 }
 0x258   :  { %v1654_v32 = vrot.slane %v1646_v49, 2  ;;  %v1653_v19 = vrot.slane %v1645_v4, 2  ;;  %v1794_v49 = vstv %s4727_s18  ;;  %s4708_s18 = sld [smem:[#allocation2 + $0x27]] }
 0x25a   :  { %1365 = vrot.lane.b32.xlu1 %v1361_v59, %s4946_s11  ;;  %1577 = vrot.lane.b32.xlu2 %v1569_v28, %s4945_s6  ;;  %v1570_v59 = vsel %vm169_vm0, %v1568_v12, %v1569_v28  ;;  %v1655_v25 = vsel %vm258_vm1, %v1653_v19, %v1654_v32 }
 0x25d   :  { %1367 = vrot.lane.b32.xlu0 %v1360_v57, %s4946_s11  ;;  %v5875_v36 = vpop.permute.xlu2 %1335 }
 0x262   :  { %1371 = vrot.lane.b32.xlu1 %v1363_v61, %s4946_s11  ;;  %v1588_v61 = vstv %s4719_s10  ;;  %s4743_s10 = sld [smem:[#allocation2 + $0x49]] }
 0x263   :  { %v1592_v53 = vmul.f32 %v5844_v54, %v1588_v61  ;;  %v1591_v31 = vmul.f32 %v5812_v62, %v1588_v61  ;;  %v1589_v57 = vmul.f32 %v5830_v58, %v1588_v61  ;;  %v1590_v43 = vmul.f32 %v5824_v34, %v1588_v61 }
 0x265   :  { %1421 = vrot.lane.b32.xlu0 %v1417_v38, %s4945_s6  ;;  %v1601_v26 = vrot.slane %v1592_v53, 1  ;;  %v1600_v3 = vrot.slane %v1591_v31, 1  ;;  %v1597_v21 = vrot.slane %v1589_v57, 1  ;;  %v1598_v42 = vrot.slane %v1590_v43, 1  ;;  %v5886_v30 = vpop.permute.xlu2 %1339  ;;  %v5920_v57 = vld [vmem:[%s8046_s0 + $0x20] sm:$0xff] }
 0x266   :  { %8160 = vst [vmem:[#allocation21_spill] sm:$0xff] %v5920_v57  ;;  %v1719_v43 = vmul.f32 %v5920_v57, %v1718_v56 }
 0x267   :  { %v1602_v17 = vsel %vm169_vm0, %v1600_v3, %v1601_v26  ;;  %v1599_v39 = vsel %vm169_vm0, %v1597_v21, %v1598_v42 }
 0x268   :  { %1607 = vrot.lane.b32.xlu2 %v1602_v17, %s4946_s11 }
 0x26a   :  { %1425 = vrot.lane.b32.xlu1 %v1420_v2, %s4945_s6 }
 0x26d   :  { %1427 = vrot.lane.b32.xlu0 %v1419_v23, %s4945_s6  ;;  %v1647_v23 = vmul.f32 %v5812_v62, %v1644_v44  ;;  %v5914_v44 = vld [vmem:[%s8046_s0 + $0x28] sm:$0x7f] }
 0x26e   :  { %8159 = vst [vmem:[#allocation12_spill] sm:$0xff] %v5914_v44 }
 0x26f   :  { %v1656_v37 = vrot.slane %v1647_v23, 2 }
 0x270   :  { %1661 = vrot.lane.b32.xlu2 %v1654_v32, %s4945_s6  ;;  %v1796_v32 = vmul.f32 %v5914_v44, %v1794_v49 }
 0x272   :  { %1455 = vrot.lane.b32.xlu1 %v1448_v47, %s4946_s11  ;;  %v1676_v47 = vstv %s4722_s13  ;;  %s4753_s13 = sld [smem:[#allocation2 + $0x53]] }
 0x273   :  { %v1678_v0 = vmul.f32 %v5824_v34, %v1676_v47  ;;  %v1677_v51 = vmul.f32 %v5830_v58, %v1676_v47  ;;  %v1680_v10 = vmul.f32 %v5844_v54, %v1676_v47 }
 0x275   :  { %1457 = vrot.lane.b32.xlu0 %v1452_v52, %s4946_s11  ;;  %v1686_v40 = vrot.slane %v1678_v0, 2  ;;  %v1685_v38 = vrot.slane %v1677_v51, 2  ;;  %v1657_v52 = vrot.slane %v1648_v1, 2  ;;  %v1689_v20 = vrot.slane %v1680_v10, 2  ;;  %v5934_v51 = vld [vmem:[%s8046_s0 + $0x68] sm:$0x7f] }
 0x276   :  { %v1804_v0 = vrot.slane %v1796_v32, 1  ;;  %8161 = vst [vmem:[#allocation22_spill] sm:$0xff] %v5934_v51 }
 0x277   :  { %v1687_v2 = vsel %vm258_vm1, %v1685_v38, %v1686_v40  ;;  %v1658_v15 = vsel %vm258_vm1, %v1656_v37, %v1657_v52 }
 0x278   :  { %1691 = vrot.lane.b32.xlu2 %v1687_v2, %s4946_s11  ;;  %v1798_v2 = vmul.f32 %v5934_v51, %v1794_v49 }
 0x27a   :  { %1489 = vrot.lane.b32.xlu1 %v1481_v5, %s4945_s6  ;;  %v5894_v9 = vpop.permute.xlu2 %1369  ;;  %v1679_v5 = vmul.f32 %v5812_v62, %v1676_v47  ;;  %v1807_v37 = vrot.slane %v1798_v2, 1 }
 0x27d   :  { %1491 = vrot.lane.b32.xlu0 %v1482_v27, %s4945_s6 }
 0x280   :  { %1697 = vrot.lane.b32.xlu2 %v1689_v20, %s4946_s11 }
 0x282   :  { %1495 = vrot.lane.b32.xlu1 %v1484_v35, %s4945_s6  ;;  %v5902_v35 = vld [vmem:[%s8046_s0 + $0x60] sm:$0xff] }
 0x283   :  { %8158 = vst [vmem:[#allocation26_spill] sm:$0xff] %v5902_v35  ;;  %v1721_v6 = vmul.f32 %v5902_v35, %v1718_v56 }
 0x284   :  { %v5906_v53 = vpop.permute.xlu2 %1423 }
 0x285   :  { %1515 = vrot.lane.b32.xlu0 %v1507_v48, %s4946_s11  ;;  %v1688_v48 = vrot.slane %v1679_v5, 2 }
 0x288   :  { %1731 = vrot.lane.b32.xlu2 %v1721_v6, %s4945_s6 }
 0x28a   :  { %1519 = vrot.lane.b32.xlu1 %v1509_v55, %s4946_s11 }
 0x28c   :  { %v5926_v47 = vpop.permute.xlu2 %1453 }
 0x28d   :  { %1521 = vrot.lane.b32.xlu0 %v1510_v18, %s4946_s11  ;;  %v1690_v18 = vsel %vm258_vm1, %v1688_v48, %v1689_v20  ;;  %v1826_v20 = vstv %s4728_s25  ;;  %s4717_s25 = sld [smem:[#allocation2 + $0x30]] }
 0x28e   :  { %v1830_v5 = vmul.f32 %v5934_v51, %v1826_v20 }
 0x292   :  { %1573 = vrot.lane.b32.xlu1 %v1566_v33, %s4945_s6 }
 0x294   :  { %v5942_v1 = vpop.permute.xlu2 %1459 }
 0x295   :  { %1575 = vrot.lane.b32.xlu0 %v1570_v59, %s4945_s6 }
 0x29a   :  { %1603 = vrot.lane.b32.xlu1 %v1599_v39, %s4946_s11  ;;  %v1795_v39 = vmul.f32 %v5920_v57, %v1794_v49 }
 0x29c   :  { %v1803_v4 = vrot.slane %v1795_v39, 1 }
 0x29d   :  { %1605 = vrot.lane.b32.xlu0 %v1598_v42, %s4946_s11  ;;  %v1720_v42 = vmul.f32 %v5914_v44, %v1718_v56 }
 0x29e   :  { %v1805_v19 = vsel %vm169_vm0, %v1803_v4, %v1804_v0 }
 0x2a2   :  { %1609 = vrot.lane.b32.xlu1 %v1601_v26, %s4946_s11  ;;  %v1744_v26 = vstv %s4725_s15  ;;  %s4739_s15 = sld [smem:[#allocation2 + $0x46]] }
 0x2a3   :  { %v1746_v17 = vmul.f32 %v5914_v44, %v1744_v26  ;;  %v1745_v23 = vmul.f32 %v5920_v57, %v1744_v26  ;;  %v1747_v10 = vmul.f32 %v5902_v35, %v1744_v26 }
 0x2a5   :  { %1659 = vrot.lane.b32.xlu0 %v1655_v25, %s4945_s6  ;;  %1755 = vrot.lane.b32.xlu2 %v1746_v17, %s4946_s11 }
 0x2aa   :  { %1663 = vrot.lane.b32.xlu1 %v1658_v15, %s4945_s6  ;;  %v1748_v15 = vmul.f32 %v5934_v51, %v1744_v26 }
 0x2ac   :  { %v1223_v11 = vpop.xlane.xlu1 %1222  ;;  %v1203_v27 = vpop.xlane.xlu0 %1202 }
 0x2ad   :  { %v1224_v33 = vrot.slane %v1223_v11, 4  ;;  %v1204_v46 = vrot.slane %v1203_v27, 4  ;;  %1665 = vrot.lane.b32.xlu0 %v1657_v52, %s4945_s6  ;;  %1809 = vrot.lane.b32.xlu2 %v1805_v19, %s4945_s6 }
 0x2af   :  { %v1225_v29 = vadd.f32 %v1224_v33, %v1223_v11  ;;  %v1205_v28 = vadd.f32 %v1204_v46, %v1203_v27  ;;  %v5955_v11 = vpop.permute.xlu2 %1493  ;;  %v1797_v27 = vmul.f32 %v5902_v35, %v1794_v49  ;;  %v1839_v46 = vrot.slane %v1830_v5, 1 }
 0x2b0   :  { %v1914_v49 = vstv %s4731_s27  ;;  %s4762_s27 = sld [smem:[#allocation2 + $0x5c]] }
 0x2b1   :  { %v1206_v55 = vrot.slane %v1205_v28, 2  ;;  %v1226_v61 = vrot.slane %v1225_v29, 2  ;;  %v1806_v48 = vrot.slane %v1797_v27, 1  ;;  %v1918_v27 = vmul.f32 %v5934_v51, %v1914_v49 }
 0x2b2   :  { %1693 = vrot.lane.b32.xlu1 %v1686_v40, %s4946_s11  ;;  %v1722_v40 = vmul.f32 %v5934_v51, %v1718_v56  ;;  %v1829_v56 = vmul.f32 %v5902_v35, %v1826_v20 }
 0x2b3   :  { %v1207_v45 = vadd.f32 %v1206_v55, %v1205_v28  ;;  %v1227_v31 = vadd.f32 %v1226_v61, %v1225_v29  ;;  %v1827_v28 = vmul.f32 %v5920_v57, %v1826_v20  ;;  %v1828_v55 = vmul.f32 %v5914_v44, %v1826_v20 }
 0x2b4   :  { %v1838_v6 = vrot.slane %v1829_v56, 1  ;;  %v1882_v61 = vstv %s4730_s26  ;;  %s4777_s26 = sld [smem:[#allocation2 + $0x6b]] }
 0x2b5   :  { %1695 = vrot.lane.b32.xlu0 %v1690_v18, %s4946_s11  ;;  %v1208_v3 = vrot.slane %v1207_v45, 1  ;;  %v1228_v12 = vrot.slane %v1227_v31, 1  ;;  %1815 = vrot.lane.b32.xlu2 %v1807_v37, %s4945_s6  ;;  %v1884_v26 = vmul.f32 %v5914_v44, %v1882_v61  ;;  %v1883_v39 = vmul.f32 %v5920_v57, %v1882_v61 }
 0x2b6   :  { %v1840_v18 = vsel %vm169_vm0, %v1838_v6, %v1839_v46 }
 0x2b7   :  { %v1209_v59 = vadd.f32 %v1208_v3, %v1207_v45  ;;  %v1229_v21 = vadd.f32 %v1228_v12, %v1227_v31  ;;  %v5969_v45 = vpop.permute.xlu2 %1517  ;;  %v1808_v31 = vsel %vm169_vm0, %v1806_v48, %v1807_v37  ;;  %v1835_v3 = vrot.slane %v1827_v28, 1 }
 0x2b8   :  { %v1836_v12 = vrot.slane %v1828_v55, 1  ;;  %v1886_v37 = vmul.f32 %v5934_v51, %v1882_v61  ;;  %v1927_v28 = vrot.slane %v1918_v27, 2 }
 0x2b9   :  { %4816 = vpush %v1209_v59 }
 0x2ba   :  { %4818 = vpush %v1229_v21  ;;  %1727 = vrot.lane.b32.xlu1 %v1719_v43, %s4945_s6  ;;  %v1892_v43 = vrot.slane %v1884_v26, 2  ;;  %v1837_v21 = vsel %vm169_vm0, %v1835_v3, %v1836_v12  ;;  %v1895_v6 = vrot.slane %v1886_v37, 2  ;;  %v1956_v26 = vstv %s4733_s28  ;;  %v6018_v3 = vld [vmem:[%s8046_s0 + $0x70] sm:$0xff]  ;;  %s4720_s28 = sld [smem:[#allocation2 + $0x33]] }
 0x2bb   :  { %8164 = vst [vmem:[#allocation11_spill] sm:$0xff] %v6018_v3  ;;  %v2032_v37 = vstv %s4736_s2  ;;  %s4732_s2 = sld [smem:[#allocation2 + $0x3f]] }
 0x2bd   :  { %1729 = vrot.lane.b32.xlu0 %v1720_v42, %s4945_s6  ;;  %1845 = vrot.lane.b32.xlu2 %v1840_v18, %s4946_s11  ;;  %v1916_v42 = vmul.f32 %v5914_v44, %v1914_v49 }
 0x2bf   :  { %v5937_v38 = vpop.permute.xlu0 %1281  ;;  %v5982_v32 = vpop.permute.xlu2 %1571 }
 0x2c2   :  { %1733 = vrot.lane.b32.xlu1 %v1722_v40, %s4945_s6  ;;  %v1924_v40 = vrot.slane %v1916_v42, 2 }
 0x2c4   :  { %v5946_v25 = vpop.permute.xlu1 %1283 }
 0x2c5   :  { %1753 = vrot.lane.b32.xlu0 %v1745_v23, %s4946_s11  ;;  %1899 = vrot.lane.b32.xlu2 %v1892_v43, %s4945_s6  ;;  %v1891_v23 = vrot.slane %v1883_v39, 2 }
 0x2c7   :  { %v5950_v52 = vpop.permute.xlu0 %1337  ;;  %v1893_v5 = vsel %vm258_vm1, %v1891_v23, %v1892_v43 }
 0x2ca   :  { %1757 = vrot.lane.b32.xlu1 %v1747_v10, %s4946_s11  ;;  %v1885_v10 = vmul.f32 %v5902_v35, %v1882_v61 }
 0x2cc   :  { %v5960_v33 = vpop.permute.xlu1 %1365  ;;  %v1894_v56 = vrot.slane %v1885_v10, 2  ;;  %v6040_v10 = vld [vmem:[%s8046_s0 + $0x30] sm:$0xff] }
 0x2cd   :  { %1759 = vrot.lane.b32.xlu0 %v1748_v15, %s4946_s11  ;;  %v5996_v15 = vpop.permute.xlu2 %1577  ;;  %8167 = vst [vmem:[#allocation25_spill] sm:$0xff] %v6040_v10 }
 0x2ce   :  { %8162 = vst [vmem:[#allocation23_spill] sm:$0xff] %v5996_v15  ;;  %v1896_v61 = vsel %vm258_vm1, %v1894_v56, %v1895_v6 }
 0x2cf   :  { %v5963_v29 = vpop.permute.xlu0 %1367 }
 0x2d2   :  { %1811 = vrot.lane.b32.xlu1 %v1804_v0, %s4945_s6  ;;  %v1915_v0 = vmul.f32 %v5920_v57, %v1914_v49 }
 0x2d4   :  { %v5974_v17 = vpop.permute.xlu1 %1371  ;;  %v1923_v19 = vrot.slane %v1915_v0, 2  ;;  %v1982_v0 = vstv %s4734_s29  ;;  %s4723_s29 = sld [smem:[#allocation2 + $0x36]] }
 0x2d5   :  { %1813 = vrot.lane.b32.xlu0 %v1808_v31, %s4945_s6  ;;  %v6008_v18 = vpop.permute.xlu2 %1607 }
 0x2d6   :  { %v1925_v20 = vsel %vm258_vm1, %v1923_v19, %v1924_v40  ;;  %8163 = vst [vmem:[#allocation24_spill] sm:$0xff] %v6008_v18  ;;  %v6034_v19 = vld [vmem:[%s8046_s0 + $0x38] sm:$0x7f] }
 0x2d7   :  { %v5977_v59 = vpop.permute.xlu0 %1421  ;;  %1929 = vrot.lane.b32.xlu2 %v1925_v20, %s4946_s11  ;;  %8166 = vst [vmem:[#allocation28_spill] sm:$0xff] %v6034_v19  ;;  %v1984_v23 = vmul.f32 %v6034_v19, %v1982_v0  ;;  %v2034_v27 = vmul.f32 %v6034_v19, %v2032_v37 }
 0x2da   :  { %1841 = vrot.lane.b32.xlu1 %v1837_v21, %s4946_s11 }
 0x2dc   :  { %v5987_v4 = vpop.permute.xlu1 %1425 }
 0x2dd   :  { %1843 = vrot.lane.b32.xlu0 %v1836_v12, %s4946_s11  ;;  %v1959_v12 = vmul.f32 %v6018_v3, %v1956_v26 }
 0x2df   :  { %v5990_v2 = vpop.permute.xlu0 %1427  ;;  %1935 = vrot.lane.b32.xlu2 %v1927_v28, %s4946_s11 }
 0x2e2   :  { %1847 = vrot.lane.b32.xlu1 %v1839_v46, %s4946_s11  ;;  %v1917_v46 = vmul.f32 %v5902_v35, %v1914_v49  ;;  %v6024_v49 = vpop.permute.xlu2 %1661 }
 0x2e3   :  { %8165 = vst [vmem:[#allocation17_spill] sm:$0xff] %v6024_v49 }
 0x2e4   :  { %v6001_v48 = vpop.permute.xlu1 %1455  ;;  %v1926_v43 = vrot.slane %v1917_v46, 2 }
 0x2e5   :  { %1897 = vrot.lane.b32.xlu0 %v1893_v5, %s4945_s6  ;;  %v1958_v5 = vmul.f32 %v6034_v19, %v1956_v26 }
 0x2e6   :  { %v1928_v42 = vsel %vm258_vm1, %v1926_v43, %v1927_v28 }
 0x2e7   :  { %v6004_v55 = vpop.permute.xlu0 %1457  ;;  %1969 = vrot.lane.b32.xlu2 %v1959_v12, %s4945_s6  ;;  %v6058_v12 = vld [vmem:[%s8046_s0 + $0x78] sm:$0x7f] }
 0x2e8   :  { %8169 = vst [vmem:[#allocation20_spill] sm:$0xff] %v6058_v12  ;;  %v1960_v43 = vmul.f32 %v6058_v12, %v1956_v26 }
 0x2ea   :  { %1901 = vrot.lane.b32.xlu1 %v1896_v61, %s4945_s6  ;;  %v6049_v56 = vpop.permute.xlu2 %1691  ;;  %v2042_v61 = vrot.slane %v2034_v27, 1 }
 0x2eb   :  { %8168 = vst [vmem:[#allocation14_spill] sm:$0xff] %v6049_v56 }
 0x2ec   :  { %v6012_v31 = vpop.permute.xlu1 %1489 }
 0x2ed   :  { %1903 = vrot.lane.b32.xlu0 %v1895_v6, %s4945_s6  ;;  %v2033_v6 = vmul.f32 %v6040_v10, %v2032_v37 }
 0x2ef   :  { %v6021_v21 = vpop.permute.xlu0 %1491  ;;  %1993 = vrot.lane.b32.xlu2 %v1984_v23, %s4946_s11  ;;  %v2041_v46 = vrot.slane %v2033_v6, 1 }
 0x2f1   :  { %v2043_v23 = vsel %vm169_vm0, %v2041_v46, %v2042_v61  ;;  %v2064_v46 = vstv %s4737_s14  ;;  %s4744_s14 = sld [smem:[#allocation2 + $0x4a]] }
 0x2f2   :  { %1931 = vrot.lane.b32.xlu1 %v1924_v40, %s4946_s11  ;;  %v1957_v40 = vmul.f32 %v6040_v10, %v1956_v26  ;;  %v6068_v27 = vpop.permute.xlu2 %1697  ;;  %v1985_v26 = vmul.f32 %v6018_v3, %v1982_v0 }
 0x2f3   :  { %8170 = vst [vmem:[#allocation29_spill] sm:$0xff] %v6068_v27  ;;  %v2035_v27 = vmul.f32 %v6018_v3, %v2032_v37 }
 0x2f4   :  { %v6028_v39 = vpop.permute.xlu1 %1495 }
 0x2f5   :  { %1933 = vrot.lane.b32.xlu0 %v1928_v42, %s4946_s11  ;;  %v2044_v57 = vrot.slane %v2035_v27, 1 }
 0x2f7   :  { %v6043_v20 = vpop.permute.xlu0 %1515  ;;  %2047 = vrot.lane.b32.xlu2 %v2043_v23, %s4945_s6  ;;  %v1986_v23 = vmul.f32 %v6058_v12, %v1982_v0 }
 0x2fa   :  { %1965 = vrot.lane.b32.xlu1 %v1957_v40, %s4945_s6  ;;  %v1983_v40 = vmul.f32 %v6040_v10, %v1982_v0  ;;  %v6081_v49 = vpop.permute.xlu2 %1731  ;;  %v2065_v0 = vmul.f32 %v6040_v10, %v2064_v46 }
 0x2fb   :  { %8173 = vst [vmem:[#allocation32_spill] sm:$0xff] %v6081_v49 }
 0x2fc   :  { %v6052_v28 = vpop.permute.xlu1 %1519 }
 0x2fd   :  { %1967 = vrot.lane.b32.xlu0 %v1958_v5, %s4945_s6  ;;  %v2036_v5 = vmul.f32 %v6058_v12, %v2032_v37 }
 0x2ff   :  { %v6061_v42 = vpop.permute.xlu0 %1521  ;;  %v2045_v35 = vrot.slane %v2036_v5, 1 }
 0x301   :  { %2053 = vrot.lane.b32.xlu2 %v2045_v35, %s4945_s6  ;;  %v2046_v49 = vsel %vm169_vm0, %v2044_v57, %v2045_v35 }
 0x302   :  { %1971 = vrot.lane.b32.xlu1 %v1960_v43, %s4945_s6  ;;  %v2068_v43 = vmul.f32 %v6058_v12, %v2064_v46 }
 0x304   :  { %v6070_v6 = vpop.permute.xlu1 %1573  ;;  %v2077_v5 = vrot.slane %v2068_v43, 1  ;;  %v2073_v43 = vrot.slane %v2065_v0, 1 }
 0x305   :  { %8171 = vst [vmem:[#allocation13_spill] sm:$0xff] %v6070_v6  ;;  %1991 = vrot.lane.b32.xlu0 %v1983_v40, %s4946_s11  ;;  %v2067_v40 = vmul.f32 %v6018_v3, %v2064_v46  ;;  %v2152_v6 = vstv %s4740_s16  ;;  %s4747_s16 = sld [smem:[#allocation2 + $0x4d]] }
 0x306   :  { %v2154_v35 = vmul.f32 %v6034_v19, %v2152_v6 }
 0x307   :  { %v6074_v51 = vpop.permute.xlu0 %1575  ;;  %v2076_v44 = vrot.slane %v2067_v40, 1  ;;  %v6096_v40 = vpop.permute.xlu2 %1755 }
 0x308   :  { %8172 = vst [vmem:[#allocation31_spill] sm:$0xff] %v6074_v51  ;;  %v2120_v51 = vstv %s4739_s15  ;;  %s4746_s15 = sld [smem:[#allocation2 + $0x4c]] }
 0x309   :  { %v2078_v37 = vsel %vm169_vm0, %v2076_v44, %v2077_v5  ;;  %8175 = vst [vmem:[#allocation33_spill] sm:$0xff] %v6096_v40  ;;  %v2121_v57 = vmul.f32 %v6040_v10, %v2120_v51  ;;  %v2123_v40 = vmul.f32 %v6018_v3, %v2120_v51 }
 0x30a   :  { %1995 = vrot.lane.b32.xlu1 %v1985_v26, %s4946_s11  ;;  %v2066_v26 = vmul.f32 %v6034_v19, %v2064_v46  ;;  %2083 = vrot.lane.b32.xlu2 %v2078_v37, %s4946_s11 }
 0x30c   :  { %v6084_v18 = vpop.permute.xlu1 %1603  ;;  %v2074_v27 = vrot.slane %v2066_v26, 1 }
 0x30d   :  { %1997 = vrot.lane.b32.xlu0 %v1986_v23, %s4946_s11  ;;  %v2122_v23 = vmul.f32 %v6034_v19, %v2120_v51  ;;  %v2124_v19 = vmul.f32 %v6058_v12, %v2120_v51 }
 0x30e   :  { %v2075_v44 = vsel %vm169_vm0, %v2073_v43, %v2074_v27 }
 0x30f   :  { %v6087_v56 = vpop.permute.xlu0 %1605  ;;  %v2130_v46 = vrot.slane %v2122_v23, 2  ;;  %v6112_v26 = vpop.permute.xlu2 %1809  ;;  %v2129_v23 = vrot.slane %v2121_v57, 2  ;;  %v2133_v57 = vrot.slane %v2124_v19, 2 }
 0x310   :  { %8174 = vst [vmem:[#allocation36_spill] sm:$0xff] %v6087_v56 }
 0x311   :  { %8177 = vst [vmem:[#allocation27_spill] sm:$0xff] %v6112_v26 }
 0x312   :  { %2049 = vrot.lane.b32.xlu1 %v2042_v61, %s4945_s6  ;;  %2137 = vrot.lane.b32.xlu2 %v2130_v46, %s4945_s6  ;;  %v2153_v61 = vmul.f32 %v6040_v10, %v2152_v6 }
 0x314   :  { %v6098_v56 = vpop.permute.xlu1 %1609  ;;  %v2161_v37 = vrot.slane %v2153_v61, 2  ;;  %v2132_v61 = vrot.slane %v2123_v40, 2  ;;  %v2155_v40 = vmul.f32 %v6018_v3, %v2152_v6 }
 0x315   :  { %2051 = vrot.lane.b32.xlu0 %v2046_v49, %s4945_s6  ;;  %v2162_v49 = vrot.slane %v2154_v35, 2  ;;  %v2156_v35 = vmul.f32 %v6058_v12, %v2152_v6 }
 0x317   :  { %v6101_v15 = vpop.permute.xlu0 %1659  ;;  %v2165_v26 = vrot.slane %v2156_v35, 2  ;;  %v2164_v35 = vrot.slane %v2155_v40, 2 }
 0x319   :  { %v2166_v6 = vsel %vm258_vm1, %v2164_v35, %v2165_v26 }
 0x31a   :  { %2079 = vrot.lane.b32.xlu1 %v2075_v44, %s4946_s11  ;;  %v2163_v44 = vsel %vm258_vm1, %v2161_v37, %v2162_v49  ;;  %v2134_v37 = vsel %vm258_vm1, %v2132_v61, %v2133_v57 }
 0x31b   :  { %2167 = vrot.lane.b32.xlu2 %v2163_v44, %s4946_s11  ;;  %v6129_v44 = vpop.permute.xlu2 %1815 }
 0x31c   :  { %v6109_v0 = vpop.permute.xlu1 %1663  ;;  %8179 = vst [vmem:[#allocation35_spill] sm:$0xff] %v6129_v44 }
 0x31d   :  { %8176 = vst [vmem:[#allocation34_spill] sm:$0xff] %v6109_v0  ;;  %2081 = vrot.lane.b32.xlu0 %v2074_v27, %s4946_s11  ;;  %v2131_v27 = vsel %vm258_vm1, %v2129_v23, %v2130_v46  ;;  %v1294_v0 = vstv %s4708_s18  ;;  %s4766_s18 = sld [smem:[#allocation2 + $0x60]] }
 0x31e   :  { %v1295_v23 = vmul.f32 %v5677_v7, %v1294_v0  ;;  %v1298_v35 = vmul.f32 %v5698_v14, %v1294_v0 }
 0x31f   :  { %v6114_v43 = vpop.permute.xlu0 %1665 }
 0x320   :  { %v1303_v44 = vrot.slane %v1295_v23, 1 }
 0x322   :  { %2085 = vrot.lane.b32.xlu1 %v2077_v5, %s4946_s11  ;;  %v1232_v5 = vstv %s4705_s17  ;;  %s4763_s17 = sld [smem:[#allocation2 + $0x5d]] }
 0x323   :  { %2173 = vrot.lane.b32.xlu2 %v2165_v26, %s4946_s11  ;;  %v1233_v19 = vmul.f32 %v5677_v7, %v1232_v5 }
 0x324   :  { %v6123_v10 = vpop.permute.xlu1 %1693 }
 0x325   :  { %2135 = vrot.lane.b32.xlu0 %v2131_v27, %s4945_s6  ;;  %v1296_v27 = vmul.f32 %v5684_v16, %v1294_v0  ;;  %v1263_v12 = vadd.f32 %v5782_v41, %v1233_v19  ;;  %v1236_v41 = vmul.f32 %v5698_v14, %v1232_v5  ;;  %v1382_v19 = vstv %s4711_s19  ;;  %s4773_s19 = sld [smem:[#allocation2 + $0x67]] }
 0x326   :  { %v1384_v23 = vmul.f32 %v5684_v16, %v1382_v19 }
 0x327   :  { %v6126_v51 = vpop.permute.xlu0 %1695  ;;  %v1289_v7 = vadd.f32 %v5837_v8, %v1263_v12 }
 0x328   :  { %8178 = vst [vmem:[#allocation30_spill] sm:$0xff] %v6126_v51  ;;  %v6143_v51 = vpop.permute.xlu2 %1845 }
 0x329   :  { %8181 = vst [vmem:[#allocation15_spill] sm:$0xff] %v6143_v51  ;;  %v1392_v51 = vrot.slane %v1384_v23, 2 }
 0x32a   :  { %2139 = vrot.lane.b32.xlu1 %v2134_v37, %s4945_s6  ;;  %v1304_v37 = vrot.slane %v1296_v27, 1 }
 0x32c   :  { %v6135_v46 = vpop.permute.xlu1 %1727  ;;  %v1305_v40 = vsel %vm169_vm0, %v1303_v44, %v1304_v37  ;;  %v1266_v44 = vadd.f32 %v5816_v60, %v1236_v41 }
 0x32d   :  { %2141 = vrot.lane.b32.xlu0 %v2133_v57, %s4945_s6  ;;  %v1234_v57 = vmul.f32 %v5684_v16, %v1232_v5  ;;  %v1313_v26 = vadd.f32 %v1305_v40, %v1289_v7 }
 0x32f   :  { %v6140_v61 = vpop.permute.xlu0 %1729  ;;  %v1264_v27 = vadd.f32 %v5791_v24, %v1234_v57  ;;  %v1345_v7 = vadd.f32 %v5863_v22, %v1313_v26  ;;  %v1292_v24 = vadd.f32 %v5946_v25, %v1266_v44 }
 0x330   :  { %8180 = vst [vmem:[#allocation16_spill] sm:$0xff] %v6140_v61  ;;  %v6167_v61 = vpop.permute.xlu2 %1899 }
 0x331   :  { %v1290_v14 = vadd.f32 %v5852_v50, %v1264_v27  ;;  %v6190_v50 = vld [vmem:[%s8046_s0 + $0x48] sm:$0x7f] }
 0x332   :  { %2169 = vrot.lane.b32.xlu1 %v2162_v49, %s4946_s11  ;;  %v6158_v49 = vld [vmem:[%s8046_s0] sm:$0xff] }
 0x333   :  { %8183 = vst [vmem:[#allocation18_spill] sm:$0xff] %v6158_v49  ;;  %v1383_v8 = vmul.f32 %v6158_v49, %v1382_v19  ;;  %v1314_v22 = vadd.f32 %v1304_v37, %v1290_v14 }
 0x334   :  { %v6148_v3 = vpop.permute.xlu1 %1733 }
 0x335   :  { %8182 = vst [vmem:[#allocation19_spill] sm:$0xff] %v6148_v3  ;;  %2171 = vrot.lane.b32.xlu0 %v2166_v6, %s4946_s11  ;;  %v1297_v6 = vmul.f32 %v5691_v63, %v1294_v0  ;;  %v1391_v16 = vrot.slane %v1383_v8, 2  ;;  %v6172_v3 = vld [vmem:[%s8046_s0 + $0x40] sm:$0xff]  ;;  %v1307_v63 = vrot.slane %v1298_v35, 1  ;;  %v1377_v0 = vadd.f32 %v5960_v33, %v1345_v7 }
 0x336   :  { %v1235_v49 = vmul.f32 %v6172_v3, %v1232_v5  ;;  %v1386_v33 = vmul.f32 %v6190_v50, %v1382_v19  ;;  %v1346_v37 = vadd.f32 %v5875_v36, %v1314_v22  ;;  %v1532_v36 = vstv %s4717_s25  ;;  %s4776_s25 = sld [smem:[#allocation2 + $0x6a]] }
 0x337   :  { %v6161_v12 = vpop.permute.xlu0 %1753  ;;  %v1306_v57 = vrot.slane %v1297_v6, 1  ;;  %v1393_v40 = vsel %vm258_vm1, %v1391_v16, %v1392_v51  ;;  %v1316_v5 = vadd.f32 %v1307_v63, %v1292_v24 }
 0x338   :  { %v1265_v23 = vadd.f32 %v5802_v13, %v1235_v49  ;;  %v1401_v8 = vadd.f32 %v1393_v40, %v1377_v0  ;;  %v1470_v49 = vstv %s4714_s24  ;;  %v6199_v35 = vpop.permute.xlu2 %1929  ;;  %v1378_v7 = vadd.f32 %v5963_v29, %v1346_v37  ;;  %s4761_s24 = sld [smem:[#allocation2 + $0x5b]] }
 0x339   :  { %v1308_v26 = vsel %vm169_vm0, %v1306_v57, %v1307_v63  ;;  %v1348_v27 = vadd.f32 %v5886_v30, %v1316_v5  ;;  %v1395_v24 = vrot.slane %v1386_v33, 2  ;;  %v1471_v63 = vmul.f32 %v5830_v58, %v1470_v49 }
 0x33a   :  { %v1291_v25 = vadd.f32 %v5937_v38, %v1265_v23  ;;  %v1433_v44 = vadd.f32 %v5977_v59, %v1401_v8  ;;  %v1385_v38 = vmul.f32 %v6172_v3, %v1382_v19  ;;  %v1533_v19 = vmul.f32 %v5830_v58, %v1532_v36 }
 0x33b   :  { %v1380_v16 = vadd.f32 %v5974_v17, %v1348_v27  ;;  %v1402_v40 = vadd.f32 %v1392_v51, %v1378_v7  ;;  %v1534_v17 = vmul.f32 %v5824_v34, %v1532_v36 }
 0x33c   :  { %v6177_v60 = vpop.permute.xlu1 %1757  ;;  %v1315_v6 = vadd.f32 %v1308_v26, %v1291_v25  ;;  %v1465_v59 = vadd.f32 %v5926_v47, %v1433_v44  ;;  %v1394_v0 = vrot.slane %v1385_v38, 2  ;;  %v1472_v38 = vmul.f32 %v5824_v34, %v1470_v49 }
 0x33d   :  { %v1404_v57 = vadd.f32 %v1395_v24, %v1380_v16  ;;  %v1434_v8 = vadd.f32 %v5906_v53, %v1402_v40  ;;  %v1542_v26 = vrot.slane %v1534_v17, 1 }
 0x33e   :  { %v1347_v30 = vadd.f32 %v5950_v52, %v1315_v6  ;;  %v1475_v5 = vadd.f32 %v1471_v63, %v1465_v59  ;;  %v1396_v47 = vsel %vm258_vm1, %v1394_v0, %v1395_v24  ;;  %v1541_v52 = vrot.slane %v1533_v19, 1 }
 0x33f   :  { %v6182_v41 = vpop.permute.xlu0 %1759  ;;  %v1436_v23 = vadd.f32 %v5990_v2, %v1404_v57  ;;  %v1474_v2 = vmul.f32 %v5844_v54, %v1470_v49  ;;  %v1466_v37 = vadd.f32 %v6001_v48, %v1434_v8  ;;  %v1620_v6 = vstv %s4720_s28  ;;  %s4745_s28 = sld [smem:[#allocation2 + $0x4b]] }
 0x340   :  { %v1379_v29 = vadd.f32 %v5894_v9, %v1347_v30  ;;  %v1501_v25 = vadd.f32 %v6012_v31, %v1475_v5  ;;  %v6219_v51 = vpop.permute.xlu2 %1935  ;;  %v1543_v31 = vsel %vm169_vm0, %v1541_v52, %v1542_v26  ;;  %v1622_v16 = vmul.f32 %v5824_v34, %v1620_v6 }
 0x341   :  { %v1468_v9 = vadd.f32 %v5942_v1, %v1436_v23  ;;  %v1621_v7 = vmul.f32 %v5830_v58, %v1620_v6  ;;  %v1473_v1 = vmul.f32 %v5812_v62, %v1470_v49  ;;  %v1476_v48 = vadd.f32 %v1472_v38, %v1466_v37 }
 0x342   :  { %v1403_v27 = vadd.f32 %v1396_v47, %v1379_v29  ;;  %v1527_v44 = vadd.f32 %v6043_v20, %v1501_v25  ;;  %v1536_v0 = vmul.f32 %v5844_v54, %v1532_v36  ;;  %v1535_v19 = vmul.f32 %v5812_v62, %v1532_v36 }
 0x343   :  { %v1478_v30 = vadd.f32 %v1474_v2, %v1468_v9  ;;  %v1630_v34 = vrot.slane %v1622_v16, 2  ;;  %v1629_v57 = vrot.slane %v1621_v7, 2  ;;  %v1623_v37 = vmul.f32 %v5812_v62, %v1620_v6 }
 0x344   :  { %v6195_v13 = vpop.permute.xlu1 %1811  ;;  %v1435_v53 = vadd.f32 %v5987_v4, %v1403_v27  ;;  %v1551_v59 = vadd.f32 %v1543_v31, %v1527_v44  ;;  %v1502_v4 = vadd.f32 %v6021_v21, %v1476_v48  ;;  %v1545_v29 = vrot.slane %v1536_v0, 1  ;;  %v8185_v44 = vld [vmem:[#allocation13_spill] sm:$0xff] }
 0x345   :  { %v1504_v63 = vadd.f32 %v6028_v39, %v1478_v30  ;;  %v1544_v21 = vrot.slane %v1535_v19, 1  ;;  %v1631_v36 = vsel %vm258_vm1, %v1629_v57, %v1630_v34  ;;  %v1624_v27 = vmul.f32 %v5844_v54, %v1620_v6  ;;  %v8187_v54 = vld [vmem:[#allocation31_spill] sm:$0xff] }
 0x346   :  { %v1467_v24 = vadd.f32 %v6004_v55, %v1435_v53  ;;  %v1583_v49 = vadd.f32 %v5982_v32, %v1551_v59  ;;  %v1528_v23 = vadd.f32 %v5969_v45, %v1502_v4  ;;  %v8184_v45 = vld [vmem:[#allocation23_spill] sm:$0xff]  ;;  %v1708_v38 = vstv %s4723_s29  ;;  %v8186_v53 = vld [vmem:[#allocation36_spill] sm:$0xff]  ;;  %v8189_v59 = vld [vmem:[#allocation21_spill] sm:$0xff]  ;;  %s4804_s29 = sld [smem:[#allocation2 + $0x85]] }
 0x347   :  { %v6203_v14 = vpop.permute.xlu0 %1813  ;;  %v1530_v40 = vadd.f32 %v6061_v42, %v1504_v63  ;;  %v1546_v8 = vsel %vm169_vm0, %v1544_v21, %v1545_v29  ;;  %v1633_v16 = vrot.slane %v1624_v27, 2  ;;  %v1709_v48 = vmul.f32 %v8189_v59, %v1708_v38  ;;  %v8190_v4 = vld [vmem:[#allocation12_spill] sm:$0xff] }
 0x348   :  { %v1477_v55 = vadd.f32 %v1473_v1, %v1467_v24  ;;  %v6242_v17 = vpop.permute.xlu2 %1969  ;;  %v1615_v39 = vadd.f32 %v6084_v18, %v1583_v49  ;;  %v1552_v25 = vadd.f32 %v1542_v26, %v1528_v23  ;;  %v8188_v1 = vld [vmem:[#allocation14_spill] sm:$0xff]  ;;  %v1632_v0 = vrot.slane %v1623_v37, 2 }
 0x349   :  { %v1554_v47 = vadd.f32 %v1545_v29, %v1530_v40  ;;  %v1858_v37 = vstv %s4729_s30  ;;  %s4748_s30 = sld [smem:[#allocation2 + $0x4e]] }
 0x34a   :  { %v1503_v5 = vadd.f32 %v5955_v11, %v1477_v55  ;;  %v1639_v42 = vadd.f32 %v1631_v36, %v1615_v39  ;;  %v1584_v11 = vadd.f32 %v8185_v44, %v1552_v25  ;;  %v8191_v55 = vld [vmem:[#allocation24_spill] sm:$0xff]  ;;  %v1634_v39 = vsel %vm258_vm1, %v1632_v0, %v1633_v16  ;;  %v8192_v36 = vld [vmem:[#allocation17_spill] sm:$0xff]  ;;  %v8194_v25 = vld [vmem:[#allocation22_spill] sm:$0xff] }
 0x34b   :  { %v1586_v9 = vadd.f32 %v8184_v45, %v1554_v47 }
 0x34c   :  { %v6212_v22 = vpop.permute.xlu1 %1841  ;;  %v1529_v32 = vadd.f32 %v6052_v28, %v1503_v5  ;;  %v1671_v2 = vadd.f32 %v6101_v15, %v1639_v42  ;;  %v1616_v26 = vadd.f32 %v8186_v53, %v1584_v11  ;;  %v1770_v15 = vstv %s4726_s1  ;;  %v8193_v42 = vld [vmem:[#allocation29_spill] sm:$0xff]  ;;  %s4764_s1 = sld [smem:[#allocation2 + $0x5e]] }
 0x34d   :  { %v1618_v28 = vadd.f32 %v6098_v56, %v1586_v9  ;;  %v1771_v62 = vmul.f32 %v8189_v59, %v1770_v15  ;;  %v1772_v19 = vmul.f32 %v8190_v4, %v1770_v15  ;;  %v1710_v9 = vmul.f32 %v8190_v4, %v1708_v38 }
 0x34e   :  { %v1553_v31 = vadd.f32 %v1546_v8, %v1529_v32  ;;  %v1703_v30 = vadd.f32 %v8188_v1, %v1671_v2  ;;  %v1640_v56 = vadd.f32 %v1630_v34, %v1616_v26  ;;  %v1712_v8 = vmul.f32 %v8194_v25, %v1708_v38 }
 0x34f   :  { %v6217_v33 = vpop.permute.xlu0 %1843  ;;  %v1642_v6 = vadd.f32 %v1633_v16, %v1618_v28  ;;  %v1779_v23 = vrot.slane %v1771_v62, 1  ;;  %v1780_v47 = vrot.slane %v1772_v19, 1  ;;  %v1859_v28 = vmul.f32 %v8189_v59, %v1858_v37  ;;  %v8197_v16 = vld [vmem:[#allocation26_spill] sm:$0xff]  ;;  %v8199_v62 = vld [vmem:[#allocation16_spill] sm:$0xff] }
 0x350   :  { %v6261_v7 = vpop.permute.xlu2 %1993  ;;  %v1585_v24 = vadd.f32 %v8187_v54, %v1553_v31  ;;  %v1713_v29 = vadd.f32 %v1709_v48, %v1703_v30  ;;  %v1672_v5 = vadd.f32 %v8192_v36, %v1640_v56  ;;  %v1860_v31 = vmul.f32 %v8190_v4, %v1858_v37  ;;  %v8198_v30 = vld [vmem:[#allocation19_spill] sm:$0xff] }
 0x351   :  { %v1674_v40 = vadd.f32 %v6114_v43, %v1642_v6  ;;  %v1781_v2 = vsel %vm169_vm0, %v1779_v23, %v1780_v47  ;;  %v1711_v54 = vmul.f32 %v8197_v16, %v1708_v38  ;;  %v1774_v0 = vmul.f32 %v8194_v25, %v1770_v15  ;;  %v8201_v23 = vld [vmem:[#allocation33_spill] sm:$0xff] }
 0x352   :  { %v1617_v49 = vadd.f32 %v8191_v55, %v1585_v24  ;;  %v1739_v21 = vadd.f32 %v6135_v46, %v1713_v29  ;;  %v1704_v43 = vadd.f32 %v6123_v10, %v1672_v5  ;;  %v8195_v46 = vld [vmem:[#allocation34_spill] sm:$0xff]  ;;  %v1773_v56 = vmul.f32 %v8197_v16, %v1770_v15  ;;  %v8200_v55 = vld [vmem:[#allocation27_spill] sm:$0xff] }
 0x353   :  { %v1706_v34 = vadd.f32 %v8193_v42, %v1674_v40  ;;  %v1868_v4 = vrot.slane %v1860_v31, 2  ;;  %v1867_v19 = vrot.slane %v1859_v28, 2  ;;  %v1783_v38 = vrot.slane %v1774_v0, 1  ;;  %v8202_v42 = vld [vmem:[#allocation32_spill] sm:$0xff] }
 0x354   :  { %v6232_v20 = vpop.permute.xlu1 %1847  ;;  %v1641_v32 = vadd.f32 %v1634_v39, %v1617_v49  ;;  %v1765_v27 = vadd.f32 %v6161_v12, %v1739_v21  ;;  %v8196_v12 = vld [vmem:[#allocation30_spill] sm:$0xff]  ;;  %v1714_v1 = vadd.f32 %v1710_v9, %v1704_v43  ;;  %v1782_v36 = vrot.slane %v1773_v56, 1 }
 0x355   :  { %v1716_v10 = vadd.f32 %v1712_v8, %v1706_v34  ;;  %v1869_v5 = vsel %vm258_vm1, %v1867_v19, %v1868_v4 }
 0x356   :  { %v1673_v11 = vadd.f32 %v8195_v46, %v1641_v32  ;;  %v1789_v24 = vadd.f32 %v1781_v2, %v1765_v27  ;;  %v1740_v6 = vadd.f32 %v8199_v62, %v1714_v1  ;;  %v1784_v9 = vsel %vm169_vm0, %v1782_v36, %v1783_v38  ;;  %v8203_v2 = vld [vmem:[#allocation35_spill] sm:$0xff] }
 0x357   :  { %v6238_v58 = vpop.permute.xlu0 %1897  ;;  %v1742_v48 = vadd.f32 %v8198_v30, %v1716_v10  ;;  %v8204_v30 = vld [vmem:[#allocation25_spill] sm:$0xff] }
 0x358   :  { %v6285_v44 = vpop.permute.xlu2 %2047  ;;  %v1705_v26 = vadd.f32 %v8196_v12, %v1673_v11  ;;  %v1821_v49 = vadd.f32 %v8200_v55, %v1789_v24  ;;  %v1766_v21 = vadd.f32 %v8201_v23, %v1740_v6  ;;  %v1861_v12 = vmul.f32 %v8197_v16, %v1858_v37 }
 0x359   :  { %v1768_v40 = vadd.f32 %v6182_v41, %v1742_v48  ;;  %v2008_v48 = vstv %s4735_s7  ;;  %s4749_s7 = sld [smem:[#allocation2 + $0x4f]] }
 0x35a   :  { %v1715_v59 = vadd.f32 %v1711_v54, %v1705_v26  ;;  %v1853_v39 = vadd.f32 %v6212_v22, %v1821_v49  ;;  %v1790_v43 = vadd.f32 %v1780_v47, %v1766_v21  ;;  %v1862_v22 = vmul.f32 %v8194_v25, %v1858_v37  ;;  %v8207_v21 = vld [vmem:[#allocation20_spill] sm:$0xff] }
 0x35b   :  { %v1792_v8 = vadd.f32 %v1783_v38, %v1768_v40  ;;  %v1946_v26 = vstv %s4732_s2  ;;  %v1870_v0 = vrot.slane %v1861_v12, 2  ;;  %s4785_s2 = sld [smem:[#allocation2 + $0x72]] }
 0x35c   :  { %v6248_v52 = vpop.permute.xlu1 %1901  ;;  %v1741_v34 = vadd.f32 %v8202_v42, %v1715_v59  ;;  %v1877_v27 = vadd.f32 %v1869_v5, %v1853_v39  ;;  %v1822_v28 = vadd.f32 %v6195_v13, %v1790_v43  ;;  %v1871_v10 = vrot.slane %v1862_v22, 2 }
 0x35d   :  { %v1824_v46 = vadd.f32 %v8203_v2, %v1792_v8  ;;  %v2009_v13 = vmul.f32 %v8204_v30, %v2008_v48  ;;  %v1950_v36 = vmul.f32 %v8207_v21, %v1946_v26 }
 0x35e   :  { %v1767_v41 = vadd.f32 %v6177_v60, %v1741_v34  ;;  %v1909_v11 = vadd.f32 %v6238_v58, %v1877_v27  ;;  %v1854_v47 = vadd.f32 %v6217_v33, %v1822_v28  ;;  %v1947_v58 = vmul.f32 %v8204_v30, %v1946_v26  ;;  %v8206_v33 = vld [vmem:[#allocation15_spill] sm:$0xff] }
 0x35f   :  { %v6253_v18 = vpop.permute.xlu0 %1903  ;;  %v1856_v60 = vadd.f32 %v6232_v20, %v1824_v46  ;;  %v8205_v20 = vld [vmem:[#allocation28_spill] sm:$0xff]  ;;  %v2017_v55 = vrot.slane %v2009_v13, 1 }
 0x360   :  { %v6305_v15 = vpop.permute.xlu2 %2053  ;;  %v1791_v54 = vadd.f32 %v1784_v9, %v1767_v41  ;;  %v1941_v1 = vadd.f32 %v6199_v35, %v1909_v11  ;;  %v1878_v16 = vadd.f32 %v1868_v4, %v1854_v47  ;;  %v2010_v6 = vmul.f32 %v8205_v20, %v2008_v48 }
 0x361   :  { %v1880_v37 = vadd.f32 %v1871_v10, %v1856_v60  ;;  %v1872_v35 = vsel %vm258_vm1, %v1870_v0, %v1871_v10  ;;  %v2096_v41 = vstv %s4738_s8  ;;  %v2012_v11 = vmul.f32 %v8207_v21, %v2008_v48  ;;  %s4750_s8 = sld [smem:[#allocation2 + $0x50]] }
 0x362   :  { %v1823_v25 = vadd.f32 %v6203_v14, %v1791_v54  ;;  %v1951_v14 = vadd.f32 %v1947_v58, %v1941_v1  ;;  %v1910_v40 = vadd.f32 %v6167_v61, %v1878_v16  ;;  %v2018_v38 = vrot.slane %v2010_v6, 1 }
 0x363   :  { %v1912_v19 = vadd.f32 %v6253_v18, %v1880_v37  ;;  %v1948_v18 = vmul.f32 %v8205_v20, %v1946_v26  ;;  %v2097_v27 = vmul.f32 %v8204_v30, %v2096_v41 }
 0x364   :  { %v6266_v63 = vpop.permute.xlu1 %1931  ;;  %v1855_v56 = vadd.f32 %v8206_v33, %v1823_v25  ;;  %v2019_v34 = vsel %vm169_vm0, %v2017_v55, %v2018_v38 }
 0x365   :  { %v1944_v4 = vadd.f32 %v6219_v51, %v1912_v19  ;;  %v1942_v42 = vadd.f32 %v6266_v63, %v1910_v40  ;;  %v8208_v51 = vld [vmem:[#allocation11_spill] sm:$0xff]  ;;  %v2105_v60 = vrot.slane %v2097_v27, 2 }
 0x366   :  { %v1879_v23 = vadd.f32 %v1872_v35, %v1855_v56  ;;  %v1949_v9 = vmul.f32 %v8208_v51, %v1946_v26  ;;  %v2011_v28 = vmul.f32 %v8208_v51, %v2008_v48  ;;  %v2021_v26 = vrot.slane %v2012_v11, 1 }
 0x367   :  { %v6270_v57 = vpop.permute.xlu0 %1933  ;;  %v1954_v22 = vadd.f32 %v1950_v36, %v1944_v4  ;;  %v1952_v63 = vadd.f32 %v1948_v18, %v1942_v42  ;;  %v2184_v56 = vstv %s4741_s9  ;;  %v2099_v19 = vmul.f32 %v8208_v51, %v2096_v41  ;;  %s4752_s9 = sld [smem:[#allocation2 + $0x52]] }
 0x368   :  { %v6323_v62 = vpop.permute.xlu2 %2083  ;;  %v1911_v8 = vadd.f32 %v6248_v52, %v1879_v23  ;;  %v2020_v30 = vrot.slane %v2011_v28, 1 }
 0x369   :  { %v2108_v23 = vrot.slane %v2099_v19, 2 }
 0x36a   :  { %v1943_v43 = vadd.f32 %v6270_v57, %v1911_v8 }
 0x36c   :  { %v6280_v45 = vpop.permute.xlu1 %1965  ;;  %v1953_v47 = vadd.f32 %v1949_v9, %v1943_v43 }
 0x36d   :  { %v1977_v49 = vadd.f32 %v6280_v45, %v1951_v14  ;;  %v2098_v45 = vmul.f32 %v8205_v20, %v2096_v41 }
 0x36e   :  { %v1979_v58 = vadd.f32 %v6242_v17, %v1953_v47 }
 0x36f   :  { %v6290_v53 = vpop.permute.xlu0 %1967  ;;  %v2106_v54 = vrot.slane %v2098_v45, 2 }
 0x370   :  { %v2138_v61 = vpop.permute.xlu2 %2137  ;;  %v1978_v52 = vadd.f32 %v6290_v53, %v1952_v63 }
 0x372   :  { %v2004_v1 = vadd.f32 %v6261_v7, %v1978_v52  ;;  %v2100_v7 = vmul.f32 %v8207_v21, %v2096_v41 }
 0x374   :  { %v6300_v29 = vpop.permute.xlu1 %1971  ;;  %v2028_v16 = vadd.f32 %v2018_v38, %v2004_v1  ;;  %v2109_v40 = vrot.slane %v2100_v7, 2  ;;  %v8209_v1 = vld [vmem:[#allocation18_spill] sm:$0xff] }
 0x375   :  { %v1980_v46 = vadd.f32 %v6300_v29, %v1954_v22  ;;  %v2107_v29 = vsel %vm258_vm1, %v2105_v60, %v2106_v54 }
 0x376   :  { %v2110_v18 = vsel %vm258_vm1, %v2108_v23, %v2109_v40 }
 0x377   :  { %v1992_v32 = vpop.permute.xlu0 %1991 }
 0x378   :  { %v2003_v5 = vadd.f32 %v1992_v32, %v1977_v49  ;;  %v2168_v48 = vpop.permute.xlu2 %2167 }
 0x37a   :  { %v2027_v32 = vadd.f32 %v2019_v34, %v2003_v5 }
 0x37c   :  { %v6313_v31 = vpop.permute.xlu1 %1995  ;;  %v2059_v57 = vadd.f32 %v6285_v44, %v2027_v32  ;;  %v2022_v44 = vsel %vm169_vm0, %v2020_v30, %v2021_v26 }
 0x37d   :  { %v2005_v13 = vadd.f32 %v6313_v31, %v1979_v58 }
 0x37f   :  { %v1998_v24 = vpop.permute.xlu0 %1997  ;;  %v2029_v17 = vadd.f32 %v2022_v44, %v2005_v13 }
 0x380   :  { %v2006_v10 = vadd.f32 %v1998_v24, %v1980_v46  ;;  %v2174_v42 = vpop.permute.xlu2 %2173 }
 0x382   :  { %v2030_v53 = vadd.f32 %v2021_v26, %v2006_v10 }
 0x384   :  { %v2050_v59 = vpop.permute.xlu1 %2049  ;;  %v2062_v20 = vadd.f32 %v6305_v15, %v2030_v53 }
 0x385   :  { %v2060_v33 = vadd.f32 %v2050_v59, %v2028_v16 }
 0x387   :  { %v2052_v39 = vpop.permute.xlu0 %2051 }
 0x388   :  { %v2061_v49 = vadd.f32 %v2052_v39, %v2029_v17 }
 0x38a   :  { %v2093_v59 = vadd.f32 %v6323_v62, %v2061_v49 }
 0x38c   :  { %v2080_v2 = vpop.permute.xlu1 %2079  ;;  %v2117_v8 = vadd.f32 %v2110_v18, %v2093_v59 }
 0x38d   :  { %v2091_v25 = vadd.f32 %v2080_v2, %v2059_v57 }
 0x38f   :  { %v2082_v12 = vpop.permute.xlu0 %2081  ;;  %v2115_v37 = vadd.f32 %v2107_v29, %v2091_v25  ;;  %v2374_v25 = vstv %s4743_s10  ;;  %v6449_v29 = vld [vmem:[%s8046_s0 + $0x8] sm:$0x7f]  ;;  %s4767_s10 = sld [smem:[#allocation2 + $0x61]] }
 0x390   :  { %v2092_v55 = vadd.f32 %v2082_v12, %v2060_v33  ;;  %v2375_v30 = vmul.f32 %v8209_v1, %v2374_v25  ;;  %v2376_v58 = vmul.f32 %v6449_v29, %v2374_v25 }
 0x392   :  { %v2116_v15 = vadd.f32 %v2106_v54, %v2092_v55 }
 0x394   :  { %v2086_v0 = vpop.permute.xlu1 %2085  ;;  %v2148_v39 = vadd.f32 %v2138_v61, %v2116_v15 }
 0x395   :  { %v2094_v14 = vadd.f32 %v2086_v0, %v2062_v20  ;;  %v2377_v0 = vmul.f32 %v6172_v3, %v2374_v25 }
 0x397   :  { %v2136_v24 = vpop.permute.xlu0 %2135  ;;  %v2118_v36 = vadd.f32 %v2109_v40, %v2094_v14  ;;  %v6465_v14 = vstv %s4746_s15  ;;  %s4757_s15 = sld [smem:[#allocation2 + $0x57]] }
 0x398   :  { %v2147_v6 = vadd.f32 %v2136_v24, %v2115_v37  ;;  %v2378_v37 = vmul.f32 %v6190_v50, %v2374_v25  ;;  %v6457_v24 = vstv %s4744_s14  ;;  %v2451_v55 = vmul.f32 %v8209_v1, %v6465_v14  ;;  %s4754_s14 = sld [smem:[#allocation2 + $0x54]] }
 0x399   :  { %v2401_v20 = vmul.f32 %v8209_v1, %v6457_v24  ;;  %v2452_v49 = vmul.f32 %v6449_v29, %v6465_v14 }
 0x39a   :  { %v2179_v35 = vadd.f32 %v2168_v48, %v2147_v6 }
 0x39b   :  { %v2460_v40 = vrot.slane %v2452_v49, 1 }
 0x39c   :  { %v2185_v31 = vadd.f32 %v2184_v56, %v2179_v35  ;;  %v2140_v38 = vpop.permute.xlu1 %2139 }
 0x39d   :  { %v2149_v43 = vadd.f32 %v2140_v38, %v2117_v8 }
 0x39e   :  { %v6354_v4 = vmax.f32 %v2185_v31, 0.0  ;;  %v2459_v31 = vrot.slane %v2451_v55, 1 }
 0x39f   :  { %v2142_v5 = vpop.permute.xlu0 %2141 }
 0x3a0   :  { %v2150_v21 = vadd.f32 %v2142_v5, %v2118_v36  ;;  %2197 = vrot.lane.b32.xlu1 %v6354_v4, %s4945_s6  ;;  %v2229_v46 = vrot.slane %v6354_v4, 1  ;;  %v2275_v10 = vrot.slane %v6354_v4, 2  ;;  %v2461_v38 = vsel %vm169_vm0, %v2459_v31, %v2460_v40 }
 0x3a2   :  { %v2182_v34 = vadd.f32 %v2174_v42, %v2150_v21 }
 0x3a4   :  { %v2188_v41 = vadd.f32 %v2184_v56, %v2182_v34  ;;  %v2170_v45 = vpop.permute.xlu1 %2169  ;;  %v6476_v34 = vstv %s4747_s16  ;;  %s4755_s16 = sld [smem:[#allocation2 + $0x55]] }
 0x3a5   :  { %v2180_v27 = vadd.f32 %v2170_v45, %v2148_v39  ;;  %v2483_v8 = vmul.f32 %v8209_v1, %v6476_v34 }
 0x3a6   :  { %v6360_v51 = vmax.f32 %v2188_v41, 0.0  ;;  %v6482_v41 = vmul.f32 %v6449_v29, %v6476_v34 }
 0x3a7   :  { %v2186_v9 = vadd.f32 %v2184_v56, %v2180_v27  ;;  %v2172_v22 = vpop.permute.xlu0 %2171 }
 0x3a8   :  { %v2181_v32 = vadd.f32 %v2172_v22, %v2149_v43  ;;  %2203 = vrot.lane.b32.xlu1 %v6360_v51, %s4945_s6  ;;  %v6396_v28 = vrot.slane %v6360_v51, 1  ;;  %v6412_v60 = vrot.slane %v6360_v51, 2  ;;  %v2491_v43 = vrot.slane %v2483_v8, 1 }
 0x3a9   :  { %v6364_v62 = vmax.f32 %v2186_v9, 0.0  ;;  %v2492_v9 = vrot.slane %v6482_v41, 1 }
 0x3aa   :  { %v2187_v2 = vadd.f32 %v2184_v56, %v2181_v32  ;;  %v2404_v56 = vmul.f32 %v6190_v50, %v6457_v24 }
 0x3ab   :  { %2199 = vrot.lane.b32.xlu0 %v6364_v62, %s4945_s6  ;;  %v6379_v63 = vrot.slane %v6364_v62, 1  ;;  %v6417_v47 = vrot.slane %v6364_v62, 2 }
 0x3ac   :  { %v6368_v61 = vmax.f32 %v2187_v2, 0.0 }
 0x3ad   :  { %v6388_v11 = vsel %vm169_vm0, %v2229_v46, %v6379_v63  ;;  %v6428_v26 = vsel %vm258_vm1, %v2275_v10, %v6417_v47 }
 0x3ae   :  { %2201 = vrot.lane.b32.xlu2 %v6368_v61, %s4945_s6  ;;  %v2232_v52 = vrot.slane %v6368_v61, 1  ;;  %v2278_v54 = vrot.slane %v6368_v61, 2 }
 0x3b0   :  { %2217 = vrot.lane.b32.xlu1 %v6368_v61, %s4946_s11  ;;  %v6400_v12 = vsel %vm169_vm0, %v2232_v52, %v6396_v28  ;;  %v6421_v57 = vsel %vm258_vm1, %v2278_v54, %v6412_v60 }
 0x3b3   :  { %2213 = vrot.lane.b32.xlu0 %v6354_v4, %s4946_s11 }
 0x3b6   :  { %2215 = vrot.lane.b32.xlu2 %v6364_v62, %s4946_s11 }
 0x3b8   :  { %2245 = vrot.lane.b32.xlu1 %v6379_v63, %s4945_s6 }
 0x3bb   :  { %2219 = vrot.lane.b32.xlu0 %v6360_v51, %s4946_s11 }
 0x3be   :  { %2243 = vrot.lane.b32.xlu2 %v6388_v11, %s4945_s6 }
 0x3c0   :  { %2259 = vrot.lane.b32.xlu1 %v6388_v11, %s4946_s11 }
 0x3c3   :  { %2247 = vrot.lane.b32.xlu0 %v6400_v12, %s4945_s6 }
 0x3c6   :  { %2249 = vrot.lane.b32.xlu2 %v6396_v28, %s4945_s6 }
 0x3c8   :  { %2265 = vrot.lane.b32.xlu1 %v6396_v28, %s4946_s11 }
 0x3cb   :  { %2261 = vrot.lane.b32.xlu0 %v6379_v63, %s4946_s11 }
 0x3ce   :  { %2263 = vrot.lane.b32.xlu2 %v6400_v12, %s4946_s11 }
 0x3d0   :  { %2293 = vrot.lane.b32.xlu1 %v6421_v57, %s4945_s6 }
 0x3d3   :  { %2289 = vrot.lane.b32.xlu0 %v6428_v26, %s4945_s6 }
 0x3d6   :  { %2291 = vrot.lane.b32.xlu2 %v6417_v47, %s4945_s6 }
 0x3d8   :  { %2307 = vrot.lane.b32.xlu1 %v6417_v47, %s4946_s11 }
 0x3db   :  { %2295 = vrot.lane.b32.xlu0 %v6412_v60, %s4945_s6 }
 0x3de   :  { %2305 = vrot.lane.b32.xlu2 %v6428_v26, %s4946_s11 }
 0x3e3   :  { %2309 = vrot.lane.b32.xlu0 %v6421_v57, %s4946_s11 }
 0x3e6   :  { %2311 = vrot.lane.b32.xlu2 %v6412_v60, %s4946_s11 }
 0x3ee   :  { %2383 = vrot.lane.b32.xlu2 %v2375_v30, %s4945_s6 }
 0x3f6   :  { %2385 = vrot.lane.b32.xlu2 %v2376_v58, %s4945_s6 }
 0x3fe   :  { %2387 = vrot.lane.b32.xlu2 %v2377_v0, %s4945_s6 }
 0x406   :  { %2389 = vrot.lane.b32.xlu2 %v2378_v37, %s4945_s6 }
 0x408   :  { %v2202_v53 = vpop.permute.xlu2 %2201 }
 0x409   :  { %v2211_v2 = vmax.f32 %v6368_v61, %v2202_v53 }
 0x40e   :  { %2409 = vrot.lane.b32.xlu2 %v2401_v20, %s4946_s11 }
 0x410   :  { %v2216_v13 = vpop.permute.xlu2 %2215 }
 0x412   :  { %v2198_v48 = vpop.permute.xlu1 %2197 }
 0x413   :  { %v2209_v42 = vmax.f32 %v6354_v4, %v2198_v48 }
 0x416   :  { %2415 = vrot.lane.b32.xlu2 %v2404_v56, %s4946_s11  ;;  %v83_v56 = vld [vmem:[%s8049_s3 + $0x90] sm:$0xff] }
 0x418   :  { %v2244_v6 = vpop.permute.xlu2 %2243 }
 0x41a   :  { %v2204_v16 = vpop.permute.xlu1 %2203 }
 0x41b   :  { %v2212_v45 = vmax.f32 %v6360_v51, %v2204_v16 }
 0x41d   :  { %v2200_v44 = vpop.permute.xlu0 %2199 }
 0x41e   :  { %2465 = vrot.lane.b32.xlu2 %v2461_v38, %s4945_s6  ;;  %v2210_v5 = vmax.f32 %v6364_v62, %v2200_v44  ;;  %v2493_v62 = vsel %vm169_vm0, %v2491_v43, %v2492_v9  ;;  %v76_v38 = vld [vmem:[%s8049_s3 + $0x58] sm:$0x7] }
 0x420   :  { %v2250_v17 = vpop.permute.xlu2 %2249  ;;  %v2226_v18 = vmax.f32 %v2210_v5, %v2216_v13 }
 0x422   :  { %v2218_v7 = vpop.permute.xlu1 %2217  ;;  %v2240_v22 = vmax.f32 %v2226_v18, %v6379_v63 }
 0x423   :  { %v2227_v54 = vmax.f32 %v2211_v2, %v2218_v7 }
 0x425   :  { %v2214_v33 = vpop.permute.xlu0 %2213  ;;  %v2241_v63 = vmax.f32 %v2227_v54, %v6400_v12  ;;  %v68_v12 = vld [vmem:[%s8049_s3 + $0x18] sm:$0x7] }
 0x426   :  { %2467 = vrot.lane.b32.xlu2 %v2460_v40, %s4945_s6  ;;  %v2225_v21 = vmax.f32 %v2209_v42, %v2214_v33 }
 0x428   :  { %v2264_v36 = vpop.permute.xlu2 %2263  ;;  %v2239_v27 = vmax.f32 %v2225_v21, %v6388_v11 }
 0x42a   :  { %v2246_v19 = vpop.permute.xlu1 %2245  ;;  %v2255_v51 = vmax.f32 %v2239_v27, %v2244_v6 }
 0x42b   :  { %v2256_v46 = vmax.f32 %v2240_v22, %v2246_v19 }
 0x42d   :  { %v2220_v35 = vpop.permute.xlu0 %2219 }
 0x42e   :  { %v2228_v32 = vmax.f32 %v2212_v45, %v2220_v35  ;;  %2497 = vrot.lane.b32.xlu2 %v2493_v62, %s4946_s11 }
 0x430   :  { %v2292_v4 = vpop.permute.xlu2 %2291  ;;  %v2242_v11 = vmax.f32 %v2228_v32, %v6396_v28 }
 0x432   :  { %v2260_v23 = vpop.permute.xlu1 %2259  ;;  %v2258_v58 = vmax.f32 %v2242_v11, %v2250_v17 }
 0x433   :  { %v2271_v25 = vmax.f32 %v2255_v51, %v2260_v23 }
 0x435   :  { %v2248_v15 = vpop.permute.xlu0 %2247  ;;  %v2285_v13 = vmax.f32 %v2271_v25, %v6428_v26  ;;  %v67_v26 = vld [vmem:[%s8049_s3 + $0x10] sm:$0xff] }
 0x436   :  { %v2257_v61 = vmax.f32 %v2241_v63, %v2248_v15  ;;  %v75_v15 = vld [vmem:[%s8049_s3 + $0x50] sm:$0xff]  ;;  %v2453_v63 = vmul.f32 %v6172_v3, %v6465_v14 }
 0x438   :  { %v2306_v48 = vpop.permute.xlu2 %2305  ;;  %v2273_v6 = vmax.f32 %v2257_v61, %v2264_v36  ;;  %v92_v36 = vld [vmem:[%s8049_s3 + $0xd8] sm:$0x7] }
 0x43a   :  { %v2266_v59 = vpop.permute.xlu1 %2265 }
 0x43b   :  { %v2274_v53 = vmax.f32 %v2258_v58, %v2266_v59  ;;  %v2454_v58 = vmul.f32 %v6190_v50, %v6465_v14 }
 0x43d   :  { %v2262_v39 = vpop.permute.xlu0 %2261  ;;  %v2288_v28 = vmax.f32 %v2274_v53, %v6412_v60  ;;  %v2287_v60 = vmax.f32 %v2273_v6, %v6421_v57  ;;  %v91_v57 = vld [vmem:[%s8049_s3 + $0xd0] sm:$0xff] }
 0x43e   :  { %v2272_v10 = vmax.f32 %v2256_v46, %v2262_v39 }
 0x440   :  { %v2286_v0 = vmax.f32 %v2272_v10, %v6417_v47  ;;  %v84_v47 = vld [vmem:[%s8049_s3 + $0x98] sm:$0x7]  ;;  %v2312_v55 = vpop.permute.xlu2 %2311  ;;  %v2486_v10 = vmul.f32 %v6190_v50, %v6476_v34 }
 0x442   :  { %v2294_v52 = vpop.permute.xlu1 %2293  ;;  %v2302_v44 = vmax.f32 %v2286_v0, %v2292_v4  ;;  %v2495_v25 = vrot.slane %v2486_v10, 1  ;;  %v2402_v0 = vmul.f32 %v6449_v29, %v6457_v24 }
 0x443   :  { %v2303_v40 = vmax.f32 %v2287_v60, %v2294_v52 }
 0x444   :  { %2503 = vrot.lane.b32.xlu2 %v2495_v25, %s4946_s11 }
 0x445   :  { %v2290_v30 = vpop.permute.xlu0 %2289 }
 0x446   :  { %v2301_v37 = vmax.f32 %v2285_v13, %v2290_v30  ;;  %v2403_v30 = vmul.f32 %v6172_v3, %v6457_v24  ;;  %v2463_v13 = vrot.slane %v2454_v58, 1 }
 0x448   :  { %v2317_v33 = vmax.f32 %v2301_v37, %v2306_v48  ;;  %v2462_v48 = vrot.slane %v2453_v63, 1  ;;  %v6545_v53 = vpop.permute.xlu2 %2383  ;;  %v2538_v37 = vstv %s4749_s7  ;;  %s4782_s7 = sld [smem:[#allocation2 + $0x6f]] }
 0x449   :  { %v2542_v14 = vmul.f32 %v6190_v50, %v2538_v37  ;;  %v2539_v24 = vmul.f32 %v8209_v1, %v2538_v37 }
 0x44a   :  { %v2308_v16 = vpop.permute.xlu1 %2307  ;;  %v2321_v49 = vmul.f32 %v2317_v33, %v67_v26  ;;  %v2342_v31 = vmul.f32 %v2317_v33, %v83_v56  ;;  %v2464_v61 = vsel %vm169_vm0, %v2462_v48, %v2463_v13  ;;  %v2570_v33 = vstv %s4750_s8  ;;  %s4808_s8 = sld [smem:[#allocation2 + $0x89]] }
 0x44b   :  { %v2318_v7 = vmax.f32 %v2302_v44, %v2308_v16  ;;  %v2485_v16 = vmul.f32 %v6172_v3, %v6476_v34  ;;  %v2541_v44 = vmul.f32 %v6172_v3, %v2538_v37  ;;  %v2551_v6 = vrot.slane %v2542_v14, 2 }
 0x44c   :  { %v2325_v18 = vsel %vm1193_vm3, %v2321_v49, 0.0  ;;  %v2346_v39 = vsel %vm1193_vm3, %v2342_v31, 0.0  ;;  %v2547_v34 = vrot.slane %v2539_v24, 2  ;;  %v2571_v41 = vmul.f32 %v8209_v1, %v2570_v33  ;;  %v6577_v31 = vld [vmem:[%s8046_s0 + $0x10] sm:$0xff] }
 0x44d   :  { %v2296_v20 = vpop.permute.xlu0 %2295  ;;  %v2322_v17 = vmul.f32 %v2318_v7, %v68_v12  ;;  %v2343_v35 = vmul.f32 %v2318_v7, %v84_v47  ;;  %v2550_v7 = vrot.slane %v2541_v44, 2  ;;  %v2574_v49 = vmul.f32 %v6190_v50, %v2570_v33  ;;  %v6588_v50 = vld [vmem:[%s8046_s0 + $0x58] sm:$0x7f] }
 0x44e   :  { %v2304_v19 = vmax.f32 %v2288_v28, %v2296_v20  ;;  %v2540_v20 = vmul.f32 %v6449_v29, %v2538_v37  ;;  %v2494_v28 = vrot.slane %v2485_v16, 1  ;;  %v2776_v16 = vstv %s4758_s22  ;;  %s4778_s22 = sld [smem:[#allocation5 + $0x2]] }
 0x44f   :  { %v2326_v42 = vsel %vm1195_vm2, %v2322_v17, 0.0  ;;  %v2347_v59 = vsel %vm1195_vm2, %v2343_v35, 0.0  ;;  %v2552_v12 = vsel %vm258_vm1, %v2550_v7, %v2551_v6  ;;  %v2612_v35 = vstv %s4752_s9  ;;  %s4765_s9 = sld [smem:[#allocation2 + $0x5f]] }
 0x450   :  { %v2320_v23 = vmax.f32 %v2304_v19, %v2312_v55  ;;  %v2327_v43 = vadd.f32 %v2326_v42, %v2325_v18  ;;  %v2348_v22 = vadd.f32 %v2347_v59, %v2346_v39  ;;  %2557 = vrot.lane.b32.xlu2 %v2552_v12, %s4945_s6  ;;  %v2548_v47 = vrot.slane %v2540_v20, 2  ;;  %v6560_v26 = vpop.permute.xlu2 %2385 }
 0x451   :  { %v2496_v56 = vsel %vm169_vm0, %v2494_v28, %v2495_v25  ;;  %v2572_v19 = vmul.f32 %v6449_v29, %v2570_v33  ;;  %v2573_v55 = vmul.f32 %v6172_v3, %v2570_v33  ;;  %v2638_v59 = vstv %s4753_s13  ;;  %s4770_s13 = sld [smem:[#allocation2 + $0x64]] }
 0x452   :  { %v2324_v8 = vmul.f32 %v2320_v23, %v76_v38  ;;  %v2345_v45 = vmul.f32 %v2320_v23, %v92_v36  ;;  %v2549_v60 = vsel %vm258_vm1, %v2547_v34, %v2548_v47  ;;  %v2579_v38 = vrot.slane %v2571_v41, 2 }
 0x453   :  { %v2580_v17 = vrot.slane %v2572_v19, 2  ;;  %v2582_v1 = vrot.slane %v2573_v55, 2  ;;  %v2583_v23 = vrot.slane %v2574_v49, 2  ;;  %v2688_v39 = vstv %s4755_s16  ;;  %s4771_s16 = sld [smem:[#allocation2 + $0x65]] }
 0x454   :  { %v2351_v52 = vsel %vm1195_vm2, %v2345_v45, 0.0  ;;  %v2330_v51 = vsel %vm1195_vm2, %v2324_v8, 0.0  ;;  %v2780_v44 = vmul.f32 %v6588_v50, %v2776_v16 }
 0x455   :  { %v2310_v5 = vpop.permute.xlu0 %2309  ;;  %v2581_v36 = vsel %vm258_vm1, %v2579_v38, %v2580_v17  ;;  %v2584_v3 = vsel %vm258_vm1, %v2582_v1, %v2583_v23  ;;  %v2850_v38 = vstv %s4761_s24  ;;  %s4774_s24 = sld [smem:[#allocation2 + $0x68]] }
 0x456   :  { %v2319_v21 = vmax.f32 %v2303_v40, %v2310_v5  ;;  %v2613_v40 = vmul.f32 %v6577_v31, %v2612_v35  ;;  %v6598_v5 = vld [vmem:[%s8046_s0 + $0x18] sm:$0x7f]  ;;  %v2789_v28 = vrot.slane %v2780_v44, 2  ;;  %v2926_v44 = vstv %s4764_s1  ;;  %s4793_s1 = sld [smem:[#allocation2 + $0x7a]] }
 0x457   :  { %v2614_v42 = vmul.f32 %v6598_v5, %v2612_v35  ;;  %v2778_v7 = vmul.f32 %v6598_v5, %v2776_v16 }
 0x458   :  { %v2323_v27 = vmul.f32 %v2319_v21, %v75_v15  ;;  %v2344_v4 = vmul.f32 %v2319_v21, %v91_v57  ;;  %2587 = vrot.lane.b32.xlu2 %v2580_v17, %s4946_s11  ;;  %v2616_v15 = vmul.f32 %v6588_v50, %v2612_v35  ;;  %v6605_v21 = vld [vmem:[%s8046_s0 + $0x50] sm:$0xff] }
 0x459   :  { %v2641_v18 = vmul.f32 %v6605_v21, %v2638_v59  ;;  %v2615_v45 = vmul.f32 %v6605_v21, %v2612_v35  ;;  %v2779_v20 = vmul.f32 %v6605_v21, %v2776_v16 }
 0x45a   :  { %v2328_v32 = vsel %vm1193_vm3, %v2323_v27, 0.0  ;;  %v2349_v62 = vsel %vm1193_vm3, %v2344_v4, 0.0  ;;  %v2690_v27 = vmul.f32 %v6598_v5, %v2688_v39  ;;  %v2639_v4 = vmul.f32 %v6577_v31, %v2638_v59 }
 0x45b   :  { %v2350_v2 = vadd.f32 %v2349_v62, %v2348_v22  ;;  %v2329_v46 = vadd.f32 %v2328_v32, %v2327_v43  ;;  %v2720_v22 = vstv %s4756_s21  ;;  %v2640_v32 = vmul.f32 %v6598_v5, %v2638_v59  ;;  %s4775_s21 = sld [smem:[#allocation2 + $0x69]] }
 0x45c   :  { %v2698_v43 = vrot.slane %v2690_v27, 1  ;;  %v2722_v62 = vmul.f32 %v6598_v5, %v2720_v22  ;;  %v2723_v24 = vmul.f32 %v6605_v21, %v2720_v22  ;;  %v2788_v33 = vrot.slane %v2779_v20, 2 }
 0x45d   :  { %v2352_v54 = vadd.f32 %v2351_v52, %v2350_v2  ;;  %v2331_v11 = vadd.f32 %v2330_v51, %v2329_v46  ;;  %v2689_v46 = vmul.f32 %v6577_v31, %v2688_v39  ;;  %v2721_v52 = vmul.f32 %v6577_v31, %v2720_v22 }
 0x45e   :  { %v2642_v51 = vmul.f32 %v6588_v50, %v2638_v59  ;;  %v2730_v10 = vrot.slane %v2722_v62, 1  ;;  %v2732_v34 = vrot.slane %v2723_v24, 1 }
 0x45f   :  { %2353 = vadd.xlane.f32.xlu0 %v2352_v54  ;;  %2332 = vadd.xlane.f32.xlu1 %v2331_v11  ;;  %v2691_v54 = vmul.f32 %v6605_v21, %v2688_v39  ;;  %v2692_v11 = vmul.f32 %v6588_v50, %v2688_v39  ;;  %v2729_v25 = vrot.slane %v2721_v52, 1 }
 0x460   :  { %2621 = vrot.lane.b32.xlu2 %v2613_v40, %s4945_s6 }
 0x461   :  { %v2731_v63 = vsel %vm169_vm0, %v2729_v25, %v2730_v10  ;;  %v2700_v58 = vrot.slane %v2691_v54, 1 }
 0x468   :  { %2627 = vrot.lane.b32.xlu2 %v2616_v15, %s4945_s6 }
 0x470   :  { %2651 = vrot.lane.b32.xlu2 %v2641_v18, %s4946_s11 }
 0x473   :  { %2413 = vrot.lane.b32.xlu0 %v2403_v30, %s4946_s11  ;;  %v2697_v30 = vrot.slane %v2689_v46, 1 }
 0x475   :  { %v2699_v48 = vsel %vm169_vm0, %v2697_v30, %v2698_v43 }
 0x478   :  { %2411 = vrot.lane.b32.xlu1 %v2402_v0, %s4946_s11  ;;  %2705 = vrot.lane.b32.xlu2 %v2698_v43, %s4945_s6  ;;  %v2701_v0 = vrot.slane %v2692_v11, 1 }
 0x47a   :  { %v2702_v37 = vsel %vm169_vm0, %v2700_v58, %v2701_v0 }
 0x47b   :  { %2469 = vrot.lane.b32.xlu0 %v2464_v61, %s4945_s6 }
 0x480   :  { %2471 = vrot.lane.b32.xlu1 %v2463_v13, %s4945_s6  ;;  %2735 = vrot.lane.b32.xlu2 %v2731_v63, %s4946_s11  ;;  %v2724_v13 = vmul.f32 %v6588_v50, %v2720_v22 }
 0x482   :  { %v2733_v14 = vrot.slane %v2724_v13, 1 }
 0x483   :  { %2499 = vrot.lane.b32.xlu0 %v2492_v9, %s4946_s11  ;;  %v6569_v9 = vpop.permute.xlu2 %2387 }
 0x484   :  { %v2734_v17 = vsel %vm169_vm0, %v2732_v34, %v2733_v14  ;;  %v2958_v34 = vstv %s4765_s9 }
 0x488   :  { %2501 = vrot.lane.b32.xlu1 %v2496_v56, %s4946_s11  ;;  %2741 = vrot.lane.b32.xlu2 %v2733_v14, %s4946_s11  ;;  %v2790_v56 = vsel %vm258_vm1, %v2788_v33, %v2789_v28  ;;  %v6695_v14 = vld [vmem:[%s8046_s0 + $0x60] sm:$0xff] }
 0x489   :  { %8213 = vst [vmem:[#allocation31_spill] sm:$0xff] %v6695_v14  ;;  %v2853_v24 = vmul.f32 %v6695_v14, %v2850_v38 }
 0x48b   :  { %2553 = vrot.lane.b32.xlu0 %v2549_v60, %s4945_s6  ;;  %v6591_v57 = vpop.permute.xlu2 %2389  ;;  %v2786_v60 = vrot.slane %v2778_v7, 2 }
 0x490   :  { %2555 = vrot.lane.b32.xlu1 %v2548_v47, %s4945_s6  ;;  %v2808_v47 = vstv %s4759_s23  ;;  %2795 = vrot.lane.b32.xlu2 %v2790_v56, %s4945_s6  ;;  %s4780_s23 = sld [smem:[#allocation2 + $0x6d]] }
 0x491   :  { %v2810_v41 = vmul.f32 %v6598_v5, %v2808_v47  ;;  %v2809_v40 = vmul.f32 %v6577_v31, %v2808_v47  ;;  %v2811_v1 = vmul.f32 %v6605_v21, %v2808_v47 }
 0x493   :  { %2559 = vrot.lane.b32.xlu0 %v2551_v6, %s4945_s6  ;;  %v6608_v8 = vpop.permute.xlu2 %2409  ;;  %v2777_v6 = vmul.f32 %v6577_v31, %v2776_v16  ;;  %v2818_v55 = vrot.slane %v2810_v41, 2  ;;  %v2817_v15 = vrot.slane %v2809_v40, 2  ;;  %v2820_v27 = vrot.slane %v2811_v1, 2 }
 0x494   :  { %v2929_v40 = vmul.f32 %v6695_v14, %v2926_v44 }
 0x495   :  { %v2785_v19 = vrot.slane %v2777_v6, 2 }
 0x497   :  { %v2787_v35 = vsel %vm258_vm1, %v2785_v19, %v2786_v60 }
 0x498   :  { %2585 = vrot.lane.b32.xlu1 %v2581_v36, %s4946_s11  ;;  %2825 = vrot.lane.b32.xlu2 %v2818_v55, %s4946_s11  ;;  %v6665_v36 = vld [vmem:[%s8046_s0 + $0x20] sm:$0xff] }
 0x499   :  { %8210 = vst [vmem:[#allocation23_spill] sm:$0xff] %v6665_v36 }
 0x49b   :  { %2589 = vrot.lane.b32.xlu0 %v2584_v3, %s4946_s11  ;;  %v6620_v2 = vpop.permute.xlu2 %2415  ;;  %v2851_v3 = vmul.f32 %v6665_v36, %v2850_v38 }
 0x4a0   :  { %2591 = vrot.lane.b32.xlu1 %v2583_v23, %s4946_s11  ;;  %v2812_v23 = vmul.f32 %v6588_v50, %v2808_v47  ;;  %2859 = vrot.lane.b32.xlu2 %v2851_v3, %s4945_s6 }
 0x4a3   :  { %2623 = vrot.lane.b32.xlu0 %v2614_v42, %s4945_s6  ;;  %v6633_v61 = vpop.permute.xlu2 %2465 }
 0x4a8   :  { %2625 = vrot.lane.b32.xlu1 %v2615_v45, %s4945_s6 }
 0x4ab   :  { %2647 = vrot.lane.b32.xlu0 %v2639_v4, %s4946_s11  ;;  %v6645_v12 = vpop.permute.xlu2 %2467  ;;  %v2821_v4 = vrot.slane %v2812_v23, 2 }
 0x4ad   :  { %v2822_v52 = vsel %vm258_vm1, %v2820_v27, %v2821_v4 }
 0x4b0   :  { %2649 = vrot.lane.b32.xlu1 %v2640_v32, %s4946_s11  ;;  %v2819_v32 = vsel %vm258_vm1, %v2817_v15, %v2818_v55 }
 0x4b3   :  { %2653 = vrot.lane.b32.xlu0 %v2642_v51, %s4946_s11  ;;  %v6654_v49 = vpop.permute.xlu2 %2497  ;;  %v6678_v51 = vld [vmem:[%s8046_s0 + $0x68] sm:$0x7f] }
 0x4b4   :  { %8211 = vst [vmem:[#allocation13_spill] sm:$0xff] %v6678_v51  ;;  %v2854_v54 = vmul.f32 %v6678_v51, %v2850_v38 }
 0x4b6   :  { %2865 = vrot.lane.b32.xlu2 %v2854_v54, %s4945_s6 }
 0x4b8   :  { %2703 = vrot.lane.b32.xlu1 %v2699_v48, %s4945_s6  ;;  %v6688_v48 = vld [vmem:[%s8046_s0 + $0x28] sm:$0x7f] }
 0x4b9   :  { %8212 = vst [vmem:[#allocation36_spill] sm:$0xff] %v6688_v48  ;;  %v2852_v13 = vmul.f32 %v6688_v48, %v2850_v38  ;;  %v2928_v6 = vmul.f32 %v6688_v48, %v2926_v44  ;;  %v2960_v19 = vmul.f32 %v6688_v48, %v2958_v34  ;;  %v2930_v38 = vmul.f32 %v6678_v51, %v2926_v44 }
 0x4bb   :  { %2707 = vrot.lane.b32.xlu0 %v2702_v37, %s4945_s6  ;;  %v6670_v45 = vpop.permute.xlu2 %2503  ;;  %v2876_v37 = vstv %s4762_s27  ;;  %v2936_v33 = vrot.slane %v2928_v6, 1  ;;  %v2968_v1 = vrot.slane %v2960_v19, 1  ;;  %s4742_s27 = sld [smem:[#allocation2 + $0x48]] }
 0x4bc   :  { %v2879_v16 = vmul.f32 %v6695_v14, %v2876_v37  ;;  %v2878_v56 = vmul.f32 %v6688_v48, %v2876_v37  ;;  %v2880_v55 = vmul.f32 %v6678_v51, %v2876_v37 }
 0x4be   :  { %2889 = vrot.lane.b32.xlu2 %v2879_v16, %s4946_s11 }
 0x4c0   :  { %2709 = vrot.lane.b32.xlu1 %v2701_v0, %s4945_s6 }
 0x4c3   :  { %2737 = vrot.lane.b32.xlu0 %v2730_v10, %s4946_s11  ;;  %v6683_v0 = vpop.permute.xlu2 %2557 }
 0x4c6   :  { %2943 = vrot.lane.b32.xlu2 %v2936_v33, %s4945_s6 }
 0x4c8   :  { %2739 = vrot.lane.b32.xlu1 %v2734_v17, %s4946_s11  ;;  %v2927_v17 = vmul.f32 %v6665_v36, %v2926_v44  ;;  %v3046_v44 = vstv %s4768_s12  ;;  %s4810_s12 = sld [smem:[#allocation2 + $0x8b]] }
 0x4ca   :  { %v2935_v3 = vrot.slane %v2927_v17, 1 }
 0x4cb   :  { %2791 = vrot.lane.b32.xlu0 %v2787_v35, %s4945_s6  ;;  %v6704_v7 = vpop.permute.xlu2 %2587  ;;  %v2959_v35 = vmul.f32 %v6665_v36, %v2958_v34 }
 0x4cc   :  { %v2937_v27 = vsel %vm169_vm0, %v2935_v3, %v2936_v33  ;;  %v3049_v3 = vmul.f32 %v6695_v14, %v3046_v44 }
 0x4cd   :  { %v2967_v23 = vrot.slane %v2959_v35, 1 }
 0x4d0   :  { %2793 = vrot.lane.b32.xlu1 %v2786_v60, %s4945_s6 }
 0x4d2   :  { %v2354_v42 = vpop.xlane.xlu0 %2353  ;;  %v2333_v59 = vpop.xlane.xlu1 %2332 }
 0x4d3   :  { %v2355_v18 = vrot.slane %v2354_v42, 4  ;;  %v2334_v39 = vrot.slane %v2333_v59, 4  ;;  %2797 = vrot.lane.b32.xlu0 %v2789_v28, %s4945_s6  ;;  %v2877_v28 = vmul.f32 %v6665_v36, %v2876_v37  ;;  %v6717_v41 = vpop.permute.xlu2 %2621 }
 0x4d5   :  { %v2356_v43 = vadd.f32 %v2355_v18, %v2354_v42  ;;  %v2335_v22 = vadd.f32 %v2334_v39, %v2333_v59  ;;  %v2969_v42 = vsel %vm169_vm0, %v2967_v23, %v2968_v1  ;;  %v2938_v59 = vrot.slane %v2929_v40, 1 }
 0x4d6   :  { %2973 = vrot.lane.b32.xlu2 %v2969_v42, %s4946_s11  ;;  %v2939_v18 = vrot.slane %v2930_v38, 1  ;;  %v3047_v38 = vmul.f32 %v6665_v36, %v3046_v44  ;;  %v3088_v23 = vstv %s4770_s13  ;;  %v3050_v42 = vmul.f32 %v6678_v51, %v3046_v44  ;;  %s4751_s13 = sld [smem:[#allocation2 + $0x51]] }
 0x4d7   :  { %v2336_v62 = vrot.slane %v2335_v22, 2  ;;  %v2357_v46 = vrot.slane %v2356_v43, 2 }
 0x4d8   :  { %2823 = vrot.lane.b32.xlu1 %v2819_v32, %s4946_s11 }
 0x4d9   :  { %v2337_v11 = vadd.f32 %v2336_v62, %v2335_v22  ;;  %v2358_v10 = vadd.f32 %v2357_v46, %v2356_v43  ;;  %v2940_v22 = vsel %vm169_vm0, %v2938_v59, %v2939_v18  ;;  %v3014_v46 = vstv %s4767_s10  ;;  %v6779_v59 = vld [vmem:[%s8046_s0 + $0x30] sm:$0xff]  ;;  %s4795_s10 = sld [smem:[#allocation2 + $0x7c]] }
 0x4da   :  { %8214 = vst [vmem:[#allocation14_spill] sm:$0xff] %v6779_v59 }
 0x4db   :  { %2827 = vrot.lane.b32.xlu0 %v2822_v52, %s4946_s11  ;;  %v2338_v25 = vrot.slane %v2337_v11, 1  ;;  %v2359_v30 = vrot.slane %v2358_v10, 1  ;;  %v6733_v43 = vpop.permute.xlu2 %2627  ;;  %v3018_v52 = vmul.f32 %v6678_v51, %v3014_v46 }
 0x4dd   :  { %v2339_v63 = vadd.f32 %v2338_v25, %v2337_v11  ;;  %v2360_v58 = vadd.f32 %v2359_v30, %v2358_v10  ;;  %v2961_v11 = vmul.f32 %v6695_v14, %v2958_v34  ;;  %v3017_v25 = vmul.f32 %v6695_v14, %v3014_v46 }
 0x4de   :  { %v3015_v30 = vmul.f32 %v6665_v36, %v3014_v46 }
 0x4df   :  { %4820 = vpush %v2339_v63  ;;  %v3016_v63 = vmul.f32 %v6688_v48, %v3014_v46  ;;  %v2970_v37 = vrot.slane %v2961_v11, 1 }
 0x4e0   :  { %4822 = vpush %v2360_v58  ;;  %2829 = vrot.lane.b32.xlu1 %v2821_v4, %s4946_s11  ;;  %v2962_v4 = vmul.f32 %v6678_v51, %v2958_v34  ;;  %v3027_v58 = vrot.slane %v3018_v52, 2  ;;  %v3023_v6 = vrot.slane %v3015_v30, 2  ;;  %v6796_v30 = vld [vmem:[%s8046_s0 + $0x78] sm:$0x7f] }
 0x4e1   :  { %8216 = vst [vmem:[#allocation12_spill] sm:$0xff] %v6796_v30 }
 0x4e2   :  { %v2971_v32 = vrot.slane %v2962_v4, 1 }
 0x4e3   :  { %2861 = vrot.lane.b32.xlu0 %v2852_v13, %s4945_s6  ;;  %v6745_v10 = vpop.permute.xlu2 %2651  ;;  %v3026_v13 = vrot.slane %v3017_v25, 2 }
 0x4e4   :  { %2979 = vrot.lane.b32.xlu2 %v2971_v32, %s4946_s11  ;;  %v2972_v34 = vsel %vm169_vm0, %v2970_v37, %v2971_v32  ;;  %v3059_v32 = vrot.slane %v3050_v42, 2 }
 0x4e5   :  { %v6701_v20 = vpop.permute.xlu0 %2413 }
 0x4e8   :  { %2863 = vrot.lane.b32.xlu1 %v2853_v24, %s4945_s6  ;;  %v3028_v24 = vsel %vm258_vm1, %v3026_v13, %v3027_v58 }
 0x4ea   :  { %v6708_v47 = vpop.permute.xlu1 %2411 }
 0x4eb   :  { %2885 = vrot.lane.b32.xlu0 %v2877_v28, %s4946_s11  ;;  %v3024_v28 = vrot.slane %v3016_v63, 2  ;;  %v6760_v19 = vpop.permute.xlu2 %2705  ;;  %v3092_v63 = vmul.f32 %v6796_v30, %v3088_v23 }
 0x4ec   :  { %3033 = vrot.lane.b32.xlu2 %v3028_v24, %s4945_s6 }
 0x4ed   :  { %v6714_v60 = vpop.permute.xlu0 %2469  ;;  %v3025_v17 = vsel %vm258_vm1, %v3023_v6, %v3024_v28  ;;  %v3114_v6 = vstv %s4771_s16  ;;  %s4760_s16 = sld [smem:[#allocation2 + $0x5a]] }
 0x4f0   :  { %2887 = vrot.lane.b32.xlu1 %v2878_v56, %s4946_s11  ;;  %v3048_v56 = vmul.f32 %v6688_v48, %v3046_v44  ;;  %v6810_v44 = vld [vmem:[%s8046_s0 + $0x38] sm:$0x7f] }
 0x4f1   :  { %8218 = vst [vmem:[#allocation17_spill] sm:$0xff] %v6810_v44  ;;  %v3090_v24 = vmul.f32 %v6810_v44, %v3088_v23 }
 0x4f2   :  { %v6724_v15 = vpop.permute.xlu1 %2471  ;;  %v3056_v35 = vrot.slane %v3048_v56, 2 }
 0x4f3   :  { %2891 = vrot.lane.b32.xlu0 %v2880_v55, %s4946_s11 }
 0x4f4   :  { %3063 = vrot.lane.b32.xlu2 %v3056_v35, %s4946_s11 }
 0x4f5   :  { %v6729_v39 = vpop.permute.xlu0 %2499 }
 0x4f8   :  { %2941 = vrot.lane.b32.xlu1 %v2937_v27, %s4945_s6  ;;  %v3055_v27 = vrot.slane %v3047_v38, 2 }
 0x4fa   :  { %v6737_v62 = vpop.permute.xlu1 %2501  ;;  %v3057_v52 = vsel %vm258_vm1, %v3055_v27, %v3056_v35 }
 0x4fb   :  { %2945 = vrot.lane.b32.xlu0 %v2940_v22, %s4945_s6  ;;  %v3058_v22 = vrot.slane %v3049_v3, 2 }
 0x4fd   :  { %v6742_v54 = vpop.permute.xlu0 %2553  ;;  %v3060_v25 = vsel %vm258_vm1, %v3058_v22, %v3059_v32  ;;  %v3196_v22 = vstv %s4774_s24  ;;  %s4781_s24 = sld [smem:[#allocation2 + $0x6e]] }
 0x500   :  { %2947 = vrot.lane.b32.xlu1 %v2939_v18, %s4945_s6  ;;  %v3089_v18 = vmul.f32 %v6779_v59, %v3088_v23 }
 0x502   :  { %v6751_v16 = vpop.permute.xlu1 %2555  ;;  %3097 = vrot.lane.b32.xlu2 %v3089_v18, %s4945_s6  ;;  %v3115_v18 = vmul.f32 %v6779_v59, %v3114_v6 }
 0x503   :  { %2975 = vrot.lane.b32.xlu0 %v2968_v1, %s4946_s11  ;;  %v6771_v1 = vpop.permute.xlu2 %2735 }
 0x505   :  { %v6756_v33 = vpop.permute.xlu0 %2559 }
 0x508   :  { %2977 = vrot.lane.b32.xlu1 %v2972_v34, %s4946_s11 }
 0x50a   :  { %v6764_v55 = vpop.permute.xlu1 %2585  ;;  %3103 = vrot.lane.b32.xlu2 %v3092_v63, %s4945_s6 }
 0x50b   :  { %3029 = vrot.lane.b32.xlu0 %v3025_v17, %s4945_s6  ;;  %v6789_v11 = vpop.permute.xlu2 %2741  ;;  %v3164_v17 = vstv %s4773_s19  ;;  %s4769_s19 = sld [smem:[#allocation2 + $0x63]] }
 0x50c   :  { %8215 = vst [vmem:[#allocation21_spill] sm:$0xff] %v6789_v11  ;;  %v3166_v3 = vmul.f32 %v6810_v44, %v3164_v17  ;;  %v3165_v63 = vmul.f32 %v6779_v59, %v3164_v17 }
 0x50d   :  { %v6768_v40 = vpop.permute.xlu0 %2589 }
 0x50e   :  { %v3174_v27 = vrot.slane %v3166_v3, 1 }
 0x510   :  { %3031 = vrot.lane.b32.xlu1 %v3024_v28, %s4945_s6  ;;  %v6817_v28 = vld [vmem:[%s8046_s0 + $0x70] sm:$0xff] }
 0x511   :  { %8219 = vst [vmem:[#allocation29_spill] sm:$0xff] %v6817_v28  ;;  %v3117_v34 = vmul.f32 %v6817_v28, %v3114_v6  ;;  %v3091_v35 = vmul.f32 %v6817_v28, %v3088_v23  ;;  %v3116_v23 = vmul.f32 %v6810_v44, %v3114_v6  ;;  %v3167_v3 = vmul.f32 %v6817_v28, %v3164_v17 }
 0x512   :  { %v6782_v4 = vpop.permute.xlu1 %2591 }
 0x513   :  { %3035 = vrot.lane.b32.xlu0 %v3027_v58, %s4945_s6  ;;  %v6805_v37 = vpop.permute.xlu2 %2795  ;;  %3127 = vrot.lane.b32.xlu2 %v3117_v34, %s4946_s11  ;;  %v3197_v34 = vmul.f32 %v6779_v59, %v3196_v22 }
 0x514   :  { %8217 = vst [vmem:[#allocation24_spill] sm:$0xff] %v6805_v37  ;;  %v3173_v37 = vrot.slane %v3165_v63, 1 }
 0x515   :  { %v6786_v46 = vpop.permute.xlu0 %2623  ;;  %v3205_v14 = vrot.slane %v3197_v34, 1 }
 0x518   :  { %3061 = vrot.lane.b32.xlu1 %v3057_v52, %s4946_s11  ;;  %v3198_v52 = vmul.f32 %v6810_v44, %v3196_v22 }
 0x51a   :  { %v6799_v58 = vpop.permute.xlu1 %2625  ;;  %v3206_v51 = vrot.slane %v3198_v52, 1 }
 0x51b   :  { %3065 = vrot.lane.b32.xlu0 %v3060_v25, %s4946_s11  ;;  %v6828_v42 = vpop.permute.xlu2 %2825  ;;  %3181 = vrot.lane.b32.xlu2 %v3174_v27, %s4945_s6 }
 0x51c   :  { %8220 = vst [vmem:[#allocation22_spill] sm:$0xff] %v6828_v42  ;;  %v3207_v11 = vsel %vm169_vm0, %v3205_v14, %v3206_v51 }
 0x51d   :  { %v6803_v13 = vpop.permute.xlu0 %2647 }
 0x520   :  { %3067 = vrot.lane.b32.xlu1 %v3059_v32, %s4946_s11 }
 0x522   :  { %v6820_v56 = vpop.permute.xlu1 %2649 }
 0x523   :  { %3099 = vrot.lane.b32.xlu0 %v3090_v24, %s4945_s6  ;;  %v6841_v24 = vpop.permute.xlu2 %2859  ;;  %3211 = vrot.lane.b32.xlu2 %v3207_v11, %s4946_s11  ;;  %v3252_v11 = vstv %s4776_s25  ;;  %s4783_s25 = sld [smem:[#allocation2 + $0x70]] }
 0x524   :  { %8221 = vst [vmem:[#allocation34_spill] sm:$0xff] %v6841_v24  ;;  %v3176_v24 = vrot.slane %v3167_v3, 1  ;;  %v3255_v3 = vmul.f32 %v6817_v28, %v3252_v11 }
 0x525   :  { %v6825_v38 = vpop.permute.xlu0 %2653 }
 0x528   :  { %3101 = vrot.lane.b32.xlu1 %v3091_v35, %s4945_s6  ;;  %v3118_v35 = vmul.f32 %v6796_v30, %v3114_v6 }
 0x52a   :  { %v6832_v32 = vpop.permute.xlu1 %2703 }
 0x52b   :  { %3123 = vrot.lane.b32.xlu0 %v3115_v18, %s4946_s11  ;;  %v3168_v18 = vmul.f32 %v6796_v30, %v3164_v17  ;;  %v3200_v17 = vmul.f32 %v6796_v30, %v3196_v22  ;;  %v6857_v52 = vpop.permute.xlu2 %2865 }
 0x52c   :  { %8223 = vst [vmem:[#allocation26_spill] sm:$0xff] %v6857_v52 }
 0x52d   :  { %v6838_v25 = vpop.permute.xlu0 %2707  ;;  %v3177_v6 = vrot.slane %v3168_v18, 1  ;;  %v3209_v14 = vrot.slane %v3200_v17, 1  ;;  %v3254_v18 = vmul.f32 %v6810_v44, %v3252_v11 }
 0x52f   :  { %v3178_v63 = vsel %vm169_vm0, %v3176_v24, %v3177_v6  ;;  %3217 = vrot.lane.b32.xlu2 %v3209_v14, %s4946_s11  ;;  %v3253_v24 = vmul.f32 %v6779_v59, %v3252_v11 }
 0x530   :  { %3125 = vrot.lane.b32.xlu1 %v3116_v23, %s4946_s11  ;;  %v3175_v23 = vsel %vm169_vm0, %v3173_v37, %v3174_v27  ;;  %v3199_v27 = vmul.f32 %v6817_v28, %v3196_v22 }
 0x531   :  { %v3261_v22 = vrot.slane %v3253_v24, 2 }
 0x532   :  { %v6848_v36 = vpop.permute.xlu1 %2709  ;;  %v3208_v52 = vrot.slane %v3199_v27, 1 }
 0x533   :  { %8222 = vst [vmem:[#allocation30_spill] sm:$0xff] %v6848_v36  ;;  %3129 = vrot.lane.b32.xlu0 %v3118_v35, %s4946_s11  ;;  %v3256_v35 = vmul.f32 %v6796_v30, %v3252_v11  ;;  %v6873_v17 = vpop.permute.xlu2 %2889  ;;  %v3284_v36 = vstv %s4777_s26  ;;  %s4784_s26 = sld [smem:[#allocation2 + $0x71]] }
 0x534   :  { %8226 = vst [vmem:[#allocation27_spill] sm:$0xff] %v6873_v17  ;;  %v3210_v11 = vsel %vm169_vm0, %v3208_v52, %v3209_v14  ;;  %v3287_v52 = vmul.f32 %v6817_v28, %v3284_v36  ;;  %v3288_v14 = vmul.f32 %v6796_v30, %v3284_v36 }
 0x535   :  { %v6853_v48 = vpop.permute.xlu0 %2737 }
 0x538   :  { %3179 = vrot.lane.b32.xlu1 %v3175_v23, %s4945_s6  ;;  %v3265_v23 = vrot.slane %v3256_v35, 2  ;;  %v3286_v35 = vmul.f32 %v6810_v44, %v3284_v36  ;;  %v2364_v44 = vstv %s4742_s27  ;;  %s4786_s27 = sld [smem:[#allocation2 + $0x73]] }
 0x53a   :  { %v6861_v34 = vpop.permute.xlu1 %2739 }
 0x53b   :  { %8224 = vst [vmem:[#allocation19_spill] sm:$0xff] %v6861_v34  ;;  %3183 = vrot.lane.b32.xlu0 %v3178_v63, %s4945_s6  ;;  %v3264_v63 = vrot.slane %v3255_v3, 2  ;;  %v3294_v3 = vrot.slane %v3286_v35, 2 }
 0x53d   :  { %v6866_v37 = vpop.permute.xlu0 %2791 }
 0x53e   :  { %8225 = vst [vmem:[#allocation16_spill] sm:$0xff] %v6866_v37  ;;  %v3266_v37 = vsel %vm258_vm1, %v3264_v63, %v3265_v23  ;;  %v6888_v63 = vpop.permute.xlu2 %2943 }
 0x53f   :  { %3271 = vrot.lane.b32.xlu2 %v3266_v37, %s4945_s6  ;;  %8228 = vst [vmem:[#allocation32_spill] sm:$0xff] %v6888_v63  ;;  %v3285_v37 = vmul.f32 %v6779_v59, %v3284_v36  ;;  %v2366_v36 = vmul.f32 %v6449_v29, %v2364_v44 }
 0x540   :  { %3185 = vrot.lane.b32.xlu1 %v3177_v6, %s4945_s6  ;;  %v3262_v6 = vrot.slane %v3254_v18, 2 }
 0x541   :  { %v3293_v24 = vrot.slane %v3285_v37, 2  ;;  %v2426_v37 = vstv %s4745_s28  ;;  %s4796_s28 = sld [smem:[#allocation2 + $0x7d]] }
 0x542   :  { %v6875_v42 = vpop.permute.xlu1 %2793  ;;  %v3263_v27 = vsel %vm258_vm1, %v3261_v22, %v3262_v6  ;;  %v3296_v22 = vrot.slane %v3287_v52, 2 }
 0x543   :  { %3213 = vrot.lane.b32.xlu0 %v3206_v51, %s4946_s11  ;;  %v3295_v59 = vsel %vm258_vm1, %v3293_v24, %v3294_v3 }
 0x545   :  { %v6880_v34 = vpop.permute.xlu0 %2797 }
 0x546   :  { %8227 = vst [vmem:[#allocation33_spill] sm:$0xff] %v6880_v34  ;;  %v6901_v35 = vpop.permute.xlu2 %2973 }
 0x547   :  { %3301 = vrot.lane.b32.xlu2 %v3294_v3, %s4946_s11  ;;  %8230 = vst [vmem:[#allocation25_spill] sm:$0xff] %v6901_v35 }
 0x548   :  { %3215 = vrot.lane.b32.xlu1 %v3210_v11, %s4946_s11  ;;  %v3297_v11 = vrot.slane %v3288_v14, 2  ;;  %v2396_v14 = vadd.f32 %v6560_v26, %v2366_v36 }
 0x54a   :  { %v6886_v17 = vpop.permute.xlu1 %2823  ;;  %v2422_v35 = vadd.f32 %v6708_v47, %v2396_v14  ;;  %v6941_v47 = vld [vmem:[%s8046_s0 + $0x48] sm:$0x7f] }
 0x54b   :  { %3267 = vrot.lane.b32.xlu0 %v3263_v27, %s4945_s6 }
 0x54d   :  { %v6892_v51 = vpop.permute.xlu0 %2827 }
 0x550   :  { %3269 = vrot.lane.b32.xlu1 %v3262_v6, %s4945_s6  ;;  %v3298_v6 = vsel %vm258_vm1, %v3296_v22, %v3297_v11  ;;  %v6923_v22 = vpop.permute.xlu2 %2979 }
 0x551   :  { %8234 = vst [vmem:[#allocation11_spill] sm:$0xff] %v6923_v22 }
 0x552   :  { %v6898_v18 = vpop.permute.xlu1 %2829 }
 0x553   :  { %8229 = vst [vmem:[#allocation35_spill] sm:$0xff] %v6898_v18  ;;  %3273 = vrot.lane.b32.xlu0 %v3265_v23, %s4945_s6  ;;  %v6914_v23 = vld [vmem:[%s8046_s0] sm:$0xff] }
 0x554   :  { %8232 = vst [vmem:[#allocation15_spill] sm:$0xff] %v6914_v23  ;;  %v2365_v52 = vmul.f32 %v6914_v23, %v2364_v44  ;;  %v2427_v3 = vmul.f32 %v6914_v23, %v2426_v37 }
 0x555   :  { %v6903_v27 = vpop.permute.xlu0 %2861 }
 0x556   :  { %v2395_v28 = vadd.f32 %v6545_v53, %v2365_v52  ;;  %v2435_v63 = vrot.slane %v2427_v3, 1  ;;  %v2514_v3 = vstv %s4748_s30  ;;  %s4815_s30 = sld [smem:[#allocation5 + $0x3]] }
 0x558   :  { %3299 = vrot.lane.b32.xlu1 %v3295_v59, %s4946_s11  ;;  %v2428_v59 = vmul.f32 %v6449_v29, %v2426_v37  ;;  %v2421_v22 = vadd.f32 %v6608_v8, %v2395_v28 }
 0x55a   :  { %v6909_v30 = vpop.permute.xlu1 %2863 }
 0x55b   :  { %8231 = vst [vmem:[#allocation28_spill] sm:$0xff] %v6909_v30  ;;  %3303 = vrot.lane.b32.xlu0 %v3298_v6, %s4946_s11  ;;  %v2436_v30 = vrot.slane %v2428_v59, 1  ;;  %v6931_v6 = vld [vmem:[%s8046_s0 + $0x40] sm:$0xff]  ;;  %v2368_v59 = vmul.f32 %v6941_v47, %v2364_v44 }
 0x55c   :  { %v2429_v29 = vmul.f32 %v6931_v6, %v2426_v37  ;;  %v2367_v26 = vmul.f32 %v6931_v6, %v2364_v44  ;;  %v2515_v44 = vmul.f32 %v6914_v23, %v2514_v3 }
 0x55d   :  { %v6921_v24 = vpop.permute.xlu0 %2885  ;;  %v2446_v53 = vadd.f32 %v2436_v30, %v2422_v35  ;;  %v2437_v52 = vsel %vm169_vm0, %v2435_v63, %v2436_v30  ;;  %v6953_v35 = vld [vmem:[%s8046_s0 + $0x8] sm:$0x7f]  ;;  %v6958_v63 = vpop.permute.xlu2 %3033 }
 0x55e   :  { %8233 = vst [vmem:[#allocation20_spill] sm:$0xff] %v6921_v24  ;;  %v2438_v14 = vrot.slane %v2429_v29, 1  ;;  %v2397_v18 = vadd.f32 %v6569_v9, %v2367_v26  ;;  %v2445_v34 = vadd.f32 %v2437_v52, %v2421_v22  ;;  %v2398_v9 = vadd.f32 %v6591_v57, %v2368_v59 }
 0x55f   :  { %v2478_v28 = vadd.f32 %v6645_v12, %v2446_v53  ;;  %8235 = vst [vmem:[#allocation18_spill] sm:$0xff] %v6953_v35  ;;  %v2517_v29 = vmul.f32 %v6931_v6, %v2514_v3  ;;  %v2523_v52 = vrot.slane %v2515_v44, 2 }
 0x560   :  { %3305 = vrot.lane.b32.xlu1 %v3297_v11, %s4946_s11  ;;  %v2430_v11 = vmul.f32 %v6941_v47, %v2426_v37  ;;  %v2516_v37 = vmul.f32 %v6953_v35, %v2514_v3  ;;  %v2423_v30 = vadd.f32 %v6701_v20, %v2397_v18  ;;  %8236 = vst [vmem:[#allocation37_spill] sm:$0xff] %v6958_v63 }
 0x561   :  { %v2510_v12 = vadd.f32 %v6729_v39, %v2478_v28  ;;  %v2477_v53 = vadd.f32 %v6633_v61, %v2445_v34  ;;  %v2424_v35 = vadd.f32 %v6620_v2, %v2398_v9  ;;  %v2526_v23 = vrot.slane %v2517_v29, 2 }
 0x562   :  { %v6935_v36 = vpop.permute.xlu1 %2887  ;;  %v2439_v8 = vrot.slane %v2430_v11, 1  ;;  %v2518_v11 = vmul.f32 %v6941_v47, %v2514_v3  ;;  %v2524_v20 = vrot.slane %v2516_v37, 2  ;;  %v2602_v3 = vstv %s4751_s13  ;;  %s4787_s13 = sld [smem:[#allocation2 + $0x74]] }
 0x563   :  { %v2509_v39 = vadd.f32 %v6654_v49, %v2477_v53 }
 0x564   :  { %v2440_v22 = vsel %vm169_vm0, %v2438_v14, %v2439_v8  ;;  %v2534_v63 = vadd.f32 %v2524_v20, %v2510_v12  ;;  %v2527_v14 = vrot.slane %v2518_v11, 2  ;;  %v2525_v34 = vsel %vm258_vm1, %v2523_v52, %v2524_v20 }
 0x565   :  { %v6946_v24 = vpop.permute.xlu0 %2891  ;;  %v2447_v18 = vadd.f32 %v2440_v22, %v2423_v30  ;;  %v2448_v37 = vadd.f32 %v2439_v8, %v2424_v35  ;;  %v6979_v44 = vpop.permute.xlu2 %3063  ;;  %v2533_v9 = vadd.f32 %v2525_v34, %v2509_v39  ;;  %v2604_v22 = vmul.f32 %v6598_v5, %v2602_v3 }
 0x566   :  { %v2566_v28 = vadd.f32 %v6751_v16, %v2534_v63  ;;  %v2528_v2 = vsel %vm258_vm1, %v2526_v23, %v2527_v14  ;;  %v2664_v12 = vstv %s4754_s14  ;;  %v2603_v35 = vmul.f32 %v6577_v31, %v2602_v3 }
 0x567   :  { %v2479_v59 = vadd.f32 %v6714_v60, %v2447_v18  ;;  %v2480_v60 = vadd.f32 %v6724_v15, %v2448_v37  ;;  %v2666_v53 = vmul.f32 %v6598_v5, %v2664_v12  ;;  %v2665_v20 = vmul.f32 %v6577_v31, %v2664_v12 }
 0x568   :  { %v2598_v49 = vadd.f32 %v6704_v7, %v2566_v28  ;;  %v2668_v28 = vmul.f32 %v6588_v50, %v2664_v12 }
 0x569   :  { %v2511_v61 = vadd.f32 %v6737_v62, %v2479_v59  ;;  %v2565_v62 = vadd.f32 %v6742_v54, %v2533_v9  ;;  %v2512_v8 = vadd.f32 %v6670_v45, %v2480_v60  ;;  %v2605_v54 = vmul.f32 %v6605_v21, %v2602_v3 }
 0x56a   :  { %v6964_v26 = vpop.permute.xlu1 %2941  ;;  %v2608_v29 = vadd.f32 %v2604_v22, %v2598_v49  ;;  %v2674_v39 = vrot.slane %v2666_v53, 1  ;;  %v2673_v34 = vrot.slane %v2665_v20, 1  ;;  %v2752_v9 = vstv %s4757_s15  ;;  %s4788_s15 = sld [smem:[#allocation2 + $0x75]] }
 0x56b   :  { %v2535_v16 = vadd.f32 %v2528_v2, %v2511_v61  ;;  %v2597_v23 = vadd.f32 %v6764_v55, %v2565_v62  ;;  %v2536_v45 = vadd.f32 %v2527_v14, %v2512_v8  ;;  %v2606_v2 = vmul.f32 %v6588_v50, %v2602_v3 }
 0x56c   :  { %v2634_v7 = vadd.f32 %v6786_v46, %v2608_v29  ;;  %v2667_v46 = vmul.f32 %v6605_v21, %v2664_v12  ;;  %v2677_v22 = vrot.slane %v2668_v28, 1  ;;  %v2753_v3 = vmul.f32 %v6577_v31, %v2752_v9  ;;  %v8238_v28 = vld [vmem:[#allocation30_spill] sm:$0xff] }
 0x56d   :  { %v6969_v57 = vpop.permute.xlu0 %2945  ;;  %v2567_v15 = vadd.f32 %v6683_v0, %v2535_v16  ;;  %v2607_v55 = vadd.f32 %v2603_v35, %v2597_v23  ;;  %v6999_v59 = vpop.permute.xlu2 %3097  ;;  %v2568_v0 = vadd.f32 %v6756_v33, %v2536_v45  ;;  %v2675_v16 = vsel %vm169_vm0, %v2673_v34, %v2674_v39  ;;  %v8239_v34 = vld [vmem:[#allocation22_spill] sm:$0xff] }
 0x56e   :  { %v2660_v52 = vadd.f32 %v6820_v56, %v2634_v7  ;;  %v2676_v49 = vrot.slane %v2667_v46, 1  ;;  %v2755_v35 = vmul.f32 %v6605_v21, %v2752_v9  ;;  %v2761_v53 = vrot.slane %v2753_v3, 2 }
 0x56f   :  { %v2599_v11 = vadd.f32 %v6768_v40, %v2567_v15  ;;  %v2633_v37 = vadd.f32 %v6717_v41, %v2607_v55  ;;  %v2600_v14 = vadd.f32 %v6782_v4, %v2568_v0  ;;  %v2754_v41 = vmul.f32 %v6598_v5, %v2752_v9 }
 0x570   :  { %v2684_v56 = vadd.f32 %v2674_v39, %v2660_v52  ;;  %v2678_v23 = vsel %vm169_vm0, %v2676_v49, %v2677_v22  ;;  %v2840_v0 = vstv %s4760_s16  ;;  %v8242_v49 = vld [vmem:[#allocation21_spill] sm:$0xff]  ;;  %s4811_s16 = sld [smem:[#allocation2 + $0x8c]] }
 0x571   :  { %v2609_v61 = vadd.f32 %v2605_v54, %v2599_v11  ;;  %v2659_v33 = vadd.f32 %v6803_v13, %v2633_v37  ;;  %v2610_v12 = vadd.f32 %v2606_v2, %v2600_v14  ;;  %v2762_v7 = vrot.slane %v2754_v41, 2  ;;  %v8240_v14 = vld [vmem:[#allocation36_spill] sm:$0xff] }
 0x572   :  { %v6977_v30 = vpop.permute.xlu1 %2947  ;;  %v2716_v8 = vadd.f32 %v6760_v19, %v2684_v56  ;;  %v2764_v54 = vrot.slane %v2755_v35, 2 }
 0x573   :  { %v2635_v60 = vadd.f32 %v6799_v58, %v2609_v61  ;;  %v2683_v58 = vadd.f32 %v2675_v16, %v2659_v33  ;;  %v2636_v19 = vadd.f32 %v6733_v43, %v2610_v12  ;;  %v8243_v12 = vld [vmem:[#allocation23_spill] sm:$0xff] }
 0x574   :  { %v2748_v13 = vadd.f32 %v6853_v48, %v2716_v8  ;;  %v2841_v8 = vmul.f32 %v8243_v12, %v2840_v0 }
 0x575   :  { %v6985_v63 = vpop.permute.xlu0 %2975  ;;  %v2661_v4 = vadd.f32 %v6745_v10, %v2635_v60  ;;  %v7023_v15 = vpop.permute.xlu2 %3103  ;;  %v2715_v5 = vadd.f32 %v6832_v32, %v2683_v58  ;;  %v2756_v10 = vmul.f32 %v6588_v50, %v2752_v9  ;;  %v2662_v11 = vadd.f32 %v6825_v38, %v2636_v19  ;;  %v8237_v32 = vld [vmem:[#allocation19_spill] sm:$0xff] }
 0x576   :  { %v2772_v20 = vadd.f32 %v2762_v7, %v2748_v13  ;;  %v2763_v50 = vsel %vm258_vm1, %v2761_v53, %v2762_v7  ;;  %v2902_v9 = vstv %s4763_s17  ;;  %v8245_v19 = vld [vmem:[#allocation31_spill] sm:$0xff]  ;;  %v8246_v53 = vld [vmem:[#allocation33_spill] sm:$0xff] }
 0x577   :  { %v2685_v31 = vadd.f32 %v2678_v23, %v2661_v4  ;;  %v2747_v45 = vadd.f32 %v6771_v1, %v2715_v5  ;;  %v2765_v55 = vrot.slane %v2756_v10, 2  ;;  %v2686_v39 = vadd.f32 %v2677_v22, %v2662_v11  ;;  %v8244_v4 = vld [vmem:[#allocation24_spill] sm:$0xff] }
 0x578   :  { %v2804_v43 = vadd.f32 %v6875_v42, %v2772_v20  ;;  %v2842_v1 = vmul.f32 %v8240_v14, %v2840_v0  ;;  %v8241_v42 = vld [vmem:[#allocation16_spill] sm:$0xff]  ;;  %v2904_v23 = vmul.f32 %v8240_v14, %v2902_v9  ;;  %v2843_v5 = vmul.f32 %v8245_v19, %v2840_v0 }
 0x579   :  { %v2717_v48 = vadd.f32 %v6838_v25, %v2685_v31  ;;  %v2766_v38 = vsel %vm258_vm1, %v2764_v54, %v2765_v55  ;;  %v2718_v25 = vadd.f32 %v8238_v28, %v2686_v39  ;;  %v2771_v61 = vadd.f32 %v2763_v50, %v2747_v45  ;;  %v8249_v39 = vld [vmem:[#allocation35_spill] sm:$0xff]  ;;  %v8250_v28 = vld [vmem:[#allocation28_spill] sm:$0xff] }
 0x57a   :  { %v6996_v18 = vpop.permute.xlu1 %2977  ;;  %v2836_v37 = vadd.f32 %v8239_v34, %v2804_v43  ;;  %v2903_v10 = vmul.f32 %v8243_v12, %v2902_v9  ;;  %v2912_v54 = vrot.slane %v2904_v23, 1  ;;  %v2905_v20 = vmul.f32 %v8245_v19, %v2902_v9  ;;  %v8251_v34 = vld [vmem:[#allocation20_spill] sm:$0xff] }
 0x57b   :  { %v2749_v52 = vadd.f32 %v8237_v32, %v2717_v48  ;;  %v2803_v60 = vadd.f32 %v8241_v42, %v2771_v61  ;;  %v2750_v22 = vadd.f32 %v8242_v49, %v2718_v25  ;;  %v2990_v61 = vstv %s4766_s18  ;;  %v8252_v49 = vld [vmem:[#allocation32_spill] sm:$0xff]  ;;  %s4798_s18 = sld [smem:[#allocation2 + $0x7f]] }
 0x57c   :  { %v2846_v41 = vadd.f32 %v2842_v1, %v2836_v37  ;;  %v2911_v43 = vrot.slane %v2903_v10, 1  ;;  %v2914_v1 = vrot.slane %v2905_v20, 1  ;;  %v2993_v23 = vmul.f32 %v8245_v19, %v2990_v61  ;;  %v8255_v19 = vld [vmem:[#allocation25_spill] sm:$0xff] }
 0x57d   :  { %v7004_v40 = vpop.permute.xlu0 %3029  ;;  %v2773_v2 = vadd.f32 %v2766_v38, %v2749_v52  ;;  %v7042_v56 = vpop.permute.xlu2 %3127  ;;  %v2835_v16 = vadd.f32 %v6886_v17, %v2803_v60  ;;  %v2774_v7 = vadd.f32 %v2765_v55, %v2750_v22  ;;  %v8248_v52 = vld [vmem:[#allocation34_spill] sm:$0xff] }
 0x57e   :  { %v2872_v58 = vadd.f32 %v6903_v27, %v2846_v41  ;;  %v8247_v27 = vld [vmem:[#allocation13_spill] sm:$0xff]  ;;  %v2913_v60 = vsel %vm169_vm0, %v2911_v43, %v2912_v54 }
 0x57f   :  { %v2805_v3 = vadd.f32 %v8244_v4, %v2773_v2  ;;  %v2845_v17 = vadd.f32 %v2841_v8, %v2835_v16  ;;  %v2806_v11 = vadd.f32 %v8246_v53, %v2774_v7  ;;  %v2906_v48 = vmul.f32 %v8247_v27, %v2902_v9  ;;  %v8253_v8 = vld [vmem:[#allocation27_spill] sm:$0xff] }
 0x580   :  { %v2898_v31 = vadd.f32 %v6935_v36, %v2872_v58  ;;  %v2844_v38 = vmul.f32 %v8247_v27, %v2840_v0  ;;  %v2992_v16 = vmul.f32 %v8240_v14, %v2990_v61  ;;  %v2991_v0 = vmul.f32 %v8243_v12, %v2990_v61 }
 0x581   :  { %v2837_v35 = vadd.f32 %v6892_v51, %v2805_v3  ;;  %v2871_v50 = vadd.f32 %v8248_v52, %v2845_v17  ;;  %v2838_v55 = vadd.f32 %v8249_v39, %v2806_v11  ;;  %v2915_v2 = vrot.slane %v2906_v48, 1 }
 0x582   :  { %v7012_v62 = vpop.permute.xlu1 %3031  ;;  %v2922_v36 = vadd.f32 %v2912_v54, %v2898_v31  ;;  %v2994_v17 = vmul.f32 %v8247_v27, %v2990_v61  ;;  %v3000_v14 = vrot.slane %v2992_v16, 2  ;;  %v2999_v53 = vrot.slane %v2991_v0, 2 }
 0x583   :  { %v2847_v45 = vadd.f32 %v2843_v5, %v2837_v35  ;;  %v2897_v37 = vadd.f32 %v8251_v34, %v2871_v50  ;;  %v2848_v9 = vadd.f32 %v2844_v38, %v2838_v55  ;;  %v2916_v3 = vsel %vm169_vm0, %v2914_v1, %v2915_v2  ;;  %v8254_v5 = vld [vmem:[#allocation26_spill] sm:$0xff]  ;;  %v8257_v1 = vld [vmem:[#allocation11_spill] sm:$0xff] }
 0x584   :  { %v2954_v22 = vadd.f32 %v8252_v49, %v2922_v36  ;;  %v3002_v54 = vrot.slane %v2993_v23, 2  ;;  %v3003_v43 = vrot.slane %v2994_v17, 2  ;;  %v3001_v52 = vsel %vm258_vm1, %v2999_v53, %v3000_v14  ;;  %v8261_v17 = vld [vmem:[#allocation12_spill] sm:$0xff] }
 0x585   :  { %v7021_v29 = vpop.permute.xlu0 %3035  ;;  %v7064_v51 = vpop.permute.xlu2 %3181  ;;  %v2873_v25 = vadd.f32 %v8250_v28, %v2847_v45  ;;  %v2921_v4 = vadd.f32 %v2913_v60, %v2897_v37  ;;  %v2874_v10 = vadd.f32 %v8254_v5, %v2848_v9  ;;  %v3078_v50 = vstv %s4769_s19  ;;  %v8256_v28 = vld [vmem:[#allocation17_spill] sm:$0xff]  ;;  %v8258_v9 = vld [vmem:[#allocation14_spill] sm:$0xff]  ;;  %s4799_s19 = sld [smem:[#allocation2 + $0x80]] }
 0x586   :  { %v2986_v58 = vadd.f32 %v6985_v63, %v2954_v22  ;;  %v3140_v37 = vstv %s4772_s20  ;;  %v3079_v49 = vmul.f32 %v8258_v9, %v3078_v50  ;;  %s4789_s20 = sld [smem:[#allocation2 + $0x76]] }
 0x587   :  { %v2899_v41 = vadd.f32 %v8253_v8, %v2873_v25  ;;  %v2953_v7 = vadd.f32 %v6964_v26, %v2921_v4  ;;  %v2900_v12 = vadd.f32 %v6946_v24, %v2874_v10  ;;  %v3004_v24 = vsel %vm258_vm1, %v3002_v54, %v3003_v43 }
 0x588   :  { %v3010_v20 = vadd.f32 %v3000_v14, %v2986_v58  ;;  %v3080_v25 = vmul.f32 %v8256_v28, %v3078_v50  ;;  %v3142_v8 = vmul.f32 %v8256_v28, %v3140_v37  ;;  %v3141_v4 = vmul.f32 %v8258_v9, %v3140_v37 }
 0x589   :  { %v2923_v31 = vadd.f32 %v2916_v3, %v2899_v41  ;;  %v2985_v45 = vadd.f32 %v8255_v19, %v2953_v7  ;;  %v2924_v39 = vadd.f32 %v2915_v2, %v2900_v12  ;;  %v8260_v41 = vld [vmem:[#allocation29_spill] sm:$0xff]  ;;  %v3144_v14 = vmul.f32 %v8261_v17, %v3140_v37 }
 0x58a   :  { %v7030_v21 = vpop.permute.xlu1 %3061  ;;  %v3042_v26 = vadd.f32 %v7012_v62, %v3010_v20  ;;  %v3081_v0 = vmul.f32 %v8260_v41, %v3078_v50  ;;  %v3150_v10 = vrot.slane %v3142_v8, 1  ;;  %v3143_v7 = vmul.f32 %v8260_v41, %v3140_v37 }
 0x58b   :  { %v2955_v63 = vadd.f32 %v6969_v57, %v2923_v31  ;;  %v2956_v38 = vadd.f32 %v6977_v30, %v2924_v39  ;;  %v3009_v36 = vadd.f32 %v3001_v52, %v2985_v45  ;;  %v8259_v30 = vld [vmem:[#allocation37_spill] sm:$0xff]  ;;  %v3149_v53 = vrot.slane %v3141_v4, 1 }
 0x58c   :  { %v3074_v57 = vadd.f32 %v6979_v44, %v3042_v26  ;;  %v3082_v54 = vmul.f32 %v8261_v17, %v3078_v50  ;;  %v3152_v45 = vrot.slane %v3143_v7, 1 }
 0x58d   :  { %v7037_v46 = vpop.permute.xlu0 %3065  ;;  %v7084_v11 = vpop.permute.xlu2 %3211  ;;  %v2987_v27 = vadd.f32 %v6996_v18, %v2955_v63  ;;  %v3041_v34 = vadd.f32 %v7004_v40, %v3009_v36  ;;  %v2988_v60 = vadd.f32 %v8257_v1, %v2956_v38  ;;  %v3151_v26 = vsel %vm169_vm0, %v3149_v53, %v3150_v10 }
 0x58e   :  { %v3084_v22 = vadd.f32 %v3080_v25, %v3074_v57 }
 0x58f   :  { %v3011_v61 = vadd.f32 %v3004_v24, %v2987_v27  ;;  %v3073_v2 = vadd.f32 %v7030_v21, %v3041_v34  ;;  %v3012_v58 = vadd.f32 %v3003_v43, %v2988_v60  ;;  %v3153_v43 = vrot.slane %v3144_v14, 1 }
 0x591   :  { %v3043_v16 = vadd.f32 %v8259_v30, %v3011_v61  ;;  %v3083_v23 = vadd.f32 %v3079_v49, %v3073_v2  ;;  %v3044_v5 = vadd.f32 %v7021_v29, %v3012_v58  ;;  %v3154_v24 = vsel %vm169_vm0, %v3152_v45, %v3153_v43 }
 0x592   :  { %v7045_v33 = vpop.permute.xlu1 %3067 }
 0x593   :  { %v3075_v40 = vadd.f32 %v7037_v46, %v3043_v16  ;;  %v3109_v46 = vadd.f32 %v6999_v59, %v3083_v23  ;;  %v3076_v12 = vadd.f32 %v7045_v33, %v3044_v5 }
 0x595   :  { %v7053_v13 = vpop.permute.xlu0 %3099  ;;  %v7099_v18 = vpop.permute.xlu2 %3217  ;;  %v3085_v31 = vadd.f32 %v3081_v0, %v3075_v40  ;;  %v3086_v52 = vadd.f32 %v3082_v54, %v3076_v12 }
 0x596   :  { %v3110_v44 = vadd.f32 %v7053_v13, %v3084_v22 }
 0x597   :  { %v3112_v57 = vadd.f32 %v7023_v15, %v3086_v52 }
 0x59a   :  { %v7062_v32 = vpop.permute.xlu1 %3101 }
 0x59b   :  { %v3111_v63 = vadd.f32 %v7062_v32, %v3085_v31 }
 0x59d   :  { %v7071_v42 = vpop.permute.xlu0 %3123  ;;  %v3272_v19 = vpop.permute.xlu2 %3271  ;;  %v3137_v33 = vadd.f32 %v7042_v56, %v3111_v63 }
 0x59e   :  { %v3135_v29 = vadd.f32 %v7071_v42, %v3109_v46 }
 0x59f   :  { %v3161_v34 = vadd.f32 %v3154_v24, %v3137_v33 }
 0x5a0   :  { %v3159_v32 = vadd.f32 %v3151_v26, %v3135_v29 }
 0x5a2   :  { %v3126_v35 = vpop.permute.xlu1 %3125 }
 0x5a3   :  { %v3136_v21 = vadd.f32 %v3126_v35, %v3110_v44  ;;  %v3228_v35 = vstv %s4775_s21 }
 0x5a4   :  { %v3230_v59 = vmul.f32 %v8256_v28, %v3228_v35  ;;  %v3229_v50 = vmul.f32 %v8258_v9, %v3228_v35  ;;  %v3231_v42 = vmul.f32 %v8260_v41, %v3228_v35  ;;  %v3232_v61 = vmul.f32 %v8261_v17, %v3228_v35 }
 0x5a5   :  { %v7087_v48 = vpop.permute.xlu0 %3129  ;;  %v3160_v20 = vadd.f32 %v3150_v10, %v3136_v21  ;;  %v3302_v9 = vpop.permute.xlu2 %3301 }
 0x5a6   :  { %v3237_v28 = vrot.slane %v3229_v50, 2  ;;  %v3138_v56 = vadd.f32 %v7087_v48, %v3112_v57  ;;  %v3240_v37 = vrot.slane %v3231_v42, 2  ;;  %v3241_v22 = vrot.slane %v3232_v61, 2 }
 0x5a7   :  { %v3192_v39 = vadd.f32 %v7064_v51, %v3160_v20  ;;  %v3238_v51 = vrot.slane %v3230_v59, 2  ;;  %v3506_v50 = vstv %s4780_s23  ;;  %v7228_v61 = vstv %s4781_s24  ;;  %s4790_s23 = sld [smem:[#allocation2 + $0x77]] }
 0x5a8   :  { %v3162_v44 = vadd.f32 %v3153_v43, %v3138_v56  ;;  %v3242_v8 = vsel %vm258_vm1, %v3240_v37, %v3241_v22  ;;  %v3510_v57 = vmul.f32 %v6941_v47, %v3506_v50  ;;  %v7235_v56 = vstv %s4783_s25  ;;  %s4802_s25 = sld [smem:[#allocation2 + $0x83]] }
 0x5a9   :  { %v3239_v15 = vsel %vm258_vm1, %v3237_v28, %v3238_v51  ;;  %v3536_v28 = vmul.f32 %v6941_v47, %v7228_v61  ;;  %s4797_s24 = sld [smem:[#allocation2 + $0x7e]] }
 0x5aa   :  { %v3180_v55 = vpop.permute.xlu1 %3179 }
 0x5ab   :  { %v3191_v25 = vadd.f32 %v3180_v55, %v3159_v32  ;;  %v3316_v55 = vstv %s4778_s22  ;;  %v8262_v32 = vld [vmem:[#allocation15_spill] sm:$0xff]  ;;  %s4801_s22 = sld [smem:[#allocation2 + $0x82]] }
 0x5ac   :  { %v3507_v24 = vmul.f32 %v8262_v32, %v3506_v50  ;;  %v3583_v37 = vmul.f32 %v8262_v32, %v7235_v56 }
 0x5ad   :  { %v3184_v62 = vpop.permute.xlu0 %3183  ;;  %v3223_v49 = vadd.f32 %v7084_v11, %v3191_v25 }
 0x5ae   :  { %v3193_v60 = vadd.f32 %v3184_v62, %v3161_v34 }
 0x5af   :  { %v3247_v48 = vadd.f32 %v3239_v15, %v3223_v49 }
 0x5b2   :  { %v3186_v3 = vpop.permute.xlu1 %3185 }
 0x5b3   :  { %v3194_v0 = vadd.f32 %v3186_v3, %v3162_v44 }
 0x5b5   :  { %v3214_v13 = vpop.permute.xlu0 %3213  ;;  %v3226_v11 = vadd.f32 %v7099_v18, %v3194_v0 }
 0x5b6   :  { %v3224_v38 = vadd.f32 %v3214_v13, %v3192_v39 }
 0x5b7   :  { %v3250_v13 = vadd.f32 %v3241_v22, %v3226_v11 }
 0x5b8   :  { %v3248_v1 = vadd.f32 %v3238_v51, %v3224_v38  ;;  %v8263_v38 = vld [vmem:[#allocation18_spill] sm:$0xff]  ;;  %v3533_v51 = vmul.f32 %v8262_v32, %v7228_v61 }
 0x5b9   :  { %v3508_v42 = vmul.f32 %v8263_v38, %v3506_v50 }
 0x5ba   :  { %v3216_v27 = vpop.permute.xlu1 %3215 }
 0x5bb   :  { %v3225_v16 = vadd.f32 %v3216_v27, %v3193_v60 }
 0x5bd   :  { %v3268_v36 = vpop.permute.xlu0 %3267  ;;  %v3249_v58 = vadd.f32 %v3242_v8, %v3225_v16 }
 0x5be   :  { %v3279_v62 = vadd.f32 %v3268_v36, %v3247_v48  ;;  %v3509_v36 = vmul.f32 %v6931_v6, %v3506_v50 }
 0x5bf   :  { %v3281_v10 = vadd.f32 %v3272_v19, %v3249_v58 }
 0x5c2   :  { %v3270_v2 = vpop.permute.xlu1 %3269 }
 0x5c3   :  { %v3280_v30 = vadd.f32 %v3270_v2, %v3248_v1  ;;  %v3584_v1 = vmul.f32 %v8263_v38, %v7235_v56  ;;  %v3591_v2 = vrot.slane %v3583_v37, 1 }
 0x5c5   :  { %v3312_v40 = vadd.f32 %v3302_v9, %v3280_v30  ;;  %v3274_v41 = vpop.permute.xlu0 %3273  ;;  %v3592_v9 = vrot.slane %v3584_v1, 1 }
 0x5c6   :  { %v3282_v53 = vadd.f32 %v3274_v41, %v3250_v13 }
 0x5c7   :  { %v3318_v4 = vadd.f32 %v3316_v55, %v3312_v40  ;;  %v3593_v22 = vsel %vm169_vm0, %v3591_v2, %v3592_v9 }
 0x5c9   :  { %v7131_v23 = vmax.f32 %v3318_v4, 0.0 }
 0x5ca   :  { %v3300_v21 = vpop.permute.xlu1 %3299 }
 0x5cb   :  { %v3311_v5 = vadd.f32 %v3300_v21, %v3279_v62  ;;  %3331 = vrot.lane.b32.xlu0 %v7131_v23, %s4945_s6  ;;  %v7162_v29 = vrot.slane %v7131_v23, 1  ;;  %v7184_v27 = vrot.slane %v7131_v23, 2 }
 0x5cd   :  { %v3317_v7 = vadd.f32 %v3316_v55, %v3311_v5  ;;  %v3304_v17 = vpop.permute.xlu0 %3303 }
 0x5ce   :  { %v3313_v14 = vadd.f32 %v3304_v17, %v3281_v10 }
 0x5cf   :  { %v7136_v31 = vmax.f32 %v3317_v7, 0.0 }
 0x5d0   :  { %v3319_v3 = vadd.f32 %v3316_v55, %v3313_v14 }
 0x5d1   :  { %3329 = vrot.lane.b32.xlu2 %v7136_v31, %s4945_s6  ;;  %v3361_v35 = vrot.slane %v7136_v31, 1  ;;  %v3407_v26 = vrot.slane %v7136_v31, 2 }
 0x5d2   :  { %v7140_v46 = vmax.f32 %v3319_v3, 0.0  ;;  %v3306_v12 = vpop.permute.xlu1 %3305 }
 0x5d3   :  { %v3314_v18 = vadd.f32 %v3306_v12, %v3282_v53  ;;  %3345 = vrot.lane.b32.xlu0 %v7136_v31, %s4946_s11  ;;  %v7172_v43 = vsel %vm169_vm0, %v3361_v35, %v7162_v29  ;;  %v7190_v52 = vsel %vm258_vm1, %v3407_v26, %v7184_v27 }
 0x5d4   :  { %3333 = vrot.lane.b32.xlu1 %v7140_v46, %s4945_s6  ;;  %v3364_v19 = vrot.slane %v7140_v46, 1  ;;  %v3410_v59 = vrot.slane %v7140_v46, 2 }
 0x5d5   :  { %v3320_v54 = vadd.f32 %v3316_v55, %v3314_v18  ;;  %v7244_v55 = vstv %s4784_s26  ;;  %s4779_s26 = sld [smem:[#allocation2 + $0x6c]] }
 0x5d6   :  { %v3615_v44 = vmul.f32 %v8262_v32, %v7244_v55  ;;  %v7251_v8 = vmul.f32 %v8263_v38, %v7244_v55  ;;  %v7264_v35 = vmul.f32 %v6941_v47, %v7244_v55 }
 0x5d7   :  { %v7146_v20 = vmax.f32 %v3320_v54, 0.0 }
 0x5d8   :  { %v3623_v0 = vrot.slane %v3615_v44, 1  ;;  %v3624_v48 = vrot.slane %v7251_v8, 1 }
 0x5d9   :  { %3335 = vrot.lane.b32.xlu2 %v7146_v20, %s4945_s6  ;;  %v7155_v63 = vrot.slane %v7146_v20, 1  ;;  %v7199_v39 = vrot.slane %v7146_v20, 2 }
 0x5da   :  { %v3625_v4 = vsel %vm169_vm0, %v3623_v0, %v3624_v48  ;;  %v77_v0 = vld [vmem:[%s8049_s3 + $0x60] sm:$0xff] }
 0x5db   :  { %3351 = vrot.lane.b32.xlu0 %v7146_v20, %s4946_s11  ;;  %v7166_v45 = vsel %vm169_vm0, %v3364_v19, %v7155_v63  ;;  %v7208_v33 = vsel %vm258_vm1, %v3410_v59, %v7199_v39 }
 0x5dc   :  { %3347 = vrot.lane.b32.xlu1 %v7131_v23, %s4946_s11 }
 0x5e1   :  { %3349 = vrot.lane.b32.xlu2 %v7140_v46, %s4946_s11 }
 0x5e3   :  { %3379 = vrot.lane.b32.xlu0 %v7166_v45, %s4945_s6 }
 0x5e4   :  { %3375 = vrot.lane.b32.xlu1 %v7172_v43, %s4945_s6 }
 0x5e9   :  { %3377 = vrot.lane.b32.xlu2 %v7162_v29, %s4945_s6 }
 0x5eb   :  { %3393 = vrot.lane.b32.xlu0 %v7162_v29, %s4946_s11 }
 0x5ec   :  { %3381 = vrot.lane.b32.xlu1 %v7155_v63, %s4945_s6 }
 0x5f1   :  { %3391 = vrot.lane.b32.xlu2 %v7172_v43, %s4946_s11 }
 0x5f3   :  { %3421 = vrot.lane.b32.xlu0 %v7190_v52, %s4945_s6 }
 0x5f4   :  { %3395 = vrot.lane.b32.xlu1 %v7166_v45, %s4946_s11 }
 0x5f9   :  { %3397 = vrot.lane.b32.xlu2 %v7155_v63, %s4946_s11 }
 0x5fb   :  { %3427 = vrot.lane.b32.xlu0 %v7199_v39, %s4945_s6 }
 0x5fc   :  { %3423 = vrot.lane.b32.xlu1 %v7184_v27, %s4945_s6 }
 0x601   :  { %3425 = vrot.lane.b32.xlu2 %v7208_v33, %s4945_s6 }
 0x603   :  { %3441 = vrot.lane.b32.xlu0 %v7208_v33, %s4946_s11 }
 0x604   :  { %3437 = vrot.lane.b32.xlu1 %v7190_v52, %s4946_s11 }
 0x609   :  { %3439 = vrot.lane.b32.xlu2 %v7184_v27, %s4946_s11 }
 0x60c   :  { %3443 = vrot.lane.b32.xlu1 %v7199_v39, %s4946_s11 }
 0x614   :  { %3515 = vrot.lane.b32.xlu1 %v3507_v24, %s4945_s6 }
 0x61c   :  { %3517 = vrot.lane.b32.xlu1 %v3508_v42, %s4945_s6 }
 0x624   :  { %3519 = vrot.lane.b32.xlu1 %v3509_v36, %s4945_s6 }
 0x62b   :  { %v3330_v25 = vpop.permute.xlu2 %3329 }
 0x62c   :  { %3521 = vrot.lane.b32.xlu1 %v3510_v57, %s4945_s6  ;;  %v3341_v13 = vmax.f32 %v7136_v31, %v3330_v25 }
 0x633   :  { %v3336_v34 = vpop.permute.xlu2 %3335 }
 0x634   :  { %3541 = vrot.lane.b32.xlu1 %v3533_v51, %s4946_s11 }
 0x63b   :  { %v3350_v49 = vpop.permute.xlu2 %3349 }
 0x63c   :  { %3547 = vrot.lane.b32.xlu1 %v3536_v28, %s4946_s11 }
 0x63d   :  { %v3332_v60 = vpop.permute.xlu0 %3331 }
 0x63e   :  { %v3342_v5 = vmax.f32 %v7131_v23, %v3332_v60  ;;  %v3627_v23 = vrot.slane %v7264_v35, 1  ;;  %v7353_v35 = vld [vmem:[%s8046_s0 + $0x58] sm:$0x7f] }
 0x643   :  { %v3378_v15 = vpop.permute.xlu2 %3377 }
 0x644   :  { %3597 = vrot.lane.b32.xlu1 %v3593_v22, %s4945_s6 }
 0x645   :  { %v3346_v30 = vpop.permute.xlu0 %3345 }
 0x646   :  { %v3334_v16 = vpop.permute.xlu1 %3333  ;;  %v3357_v53 = vmax.f32 %v3341_v13, %v3346_v30 }
 0x647   :  { %v3343_v14 = vmax.f32 %v7140_v46, %v3334_v16  ;;  %v3344_v46 = vmax.f32 %v7146_v20, %v3336_v34 }
 0x648   :  { %v3371_v26 = vmax.f32 %v3357_v53, %v7172_v43 }
 0x649   :  { %v3359_v18 = vmax.f32 %v3343_v14, %v3350_v49 }
 0x64b   :  { %v3392_v58 = vpop.permute.xlu2 %3391  ;;  %v3373_v31 = vmax.f32 %v3359_v18, %v7166_v45 }
 0x64c   :  { %3599 = vrot.lane.b32.xlu1 %v3592_v9, %s4945_s6  ;;  %v70_v9 = vld [vmem:[%s8049_s3 + $0x28] sm:$0x7] }
 0x64d   :  { %v3352_v40 = vpop.permute.xlu0 %3351 }
 0x64e   :  { %v3348_v41 = vpop.permute.xlu1 %3347  ;;  %v3360_v24 = vmax.f32 %v3344_v46, %v3352_v40 }
 0x64f   :  { %v3358_v17 = vmax.f32 %v3342_v5, %v3348_v41  ;;  %v7289_v41 = vstv %s4786_s27  ;;  %v93_v5 = vld [vmem:[%s8049_s3 + $0xe0] sm:$0xff]  ;;  %s4792_s27 = sld [smem:[#allocation2 + $0x79]] }
 0x650   :  { %v3374_v43 = vmax.f32 %v3360_v24, %v7155_v63 }
 0x651   :  { %v3372_v3 = vmax.f32 %v3358_v17, %v7162_v29 }
 0x653   :  { %v3398_v7 = vpop.permute.xlu2 %3397  ;;  %v3388_v19 = vmax.f32 %v3372_v3, %v3378_v15 }
 0x654   :  { %3629 = vrot.lane.b32.xlu1 %v3625_v4, %s4946_s11 }
 0x655   :  { %v3380_v62 = vpop.permute.xlu0 %3379 }
 0x656   :  { %v3376_v21 = vpop.permute.xlu1 %3375  ;;  %v3389_v42 = vmax.f32 %v3373_v31, %v3380_v62  ;;  %v3673_v62 = vmul.f32 %v6931_v6, %v7289_v41 }
 0x657   :  { %v3387_v29 = vmax.f32 %v3371_v26, %v3376_v21  ;;  %v7298_v21 = vmul.f32 %v6941_v47, %v7289_v41  ;;  %v78_v26 = vld [vmem:[%s8049_s3 + $0x68] sm:$0x7] }
 0x658   :  { %v3682_v17 = vrot.slane %v3673_v62, 2 }
 0x659   :  { %v3403_v28 = vmax.f32 %v3387_v29, %v3392_v58  ;;  %v3683_v14 = vrot.slane %v7298_v21, 2 }
 0x65b   :  { %v3426_v59 = vpop.permute.xlu2 %3425  ;;  %v3417_v1 = vmax.f32 %v3403_v28, %v7190_v52  ;;  %v85_v52 = vld [vmem:[%s8049_s3 + $0xa0] sm:$0xff]  ;;  %v3617_v28 = vmul.f32 %v6931_v6, %v7244_v55  ;;  %v7338_v55 = vstv %s4789_s20  ;;  %s4813_s20 = sld [smem:[#allocation2 + $0x8e]] }
 0x65c   :  { %3635 = vrot.lane.b32.xlu1 %v3627_v23, %s4946_s11 }
 0x65d   :  { %v3394_v11 = vpop.permute.xlu0 %3393 }
 0x65e   :  { %v3382_v10 = vpop.permute.xlu1 %3381  ;;  %v3404_v50 = vmax.f32 %v3388_v19, %v3394_v11 }
 0x65f   :  { %v3390_v20 = vmax.f32 %v3374_v43, %v3382_v10 }
 0x660   :  { %v3418_v25 = vmax.f32 %v3404_v50, %v7184_v27  ;;  %v86_v27 = vld [vmem:[%s8049_s3 + $0xa8] sm:$0x7] }
 0x661   :  { %v3406_v63 = vmax.f32 %v3390_v20, %v3398_v7 }
 0x663   :  { %v3440_v34 = vpop.permute.xlu2 %3439  ;;  %v3420_v11 = vmax.f32 %v3406_v63, %v7199_v39  ;;  %v3684_v39 = vsel %vm258_vm1, %v3682_v17, %v3683_v14  ;;  %v3535_v63 = vmul.f32 %v6931_v6, %v7228_v61 }
 0x664   :  { %3689 = vrot.lane.b32.xlu1 %v3684_v39, %s4945_s6 }
 0x665   :  { %v3422_v12 = vpop.permute.xlu0 %3421 }
 0x666   :  { %v3396_v54 = vpop.permute.xlu1 %3395  ;;  %v3433_v2 = vmax.f32 %v3417_v1, %v3422_v12  ;;  %v3626_v1 = vrot.slane %v3617_v28, 1 }
 0x667   :  { %v3405_v57 = vmax.f32 %v3389_v42, %v3396_v54 }
 0x669   :  { %v3419_v45 = vmax.f32 %v3405_v57, %v7208_v33  ;;  %v69_v33 = vld [vmem:[%s8049_s3 + $0x20] sm:$0xff] }
 0x66b   :  { %v3435_v22 = vmax.f32 %v3419_v45, %v3426_v59  ;;  %v94_v59 = vld [vmem:[%s8049_s3 + $0xe8] sm:$0x7] }
 0x66d   :  { %v3428_v36 = vpop.permute.xlu0 %3427 }
 0x66e   :  { %v3424_v51 = vpop.permute.xlu1 %3423  ;;  %v3436_v13 = vmax.f32 %v3420_v11, %v3428_v36  ;;  %v7321_v36 = vstv %s4787_s13 }
 0x66f   :  { %v3434_v37 = vmax.f32 %v3418_v25, %v3424_v51  ;;  %v7325_v51 = vmul.f32 %v8263_v38, %v7321_v36 }
 0x671   :  { %v3450_v60 = vmax.f32 %v3434_v37, %v3440_v34  ;;  %v3712_v34 = vrot.slane %v7325_v51, 2  ;;  %v7475_v51 = vld [vmem:[%s8046_s0 + $0x48] sm:$0x7f] }
 0x673   :  { %v3454_v15 = vmul.f32 %v3450_v60, %v70_v9  ;;  %v3475_v44 = vmul.f32 %v3450_v60, %v86_v27  ;;  %3719 = vrot.lane.b32.xlu1 %v3712_v34, %s4946_s11  ;;  %v7343_v9 = vld [vmem:[%s8046_s0 + $0x10] sm:$0xff] }
 0x674   :  { %v3745_v27 = vmul.f32 %v7343_v9, %v7338_v55 }
 0x675   :  { %v3442_v49 = vpop.permute.xlu0 %3441  ;;  %v3458_v12 = vsel %vm1195_vm2, %v3454_v15, 0.0  ;;  %v3479_v18 = vsel %vm1195_vm2, %v3475_v44, 0.0  ;;  %v7374_v15 = vld [vmem:[%s8046_s0 + $0x50] sm:$0xff] }
 0x676   :  { %v3438_v30 = vpop.permute.xlu1 %3437  ;;  %v3451_v40 = vmax.f32 %v3435_v22, %v3442_v49 }
 0x677   :  { %v3449_v16 = vmax.f32 %v3433_v2, %v3438_v30  ;;  %v3628_v2 = vsel %vm169_vm0, %v3626_v1, %v3627_v23  ;;  %v3748_v23 = vmul.f32 %v7353_v35, %v7338_v55  ;;  %v7367_v30 = vstv %s4790_s23  ;;  %s4791_s23 = sld [smem:[#allocation2 + $0x78]] }
 0x678   :  { %v3455_v3 = vmul.f32 %v3451_v40, %v77_v0  ;;  %v3476_v53 = vmul.f32 %v3451_v40, %v93_v5  ;;  %v3773_v44 = vmul.f32 %v7374_v15, %v7367_v30  ;;  %v7378_v40 = vstv %s4779_s26  ;;  %s4800_s26 = sld [smem:[#allocation2 + $0x81]] }
 0x679   :  { %v3453_v4 = vmul.f32 %v3449_v16, %v69_v33  ;;  %v3474_v58 = vmul.f32 %v3449_v16, %v85_v52  ;;  %v3586_v33 = vmul.f32 %v6941_v47, %v7235_v56  ;;  %v3534_v52 = vmul.f32 %v8263_v38, %v7228_v61 }
 0x67a   :  { %v3460_v50 = vsel %vm1193_vm3, %v3455_v3, 0.0  ;;  %v3481_v29 = vsel %vm1193_vm3, %v3476_v53, 0.0  ;;  %v3585_v16 = vmul.f32 %v6931_v6, %v7235_v56  ;;  %v3497_v61 = vmul.f32 %v8262_v32, %v7378_v40  ;;  %v7390_v56 = vld [vmem:[%s8046_s0 + $0x18] sm:$0x7f] }
 0x67b   :  { %v3457_v10 = vsel %vm1193_vm3, %v3453_v4, 0.0  ;;  %v3478_v7 = vsel %vm1193_vm3, %v3474_v58, 0.0  ;;  %3753 = vrot.lane.b32.xlu1 %v3745_v27, %s4945_s6  ;;  %v3595_v0 = vrot.slane %v3586_v33, 1  ;;  %v7384_v6 = vstv %s4792_s27  ;;  %s4803_s27 = sld [smem:[#allocation2 + $0x84]] }
 0x67c   :  { %v3459_v54 = vadd.f32 %v3458_v12, %v3457_v10  ;;  %v3480_v19 = vadd.f32 %v3479_v18, %v3478_v7  ;;  %v3594_v58 = vrot.slane %v3585_v16, 1  ;;  %v7394_v62 = vmul.f32 %v7390_v56, %v7384_v6  ;;  %v7418_v18 = vld [vmem:[%s8046_s0] sm:$0xff] }
 0x67d   :  { %v3500_v7 = vmul.f32 %v6941_v47, %v7378_v40  ;;  %v3672_v12 = vmul.f32 %v8263_v38, %v7289_v41  ;;  %v3671_v39 = vmul.f32 %v7418_v18, %v7289_v41  ;;  %v7435_v41 = vstv %s4782_s7  ;;  %s4807_s7 = sld [smem:[#allocation2 + $0x88]] }
 0x67e   :  { %v3444_v46 = vpop.permute.xlu1 %3443  ;;  %v3482_v57 = vadd.f32 %v3481_v29, %v3480_v19  ;;  %v3461_v25 = vadd.f32 %v3460_v50, %v3459_v54  ;;  %v3596_v32 = vsel %vm169_vm0, %v3594_v58, %v3595_v0  ;;  %v3830_v5 = vrot.slane %v7394_v62, 1  ;;  %v7541_v62 = vld [vmem:[%s8046_s0 + $0x60] sm:$0xff] }
 0x67f   :  { %v3452_v31 = vmax.f32 %v3436_v13, %v3444_v46  ;;  %v7404_v13 = vstv %s4793_s1  ;;  %v3703_v46 = vmul.f32 %v7418_v18, %v7321_v36  ;;  %v3746_v21 = vmul.f32 %v7390_v56, %v7338_v55  ;;  %s4812_s1 = sld [smem:[#allocation2 + $0x8d]] }
 0x680   :  { %v3853_v3 = vmul.f32 %v7343_v9, %v7404_v13  ;;  %v7410_v53 = vmul.f32 %v7390_v56, %v7404_v13  ;;  %v7439_v29 = vmul.f32 %v7353_v35, %v7404_v13 }
 0x681   :  { %v3456_v24 = vmul.f32 %v3452_v31, %v78_v26  ;;  %v3477_v42 = vmul.f32 %v3452_v31, %v94_v59  ;;  %v3680_v59 = vrot.slane %v3672_v12, 2  ;;  %v3679_v31 = vrot.slane %v3671_v39, 2 }
 0x682   :  { %v3861_v54 = vrot.slane %v3853_v3, 1  ;;  %v3862_v19 = vrot.slane %v7410_v53, 1  ;;  %v3711_v8 = vrot.slane %v3703_v46, 2  ;;  %v3821_v3 = vmul.f32 %v7343_v9, %v7384_v6 }
 0x683   :  { %v3462_v43 = vsel %vm1195_vm2, %v3456_v24, 0.0  ;;  %v3483_v37 = vsel %vm1195_vm2, %v3477_v42, 0.0  ;;  %3759 = vrot.lane.b32.xlu1 %v3748_v23, %s4945_s6  ;;  %v3559_v24 = vmul.f32 %v7418_v18, %v7435_v41  ;;  %v7447_v42 = vld [vmem:[%s8046_s0 + $0x8] sm:$0x7f]  ;;  %v7522_v12 = vstv %s4799_s19  ;;  %s4805_s19 = sld [smem:[#allocation2 + $0x86]] }
 0x684   :  { %v3484_v20 = vadd.f32 %v3483_v37, %v3482_v57  ;;  %v3463_v45 = vadd.f32 %v3462_v43, %v3461_v25  ;;  %v3863_v26 = vsel %vm169_vm0, %v3861_v54, %v3862_v19  ;;  %v7451_v57 = vmul.f32 %v7447_v42, %v7435_v41 }
 0x685   :  { %v3865_v25 = vrot.slane %v7439_v29, 1  ;;  %v3567_v28 = vrot.slane %v3559_v24, 1 }
 0x686   :  { %3485 = vadd.xlane.f32.xlu0 %v3484_v20  ;;  %3464 = vadd.xlane.f32.xlu2 %v3463_v45  ;;  %v3516_v60 = vpop.permute.xlu1 %3515  ;;  %v3568_v43 = vrot.slane %v7451_v57, 1  ;;  %v3713_v20 = vsel %vm258_vm1, %v3711_v8, %v3712_v34  ;;  %v3706_v34 = vmul.f32 %v7475_v51, %v7321_v36 }
 0x687   :  { %v3527_v11 = vadd.f32 %v3516_v60, %v3497_v61  ;;  %v7465_v60 = vstv %s4795_s10 }
 0x688   :  { %v3569_v45 = vsel %vm169_vm0, %v3567_v28, %v3568_v43  ;;  %v3912_v27 = vmul.f32 %v7353_v35, %v7465_v60  ;;  %v3909_v29 = vmul.f32 %v7343_v9, %v7465_v60 }
 0x68a   :  { %v3921_v16 = vrot.slane %v3912_v27, 2 }
 0x68b   :  { %3783 = vrot.lane.b32.xlu1 %v3773_v44, %s4946_s11 }
 0x68e   :  { %v7347_v49 = vpop.permute.xlu1 %3517 }
 0x693   :  { %3837 = vrot.lane.b32.xlu1 %v3830_v5, %s4945_s6 }
 0x696   :  { %v7359_v22 = vpop.permute.xlu1 %3519 }
 0x69a   :  { %3545 = vrot.lane.b32.xlu0 %v3535_v63, %s4946_s11  ;;  %v7482_v63 = vld [vmem:[%s8046_s0 + $0x40] sm:$0xff] }
 0x69b   :  { %3867 = vrot.lane.b32.xlu1 %v3863_v26, %s4946_s11  ;;  %v3705_v33 = vmul.f32 %v7482_v63, %v7321_v36  ;;  %v3747_v36 = vmul.f32 %v7374_v15, %v7338_v55  ;;  %v3771_v55 = vmul.f32 %v7343_v9, %v7367_v30  ;;  %v3824_v26 = vmul.f32 %v7353_v35, %v7384_v6 }
 0x69c   :  { %v3499_v57 = vmul.f32 %v7482_v63, %v7378_v40 }
 0x69d   :  { %v3714_v61 = vrot.slane %v3705_v33, 2  ;;  %v3833_v46 = vrot.slane %v3824_v26, 1  ;;  %v7595_v33 = vld [vmem:[%s8046_s0 + $0x68] sm:$0x7f] }
 0x69e   :  { %3543 = vrot.lane.b32.xlu2 %v3534_v52, %s4946_s11  ;;  %v3522_v4 = vpop.permute.xlu1 %3521 }
 0x69f   :  { %v3530_v47 = vadd.f32 %v3522_v4, %v3500_v7 }
 0x6a2   :  { %3603 = vrot.lane.b32.xlu0 %v3595_v0, %s4945_s6  ;;  %v3715_v0 = vrot.slane %v3706_v34, 2  ;;  %v3940_v34 = vstv %s4796_s28  ;;  %s4806_s28 = sld [smem:[#allocation2 + $0x87]] }
 0x6a3   :  { %3873 = vrot.lane.b32.xlu1 %v3865_v25, %s4946_s11 }
 0x6a4   :  { %v3716_v58 = vsel %vm258_vm1, %v3714_v61, %v3715_v0 }
 0x6a6   :  { %3601 = vrot.lane.b32.xlu2 %v3596_v32, %s4945_s6  ;;  %v3542_v10 = vpop.permute.xlu1 %3541 }
 0x6a7   :  { %v3553_v17 = vadd.f32 %v3542_v10, %v3527_v11  ;;  %v7509_v10 = vld [vmem:[%s8046_s0 + $0x20] sm:$0xff] }
 0x6a8   :  { %v4009_v39 = vmul.f32 %v7509_v10, %v7522_v12 }
 0x6a9   :  { %v3577_v1 = vadd.f32 %v3569_v45, %v3553_v17  ;;  %v3772_v17 = vmul.f32 %v7390_v56, %v7367_v30  ;;  %v3910_v45 = vmul.f32 %v7390_v56, %v7465_v60 }
 0x6aa   :  { %3633 = vrot.lane.b32.xlu0 %v3628_v2, %s4946_s11  ;;  %v3911_v2 = vmul.f32 %v7374_v15, %v7465_v60  ;;  %v3942_v60 = vmul.f32 %v7390_v56, %v3940_v34 }
 0x6ab   :  { %v3918_v27 = vrot.slane %v3910_v45, 2 }
 0x6ac   :  { %v3920_v52 = vrot.slane %v3911_v2, 2 }
 0x6ae   :  { %3631 = vrot.lane.b32.xlu2 %v3624_v48, %s4946_s11  ;;  %v3548_v38 = vpop.permute.xlu1 %3547  ;;  %v3681_v48 = vsel %vm258_vm1, %v3679_v31, %v3680_v59  ;;  %v3922_v44 = vsel %vm258_vm1, %v3920_v52, %v3921_v16  ;;  %v3855_v31 = vmul.f32 %v7374_v15, %v7404_v13  ;;  %v3941_v52 = vmul.f32 %v7343_v9, %v3940_v34 }
 0x6af   :  { %v7431_v50 = vadd.f32 %v3548_v38, %v3530_v47  ;;  %3927 = vrot.lane.b32.xlu1 %v3922_v44, %s4945_s6  ;;  %v3829_v47 = vrot.slane %v3821_v3, 1  ;;  %v3823_v38 = vmul.f32 %v7374_v15, %v7384_v6  ;;  %v7555_v6 = vld [vmem:[%s8046_s0 + $0x28] sm:$0x7f]  ;;  %v3950_v44 = vrot.slane %v3942_v60, 2 }
 0x6b0   :  { %v3864_v24 = vrot.slane %v3855_v31, 1  ;;  %v3949_v61 = vrot.slane %v3941_v52, 2 }
 0x6b1   :  { %v3831_v54 = vsel %vm169_vm0, %v3829_v47, %v3830_v5  ;;  %v4011_v5 = vmul.f32 %v7541_v62, %v7522_v12  ;;  %v3832_v8 = vrot.slane %v3823_v38, 1 }
 0x6b2   :  { %3687 = vrot.lane.b32.xlu0 %v3680_v59, %s4945_s6  ;;  %v3774_v59 = vmul.f32 %v7353_v35, %v7367_v30  ;;  %v7549_v30 = vstv %s4801_s22  ;;  %v3951_v47 = vsel %vm258_vm1, %v3949_v61, %v3950_v44 }
 0x6b3   :  { %v3834_v13 = vsel %vm169_vm0, %v3832_v8, %v3833_v46 }
 0x6b6   :  { %3685 = vrot.lane.b32.xlu2 %v3681_v48, %s4945_s6  ;;  %v3598_v37 = vpop.permute.xlu1 %3597  ;;  %v7559_v48 = vmul.f32 %v7555_v6, %v7549_v30 }
 0x6b7   :  { %v3609_v23 = vadd.f32 %v3598_v37, %v3577_v1  ;;  %3929 = vrot.lane.b32.xlu1 %v3921_v16, %s4945_s6  ;;  %v3866_v37 = vsel %vm169_vm0, %v3864_v24, %v3865_v25 }
 0x6b8   :  { %v4068_v28 = vrot.slane %v7559_v48, 1  ;;  %v4061_v48 = vmul.f32 %v7541_v62, %v7549_v30 }
 0x6ba   :  { %3717 = vrot.lane.b32.xlu0 %v3713_v20, %s4946_s11  ;;  %v7570_v20 = vstv %s4802_s25  ;;  %s4814_s25 = sld [smem:[#allocation2 + $0x8f]] }
 0x6bb   :  { %v7577_v1 = vmul.f32 %v7555_v6, %v7570_v20  ;;  %v7599_v53 = vmul.f32 %v7595_v33, %v7570_v20 }
 0x6bd   :  { %v4100_v2 = vrot.slane %v7577_v1, 1  ;;  %v4103_v16 = vrot.slane %v7599_v53, 1  ;;  %v7717_v1 = vstv %s4810_s12  ;;  %s4647_s12 = sshll.u32 %s8051_s5, 4  ;;  %s4648_s12 = int_to_ptr.hbm [resolvable:$true] %s4647_s12 }
 0x6be   :  { %3691 = vrot.lane.b32.xlu2 %v3683_v14, %s4945_s6  ;;  %v7490_v4 = vpop.permute.xlu1 %3599  ;;  %v7504_v14 = vstv %s4798_s18 }
 0x6bf   :  { %v3983_v7 = vmul.f32 %v7509_v10, %v7504_v14 }
 0x6c1   :  { %3991 = vrot.lane.b32.xlu1 %v3983_v7, %s4945_s6 }
 0x6c2   :  { %3723 = vrot.lane.b32.xlu0 %v3715_v0, %s4946_s11 }
 0x6c6   :  { %3721 = vrot.lane.b32.xlu2 %v3716_v58, %s4946_s11  ;;  %v3630_v11 = vpop.permute.xlu1 %3629  ;;  %v7610_v58 = vstv %s4804_s29  ;;  %s4809_s29 = sld [smem:[#allocation2 + $0x8a]] }
 0x6c7   :  { %v7498_v32 = vadd.f32 %v3630_v11, %v3609_v23  ;;  %v3917_v23 = vrot.slane %v3909_v29, 2  ;;  %v4150_v7 = vmul.f32 %v7595_v33, %v7610_v58 }
 0x6c9   :  { %4017 = vrot.lane.b32.xlu1 %v4009_v39, %s4946_s11  ;;  %v3943_v39 = vmul.f32 %v7374_v15, %v3940_v34  ;;  %v4159_v26 = vrot.slane %v4150_v7, 2 }
 0x6ca   :  { %3757 = vrot.lane.b32.xlu0 %v3747_v36, %s4945_s6 }
 0x6ce   :  { %3755 = vrot.lane.b32.xlu2 %v3746_v21, %s4945_s6  ;;  %v7581_v25 = vpop.permute.xlu1 %3635  ;;  %v4149_v21 = vmul.f32 %v7541_v62, %v7610_v58 }
 0x6d1   :  { %4021 = vrot.lane.b32.xlu1 %v4011_v5, %s4946_s11 }
 0x6d2   :  { %3781 = vrot.lane.b32.xlu0 %v3772_v17, %s4946_s11 }
 0x6d6   :  { %3779 = vrot.lane.b32.xlu2 %v3771_v55, %s4946_s11  ;;  %v7605_v0 = vpop.permute.xlu1 %3689  ;;  %v3944_v55 = vmul.f32 %v7353_v35, %v3940_v34 }
 0x6d8   :  { %v3953_v24 = vrot.slane %v3944_v55, 2  ;;  %v3984_v55 = vmul.f32 %v7555_v6, %v7504_v14 }
 0x6d9   :  { %4075 = vrot.lane.b32.xlu1 %v4068_v28, %s4945_s6 }
 0x6da   :  { %3835 = vrot.lane.b32.xlu0 %v3831_v54, %s4945_s6  ;;  %v4158_v54 = vrot.slane %v4149_v21, 2  ;;  %v3562_v21 = vmul.f32 %v7475_v51, %v7435_v41 }
 0x6de   :  { %3785 = vrot.lane.b32.xlu2 %v3774_v59, %s4946_s11  ;;  %v3498_v59 = vmul.f32 %v7447_v42, %v7378_v40 }
 0x6e1   :  { %4107 = vrot.lane.b32.xlu1 %v4100_v2, %s4946_s11 }
 0x6e2   :  { %3841 = vrot.lane.b32.xlu0 %v3833_v46, %s4945_s6  ;;  %v4160_v46 = vsel %vm258_vm1, %v4158_v54, %v4159_v26 }
 0x6e6   :  { %3839 = vrot.lane.b32.xlu2 %v3834_v13, %s4945_s6  ;;  %v3952_v13 = vrot.slane %v3943_v39, 2  ;;  %v3529_v39 = vadd.f32 %v7359_v22, %v3499_v57  ;;  %v3986_v22 = vmul.f32 %v7595_v33, %v7504_v14 }
 0x6e8   :  { %v3954_v52 = vsel %vm258_vm1, %v3952_v13, %v3953_v24 }
 0x6e9   :  { %4111 = vrot.lane.b32.xlu1 %v4103_v16, %s4946_s11 }
 0x6ea   :  { %3871 = vrot.lane.b32.xlu0 %v3866_v37, %s4946_s11  ;;  %v3528_v37 = vadd.f32 %v7347_v49, %v3498_v59  ;;  %v3561_v49 = vmul.f32 %v7482_v63, %v7435_v41 }
 0x6ee   :  { %3869 = vrot.lane.b32.xlu2 %v3862_v19, %s4946_s11  ;;  %v3919_v19 = vsel %vm258_vm1, %v3917_v23, %v3918_v27 }
 0x6f1   :  { %4165 = vrot.lane.b32.xlu1 %v4160_v46, %s4945_s6 }
 0x6f2   :  { %3925 = vrot.lane.b32.xlu0 %v3918_v27, %s4945_s6  ;;  %v7626_v27 = vpop.permute.xlu1 %3719 }
 0x6f6   :  { %3923 = vrot.lane.b32.xlu2 %v3919_v19, %s4945_s6 }
 0x6f9   :  { %v3486_v36 = vpop.xlane.xlu0 %3485  ;;  %v3465_v11 = vpop.xlane.xlu2 %3464  ;;  %4167 = vrot.lane.b32.xlu1 %v4159_v26, %s4945_s6  ;;  %v7655_v26 = vld [vmem:[%s8046_s0 + $0x30] sm:$0xff] }
 0x6fa   :  { %v3487_v17 = vrot.slane %v3486_v36, 4  ;;  %v3466_v3 = vrot.slane %v3465_v11, 4  ;;  %3957 = vrot.lane.b32.xlu0 %v3950_v44, %s4946_s11  ;;  %v7646_v41 = vpop.permute.xlu1 %3753 }
 0x6fc   :  { %v3488_v38 = vadd.f32 %v3487_v17, %v3486_v36  ;;  %v3467_v5 = vadd.f32 %v3466_v3, %v3465_v11  ;;  %v3985_v11 = vmul.f32 %v7541_v62, %v7504_v14  ;;  %v3571_v3 = vrot.slane %v3562_v21, 1 }
 0x6fe   :  { %v3489_v31 = vrot.slane %v3488_v38, 2  ;;  %v3468_v8 = vrot.slane %v3467_v5, 2  ;;  %3955 = vrot.lane.b32.xlu2 %v3951_v47, %s4946_s11  ;;  %v3646_v47 = vstv %s4785_s2  ;;  %v3580_v14 = vadd.f32 %v3571_v3, %v7431_v50 }
 0x6ff   :  { %v7661_v46 = vmul.f32 %v7447_v42, %v3646_v47  ;;  %v4010_v42 = vmul.f32 %v7555_v6, %v7522_v12  ;;  %v4091_v50 = vmul.f32 %v7509_v10, %v7570_v20 }
 0x700   :  { %v3469_v45 = vadd.f32 %v3468_v8, %v3467_v5  ;;  %v3490_v29 = vadd.f32 %v3489_v31, %v3488_v38  ;;  %v3647_v5 = vmul.f32 %v7418_v18, %v3646_v47  ;;  %v4059_v8 = vmul.f32 %v7509_v10, %v7549_v30 }
 0x701   :  { %v3544_v34 = vpop.permute.xlu2 %3543 }
 0x702   :  { %v3554_v23 = vadd.f32 %v3544_v34, %v3528_v37  ;;  %3961 = vrot.lane.b32.xlu0 %v3953_v24, %s4946_s11  ;;  %v3470_v60 = vrot.slane %v3469_v45, 1  ;;  %v3491_v19 = vrot.slane %v3490_v29, 1  ;;  %v3655_v13 = vrot.slane %v3647_v5, 2 }
 0x703   :  { %v3656_v37 = vrot.slane %v7661_v46, 2  ;;  %v7674_v34 = vstv %s4808_s8 }
 0x704   :  { %v3578_v44 = vadd.f32 %v3568_v43, %v3554_v23  ;;  %v3471_v61 = vadd.f32 %v3470_v60, %v3469_v45  ;;  %v3492_v36 = vadd.f32 %v3491_v19, %v3490_v29  ;;  %v3570_v43 = vrot.slane %v3561_v49, 1  ;;  %v7677_v19 = vpop.permute.xlu1 %3759 }
 0x705   :  { %v4067_v29 = vrot.slane %v4059_v8, 1  ;;  %v3649_v60 = vmul.f32 %v7482_v63, %v3646_v47 }
 0x706   :  { %4824 = vpush %v3471_v61  ;;  %3959 = vrot.lane.b32.xlu2 %v3954_v52, %s4946_s11  ;;  %v3610_v7 = vadd.f32 %v7490_v4, %v3578_v44  ;;  %v7649_v4 = vstv %s4807_s7  ;;  %v3572_v40 = vsel %vm169_vm0, %v3570_v43, %v3571_v3  ;;  %v4247_v52 = vmul.f32 %v7655_v26, %v7674_v34  ;;  %v7703_v3 = vld [vmem:[%s8046_s0 + $0x70] sm:$0xff]  ;;  %s4947_s7 = smov [#allocation7]  }
 0x707   :  { %4826 = vpush %v3492_v36  ;;  %v4221_v59 = vmul.f32 %v7655_v26, %v7649_v4  ;;  %v3657_v61 = vsel %vm258_vm1, %v3655_v13, %v3656_v37  ;;  %v3650_v36 = vmul.f32 %v7475_v51, %v3646_v47  ;;  %v4069_v63 = vsel %vm169_vm0, %v4067_v29, %v4068_v28  ;;  %s4645_s8 = sshll.u32 %s4947_s7, 4  ;;  %s4646_s8 = int_to_ptr.vmem [resolvable:$true] %s4645_s8 }
 0x708   :  { %v3658_v21 = vrot.slane %v3649_v60, 2  ;;  %v4099_v43 = vrot.slane %v4091_v50, 1  ;;  %v4062_v28 = vmul.f32 %v7595_v33, %v7549_v30  ;;  %v3734_v29 = vstv %s4788_s15 }
 0x709   :  { %v3602_v17 = vpop.permute.xlu2 %3601  ;;  %4229 = vrot.lane.b32.xlu1 %v4221_v59, %s4945_s6  ;;  %v3659_v51 = vrot.slane %v3650_v36, 2 }
 0x70a   :  { %3995 = vrot.lane.b32.xlu0 %v3985_v11, %s4945_s6  ;;  %v3665_v11 = vadd.f32 %v3657_v61, %v7498_v32  ;;  %v4071_v59 = vrot.slane %v4062_v28, 1  ;;  %v3736_v61 = vmul.f32 %v7390_v56, %v3734_v29  ;;  %v7768_v28 = vld [vmem:[%s8046_s0 + $0x78] sm:$0x7f] }
 0x70c   :  { %v3546_v54 = vpop.permute.xlu0 %3545 }
 0x70d   :  { %v3555_v38 = vadd.f32 %v3546_v54, %v3529_v39  ;;  %v7711_v39 = vpop.permute.xlu1 %3783  ;;  %v4070_v54 = vrot.slane %v4061_v48, 1 }
 0x70e   :  { %3993 = vrot.lane.b32.xlu2 %v3984_v55, %s4945_s6  ;;  %v4249_v55 = vmul.f32 %v7703_v3, %v7674_v34 }
 0x70f   :  { %v3579_v31 = vadd.f32 %v3572_v40, %v3555_v38  ;;  %v4093_v40 = vmul.f32 %v7541_v62, %v7570_v20 }
 0x711   :  { %v3632_v24 = vpop.permute.xlu2 %3631  ;;  %v3611_v45 = vadd.f32 %v3602_v17, %v3579_v31  ;;  %4255 = vrot.lane.b32.xlu1 %v4247_v52, %s4946_s11  ;;  %v4012_v17 = vmul.f32 %v7595_v33, %v7522_v12  ;;  %v4101_v12 = vsel %vm169_vm0, %v4099_v43, %v4100_v2  ;;  %v4102_v8 = vrot.slane %v4093_v40, 1 }
 0x712   :  { %v3642_v18 = vadd.f32 %v3632_v24, %v3610_v7  ;;  %3997 = vrot.lane.b32.xlu0 %v3986_v22, %s4945_s6  ;;  %v7723_v22 = vld [vmem:[%s8046_s0 + $0x38] sm:$0x7f]  ;;  %v4072_v24 = vsel %vm169_vm0, %v4070_v54, %v4071_v59  ;;  %v4147_v52 = vmul.f32 %v7509_v10, %v7610_v58  ;;  %s4794_s0 = sld [smem:[#allocation2 + $0x7b]] }
 0x713   :  { %v7727_v20 = vmul.f32 %v7723_v22, %v7717_v1 }
 0x714   :  { %v3604_v23 = vpop.permute.xlu0 %3603  ;;  %v3666_v31 = vadd.f32 %v3656_v37, %v3642_v18 }
 0x715   :  { %v3612_v44 = vadd.f32 %v3604_v23, %v3580_v14  ;;  %v4306_v13 = vrot.slane %v7727_v20, 1  ;;  %v4104_v14 = vsel %vm169_vm0, %v4102_v8, %v4103_v16  ;;  %v7739_v37 = vpop.permute.xlu1 %3837  ;;  %v7741_v23 = vstv %s4811_s16 }
 0x716   :  { %4019 = vrot.lane.b32.xlu2 %v4010_v42, %s4946_s11  ;;  %v7748_v53 = vmul.f32 %v7723_v22, %v7741_v23  ;;  %v3735_v16 = vmul.f32 %v7343_v9, %v3734_v29  ;;  %v4300_v20 = vmul.f32 %v7768_v28, %v7717_v1 }
 0x717   :  { %v3644_v49 = vadd.f32 %v7581_v25, %v3612_v44  ;;  %v3660_v25 = vsel %vm258_vm1, %v3658_v21, %v3659_v51  ;;  %v4155_v21 = vrot.slane %v4147_v52, 2 }
 0x718   :  { %v4338_v36 = vrot.slane %v7748_v53, 1 }
 0x719   :  { %v3686_v7 = vpop.permute.xlu2 %3685  ;;  %4259 = vrot.lane.b32.xlu1 %v4249_v55, %s4946_s11  ;;  %v3668_v38 = vadd.f32 %v3659_v51, %v3644_v49 }
 0x71a   :  { %v3697_v57 = vadd.f32 %v3686_v7, %v3665_v11  ;;  %4073 = vrot.lane.b32.xlu0 %v4069_v63, %s4945_s6  ;;  %v4178_v11 = vstv %s4805_s19 }
 0x71b   :  { %v4179_v48 = vmul.f32 %v7509_v10, %v4178_v11 }
 0x71c   :  { %v3634_v32 = vpop.permute.xlu0 %3633 }
 0x71d   :  { %v3643_v47 = vadd.f32 %v3634_v32, %v3611_v45  ;;  %v4187_v40 = vrot.slane %v4179_v48, 2 }
 0x71e   :  { %4023 = vrot.lane.b32.xlu2 %v4012_v17, %s4946_s11  ;;  %v7762_v17 = vpop.permute.xlu1 %3867 }
 0x71f   :  { %v3667_v30 = vadd.f32 %v3660_v25, %v3643_v47  ;;  %v7772_v25 = vmul.f32 %v7768_v28, %v7741_v23 }
 0x721   :  { %v3692_v5 = vpop.permute.xlu2 %3691  ;;  %v3699_v46 = vadd.f32 %v7605_v0, %v3667_v30  ;;  %4313 = vrot.lane.b32.xlu1 %v4306_v13, %s4945_s6  ;;  %v4341_v47 = vrot.slane %v7772_v25, 1 }
 0x722   :  { %v3700_v2 = vadd.f32 %v3692_v5, %v3668_v38  ;;  %4105 = vrot.lane.b32.xlu0 %v4101_v12, %s4946_s11  ;;  %v7782_v38 = vstv %s4813_s20 }
 0x724   :  { %v3688_v0 = vpop.permute.xlu0 %3687 }
 0x725   :  { %v3698_v45 = vadd.f32 %v3688_v0, %v3666_v31  ;;  %v4387_v31 = vmul.f32 %v7703_v3, %v7782_v38 }
 0x726   :  { %4077 = vrot.lane.b32.xlu2 %v4072_v24, %s4945_s6  ;;  %v4182_v24 = vmul.f32 %v7595_v33, %v4178_v11 }
 0x727   :  { %v3730_v42 = vadd.f32 %v7626_v27, %v3698_v45  ;;  %v4148_v27 = vmul.f32 %v7555_v6, %v7610_v58 }
 0x729   :  { %v3722_v18 = vpop.permute.xlu2 %3721  ;;  %v4156_v49 = vrot.slane %v4148_v27, 2  ;;  %4345 = vrot.lane.b32.xlu1 %v4338_v36, %s4946_s11  ;;  %v3740_v7 = vadd.f32 %v3736_v61, %v3730_v42  ;;  %v4181_v42 = vmul.f32 %v7541_v62, %v4178_v11  ;;  %v7793_v27 = vpop.permute.xlu1 %3873 }
 0x72a   :  { %v3731_v60 = vadd.f32 %v3722_v18, %v3699_v46  ;;  %4109 = vrot.lane.b32.xlu0 %v4104_v14, %s4946_s11  ;;  %v4396_v14 = vrot.slane %v4387_v31, 2 }
 0x72b   :  { %v4157_v32 = vsel %vm258_vm1, %v4155_v21, %v4156_v49 }
 0x72c   :  { %v3718_v44 = vpop.permute.xlu0 %3717 }
 0x72d   :  { %v3729_v50 = vadd.f32 %v3718_v44, %v3697_v57  ;;  %v4180_v57 = vmul.f32 %v7555_v6, %v4178_v11 }
 0x72e   :  { %4079 = vrot.lane.b32.xlu2 %v4071_v59, %s4945_s6  ;;  %v3737_v59 = vmul.f32 %v7374_v15, %v3734_v29 }
 0x72f   :  { %v3739_v63 = vadd.f32 %v3735_v16, %v3729_v50  ;;  %v4188_v30 = vrot.slane %v4180_v57, 2  ;;  %v4191_v50 = vrot.slane %v4182_v24, 2 }
 0x730   :  { %v3741_v45 = vadd.f32 %v3737_v59, %v3731_v60 }
 0x731   :  { %v3756_v51 = vpop.permute.xlu2 %3755  ;;  %v3765_v58 = vadd.f32 %v7646_v41, %v3739_v63  ;;  %v3738_v41 = vmul.f32 %v7353_v35, %v3734_v29  ;;  %4349 = vrot.lane.b32.xlu1 %v4341_v47, %s4946_s11  ;;  %v4189_v0 = vsel %vm258_vm1, %v4187_v40, %v4188_v30 }
 0x732   :  { %v3766_v43 = vadd.f32 %v3756_v51, %v3740_v7  ;;  %4163 = vrot.lane.b32.xlu0 %v4156_v49, %s4945_s6  ;;  %v4190_v49 = vrot.slane %v4181_v42, 2 }
 0x734   :  { %v3724_v55 = vpop.permute.xlu0 %3723  ;;  %v4192_v57 = vsel %vm258_vm1, %v4190_v49, %v4191_v50 }
 0x735   :  { %v3732_v12 = vadd.f32 %v3724_v55, %v3700_v2  ;;  %v4388_v2 = vmul.f32 %v7768_v28, %v7782_v38 }
 0x736   :  { %4161 = vrot.lane.b32.xlu2 %v4157_v32, %s4945_s6 }
 0x737   :  { %v3742_v54 = vadd.f32 %v3738_v41, %v3732_v12  ;;  %v4397_v18 = vrot.slane %v4388_v2, 2  ;;  %v4223_v12 = vmul.f32 %v7703_v3, %v7649_v4  ;;  %v3884_v2 = vstv %s4794_s0 }
 0x738   :  { %v3885_v42 = vmul.f32 %v7343_v9, %v3884_v2 }
 0x739   :  { %v3780_v5 = vpop.permute.xlu2 %3779  ;;  %v3768_v46 = vadd.f32 %v7677_v19, %v3742_v54  ;;  %v3796_v19 = vstv %s4791_s23  ;;  %v4398_v61 = vsel %vm258_vm1, %v4396_v14, %v4397_v18  ;;  %v3886_v14 = vmul.f32 %v7390_v56, %v3884_v2 }
 0x73a   :  { %v3791_v8 = vadd.f32 %v3780_v5, %v3765_v58  ;;  %4195 = vrot.lane.b32.xlu0 %v4188_v30, %s4946_s11  ;;  %v3799_v52 = vmul.f32 %v7374_v15, %v3796_v19  ;;  %v3800_v44 = vmul.f32 %v7353_v35, %v3796_v19  ;;  %4403 = vrot.lane.b32.xlu1 %v4398_v61, %s4945_s6  ;;  %v7809_v30 = vpop.permute.xlu1 %3927 }
 0x73b   :  { %v3798_v63 = vmul.f32 %v7390_v56, %v3796_v19  ;;  %v3797_v11 = vmul.f32 %v7343_v9, %v3796_v19  ;;  %v4248_v9 = vmul.f32 %v7723_v22, %v7674_v34 }
 0x73c   :  { %v3758_v29 = vpop.permute.xlu0 %3757  ;;  %v3808_v7 = vrot.slane %v3799_v52, 1  ;;  %v3809_v51 = vrot.slane %v3800_v44, 1  ;;  %v3893_v52 = vrot.slane %v3885_v42, 2  ;;  %v3894_v44 = vrot.slane %v3886_v14, 2 }
 0x73d   :  { %v3767_v16 = vadd.f32 %v3758_v29, %v3741_v45  ;;  %v3806_v48 = vrot.slane %v3798_v63, 1  ;;  %v3805_v32 = vrot.slane %v3797_v11, 1  ;;  %v4297_v29 = vmul.f32 %v7655_v26, %v7717_v1 }
 0x73e   :  { %4193 = vrot.lane.b32.xlu2 %v4189_v0, %s4946_s11  ;;  %v3810_v55 = vsel %vm169_vm0, %v3808_v7, %v3809_v51  ;;  %v3895_v63 = vsel %vm258_vm1, %v3893_v52, %v3894_v44 }
 0x73f   :  { %v3793_v60 = vadd.f32 %v7711_v39, %v3767_v16  ;;  %v3807_v59 = vsel %vm169_vm0, %v3805_v32, %v3806_v48  ;;  %v4250_v32 = vmul.f32 %v7768_v28, %v7674_v34 }
 0x740   :  { %v3815_v24 = vadd.f32 %v3807_v59, %v3791_v8  ;;  %v3888_v8 = vmul.f32 %v7353_v35, %v3884_v2  ;;  %v4329_v35 = vmul.f32 %v7655_v26, %v7741_v23  ;;  %v4331_v59 = vmul.f32 %v7703_v3, %v7741_v23 }
 0x741   :  { %v3786_v21 = vpop.permute.xlu2 %3785  ;;  %v3817_v54 = vadd.f32 %v3810_v55, %v3793_v60 }
 0x742   :  { %v3794_v58 = vadd.f32 %v3786_v21, %v3768_v46  ;;  %4199 = vrot.lane.b32.xlu0 %v4191_v50, %s4946_s11  ;;  %4405 = vrot.lane.b32.xlu1 %v4397_v18, %s4945_s6  ;;  %v4224_v18 = vmul.f32 %v7768_v28, %v7649_v4  ;;  %v3930_v19 = vpop.permute.xlu1 %3929  ;;  %v3897_v49 = vrot.slane %v3888_v8, 2  ;;  %v4385_v8 = vmul.f32 %v7655_v26, %v7782_v38 }
 0x744   :  { %v3782_v41 = vpop.permute.xlu0 %3781  ;;  %v3818_v56 = vadd.f32 %v3809_v51, %v3794_v58 }
 0x745   :  { %v3792_v39 = vadd.f32 %v3782_v41, %v3766_v43  ;;  %v4222_v43 = vmul.f32 %v7723_v22, %v7649_v4  ;;  %v4305_v4 = vrot.slane %v4297_v29, 1  ;;  %v4337_v41 = vrot.slane %v4329_v35, 1 }
 0x746   :  { %4197 = vrot.lane.b32.xlu2 %v4192_v57, %s4946_s11 }
 0x747   :  { %v3816_v40 = vadd.f32 %v3806_v48, %v3792_v39  ;;  %v4307_v21 = vsel %vm169_vm0, %v4305_v4, %v4306_v13 }
 0x749   :  { %v3840_v5 = vpop.permute.xlu2 %3839  ;;  %v3848_v46 = vadd.f32 %v7739_v37, %v3816_v40  ;;  %v7846_v40 = vstv %s4797_s24 }
 0x74a   :  { %v3849_v31 = vadd.f32 %v3840_v5, %v3817_v54  ;;  %4233 = vrot.lane.b32.xlu0 %v4223_v12, %s4945_s6  ;;  %v3992_v48 = vpop.permute.xlu1 %3991  ;;  %v4339_v54 = vsel %vm169_vm0, %v4337_v41, %v4338_v36 }
 0x74c   :  { %v3836_v0 = vpop.permute.xlu0 %3835 }
 0x74d   :  { %v3847_v45 = vadd.f32 %v3836_v0, %v3815_v24  ;;  %v4340_v24 = vrot.slane %v4331_v59, 1 }
 0x74e   :  { %4231 = vrot.lane.b32.xlu2 %v4222_v43, %s4945_s6 }
 0x74f   :  { %v3879_v37 = vadd.f32 %v7762_v17, %v3847_v45  ;;  %v3887_v17 = vmul.f32 %v7374_v15, %v3884_v2 }
 0x751   :  { %v3870_v16 = vpop.permute.xlu2 %3869  ;;  %v3903_v7 = vadd.f32 %v3895_v63, %v3879_v37  ;;  %v3896_v51 = vrot.slane %v3887_v17, 2 }
 0x752   :  { %v3880_v61 = vadd.f32 %v3870_v16, %v3848_v46  ;;  %4235 = vrot.lane.b32.xlu0 %v4224_v18, %s4945_s6  ;;  %v4309_v46 = vrot.slane %v4300_v20, 1  ;;  %v4018_v42 = vpop.permute.xlu1 %4017  ;;  %v4342_v18 = vsel %vm169_vm0, %v4340_v24, %v4341_v47  ;;  %v3974_v16 = vmul.f32 %v7555_v6, %v7846_v40 }
 0x753   :  { %v3898_v13 = vsel %vm258_vm1, %v3896_v51, %v3897_v49 }
 0x754   :  { %v3842_v50 = vpop.permute.xlu0 %3841  ;;  %v3904_v53 = vadd.f32 %v3894_v44, %v3880_v61 }
 0x755   :  { %v3850_v60 = vadd.f32 %v3842_v50, %v3818_v56  ;;  %v4393_v56 = vrot.slane %v4385_v8, 2 }
 0x756   :  { %4257 = vrot.lane.b32.xlu2 %v4248_v9, %s4946_s11  ;;  %v4416_v9 = vstv %s4814_s25 }
 0x757   :  { %v3882_v11 = vadd.f32 %v7793_v27, %v3850_v60  ;;  %v4299_v27 = vmul.f32 %v7703_v3, %v7717_v1  ;;  %v3973_v1 = vmul.f32 %v7509_v10, %v7846_v40  ;;  %v4418_v17 = vmul.f32 %v7723_v22, %v4416_v9 }
 0x758   :  { %v4034_v60 = vstv %s4800_s26  ;;  %v4420_v41 = vmul.f32 %v7768_v28, %v4416_v9 }
 0x759   :  { %v3906_v58 = vadd.f32 %v3897_v49, %v3882_v11  ;;  %v3924_v15 = vpop.permute.xlu2 %3923  ;;  %v4308_v5 = vrot.slane %v4299_v27, 1  ;;  %v4036_v11 = vmul.f32 %v7555_v6, %v4034_v60  ;;  %v4419_v27 = vmul.f32 %v7703_v3, %v4416_v9 }
 0x75a   :  { %v3935_v57 = vadd.f32 %v3924_v15, %v3903_v7  ;;  %4311 = vrot.lane.b32.xlu0 %v4307_v21, %s4945_s6  ;;  %v4022_v47 = vpop.permute.xlu1 %4021  ;;  %v4426_v21 = vrot.slane %v4418_v17, 2  ;;  %v3975_v7 = vmul.f32 %v7541_v62, %v7846_v40  ;;  %v4429_v59 = vrot.slane %v4420_v41, 2 }
 0x75b   :  { %v3938_v39 = vadd.f32 %v3930_v19, %v3906_v58  ;;  %v4310_v36 = vsel %vm169_vm0, %v4308_v5, %v4309_v46  ;;  %v4386_v19 = vmul.f32 %v7723_v22, %v7782_v38  ;;  %v4417_v38 = vmul.f32 %v7655_v26, %v4416_v9 }
 0x75c   :  { %v3872_v55 = vpop.permute.xlu0 %3871  ;;  %v4035_v17 = vmul.f32 %v7509_v10, %v4034_v60 }
 0x75d   :  { %v3881_v12 = vadd.f32 %v3872_v55, %v3849_v31  ;;  %v4394_v44 = vrot.slane %v4386_v19, 2  ;;  %v4425_v51 = vrot.slane %v4417_v38, 2 }
 0x75e   :  { %4261 = vrot.lane.b32.xlu2 %v4250_v32, %s4946_s11  ;;  %v4043_v38 = vrot.slane %v4035_v17, 1 }
 0x75f   :  { %v3905_v34 = vadd.f32 %v3898_v13, %v3881_v12  ;;  %v4395_v49 = vsel %vm258_vm1, %v4393_v56, %v4394_v44  ;;  %v4037_v12 = vmul.f32 %v7541_v62, %v4034_v60 }
 0x761   :  { %v3956_v43 = vpop.permute.xlu2 %3955  ;;  %v3937_v31 = vadd.f32 %v7809_v30, %v3905_v34 }
 0x762   :  { %v3967_v2 = vadd.f32 %v3956_v43, %v3935_v57  ;;  %4343 = vrot.lane.b32.xlu0 %v4339_v54, %s4946_s11  ;;  %v4076_v58 = vpop.permute.xlu1 %4075  ;;  %v4044_v57 = vrot.slane %v4036_v11, 1  ;;  %v4038_v54 = vmul.f32 %v7595_v33, %v4034_v60 }
 0x764   :  { %v3977_v0 = vadd.f32 %v3973_v1, %v3967_v2  ;;  %v3926_v45 = vpop.permute.xlu0 %3925  ;;  %v4428_v1 = vrot.slane %v4419_v27, 2  ;;  %v4047_v2 = vrot.slane %v4038_v54, 1  ;;  %v4045_v11 = vsel %vm169_vm0, %v4043_v38, %v4044_v57 }
 0x765   :  { %v3936_v14 = vadd.f32 %v3926_v45, %v3904_v53  ;;  %v4360_v38 = vstv %s4812_s1 }
 0x766   :  { %v4003_v23 = vadd.f32 %v3992_v48, %v3977_v0  ;;  %4315 = vrot.lane.b32.xlu2 %v4310_v36, %s4945_s6  ;;  %v4430_v36 = vsel %vm258_vm1, %v4428_v1, %v4429_v59 }
 0x768   :  { %v7863_v30 = vadd.f32 %v4018_v42, %v4003_v23 }
 0x769   :  { %v3960_v37 = vpop.permute.xlu2 %3959 }
 0x76a   :  { %v3969_v29 = vadd.f32 %v3960_v37, %v3937_v31  ;;  %4347 = vrot.lane.b32.xlu0 %v4342_v18, %s4946_s11  ;;  %v4046_v31 = vrot.slane %v4037_v12, 1  ;;  %v4108_v53 = vpop.permute.xlu1 %4107  ;;  %v4210_v12 = vstv %s4806_s28 }
 0x76c   :  { %v3958_v25 = vpop.permute.xlu0 %3957  ;;  %v3979_v32 = vadd.f32 %v3975_v7, %v3969_v29  ;;  %v4048_v42 = vsel %vm169_vm0, %v4046_v31, %v4047_v2 }
 0x76d   :  { %v3968_v52 = vadd.f32 %v3958_v25, %v3936_v14 }
 0x76e   :  { %4317 = vrot.lane.b32.xlu2 %v4309_v46, %s4945_s6  ;;  %v3976_v46 = vmul.f32 %v7595_v33, %v7846_v40 }
 0x76f   :  { %v3978_v61 = vadd.f32 %v3974_v16, %v3968_v52 }
 0x771   :  { %v3994_v4 = vpop.permute.xlu2 %3993 }
 0x772   :  { %v4004_v50 = vadd.f32 %v3994_v4, %v3978_v61  ;;  %4401 = vrot.lane.b32.xlu0 %v4394_v44, %s4945_s6  ;;  %v7896_v37 = vpop.permute.xlu1 %4111 }
 0x774   :  { %v3962_v63 = vpop.permute.xlu0 %3961 }
 0x775   :  { %v3970_v35 = vadd.f32 %v3962_v63, %v3938_v39  ;;  %v4427_v39 = vsel %vm258_vm1, %v4425_v51, %v4426_v21 }
 0x776   :  { %4399 = vrot.lane.b32.xlu2 %v4395_v49, %s4945_s6 }
 0x777   :  { %v3980_v24 = vadd.f32 %v3976_v46, %v3970_v35  ;;  %v4122_v35 = vstv %s4803_s27  ;;  %v4211_v46 = vmul.f32 %v7655_v26, %v4210_v12 }
 0x779   :  { %v4020_v15 = vpop.permute.xlu2 %4019 }
 0x77a   :  { %v4030_v48 = vadd.f32 %v4020_v15, %v4004_v50  ;;  %4433 = vrot.lane.b32.xlu0 %v4426_v21, %s4946_s11  ;;  %v4166_v52 = vpop.permute.xlu1 %4165  ;;  %v4123_v21 = vmul.f32 %v7509_v10, %v4122_v35  ;;  %v4053_v15 = vadd.f32 %v4045_v11, %v7863_v30 }
 0x77c   :  { %v4054_v20 = vadd.f32 %v4044_v57, %v4030_v48  ;;  %v3996_v13 = vpop.permute.xlu0 %3995  ;;  %v4131_v48 = vrot.slane %v4123_v21, 2  ;;  %v4125_v57 = vmul.f32 %v7541_v62, %v4122_v35  ;;  %v4361_v21 = vmul.f32 %v7655_v26, %v4360_v38 }
 0x77d   :  { %v4005_v55 = vadd.f32 %v3996_v13, %v3979_v32 }
 0x77e   :  { %v7887_v34 = vadd.f32 %v4076_v58, %v4054_v20  ;;  %4431 = vrot.lane.b32.xlu2 %v4427_v39, %s4946_s11  ;;  %v4124_v58 = vmul.f32 %v7555_v6, %v4122_v35  ;;  %v4134_v6 = vrot.slane %v4125_v57, 2 }
 0x77f   :  { %v4031_v5 = vadd.f32 %v4022_v47, %v4005_v55  ;;  %v4126_v55 = vmul.f32 %v7595_v33, %v4122_v35 }
 0x780   :  { %v4132_v32 = vrot.slane %v4124_v58, 2  ;;  %v4118_v62 = vadd.f32 %v4108_v53, %v7887_v34  ;;  %v4213_v34 = vmul.f32 %v7703_v3, %v4210_v12 }
 0x781   :  { %v4024_v43 = vpop.permute.xlu2 %4023  ;;  %v4055_v23 = vadd.f32 %v4048_v42, %v4031_v5 }
 0x782   :  { %4437 = vrot.lane.b32.xlu0 %v4429_v59, %s4946_s11  ;;  %v7898_v61 = vpop.permute.xlu1 %4167  ;;  %v4133_v27 = vsel %vm258_vm1, %v4131_v48, %v4132_v32  ;;  %v4135_v59 = vrot.slane %v4126_v55, 2 }
 0x784   :  { %v3998_v0 = vpop.permute.xlu0 %3997  ;;  %v4136_v31 = vsel %vm258_vm1, %v4134_v6, %v4135_v59 }
 0x785   :  { %v4006_v45 = vadd.f32 %v3998_v0, %v3980_v24 }
 0x786   :  { %4435 = vrot.lane.b32.xlu2 %v4430_v36, %s4946_s11 }
 0x787   :  { %v4032_v14 = vadd.f32 %v4024_v43, %v4006_v45 }
 0x789   :  { %v4078_v18 = vpop.permute.xlu2 %4077  ;;  %v4056_v19 = vadd.f32 %v4047_v2, %v4032_v14  ;;  %v4272_v2 = vstv %s4809_s29  ;;  %v4142_v14 = vadd.f32 %v4132_v32, %v4118_v62  ;;  %v4369_v32 = vrot.slane %v4361_v21, 2 }
 0x78a   :  { %v4087_v40 = vadd.f32 %v4078_v18, %v4055_v23  ;;  %v4230_v50 = vpop.permute.xlu1 %4229  ;;  %v4274_v33 = vmul.f32 %v7723_v22, %v4272_v2  ;;  %v4273_v45 = vmul.f32 %v7655_v26, %v4272_v2  ;;  %v4214_v26 = vmul.f32 %v7768_v28, %v4210_v12 }
 0x78c   :  { %v4074_v29 = vpop.permute.xlu0 %4073 }
 0x78d   :  { %v4085_v41 = vadd.f32 %v4074_v29, %v4053_v15  ;;  %v4281_v29 = vrot.slane %v4273_v45, 1 }
 0x791   :  { %v4080_v16 = vpop.permute.xlu2 %4079 }
 0x792   :  { %v4088_v8 = vadd.f32 %v4080_v16, %v4056_v19  ;;  %v4256_v7 = vpop.permute.xlu1 %4255 }
 0x794   :  { %v4106_v25 = vpop.permute.xlu0 %4105  ;;  %v4120_v16 = vadd.f32 %v7896_v37, %v4088_v8 }
 0x795   :  { %v4117_v39 = vadd.f32 %v4106_v25, %v4085_v41 }
 0x796   :  { %v4144_v35 = vadd.f32 %v4135_v59, %v4120_v16  ;;  %v4363_v59 = vmul.f32 %v7703_v3, %v4360_v38 }
 0x797   :  { %v4141_v10 = vadd.f32 %v4133_v27, %v4117_v39 }
 0x799   :  { %v4162_v47 = vpop.permute.xlu2 %4161 }
 0x79a   :  { %v4260_v13 = vpop.permute.xlu1 %4259  ;;  %v4173_v54 = vadd.f32 %v4162_v47, %v4141_v10 }
 0x79c   :  { %v4110_v44 = vpop.permute.xlu0 %4109 }
 0x79d   :  { %v4119_v5 = vadd.f32 %v4110_v44, %v4087_v40  ;;  %v4282_v40 = vrot.slane %v4274_v33, 1  ;;  %v4212_v44 = vmul.f32 %v7723_v22, %v4210_v12 }
 0x79f   :  { %v4143_v24 = vadd.f32 %v4136_v31, %v4119_v5  ;;  %v4283_v17 = vsel %vm169_vm0, %v4281_v29, %v4282_v40 }
 0x7a1   :  { %v4194_v9 = vpop.permute.xlu2 %4193  ;;  %v4175_v18 = vadd.f32 %v4166_v52, %v4143_v24  ;;  %v4276_v52 = vmul.f32 %v7768_v28, %v4272_v2 }
 0x7a2   :  { %v4205_v1 = vadd.f32 %v4194_v9, %v4173_v54  ;;  %v4314_v0 = vpop.permute.xlu1 %4313 }
 0x7a3   :  { %v4285_v41 = vrot.slane %v4276_v52, 1 }
 0x7a4   :  { %v4164_v56 = vpop.permute.xlu0 %4163  ;;  %v4215_v36 = vadd.f32 %v4211_v46, %v4205_v1 }
 0x7a5   :  { %v4174_v25 = vadd.f32 %v4164_v56, %v4142_v14  ;;  %v4448_v14 = vstv %s4815_s30 }
 0x7a6   :  { %v4241_v23 = vadd.f32 %v4230_v50, %v4215_v36  ;;  %v4275_v50 = vmul.f32 %v7703_v3, %v4272_v2  ;;  %v4372_v2 = vrot.slane %v4363_v59, 2 }
 0x7a8   :  { %v4267_v9 = vadd.f32 %v4256_v7, %v4241_v23  ;;  %v4176_v7 = vadd.f32 %v7898_v61, %v4144_v35  ;;  %v4284_v48 = vrot.slane %v4275_v50, 1 }
 0x7a9   :  { %v4198_v4 = vpop.permute.xlu2 %4197 }
 0x7aa   :  { %v4207_v47 = vadd.f32 %v4198_v4, %v4175_v18  ;;  %v4346_v8 = vpop.permute.xlu1 %4345  ;;  %v4362_v4 = vmul.f32 %v7723_v22, %v4360_v38  ;;  %v4291_v58 = vadd.f32 %v4283_v17, %v4267_v9 }
 0x7ac   :  { %v4196_v49 = vpop.permute.xlu0 %4195  ;;  %v4217_v37 = vadd.f32 %v4213_v34, %v4207_v47  ;;  %v4370_v10 = vrot.slane %v4362_v4, 2 }
 0x7ad   :  { %v4206_v53 = vadd.f32 %v4196_v49, %v4174_v25 }
 0x7ae   :  { %v4371_v54 = vsel %vm258_vm1, %v4369_v32, %v4370_v10 }
 0x7af   :  { %v4216_v56 = vadd.f32 %v4212_v44, %v4206_v53 }
 0x7b1   :  { %v7901_v63 = vpop.permute.xlu2 %4231 }
 0x7b2   :  { %v4242_v27 = vadd.f32 %v7901_v63, %v4216_v56  ;;  %v4364_v63 = vmul.f32 %v7768_v28, %v4360_v38  ;;  %v4350_v46 = vpop.permute.xlu1 %4349 }
 0x7b4   :  { %v7905_v51 = vpop.permute.xlu0 %4199 }
 0x7b5   :  { %v4208_v57 = vadd.f32 %v7905_v51, %v4176_v7 }
 0x7b7   :  { %v4218_v5 = vadd.f32 %v4214_v26, %v4208_v57 }
 0x7b9   :  { %v7909_v60 = vpop.permute.xlu2 %4257 }
 0x7ba   :  { %v4268_v22 = vadd.f32 %v7909_v60, %v4242_v27  ;;  %v4373_v60 = vrot.slane %v4364_v63, 2 }
 0x7bc   :  { %v4234_v20 = vpop.permute.xlu0 %4233  ;;  %v4292_v31 = vadd.f32 %v4282_v40, %v4268_v22  ;;  %v4374_v3 = vsel %vm258_vm1, %v4372_v2, %v4373_v60  ;;  %v4404_v40 = vpop.permute.xlu1 %4403 }
 0x7bd   :  { %v4243_v49 = vadd.f32 %v4234_v20, %v4217_v37  ;;  %v4286_v20 = vsel %vm169_vm0, %v4284_v48, %v4285_v41 }
 0x7be   :  { %v4324_v33 = vadd.f32 %v4314_v0, %v4292_v31 }
 0x7bf   :  { %v4269_v55 = vadd.f32 %v4260_v13, %v4243_v49 }
 0x7c0   :  { %v4356_v16 = vadd.f32 %v4346_v8, %v4324_v33 }
 0x7c1   :  { %v7914_v30 = vpop.permute.xlu2 %4261  ;;  %v4293_v51 = vadd.f32 %v4286_v20, %v4269_v55 }
 0x7c2   :  { %v4380_v47 = vadd.f32 %v4370_v10, %v4356_v16 }
 0x7c4   :  { %v4236_v43 = vpop.permute.xlu0 %4235  ;;  %v4406_v21 = vpop.permute.xlu1 %4405 }
 0x7c5   :  { %v4244_v13 = vadd.f32 %v4236_v43, %v4218_v5 }
 0x7c7   :  { %v4270_v45 = vadd.f32 %v7914_v30, %v4244_v13 }
 0x7c9   :  { %v4316_v42 = vpop.permute.xlu2 %4315  ;;  %v4294_v25 = vadd.f32 %v4285_v41, %v4270_v45 }
 0x7ca   :  { %v4325_v62 = vadd.f32 %v4316_v42, %v4293_v51 }
 0x7cc   :  { %v4312_v19 = vpop.permute.xlu0 %4311 }
 0x7cd   :  { %v4323_v39 = vadd.f32 %v4312_v19, %v4291_v58 }
 0x7d1   :  { %v4318_v11 = vpop.permute.xlu2 %4317 }
 0x7d2   :  { %v4326_v42 = vadd.f32 %v4318_v11, %v4294_v25 }
 0x7d4   :  { %v4344_v15 = vpop.permute.xlu0 %4343  ;;  %v4358_v53 = vadd.f32 %v4350_v46, %v4326_v42 }
 0x7d5   :  { %v4355_v6 = vadd.f32 %v4344_v15, %v4323_v39 }
 0x7d6   :  { %v4382_v50 = vadd.f32 %v4373_v60, %v4358_v53 }
 0x7d7   :  { %v4379_v1 = vadd.f32 %v4371_v54, %v4355_v6 }
 0x7d8   :  { %v4414_v37 = vadd.f32 %v4406_v21, %v4382_v50 }
 0x7d9   :  { %v4400_v61 = vpop.permute.xlu2 %4399 }
 0x7da   :  { %v4411_v24 = vadd.f32 %v4400_v61, %v4379_v1 }
 0x7dc   :  { %v4348_v12 = vpop.permute.xlu0 %4347 }
 0x7dd   :  { %v4357_v36 = vadd.f32 %v4348_v12, %v4325_v62 }
 0x7df   :  { %v4381_v28 = vadd.f32 %v4374_v3, %v4357_v36 }
 0x7e1   :  { %v4432_v23 = vpop.permute.xlu2 %4431  ;;  %v4413_v0 = vadd.f32 %v4404_v40, %v4381_v28 }
 0x7e2   :  { %v4443_v18 = vadd.f32 %v4432_v23, %v4411_v24 }
 0x7e4   :  { %v4449_v29 = vadd.f32 %v4448_v14, %v4443_v18  ;;  %v4402_v19 = vpop.permute.xlu0 %4401 }
 0x7e5   :  { %v4412_v44 = vadd.f32 %v4402_v19, %v4380_v47 }
 0x7e6   :  { %v7940_v43 = vmax.f32 %v4449_v29, 0.0 }
 0x7e8   :  { %4461 = vrot.lane.b32.xlu1 %v7940_v43, %s4945_s6  ;;  %v4493_v15 = vrot.slane %v7940_v43, 1  ;;  %v4539_v10 = vrot.slane %v7940_v43, 2 }
 0x7e9   :  { %v4436_v30 = vpop.permute.xlu2 %4435 }
 0x7ea   :  { %v4445_v34 = vadd.f32 %v4436_v30, %v4413_v0 }
 0x7ec   :  { %v4451_v9 = vadd.f32 %v4448_v14, %v4445_v34  ;;  %v4434_v17 = vpop.permute.xlu0 %4433 }
 0x7ed   :  { %v4444_v38 = vadd.f32 %v4434_v17, %v4412_v44 }
 0x7ee   :  { %v7944_v35 = vmax.f32 %v4451_v9, 0.0 }
 0x7ef   :  { %v4450_v52 = vadd.f32 %v4448_v14, %v4444_v38 }
 0x7f0   :  { %4477 = vrot.lane.b32.xlu1 %v7940_v43, %s4946_s11  ;;  %4465 = vrot.lane.b32.xlu0 %v7944_v35, %s4945_s6  ;;  %v4496_v41 = vrot.slane %v7944_v35, 1  ;;  %v4542_v27 = vrot.slane %v7944_v35, 2 }
 0x7f1   :  { %v7950_v11 = vmax.f32 %v4450_v52, 0.0  ;;  %v71_v52 = vld [vmem:[%s8049_s3 + $0x30] sm:$0xff] }
 0x7f3   :  { %4463 = vrot.lane.b32.xlu2 %v7950_v11, %s4945_s6  ;;  %v4494_v58 = vrot.slane %v7950_v11, 1  ;;  %v4540_v57 = vrot.slane %v7950_v11, 2 }
 0x7f4   :  { %v4438_v8 = vpop.permute.xlu0 %4437 }
 0x7f5   :  { %v4446_v56 = vadd.f32 %v4438_v8, %v4414_v37  ;;  %v4495_v7 = vsel %vm169_vm0, %v4493_v15, %v4494_v58  ;;  %v4541_v55 = vsel %vm258_vm1, %v4539_v10, %v4540_v57  ;;  %v87_v37 = vld [vmem:[%s8049_s3 + $0xb0] sm:$0xff]  ;;  %v72_v8 = vld [vmem:[%s8049_s3 + $0x38] sm:$0x7] }
 0x7f7   :  { %v4452_v4 = vadd.f32 %v4448_v14, %v4446_v56  ;;  %v88_v56 = vld [vmem:[%s8049_s3 + $0xb8] sm:$0x7] }
 0x7f8   :  { %4481 = vrot.lane.b32.xlu1 %v7944_v35, %s4946_s11 }
 0x7f9   :  { %v7956_v49 = vmax.f32 %v4452_v4, 0.0 }
 0x7fb   :  { %4479 = vrot.lane.b32.xlu2 %v7950_v11, %s4946_s11  ;;  %4467 = vrot.lane.b32.xlu0 %v7956_v49, %s4945_s6  ;;  %v7970_v48 = vrot.slane %v7956_v49, 1  ;;  %v7984_v39 = vrot.slane %v7956_v49, 2 }
 0x7fd   :  { %v4498_v32 = vsel %vm169_vm0, %v4496_v41, %v7970_v48  ;;  %v4544_v26 = vsel %vm258_vm1, %v4542_v27, %v7984_v39 }
 0x800   :  { %4509 = vrot.lane.b32.xlu1 %v4494_v58, %s4945_s6 }
 0x803   :  { %4483 = vrot.lane.b32.xlu2 %v7956_v49, %s4946_s11  ;;  %4507 = vrot.lane.b32.xlu0 %v4495_v7, %s4945_s6 }
 0x808   :  { %4525 = vrot.lane.b32.xlu1 %v4494_v58, %s4946_s11 }
 0x80b   :  { %4523 = vrot.lane.b32.xlu0 %v4495_v7, %s4946_s11  ;;  %4511 = vrot.lane.b32.xlu2 %v4498_v32, %s4945_s6 }
 0x810   :  { %4529 = vrot.lane.b32.xlu1 %v7970_v48, %s4946_s11 }
 0x813   :  { %4527 = vrot.lane.b32.xlu0 %v4498_v32, %s4946_s11  ;;  %4513 = vrot.lane.b32.xlu2 %v7970_v48, %s4945_s6 }
 0x818   :  { %4557 = vrot.lane.b32.xlu1 %v4544_v26, %s4945_s6 }
 0x81b   :  { %4555 = vrot.lane.b32.xlu0 %v4540_v57, %s4945_s6  ;;  %4553 = vrot.lane.b32.xlu2 %v4541_v55, %s4945_s6 }
 0x820   :  { %4559 = vrot.lane.b32.xlu1 %v7984_v39, %s4945_s6 }
 0x823   :  { %4571 = vrot.lane.b32.xlu0 %v4540_v57, %s4946_s11  ;;  %4569 = vrot.lane.b32.xlu2 %v4541_v55, %s4946_s11 }
 0x82b   :  { %4575 = vrot.lane.b32.xlu0 %v7984_v39, %s4946_s11  ;;  %4573 = vrot.lane.b32.xlu2 %v4544_v26, %s4946_s11 }
 0x84d   :  { %v4464_v6 = vpop.permute.xlu2 %4463 }
 0x84e   :  { %v4474_v45 = vmax.f32 %v7950_v11, %v4464_v6 }
 0x855   :  { %v4480_v20 = vpop.permute.xlu2 %4479 }
 0x856   :  { %v4490_v18 = vmax.f32 %v4474_v45, %v4480_v20 }
 0x858   :  { %v4504_v16 = vmax.f32 %v4490_v18, %v4494_v58 }
 0x85a   :  { %v4462_v22 = vpop.permute.xlu1 %4461 }
 0x85b   :  { %v4473_v13 = vmax.f32 %v7940_v43, %v4462_v22 }
 0x85d   :  { %v4484_v61 = vpop.permute.xlu2 %4483 }
 0x862   :  { %v4478_v54 = vpop.permute.xlu1 %4477  ;;  %v4466_v59 = vpop.permute.xlu0 %4465 }
 0x863   :  { %v4489_v62 = vmax.f32 %v4473_v13, %v4478_v54  ;;  %v4475_v60 = vmax.f32 %v7944_v35, %v4466_v59 }
 0x865   :  { %v4512_v46 = vpop.permute.xlu2 %4511  ;;  %v4503_v36 = vmax.f32 %v4489_v62, %v4495_v7 }
 0x86a   :  { %v4482_v5 = vpop.permute.xlu1 %4481 }
 0x86b   :  { %v4491_v24 = vmax.f32 %v4475_v60, %v4482_v5 }
 0x86d   :  { %v4468_v63 = vpop.permute.xlu0 %4467  ;;  %v4514_v12 = vpop.permute.xlu2 %4513  ;;  %v4505_v28 = vmax.f32 %v4491_v24, %v4498_v32 }
 0x86e   :  { %v4476_v19 = vmax.f32 %v7956_v49, %v4468_v63 }
 0x86f   :  { %v4521_v25 = vmax.f32 %v4505_v28, %v4512_v46 }
 0x870   :  { %v4492_v43 = vmax.f32 %v4476_v19, %v4484_v61 }
 0x872   :  { %v4510_v51 = vpop.permute.xlu1 %4509  ;;  %v4506_v9 = vmax.f32 %v4492_v43, %v7970_v48 }
 0x873   :  { %v4520_v42 = vmax.f32 %v4504_v16, %v4510_v51  ;;  %v80_v51 = vld [vmem:[%s8049_s3 + $0x78] sm:$0x7] }
 0x874   :  { %v4522_v50 = vmax.f32 %v4506_v9, %v4514_v12 }
 0x875   :  { %v4508_v1 = vpop.permute.xlu0 %4507  ;;  %v4554_v33 = vpop.permute.xlu2 %4553 }
 0x876   :  { %v4519_v3 = vmax.f32 %v4503_v36, %v4508_v1 }
 0x87a   :  { %v4526_v31 = vpop.permute.xlu1 %4525 }
 0x87b   :  { %v4536_v34 = vmax.f32 %v4520_v42, %v4526_v31 }
 0x87d   :  { %v4524_v2 = vpop.permute.xlu0 %4523  ;;  %v4570_v47 = vpop.permute.xlu2 %4569  ;;  %v4550_v38 = vmax.f32 %v4536_v34, %v4540_v57  ;;  %v79_v57 = vld [vmem:[%s8049_s3 + $0x70] sm:$0xff]  ;;  %v4627_v34 = vlaneseq }
 0x87e   :  { %v4535_v29 = vmax.f32 %v4519_v3, %v4524_v2 }
 0x880   :  { %v4549_v40 = vmax.f32 %v4535_v29, %v4541_v55 }
 0x882   :  { %v4530_v14 = vpop.permute.xlu1 %4529  ;;  %v4565_v53 = vmax.f32 %v4549_v40, %v4554_v33 }
 0x883   :  { %v4538_v49 = vmax.f32 %v4522_v50, %v4530_v14 }
 0x884   :  { %v4581_v35 = vmax.f32 %v4565_v53, %v4570_v47  ;;  %v4628_v53 = vand.u32 127, %v4627_v34 }
 0x885   :  { %v4528_v23 = vpop.permute.xlu0 %4527  ;;  %v4574_v7 = vpop.permute.xlu2 %4573  ;;  %v4552_v55 = vmax.f32 %v4538_v49, %v7984_v39  ;;  %v96_v39 = vld [vmem:[%s8049_s3 + $0xf8] sm:$0x7] }
 0x886   :  { %v4537_v0 = vmax.f32 %v4521_v25, %v4528_v23  ;;  %v4585_v15 = vmul.f32 %v4581_v35, %v71_v52  ;;  %v4606_v48 = vmul.f32 %v4581_v35, %v87_v37  ;;  %vm4630_vm4 = vcmp.eq.s32.totalorder %v4628_v53, 0 }
 0x887   :  { %vm4634_vm5 = vcmp.eq.s32.totalorder %v4628_v53, 1 }
 0x888   :  { %v4551_v17 = vmax.f32 %v4537_v0, %v4544_v26  ;;  %v95_v26 = vld [vmem:[%s8049_s3 + $0xf0] sm:$0xff]  ;;  %v4589_v20 = vsel %vm1193_vm3, %v4585_v15, 0.0  ;;  %v4610_v54 = vsel %vm1193_vm3, %v4606_v48, 0.0  ;;  %s4817_s3 = spop %4816 }
 0x889   :  { %s4819_s21 = spop %4818 }
 0x88a   :  { %v4558_v44 = vpop.permute.xlu1 %4557  ;;  %s4821_s22 = spop %4820 }
 0x88b   :  { %v4567_v21 = vmax.f32 %v4551_v17, %v4558_v44  ;;  %s4823_s23 = spop %4822  ;;  %s2341_s24 = sadd.f32 %s4821_s22, %s4817_s3  ;;  %v4629_v44 = vld [vmem:[%s8050_s4] sm:$0x1] }
 0x88c   :  { %s4825_s0 = spop %4824  ;;  %s2362_s26 = sadd.f32 %s4823_s23, %s4819_s21 }
 0x88d   :  { %v4556_v30 = vpop.permute.xlu0 %4555  ;;  %v4583_v41 = vmax.f32 %v4567_v21, %v4574_v7  ;;  %s4827_s25 = spop %4826  ;;  %s3473_s27 = sadd.f32 %s4825_s0, %s2341_s24 }
 0x88e   :  { %v4566_v11 = vmax.f32 %v4550_v38, %v4556_v30  ;;  %s3494_s28 = sadd.f32 %s4827_s25, %s2362_s26 }
 0x88f   :  { %v4587_v61 = vmul.f32 %v4583_v41, %v79_v57  ;;  %v4608_v59 = vmul.f32 %v4583_v41, %v95_v26 }
 0x891   :  { %v4592_v31 = vsel %vm1193_vm3, %v4587_v61, 0.0  ;;  %v4613_v13 = vsel %vm1193_vm3, %v4608_v59, 0.0 }
 0x892   :  { %v4560_v10 = vpop.permute.xlu1 %4559 }
 0x893   :  { %v4568_v5 = vmax.f32 %v4552_v55, %v4560_v10 }
 0x895   :  { %v4572_v4 = vpop.permute.xlu0 %4571 }
 0x896   :  { %v4582_v58 = vmax.f32 %v4566_v11, %v4572_v4 }
 0x898   :  { %v4586_v32 = vmul.f32 %v4582_v58, %v72_v8  ;;  %v4607_v27 = vmul.f32 %v4582_v58, %v88_v56 }
 0x89a   :  { %v4590_v6 = vsel %vm1195_vm2, %v4586_v32, 0.0  ;;  %v4611_v22 = vsel %vm1195_vm2, %v4607_v27, 0.0 }
 0x89b   :  { %v4591_v63 = vadd.f32 %v4590_v6, %v4589_v20  ;;  %v4612_v46 = vadd.f32 %v4611_v22, %v4610_v54 }
 0x89d   :  { %v4576_v1 = vpop.permute.xlu0 %4575  ;;  %v4614_v60 = vadd.f32 %v4613_v13, %v4612_v46  ;;  %v4593_v24 = vadd.f32 %v4592_v31, %v4591_v63 }
 0x89e   :  { %v4584_v12 = vmax.f32 %v4568_v5, %v4576_v1 }
 0x8a0   :  { %v4588_v2 = vmul.f32 %v4584_v12, %v80_v51  ;;  %v4609_v62 = vmul.f32 %v4584_v12, %v96_v39 }
 0x8a2   :  { %v4594_v36 = vsel %vm1195_vm2, %v4588_v2, 0.0  ;;  %v4615_v33 = vsel %vm1195_vm2, %v4609_v62, 0.0 }
 0x8a3   :  { %v4616_v45 = vadd.f32 %v4615_v33, %v4614_v60  ;;  %v4595_v3 = vadd.f32 %v4594_v36, %v4593_v24 }
 0x8a5   :  { %4617 = vadd.xlane.f32.xlu2 %v4616_v45  ;;  %4596 = vadd.xlane.f32.xlu1 %v4595_v3 }
 0x918   :  { %v4618_v14 = vpop.xlane.xlu2 %4617  ;;  %v4597_v23 = vpop.xlane.xlu1 %4596 }
 0x919   :  { %v4619_v18 = vrot.slane %v4618_v14, 4  ;;  %v4598_v28 = vrot.slane %v4597_v23, 4 }
 0x91b   :  { %v4620_v29 = vadd.f32 %v4619_v18, %v4618_v14  ;;  %v4599_v19 = vadd.f32 %v4598_v28, %v4597_v23 }
 0x91d   :  { %v4621_v16 = vrot.slane %v4620_v29, 2  ;;  %v4600_v25 = vrot.slane %v4599_v19, 2 }
 0x91f   :  { %v4622_v40 = vadd.f32 %v4621_v16, %v4620_v29  ;;  %v4601_v43 = vadd.f32 %v4600_v25, %v4599_v19 }
 0x921   :  { %v4602_v42 = vrot.slane %v4601_v43, 1  ;;  %v4623_v0 = vrot.slane %v4622_v40, 1 }
 0x923   :  { %v4603_v47 = vadd.f32 %v4602_v42, %v4601_v43  ;;  %v4624_v30 = vadd.f32 %v4623_v0, %v4622_v40 }
 0x925   :  { %4828 = vpush %v4603_v47 }
 0x926   :  { %4830 = vpush %v4624_v30 }
 0x956   :  { %s4829_s29 = spop %4828 }
 0x957   :  { %s4605_s1 = sadd.f32 %s4829_s29, %s3473_s27  ;;  %s4831_s30 = spop %4830 }
 0x958   :  { %s4626_s2 = sadd.f32 %s4831_s30, %s3494_s28 }
 0x959   :  { %v4631_v9 = vstv %s4605_s1 }
 0x95a   :  { %v4632_v17 = vsel %vm4630_vm4, %v4631_v9, 0.0  ;;  %v4635_v38 = vstv %s4626_s2 }
 0x95b   :  { %v4633_v35 = vadd.f32 %v4632_v17, %v4629_v44  ;;  %v4636_v50 = vsel %vm4634_vm5, %v4635_v38, 0.0 }
 0x95d   :  { %v4637_v52 = vadd.f32 %v4636_v50, %v4633_v35 }
 0x95f   :  { %4639 = vst.msk [vmem:[#allocation7] sm:$0x1] %vm4638_vm6, %v4637_v52 }
 0x960   :  { %4650 = dma.vmem_to_hbm [thread:$0]  %s4646_s8, 16, %s4648_s12, [#allocation3]  }
 0x961   :  { %4941 = dma.done.wait [#allocation3], 16  }
 0x962   :  { %4942 = vsyncadd [#allocation3], 4294967280 }
 0x963   :  { %4655 = vsyncpa [#allocation3], 1 }
 0x964   :  { %4656 = vsyncpa [#allocation4], 1 }
 0x965   :  { %4657 = vsyncpa [#allocation6], 1 }

</bundles_post_ra>
